<compile_context>
chip_gen: v7x
topology: tpu7x:2x2x1
jax: 0.10.0
libtpu: 0.0.40
codegen_flags: <defaults>
</compile_context>

<pallas_src>
import math
import jax
import jax.numpy as jnp
from jax.experimental import pallas as pl
from jax.experimental.pallas import tpu as pltpu


MATMUL_DTYPE = jnp.bfloat16   # matmul operands in bf16; accumulation + epilogue stay f32
HW_TILE_CAP = 512             # max HW tile per grid step (multiple of 128)


# ----------------------------------------------------------------------------
# Pallas kernels
# ----------------------------------------------------------------------------
def _conv_bn_relu_kernel(taps_ref, w_ref, s_ref, b_ref, o_ref):
    # taps_ref: (1, 9*Cin, T)   im2col taps, HW tile on the lane axis
    # w_ref:    (Cout, 9*Cin)   conv weight, taps fused into the contraction dim
    # s_ref:    (Cout, 1)       folded BN scale
    # b_ref:    (Cout, 1)       folded BN bias (includes conv bias)
    # o_ref:    (1, Cout, T)
    acc = jnp.dot(w_ref[...], taps_ref[0], preferred_element_type=jnp.float32)
    y = acc * s_ref[...] + b_ref[...]
    o_ref[0] = jnp.maximum(y, 0.0)


def _conv1x1_kernel(x_ref, w_ref, b_ref, o_ref):
    # x_ref: (1, Cin, T), w_ref: (Cout, Cin), b_ref: (Cout, 1), o_ref: (1, Cout, T)
    o_ref[0] = jnp.dot(w_ref[...], x_ref[0],
                       preferred_element_type=jnp.float32) + b_ref[...]


# ----------------------------------------------------------------------------
# Pallas wrappers
# ----------------------------------------------------------------------------
def _pick_hw_tile(hw, cap=HW_TILE_CAP):
    """Largest tile <= cap that divides hw and is a multiple of 128 (else full extent)."""
    if hw <= cap:
        return hw
    t = (cap // 128) * 128
    while t > 128 and hw % t != 0:
        t -= 128
    return t if (t >= 128 and hw % t == 0) else hw


def conv3x3_bn_relu(x, w, scale, bias):
    """Fused Conv2d(k=3, pad=1) + BatchNorm(eval, folded) + ReLU.

    x: (N, Cin, H, W) f32;  w: (3, 3, Cin, Cout);  scale/bias: (Cout,)
    """
    n, cin, h, wd = x.shape
    cout = w.shape[-1]
    hw = h * wd

    # im2col taps in fused-contraction layout: (N, 9*Cin, HW), single contiguous tensor.
    xp = jnp.pad(x, ((0, 0), (0, 0), (1, 1), (1, 1)))
    taps = jnp.concatenate(
        [xp[:, :, kh:kh + h, kw:kw + wd] for kh in range(3) for kw in range(3)],
        axis=1,
    ).reshape(n, 9 * cin, hw).astype(MATMUL_DTYPE)

    # weight (kh, kw, Cin, Cout) -> (Cout, 9*Cin), tap-major / cin-minor (matches taps).
    wf = jnp.transpose(w, (3, 0, 1, 2)).reshape(cout, 9 * cin).astype(MATMUL_DTYPE)
    s2 = scale.reshape(cout, 1).astype(jnp.float32)
    b2 = bias.reshape(cout, 1).astype(jnp.float32)

    tile = _pick_hw_tile(hw)
    grid = (n, hw // tile)

    out = pl.pallas_call(
        _conv_bn_relu_kernel,
        out_shape=jax.ShapeDtypeStruct((n, cout, hw), jnp.float32),
        grid=grid,
        in_specs=[
            pl.BlockSpec((1, 9 * cin, tile), lambda i, j: (i, 0, j)),
            pl.BlockSpec((cout, 9 * cin), lambda i, j: (0, 0)),
            pl.BlockSpec((cout, 1), lambda i, j: (0, 0)),
            pl.BlockSpec((cout, 1), lambda i, j: (0, 0)),
        ],
        out_specs=pl.BlockSpec((1, cout, tile), lambda i, j: (i, 0, j)),
        compiler_params=pltpu.CompilerParams(
            dimension_semantics=("parallel", "parallel")),
    )(taps, wf, s2, b2)
    return out.reshape(n, cout, h, wd)


def conv1x1(x, w, b):
    """Conv2d(k=1) == per-pixel matmul, lane-dense over HW.

    x: (N, Cin, H, W); w: (Cout, Cin); b: (Cout,)
    """
    n, cin, h, wd = x.shape
    cout = w.shape[0]
    hw = h * wd
    xf = x.reshape(n, cin, hw).astype(MATMUL_DTYPE)
    wf = w.astype(MATMUL_DTYPE)
    b2 = b.reshape(cout, 1).astype(jnp.float32)

    tile = _pick_hw_tile(hw)
    grid = (n, hw // tile)

    out = pl.pallas_call(
        _conv1x1_kernel,
        out_shape=jax.ShapeDtypeStruct((n, cout, hw), jnp.float32),
        grid=grid,
        in_specs=[
            pl.BlockSpec((1, cin, tile), lambda i, j: (i, 0, j)),
            pl.BlockSpec((cout, cin), lambda i, j: (0, 0)),
            pl.BlockSpec((cout, 1), lambda i, j: (0, 0)),
        ],
        out_specs=pl.BlockSpec((1, cout, tile), lambda i, j: (i, 0, j)),
        compiler_params=pltpu.CompilerParams(
            dimension_semantics=("parallel", "parallel")),
    )(xf, wf, b2)
    return out.reshape(n, cout, h, wd)


# ----------------------------------------------------------------------------
# Plain-JAX glue (pooling / upsampling / pad / concat)
# ----------------------------------------------------------------------------
def maxpool2(x):
    n, c, h, w = x.shape
    return jnp.max(x.reshape(n, c, h // 2, 2, w // 2, 2), axis=(3, 5))


def _interp_matrix(insz, outsz):
    """align_corners=True bilinear interpolation as a dense (outsz, insz) matrix (no gathers)."""
    if insz == 1:
        return jnp.ones((outsz, 1), jnp.float32)
    src = jnp.arange(outsz, dtype=jnp.float32) * (insz - 1) / (outsz - 1)
    lo = jnp.clip(jnp.floor(src), 0.0, insz - 1)
    frac = src - lo
    lo_i = lo.astype(jnp.int32)
    hi_i = jnp.clip(lo_i + 1, 0, insz - 1)
    cols = jnp.arange(insz, dtype=jnp.int32)[None, :]
    m = ((1.0 - frac)[:, None] * (cols == lo_i[:, None]).astype(jnp.float32)
         + frac[:, None] * (cols == hi_i[:, None]).astype(jnp.float32))
    return m


def bilinear_up2_align_corners(x):
    """nn.Upsample(scale_factor=2, mode='bilinear', align_corners=True), NCHW."""
    n, c, h, w = x.shape
    mh = _interp_matrix(h, 2 * h)
    mw = _interp_matrix(w, 2 * w)
    y = jnp.einsum('oh,nchw->ncow', mh, x)
    return jnp.einsum('pw,ncow->ncop', mw, y)


# ----------------------------------------------------------------------------
# Parameter initialization (deterministic, PyTorch-like init)
# ----------------------------------------------------------------------------
def init_conv(key, kh, kw, cin, cout):
    wkey, bkey = jax.random.split(key)
    fan_in = cin * kh * kw
    bound = 1.0 / math.sqrt(fan_in)
    w = jax.random.uniform(wkey, (kh, kw, cin, cout), jnp.float32, -bound, bound)
    b = jax.random.uniform(bkey, (cout,), jnp.float32, -bound, bound)
    return w, b


def init_bn(key, c):
    k1, k2, k3, k4 = jax.random.split(key, 4)
    gamma = 1.0 + 0.1 * jax.random.normal(k1, (c,), jnp.float32)
    beta = 0.1 * jax.random.normal(k2, (c,), jnp.float32)
    mean = 0.1 * jax.random.normal(k3, (c,), jnp.float32)
    var = 1.0 + 0.1 * jax.random.uniform(k4, (c,), jnp.float32)
    return gamma, beta, mean, var


def fold_bn(b_conv, gamma, beta, mean, var, eps=1e-5):
    s = gamma / jnp.sqrt(var + eps)
    o = (b_conv - mean) * s + beta
    return s, o


def init_double_conv(key, cin, cout, cmid=None):
    if cmid is None:
        cmid = cout
    k = jax.random.split(key, 4)
    w1, b1 = init_conv(k[0], 3, 3, cin, cmid)
    s1, o1 = fold_bn(b1, *init_bn(k[1], cmid))
    w2, b2 = init_conv(k[2], 3, 3, cmid, cout)
    s2, o2 = fold_bn(b2, *init_bn(k[3], cout))
    return {'w1': w1, 's1': s1, 'o1': o1, 'w2': w2, 's2': s2, 'o2': o2}


def init_unet(key, n_channels, n_classes, fc):
    ks = jax.random.split(key, 10)
    p = {
        'inc':   init_double_conv(ks[0], n_channels, fc),
        'down1': init_double_conv(ks[1], fc, fc * 2),
        'down2': init_double_conv(ks[2], fc * 2, fc * 4),
        'down3': init_double_conv(ks[3], fc * 4, fc * 8),
        'down4': init_double_conv(ks[4], fc * 8, fc * 16 // 2),          # bilinear => factor 2
        'up1':   init_double_conv(ks[5], fc * 16, fc * 8 // 2, fc * 16 // 2),
        'up2':   init_double_conv(ks[6], fc * 8, fc * 4 // 2, fc * 8 // 2),
        'up3':   init_double_conv(ks[7], fc * 4, fc * 2 // 2, fc * 4 // 2),
        'up4':   init_double_conv(ks[8], fc * 2, fc, fc * 2 // 2),
    }
    wo, bo = init_conv(ks[9], 1, 1, fc, n_classes)
    p['outc'] = {'w': wo.reshape(fc, n_classes).T, 'b': bo}   # (Cout, Cin) for the kernel
    return p


# ----------------------------------------------------------------------------
# UNet forward (NCHW, same structure as the PyTorch module)
# ----------------------------------------------------------------------------
def double_conv_apply(p, x):
    x = conv3x3_bn_relu(x, p['w1'], p['s1'], p['o1'])
    x = conv3x3_bn_relu(x, p['w2'], p['s2'], p['o2'])
    return x


def up_apply(p, x1, x2):
    x1 = bilinear_up2_align_corners(x1)
    dy = x2.shape[2] - x1.shape[2]
    dx = x2.shape[3] - x1.shape[3]
    x1 = jnp.pad(x1, ((0, 0), (0, 0),
                      (dy // 2, dy - dy // 2), (dx // 2, dx - dx // 2)))
    x = jnp.concatenate([x2, x1], axis=1)    # torch.cat(dim=1)
    return double_conv_apply(p, x)


def unet_forward(params, x):
    x1 = double_conv_apply(params['inc'], x)
    x2 = double_conv_apply(params['down1'], maxpool2(x1))
    x3 = double_conv_apply(params['down2'], maxpool2(x2))
    x4 = double_conv_apply(params['down3'], maxpool2(x3))
    x5 = double_conv_apply(params['down4'], maxpool2(x4))
    y = up_apply(params['up1'], x5, x4)
    y = up_apply(params['up2'], y, x3)
    y = up_apply(params['up3'], y, x2)
    y = up_apply(params['up4'], y, x1)
    logits = conv1x1(y, params['outc']['w'], params['outc']['b'])
    return logits


# ----------------------------------------------------------------------------
if __name__ == "__main__":
    key = jax.random.PRNGKey(0)
    k_params, k_x = jax.random.split(key)

    N, H, W = 2, 32, 32
    n_channels, n_classes, first_channels = 3, 2, 8

    params = init_unet(k_params, n_channels, n_classes, first_channels)
    # NCHW input, same as the PyTorch module: (2, 3, 32, 32)
    x = jax.random.normal(k_x, (N, n_channels, H, W), jnp.float32)

    logits = jax.jit(unet_forward)(params, x)
    logits = jax.block_until_ready(logits)

    assert logits.shape == (N, n_classes, H, W), logits.shape
    assert bool(jnp.all(jnp.isfinite(logits)))
    print("KERNEL_OK")
</pallas_src>

<mosaic_0001>
module attributes {stable_mosaic.version = 11 : i64} {
  func.func @_conv_bn_relu_kernel(%arg0: i32, %arg1: i32, %arg2: memref<1x27x512xbf16, #tpu.memory_space<vmem>>, %arg3: memref<8x27xbf16, #tpu.memory_space<vmem>>, %arg4: memref<8x1xf32, #tpu.memory_space<vmem>>, %arg5: memref<8x1xf32, #tpu.memory_space<vmem>>, %arg6: memref<1x8x512xf32, #tpu.memory_space<vmem>>) attributes {dimension_semantics = [#tpu.dimension_semantics<parallel>, #tpu.dimension_semantics<parallel>], iteration_bounds = array<i64: 2, 2>, scalar_prefetch = 0 : i64, scratch_operands = 0 : i64, tpu.core_type = #tpu.core_type<tc>, window_params = [{transform_indices = @transform_0, window_bounds = array<i64: 1, 27, 512>}, {pipeline_mode = #tpu.pipeline_mode<synchronous>, transform_indices = @transform_1, window_bounds = array<i64: 8, 27>}, {pipeline_mode = #tpu.pipeline_mode<synchronous>, transform_indices = @transform_2, window_bounds = array<i64: 8, 1>}, {pipeline_mode = #tpu.pipeline_mode<synchronous>, transform_indices = @transform_3, window_bounds = array<i64: 8, 1>}, {transform_indices = @transform_4, window_bounds = array<i64: 1, 8, 512>}]} {
    %c0 = arith.constant 0 : index
    %c0_0 = arith.constant 0 : index
    %0 = vector.load %arg3[%c0, %c0_0] : memref<8x27xbf16, #tpu.memory_space<vmem>>, vector<8x27xbf16>
    %c0_1 = arith.constant 0 : index
    %c0_2 = arith.constant 0 : index
    %c0_3 = arith.constant 0 : index
    %1 = vector.load %arg2[%c0_1, %c0_2, %c0_3] : memref<1x27x512xbf16, #tpu.memory_space<vmem>>, vector<1x27x512xbf16>
    %2 = vector.shape_cast %1 : vector<1x27x512xbf16> to vector<27x512xbf16>
    %cst = arith.constant dense<0.000000e+00> : vector<8x512xf32>
    %3 = tpu.matmul %0, %2, %cst {dimension_numbers = #tpu.dot_dimension_numbers<[1], [0], [0], [1], [0, 0, 1, 1], [], []>} : vector<8x27xbf16>, vector<27x512xbf16>, vector<8x512xf32> -> vector<8x512xf32>
    %c0_4 = arith.constant 0 : index
    %c0_5 = arith.constant 0 : index
    %4 = vector.load %arg4[%c0_4, %c0_5] : memref<8x1xf32, #tpu.memory_space<vmem>>, vector<8x1xf32>
    %5 = vector.broadcast %4 : vector<8x1xf32> to vector<8x512xf32>
    %6 = arith.mulf %3, %5 : vector<8x512xf32>
    %c0_6 = arith.constant 0 : index
    %c0_7 = arith.constant 0 : index
    %7 = vector.load %arg5[%c0_6, %c0_7] : memref<8x1xf32, #tpu.memory_space<vmem>>, vector<8x1xf32>
    %8 = vector.broadcast %7 : vector<8x1xf32> to vector<8x512xf32>
    %9 = arith.addf %6, %8 : vector<8x512xf32>
    %cst_8 = arith.constant 0.000000e+00 : f32
    %10 = vector.broadcast %cst_8 : f32 to vector<8x512xf32>
    %11 = arith.maximumf %9, %10 : vector<8x512xf32>
    %c0_9 = arith.constant 0 : index
    %c0_10 = arith.constant 0 : index
    %c0_11 = arith.constant 0 : index
    %12 = vector.load %arg6[%c0_9, %c0_10, %c0_11] : memref<1x8x512xf32, #tpu.memory_space<vmem>>, vector<1x8x512xf32>
    %13 = vector.shape_cast %12 : vector<1x8x512xf32> to vector<8x512xf32>
    %14 = vector.shape_cast %11 : vector<8x512xf32> to vector<1x8x512xf32>
    tpu.vector_store %arg6[%c0_9, %c0_10, %c0_11], %14 {strides = array<i32>} : memref<1x8x512xf32, #tpu.memory_space<vmem>>, vector<1x8x512xf32>,
    return
  }
  func.func @transform_0(%arg0: i32, %arg1: i32) -> (i32, i32, i32) {
    %c0_i32 = arith.constant 0 : i32
    %c0_i32_0 = arith.constant 0 : i32
    return %arg0, %c0_i32, %arg1 : i32, i32, i32
  }
  func.func @transform_1(%arg0: i32, %arg1: i32) -> (i32, i32) {
    %c0_i32 = arith.constant 0 : i32
    %c0_i32_0 = arith.constant 0 : i32
    %c0_i32_1 = arith.constant 0 : i32
    return %c0_i32, %c0_i32_0 : i32, i32
  }
  func.func @transform_2(%arg0: i32, %arg1: i32) -> (i32, i32) {
    %c0_i32 = arith.constant 0 : i32
    %c0_i32_0 = arith.constant 0 : i32
    %c0_i32_1 = arith.constant 0 : i32
    return %c0_i32, %c0_i32_0 : i32, i32
  }
  func.func @transform_3(%arg0: i32, %arg1: i32) -> (i32, i32) {
    %c0_i32 = arith.constant 0 : i32
    %c0_i32_0 = arith.constant 0 : i32
    %c0_i32_1 = arith.constant 0 : i32
    return %c0_i32, %c0_i32_0 : i32, i32
  }
  func.func @transform_4(%arg0: i32, %arg1: i32) -> (i32, i32, i32) {
    %c0_i32 = arith.constant 0 : i32
    %c0_i32_0 = arith.constant 0 : i32
    return %arg0, %c0_i32, %arg1 : i32, i32, i32
  }
}

module attributes {stable_mosaic.version = 11 : i64} {
  func.func @_conv_bn_relu_kernel(%arg0: i32, %arg1: i32, %arg2: memref<1x72x512xbf16, #tpu.memory_space<vmem>>, %arg3: memref<8x72xbf16, #tpu.memory_space<vmem>>, %arg4: memref<8x1xf32, #tpu.memory_space<vmem>>, %arg5: memref<8x1xf32, #tpu.memory_space<vmem>>, %arg6: memref<1x8x512xf32, #tpu.memory_space<vmem>>) attributes {dimension_semantics = [#tpu.dimension_semantics<parallel>, #tpu.dimension_semantics<parallel>], iteration_bounds = array<i64: 2, 2>, scalar_prefetch = 0 : i64, scratch_operands = 0 : i64, tpu.core_type = #tpu.core_type<tc>, window_params = [{transform_indices = @transform_0, window_bounds = array<i64: 1, 72, 512>}, {pipeline_mode = #tpu.pipeline_mode<synchronous>, transform_indices = @transform_1, window_bounds = array<i64: 8, 72>}, {pipeline_mode = #tpu.pipeline_mode<synchronous>, transform_indices = @transform_2, window_bounds = array<i64: 8, 1>}, {pipeline_mode = #tpu.pipeline_mode<synchronous>, transform_indices = @transform_3, window_bounds = array<i64: 8, 1>}, {transform_indices = @transform_4, window_bounds = array<i64: 1, 8, 512>}]} {
    %c0 = arith.constant 0 : index
    %c0_0 = arith.constant 0 : index
    %0 = vector.load %arg3[%c0, %c0_0] : memref<8x72xbf16, #tpu.memory_space<vmem>>, vector<8x72xbf16>
    %c0_1 = arith.constant 0 : index
    %c0_2 = arith.constant 0 : index
    %c0_3 = arith.constant 0 : index
    %1 = vector.load %arg2[%c0_1, %c0_2, %c0_3] : memref<1x72x512xbf16, #tpu.memory_space<vmem>>, vector<1x72x512xbf16>
    %2 = vector.shape_cast %1 : vector<1x72x512xbf16> to vector<72x512xbf16>
    %cst = arith.constant dense<0.000000e+00> : vector<8x512xf32>
    %3 = tpu.matmul %0, %2, %cst {dimension_numbers = #tpu.dot_dimension_numbers<[1], [0], [0], [1], [0, 0, 1, 1], [], []>} : vector<8x72xbf16>, vector<72x512xbf16>, vector<8x512xf32> -> vector<8x512xf32>
    %c0_4 = arith.constant 0 : index
    %c0_5 = arith.constant 0 : index
    %4 = vector.load %arg4[%c0_4, %c0_5] : memref<8x1xf32, #tpu.memory_space<vmem>>, vector<8x1xf32>
    %5 = vector.broadcast %4 : vector<8x1xf32> to vector<8x512xf32>
    %6 = arith.mulf %3, %5 : vector<8x512xf32>
    %c0_6 = arith.constant 0 : index
    %c0_7 = arith.constant 0 : index
    %7 = vector.load %arg5[%c0_6, %c0_7] : memref<8x1xf32, #tpu.memory_space<vmem>>, vector<8x1xf32>
    %8 = vector.broadcast %7 : vector<8x1xf32> to vector<8x512xf32>
    %9 = arith.addf %6, %8 : vector<8x512xf32>
    %cst_8 = arith.constant 0.000000e+00 : f32
    %10 = vector.broadcast %cst_8 : f32 to vector<8x512xf32>
    %11 = arith.maximumf %9, %10 : vector<8x512xf32>
    %c0_9 = arith.constant 0 : index
    %c0_10 = arith.constant 0 : index
    %c0_11 = arith.constant 0 : index
    %12 = vector.load %arg6[%c0_9, %c0_10, %c0_11] : memref<1x8x512xf32, #tpu.memory_space<vmem>>, vector<1x8x512xf32>
    %13 = vector.shape_cast %12 : vector<1x8x512xf32> to vector<8x512xf32>
    %14 = vector.shape_cast %11 : vector<8x512xf32> to vector<1x8x512xf32>
    tpu.vector_store %arg6[%c0_9, %c0_10, %c0_11], %14 {strides = array<i32>} : memref<1x8x512xf32, #tpu.memory_space<vmem>>, vector<1x8x512xf32>,
    return
  }
  func.func @transform_0(%arg0: i32, %arg1: i32) -> (i32, i32, i32) {
    %c0_i32 = arith.constant 0 : i32
    %c0_i32_0 = arith.constant 0 : i32
    return %arg0, %c0_i32, %arg1 : i32, i32, i32
  }
  func.func @transform_1(%arg0: i32, %arg1: i32) -> (i32, i32) {
    %c0_i32 = arith.constant 0 : i32
    %c0_i32_0 = arith.constant 0 : i32
    %c0_i32_1 = arith.constant 0 : i32
    return %c0_i32, %c0_i32_0 : i32, i32
  }
  func.func @transform_2(%arg0: i32, %arg1: i32) -> (i32, i32) {
    %c0_i32 = arith.constant 0 : i32
    %c0_i32_0 = arith.constant 0 : i32
    %c0_i32_1 = arith.constant 0 : i32
    return %c0_i32, %c0_i32_0 : i32, i32
  }
  func.func @transform_3(%arg0: i32, %arg1: i32) -> (i32, i32) {
    %c0_i32 = arith.constant 0 : i32
    %c0_i32_0 = arith.constant 0 : i32
    %c0_i32_1 = arith.constant 0 : i32
    return %c0_i32, %c0_i32_0 : i32, i32
  }
  func.func @transform_4(%arg0: i32, %arg1: i32) -> (i32, i32, i32) {
    %c0_i32 = arith.constant 0 : i32
    %c0_i32_0 = arith.constant 0 : i32
    return %arg0, %c0_i32, %arg1 : i32, i32, i32
  }
}

module attributes {stable_mosaic.version = 11 : i64} {
  func.func @_conv_bn_relu_kernel(%arg0: i32, %arg1: i32, %arg2: memref<1x72x256xbf16, #tpu.memory_space<vmem>>, %arg3: memref<16x72xbf16, #tpu.memory_space<vmem>>, %arg4: memref<16x1xf32, #tpu.memory_space<vmem>>, %arg5: memref<16x1xf32, #tpu.memory_space<vmem>>, %arg6: memref<1x16x256xf32, #tpu.memory_space<vmem>>) attributes {dimension_semantics = [#tpu.dimension_semantics<parallel>, #tpu.dimension_semantics<parallel>], iteration_bounds = array<i64: 2, 1>, scalar_prefetch = 0 : i64, scratch_operands = 0 : i64, tpu.core_type = #tpu.core_type<tc>, window_params = [{transform_indices = @transform_0, window_bounds = array<i64: 1, 72, 256>}, {pipeline_mode = #tpu.pipeline_mode<synchronous>, transform_indices = @transform_1, window_bounds = array<i64: 16, 72>}, {pipeline_mode = #tpu.pipeline_mode<synchronous>, transform_indices = @transform_2, window_bounds = array<i64: 16, 1>}, {pipeline_mode = #tpu.pipeline_mode<synchronous>, transform_indices = @transform_3, window_bounds = array<i64: 16, 1>}, {transform_indices = @transform_4, window_bounds = array<i64: 1, 16, 256>}]} {
    %c0 = arith.constant 0 : index
    %c0_0 = arith.constant 0 : index
    %0 = vector.load %arg3[%c0, %c0_0] : memref<16x72xbf16, #tpu.memory_space<vmem>>, vector<16x72xbf16>
    %c0_1 = arith.constant 0 : index
    %c0_2 = arith.constant 0 : index
    %c0_3 = arith.constant 0 : index
    %1 = vector.load %arg2[%c0_1, %c0_2, %c0_3] : memref<1x72x256xbf16, #tpu.memory_space<vmem>>, vector<1x72x256xbf16>
    %2 = vector.shape_cast %1 : vector<1x72x256xbf16> to vector<72x256xbf16>
    %cst = arith.constant dense<0.000000e+00> : vector<16x256xf32>
    %3 = tpu.matmul %0, %2, %cst {dimension_numbers = #tpu.dot_dimension_numbers<[1], [0], [0], [1], [0, 0, 1, 1], [], []>} : vector<16x72xbf16>, vector<72x256xbf16>, vector<16x256xf32> -> vector<16x256xf32>
    %c0_4 = arith.constant 0 : index
    %c0_5 = arith.constant 0 : index
    %4 = vector.load %arg4[%c0_4, %c0_5] : memref<16x1xf32, #tpu.memory_space<vmem>>, vector<16x1xf32>
    %5 = vector.broadcast %4 : vector<16x1xf32> to vector<16x256xf32>
    %6 = arith.mulf %3, %5 : vector<16x256xf32>
    %c0_6 = arith.constant 0 : index
    %c0_7 = arith.constant 0 : index
    %7 = vector.load %arg5[%c0_6, %c0_7] : memref<16x1xf32, #tpu.memory_space<vmem>>, vector<16x1xf32>
    %8 = vector.broadcast %7 : vector<16x1xf32> to vector<16x256xf32>
    %9 = arith.addf %6, %8 : vector<16x256xf32>
    %cst_8 = arith.constant 0.000000e+00 : f32
    %10 = vector.broadcast %cst_8 : f32 to vector<16x256xf32>
    %11 = arith.maximumf %9, %10 : vector<16x256xf32>
    %c0_9 = arith.constant 0 : index
    %c0_10 = arith.constant 0 : index
    %c0_11 = arith.constant 0 : index
    %12 = vector.load %arg6[%c0_9, %c0_10, %c0_11] : memref<1x16x256xf32, #tpu.memory_space<vmem>>, vector<1x16x256xf32>
    %13 = vector.shape_cast %12 : vector<1x16x256xf32> to vector<16x256xf32>
    %14 = vector.shape_cast %11 : vector<16x256xf32> to vector<1x16x256xf32>
    tpu.vector_store %arg6[%c0_9, %c0_10, %c0_11], %14 {strides = array<i32>} : memref<1x16x256xf32, #tpu.memory_space<vmem>>, vector<1x16x256xf32>,
    return
  }
  func.func @transform_0(%arg0: i32, %arg1: i32) -> (i32, i32, i32) {
    %c0_i32 = arith.constant 0 : i32
    %c0_i32_0 = arith.constant 0 : i32
    return %arg0, %c0_i32, %arg1 : i32, i32, i32
  }
  func.func @transform_1(%arg0: i32, %arg1: i32) -> (i32, i32) {
    %c0_i32 = arith.constant 0 : i32
    %c0_i32_0 = arith.constant 0 : i32
    %c0_i32_1 = arith.constant 0 : i32
    return %c0_i32, %c0_i32_0 : i32, i32
  }
  func.func @transform_2(%arg0: i32, %arg1: i32) -> (i32, i32) {
    %c0_i32 = arith.constant 0 : i32
    %c0_i32_0 = arith.constant 0 : i32
    %c0_i32_1 = arith.constant 0 : i32
    return %c0_i32, %c0_i32_0 : i32, i32
  }
  func.func @transform_3(%arg0: i32, %arg1: i32) -> (i32, i32) {
    %c0_i32 = arith.constant 0 : i32
    %c0_i32_0 = arith.constant 0 : i32
    %c0_i32_1 = arith.constant 0 : i32
    return %c0_i32, %c0_i32_0 : i32, i32
  }
  func.func @transform_4(%arg0: i32, %arg1: i32) -> (i32, i32, i32) {
    %c0_i32 = arith.constant 0 : i32
    %c0_i32_0 = arith.constant 0 : i32
    return %arg0, %c0_i32, %arg1 : i32, i32, i32
  }
}

module attributes {stable_mosaic.version = 11 : i64} {
  func.func @_conv_bn_relu_kernel(%arg0: i32, %arg1: i32, %arg2: memref<1x144x256xbf16, #tpu.memory_space<vmem>>, %arg3: memref<16x144xbf16, #tpu.memory_space<vmem>>, %arg4: memref<16x1xf32, #tpu.memory_space<vmem>>, %arg5: memref<16x1xf32, #tpu.memory_space<vmem>>, %arg6: memref<1x16x256xf32, #tpu.memory_space<vmem>>) attributes {dimension_semantics = [#tpu.dimension_semantics<parallel>, #tpu.dimension_semantics<parallel>], iteration_bounds = array<i64: 2, 1>, scalar_prefetch = 0 : i64, scratch_operands = 0 : i64, tpu.core_type = #tpu.core_type<tc>, window_params = [{transform_indices = @transform_0, window_bounds = array<i64: 1, 144, 256>}, {pipeline_mode = #tpu.pipeline_mode<synchronous>, transform_indices = @transform_1, window_bounds = array<i64: 16, 144>}, {pipeline_mode = #tpu.pipeline_mode<synchronous>, transform_indices = @transform_2, window_bounds = array<i64: 16, 1>}, {pipeline_mode = #tpu.pipeline_mode<synchronous>, transform_indices = @transform_3, window_bounds = array<i64: 16, 1>}, {transform_indices = @transform_4, window_bounds = array<i64: 1, 16, 256>}]} {
    %c0 = arith.constant 0 : index
    %c0_0 = arith.constant 0 : index
    %0 = vector.load %arg3[%c0, %c0_0] : memref<16x144xbf16, #tpu.memory_space<vmem>>, vector<16x144xbf16>
    %c0_1 = arith.constant 0 : index
    %c0_2 = arith.constant 0 : index
    %c0_3 = arith.constant 0 : index
    %1 = vector.load %arg2[%c0_1, %c0_2, %c0_3] : memref<1x144x256xbf16, #tpu.memory_space<vmem>>, vector<1x144x256xbf16>
    %2 = vector.shape_cast %1 : vector<1x144x256xbf16> to vector<144x256xbf16>
    %cst = arith.constant dense<0.000000e+00> : vector<16x256xf32>
    %3 = tpu.matmul %0, %2, %cst {dimension_numbers = #tpu.dot_dimension_numbers<[1], [0], [0], [1], [0, 0, 1, 1], [], []>} : vector<16x144xbf16>, vector<144x256xbf16>, vector<16x256xf32> -> vector<16x256xf32>
    %c0_4 = arith.constant 0 : index
    %c0_5 = arith.constant 0 : index
    %4 = vector.load %arg4[%c0_4, %c0_5] : memref<16x1xf32, #tpu.memory_space<vmem>>, vector<16x1xf32>
    %5 = vector.broadcast %4 : vector<16x1xf32> to vector<16x256xf32>
    %6 = arith.mulf %3, %5 : vector<16x256xf32>
    %c0_6 = arith.constant 0 : index
    %c0_7 = arith.constant 0 : index
    %7 = vector.load %arg5[%c0_6, %c0_7] : memref<16x1xf32, #tpu.memory_space<vmem>>, vector<16x1xf32>
    %8 = vector.broadcast %7 : vector<16x1xf32> to vector<16x256xf32>
    %9 = arith.addf %6, %8 : vector<16x256xf32>
    %cst_8 = arith.constant 0.000000e+00 : f32
    %10 = vector.broadcast %cst_8 : f32 to vector<16x256xf32>
    %11 = arith.maximumf %9, %10 : vector<16x256xf32>
    %c0_9 = arith.constant 0 : index
    %c0_10 = arith.constant 0 : index
    %c0_11 = arith.constant 0 : index
    %12 = vector.load %arg6[%c0_9, %c0_10, %c0_11] : memref<1x16x256xf32, #tpu.memory_space<vmem>>, vector<1x16x256xf32>
    %13 = vector.shape_cast %12 : vector<1x16x256xf32> to vector<16x256xf32>
    %14 = vector.shape_cast %11 : vector<16x256xf32> to vector<1x16x256xf32>
    tpu.vector_store %arg6[%c0_9, %c0_10, %c0_11], %14 {strides = array<i32>} : memref<1x16x256xf32, #tpu.memory_space<vmem>>, vector<1x16x256xf32>,
    return
  }
  func.func @transform_0(%arg0: i32, %arg1: i32) -> (i32, i32, i32) {
    %c0_i32 = arith.constant 0 : i32
    %c0_i32_0 = arith.constant 0 : i32
    return %arg0, %c0_i32, %arg1 : i32, i32, i32
  }
  func.func @transform_1(%arg0: i32, %arg1: i32) -> (i32, i32) {
    %c0_i32 = arith.constant 0 : i32
    %c0_i32_0 = arith.constant 0 : i32
    %c0_i32_1 = arith.constant 0 : i32
    return %c0_i32, %c0_i32_0 : i32, i32
  }
  func.func @transform_2(%arg0: i32, %arg1: i32) -> (i32, i32) {
    %c0_i32 = arith.constant 0 : i32
    %c0_i32_0 = arith.constant 0 : i32
    %c0_i32_1 = arith.constant 0 : i32
    return %c0_i32, %c0_i32_0 : i32, i32
  }
  func.func @transform_3(%arg0: i32, %arg1: i32) -> (i32, i32) {
    %c0_i32 = arith.constant 0 : i32
    %c0_i32_0 = arith.constant 0 : i32
    %c0_i32_1 = arith.constant 0 : i32
    return %c0_i32, %c0_i32_0 : i32, i32
  }
  func.func @transform_4(%arg0: i32, %arg1: i32) -> (i32, i32, i32) {
    %c0_i32 = arith.constant 0 : i32
    %c0_i32_0 = arith.constant 0 : i32
    return %arg0, %c0_i32, %arg1 : i32, i32, i32
  }
}

module attributes {stable_mosaic.version = 11 : i64} {
  func.func @_conv_bn_relu_kernel(%arg0: i32, %arg1: i32, %arg2: memref<1x144x64xbf16, #tpu.memory_space<vmem>>, %arg3: memref<32x144xbf16, #tpu.memory_space<vmem>>, %arg4: memref<32x1xf32, #tpu.memory_space<vmem>>, %arg5: memref<32x1xf32, #tpu.memory_space<vmem>>, %arg6: memref<1x32x64xf32, #tpu.memory_space<vmem>>) attributes {dimension_semantics = [#tpu.dimension_semantics<parallel>, #tpu.dimension_semantics<parallel>], iteration_bounds = array<i64: 2, 1>, scalar_prefetch = 0 : i64, scratch_operands = 0 : i64, tpu.core_type = #tpu.core_type<tc>, window_params = [{transform_indices = @transform_0, window_bounds = array<i64: 1, 144, 64>}, {pipeline_mode = #tpu.pipeline_mode<synchronous>, transform_indices = @transform_1, window_bounds = array<i64: 32, 144>}, {pipeline_mode = #tpu.pipeline_mode<synchronous>, transform_indices = @transform_2, window_bounds = array<i64: 32, 1>}, {pipeline_mode = #tpu.pipeline_mode<synchronous>, transform_indices = @transform_3, window_bounds = array<i64: 32, 1>}, {transform_indices = @transform_4, window_bounds = array<i64: 1, 32, 64>}]} {
    %c0 = arith.constant 0 : index
    %c0_0 = arith.constant 0 : index
    %0 = vector.load %arg3[%c0, %c0_0] : memref<32x144xbf16, #tpu.memory_space<vmem>>, vector<32x144xbf16>
    %c0_1 = arith.constant 0 : index
    %c0_2 = arith.constant 0 : index
    %c0_3 = arith.constant 0 : index
    %1 = vector.load %arg2[%c0_1, %c0_2, %c0_3] : memref<1x144x64xbf16, #tpu.memory_space<vmem>>, vector<1x144x64xbf16>
    %2 = vector.shape_cast %1 : vector<1x144x64xbf16> to vector<144x64xbf16>
    %cst = arith.constant dense<0.000000e+00> : vector<32x64xf32>
    %3 = tpu.matmul %0, %2, %cst {dimension_numbers = #tpu.dot_dimension_numbers<[1], [0], [0], [1], [0, 0, 1, 1], [], []>} : vector<32x144xbf16>, vector<144x64xbf16>, vector<32x64xf32> -> vector<32x64xf32>
    %c0_4 = arith.constant 0 : index
    %c0_5 = arith.constant 0 : index
    %4 = vector.load %arg4[%c0_4, %c0_5] : memref<32x1xf32, #tpu.memory_space<vmem>>, vector<32x1xf32>
    %5 = vector.broadcast %4 : vector<32x1xf32> to vector<32x64xf32>
    %6 = arith.mulf %3, %5 : vector<32x64xf32>
    %c0_6 = arith.constant 0 : index
    %c0_7 = arith.constant 0 : index
    %7 = vector.load %arg5[%c0_6, %c0_7] : memref<32x1xf32, #tpu.memory_space<vmem>>, vector<32x1xf32>
    %8 = vector.broadcast %7 : vector<32x1xf32> to vector<32x64xf32>
    %9 = arith.addf %6, %8 : vector<32x64xf32>
    %cst_8 = arith.constant 0.000000e+00 : f32
    %10 = vector.broadcast %cst_8 : f32 to vector<32x64xf32>
    %11 = arith.maximumf %9, %10 : vector<32x64xf32>
    %c0_9 = arith.constant 0 : index
    %c0_10 = arith.constant 0 : index
    %c0_11 = arith.constant 0 : index
    %12 = vector.load %arg6[%c0_9, %c0_10, %c0_11] : memref<1x32x64xf32, #tpu.memory_space<vmem>>, vector<1x32x64xf32>
    %13 = vector.shape_cast %12 : vector<1x32x64xf32> to vector<32x64xf32>
    %14 = vector.shape_cast %11 : vector<32x64xf32> to vector<1x32x64xf32>
    tpu.vector_store %arg6[%c0_9, %c0_10, %c0_11], %14 {strides = array<i32>} : memref<1x32x64xf32, #tpu.memory_space<vmem>>, vector<1x32x64xf32>,
    return
  }
  func.func @transform_0(%arg0: i32, %arg1: i32) -> (i32, i32, i32) {
    %c0_i32 = arith.constant 0 : i32
    %c0_i32_0 = arith.constant 0 : i32
    return %arg0, %c0_i32, %arg1 : i32, i32, i32
  }
  func.func @transform_1(%arg0: i32, %arg1: i32) -> (i32, i32) {
    %c0_i32 = arith.constant 0 : i32
    %c0_i32_0 = arith.constant 0 : i32
    %c0_i32_1 = arith.constant 0 : i32
    return %c0_i32, %c0_i32_0 : i32, i32
  }
  func.func @transform_2(%arg0: i32, %arg1: i32) -> (i32, i32) {
    %c0_i32 = arith.constant 0 : i32
    %c0_i32_0 = arith.constant 0 : i32
    %c0_i32_1 = arith.constant 0 : i32
    return %c0_i32, %c0_i32_0 : i32, i32
  }
  func.func @transform_3(%arg0: i32, %arg1: i32) -> (i32, i32) {
    %c0_i32 = arith.constant 0 : i32
    %c0_i32_0 = arith.constant 0 : i32
    %c0_i32_1 = arith.constant 0 : i32
    return %c0_i32, %c0_i32_0 : i32, i32
  }
  func.func @transform_4(%arg0: i32, %arg1: i32) -> (i32, i32, i32) {
    %c0_i32 = arith.constant 0 : i32
    %c0_i32_0 = arith.constant 0 : i32
    return %arg0, %c0_i32, %arg1 : i32, i32, i32
  }
}

module attributes {stable_mosaic.version = 11 : i64} {
  func.func @_conv_bn_relu_kernel(%arg0: i32, %arg1: i32, %arg2: memref<1x288x64xbf16, #tpu.memory_space<vmem>>, %arg3: memref<32x288xbf16, #tpu.memory_space<vmem>>, %arg4: memref<32x1xf32, #tpu.memory_space<vmem>>, %arg5: memref<32x1xf32, #tpu.memory_space<vmem>>, %arg6: memref<1x32x64xf32, #tpu.memory_space<vmem>>) attributes {dimension_semantics = [#tpu.dimension_semantics<parallel>, #tpu.dimension_semantics<parallel>], iteration_bounds = array<i64: 2, 1>, scalar_prefetch = 0 : i64, scratch_operands = 0 : i64, tpu.core_type = #tpu.core_type<tc>, window_params = [{transform_indices = @transform_0, window_bounds = array<i64: 1, 288, 64>}, {pipeline_mode = #tpu.pipeline_mode<synchronous>, transform_indices = @transform_1, window_bounds = array<i64: 32, 288>}, {pipeline_mode = #tpu.pipeline_mode<synchronous>, transform_indices = @transform_2, window_bounds = array<i64: 32, 1>}, {pipeline_mode = #tpu.pipeline_mode<synchronous>, transform_indices = @transform_3, window_bounds = array<i64: 32, 1>}, {transform_indices = @transform_4, window_bounds = array<i64: 1, 32, 64>}]} {
    %c0 = arith.constant 0 : index
    %c0_0 = arith.constant 0 : index
    %0 = vector.load %arg3[%c0, %c0_0] : memref<32x288xbf16, #tpu.memory_space<vmem>>, vector<32x288xbf16>
    %c0_1 = arith.constant 0 : index
    %c0_2 = arith.constant 0 : index
    %c0_3 = arith.constant 0 : index
    %1 = vector.load %arg2[%c0_1, %c0_2, %c0_3] : memref<1x288x64xbf16, #tpu.memory_space<vmem>>, vector<1x288x64xbf16>
    %2 = vector.shape_cast %1 : vector<1x288x64xbf16> to vector<288x64xbf16>
    %cst = arith.constant dense<0.000000e+00> : vector<32x64xf32>
    %3 = tpu.matmul %0, %2, %cst {dimension_numbers = #tpu.dot_dimension_numbers<[1], [0], [0], [1], [0, 0, 1, 1], [], []>} : vector<32x288xbf16>, vector<288x64xbf16>, vector<32x64xf32> -> vector<32x64xf32>
    %c0_4 = arith.constant 0 : index
    %c0_5 = arith.constant 0 : index
    %4 = vector.load %arg4[%c0_4, %c0_5] : memref<32x1xf32, #tpu.memory_space<vmem>>, vector<32x1xf32>
    %5 = vector.broadcast %4 : vector<32x1xf32> to vector<32x64xf32>
    %6 = arith.mulf %3, %5 : vector<32x64xf32>
    %c0_6 = arith.constant 0 : index
    %c0_7 = arith.constant 0 : index
    %7 = vector.load %arg5[%c0_6, %c0_7] : memref<32x1xf32, #tpu.memory_space<vmem>>, vector<32x1xf32>
    %8 = vector.broadcast %7 : vector<32x1xf32> to vector<32x64xf32>
    %9 = arith.addf %6, %8 : vector<32x64xf32>
    %cst_8 = arith.constant 0.000000e+00 : f32
    %10 = vector.broadcast %cst_8 : f32 to vector<32x64xf32>
    %11 = arith.maximumf %9, %10 : vector<32x64xf32>
    %c0_9 = arith.constant 0 : index
    %c0_10 = arith.constant 0 : index
    %c0_11 = arith.constant 0 : index
    %12 = vector.load %arg6[%c0_9, %c0_10, %c0_11] : memref<1x32x64xf32, #tpu.memory_space<vmem>>, vector<1x32x64xf32>
    %13 = vector.shape_cast %12 : vector<1x32x64xf32> to vector<32x64xf32>
    %14 = vector.shape_cast %11 : vector<32x64xf32> to vector<1x32x64xf32>
    tpu.vector_store %arg6[%c0_9, %c0_10, %c0_11], %14 {strides = array<i32>} : memref<1x32x64xf32, #tpu.memory_space<vmem>>, vector<1x32x64xf32>,
    return
  }
  func.func @transform_0(%arg0: i32, %arg1: i32) -> (i32, i32, i32) {
    %c0_i32 = arith.constant 0 : i32
    %c0_i32_0 = arith.constant 0 : i32
    return %arg0, %c0_i32, %arg1 : i32, i32, i32
  }
  func.func @transform_1(%arg0: i32, %arg1: i32) -> (i32, i32) {
    %c0_i32 = arith.constant 0 : i32
    %c0_i32_0 = arith.constant 0 : i32
    %c0_i32_1 = arith.constant 0 : i32
    return %c0_i32, %c0_i32_0 : i32, i32
  }
  func.func @transform_2(%arg0: i32, %arg1: i32) -> (i32, i32) {
    %c0_i32 = arith.constant 0 : i32
    %c0_i32_0 = arith.constant 0 : i32
    %c0_i32_1 = arith.constant 0 : i32
    return %c0_i32, %c0_i32_0 : i32, i32
  }
  func.func @transform_3(%arg0: i32, %arg1: i32) -> (i32, i32) {
    %c0_i32 = arith.constant 0 : i32
    %c0_i32_0 = arith.constant 0 : i32
    %c0_i32_1 = arith.constant 0 : i32
    return %c0_i32, %c0_i32_0 : i32, i32
  }
  func.func @transform_4(%arg0: i32, %arg1: i32) -> (i32, i32, i32) {
    %c0_i32 = arith.constant 0 : i32
    %c0_i32_0 = arith.constant 0 : i32
    return %arg0, %c0_i32, %arg1 : i32, i32, i32
  }
}

module attributes {stable_mosaic.version = 11 : i64} {
  func.func @_conv_bn_relu_kernel(%arg0: i32, %arg1: i32, %arg2: memref<1x288x16xbf16, #tpu.memory_space<vmem>>, %arg3: memref<64x288xbf16, #tpu.memory_space<vmem>>, %arg4: memref<64x1xf32, #tpu.memory_space<vmem>>, %arg5: memref<64x1xf32, #tpu.memory_space<vmem>>, %arg6: memref<1x64x16xf32, #tpu.memory_space<vmem>>) attributes {dimension_semantics = [#tpu.dimension_semantics<parallel>, #tpu.dimension_semantics<parallel>], iteration_bounds = array<i64: 2, 1>, scalar_prefetch = 0 : i64, scratch_operands = 0 : i64, tpu.core_type = #tpu.core_type<tc>, window_params = [{transform_indices = @transform_0, window_bounds = array<i64: 1, 288, 16>}, {pipeline_mode = #tpu.pipeline_mode<synchronous>, transform_indices = @transform_1, window_bounds = array<i64: 64, 288>}, {pipeline_mode = #tpu.pipeline_mode<synchronous>, transform_indices = @transform_2, window_bounds = array<i64: 64, 1>}, {pipeline_mode = #tpu.pipeline_mode<synchronous>, transform_indices = @transform_3, window_bounds = array<i64: 64, 1>}, {transform_indices = @transform_4, window_bounds = array<i64: 1, 64, 16>}]} {
    %c0 = arith.constant 0 : index
    %c0_0 = arith.constant 0 : index
    %0 = vector.load %arg3[%c0, %c0_0] : memref<64x288xbf16, #tpu.memory_space<vmem>>, vector<64x288xbf16>
    %c0_1 = arith.constant 0 : index
    %c0_2 = arith.constant 0 : index
    %c0_3 = arith.constant 0 : index
    %1 = vector.load %arg2[%c0_1, %c0_2, %c0_3] : memref<1x288x16xbf16, #tpu.memory_space<vmem>>, vector<1x288x16xbf16>
    %2 = vector.shape_cast %1 : vector<1x288x16xbf16> to vector<288x16xbf16>
    %cst = arith.constant dense<0.000000e+00> : vector<64x16xf32>
    %3 = tpu.matmul %0, %2, %cst {dimension_numbers = #tpu.dot_dimension_numbers<[1], [0], [0], [1], [0, 0, 1, 1], [], []>} : vector<64x288xbf16>, vector<288x16xbf16>, vector<64x16xf32> -> vector<64x16xf32>
    %c0_4 = arith.constant 0 : index
    %c0_5 = arith.constant 0 : index
    %4 = vector.load %arg4[%c0_4, %c0_5] : memref<64x1xf32, #tpu.memory_space<vmem>>, vector<64x1xf32>
    %5 = vector.broadcast %4 : vector<64x1xf32> to vector<64x16xf32>
    %6 = arith.mulf %3, %5 : vector<64x16xf32>
    %c0_6 = arith.constant 0 : index
    %c0_7 = arith.constant 0 : index
    %7 = vector.load %arg5[%c0_6, %c0_7] : memref<64x1xf32, #tpu.memory_space<vmem>>, vector<64x1xf32>
    %8 = vector.broadcast %7 : vector<64x1xf32> to vector<64x16xf32>
    %9 = arith.addf %6, %8 : vector<64x16xf32>
    %cst_8 = arith.constant 0.000000e+00 : f32
    %10 = vector.broadcast %cst_8 : f32 to vector<64x16xf32>
    %11 = arith.maximumf %9, %10 : vector<64x16xf32>
    %c0_9 = arith.constant 0 : index
    %c0_10 = arith.constant 0 : index
    %c0_11 = arith.constant 0 : index
    %12 = vector.load %arg6[%c0_9, %c0_10, %c0_11] : memref<1x64x16xf32, #tpu.memory_space<vmem>>, vector<1x64x16xf32>
    %13 = vector.shape_cast %12 : vector<1x64x16xf32> to vector<64x16xf32>
    %14 = vector.shape_cast %11 : vector<64x16xf32> to vector<1x64x16xf32>
    tpu.vector_store %arg6[%c0_9, %c0_10, %c0_11], %14 {strides = array<i32>} : memref<1x64x16xf32, #tpu.memory_space<vmem>>, vector<1x64x16xf32>,
    return
  }
  func.func @transform_0(%arg0: i32, %arg1: i32) -> (i32, i32, i32) {
    %c0_i32 = arith.constant 0 : i32
    %c0_i32_0 = arith.constant 0 : i32
    return %arg0, %c0_i32, %arg1 : i32, i32, i32
  }
  func.func @transform_1(%arg0: i32, %arg1: i32) -> (i32, i32) {
    %c0_i32 = arith.constant 0 : i32
    %c0_i32_0 = arith.constant 0 : i32
    %c0_i32_1 = arith.constant 0 : i32
    return %c0_i32, %c0_i32_0 : i32, i32
  }
  func.func @transform_2(%arg0: i32, %arg1: i32) -> (i32, i32) {
    %c0_i32 = arith.constant 0 : i32
    %c0_i32_0 = arith.constant 0 : i32
    %c0_i32_1 = arith.constant 0 : i32
    return %c0_i32, %c0_i32_0 : i32, i32
  }
  func.func @transform_3(%arg0: i32, %arg1: i32) -> (i32, i32) {
    %c0_i32 = arith.constant 0 : i32
    %c0_i32_0 = arith.constant 0 : i32
    %c0_i32_1 = arith.constant 0 : i32
    return %c0_i32, %c0_i32_0 : i32, i32
  }
  func.func @transform_4(%arg0: i32, %arg1: i32) -> (i32, i32, i32) {
    %c0_i32 = arith.constant 0 : i32
    %c0_i32_0 = arith.constant 0 : i32
    return %arg0, %c0_i32, %arg1 : i32, i32, i32
  }
}

module attributes {stable_mosaic.version = 11 : i64} {
  func.func @_conv_bn_relu_kernel(%arg0: i32, %arg1: i32, %arg2: memref<1x576x16xbf16, #tpu.memory_space<vmem>>, %arg3: memref<64x576xbf16, #tpu.memory_space<vmem>>, %arg4: memref<64x1xf32, #tpu.memory_space<vmem>>, %arg5: memref<64x1xf32, #tpu.memory_space<vmem>>, %arg6: memref<1x64x16xf32, #tpu.memory_space<vmem>>) attributes {dimension_semantics = [#tpu.dimension_semantics<parallel>, #tpu.dimension_semantics<parallel>], iteration_bounds = array<i64: 2, 1>, scalar_prefetch = 0 : i64, scratch_operands = 0 : i64, tpu.core_type = #tpu.core_type<tc>, window_params = [{transform_indices = @transform_0, window_bounds = array<i64: 1, 576, 16>}, {pipeline_mode = #tpu.pipeline_mode<synchronous>, transform_indices = @transform_1, window_bounds = array<i64: 64, 576>}, {pipeline_mode = #tpu.pipeline_mode<synchronous>, transform_indices = @transform_2, window_bounds = array<i64: 64, 1>}, {pipeline_mode = #tpu.pipeline_mode<synchronous>, transform_indices = @transform_3, window_bounds = array<i64: 64, 1>}, {transform_indices = @transform_4, window_bounds = array<i64: 1, 64, 16>}]} {
    %c0 = arith.constant 0 : index
    %c0_0 = arith.constant 0 : index
    %0 = vector.load %arg3[%c0, %c0_0] : memref<64x576xbf16, #tpu.memory_space<vmem>>, vector<64x576xbf16>
    %c0_1 = arith.constant 0 : index
    %c0_2 = arith.constant 0 : index
    %c0_3 = arith.constant 0 : index
    %1 = vector.load %arg2[%c0_1, %c0_2, %c0_3] : memref<1x576x16xbf16, #tpu.memory_space<vmem>>, vector<1x576x16xbf16>
    %2 = vector.shape_cast %1 : vector<1x576x16xbf16> to vector<576x16xbf16>
    %cst = arith.constant dense<0.000000e+00> : vector<64x16xf32>
    %3 = tpu.matmul %0, %2, %cst {dimension_numbers = #tpu.dot_dimension_numbers<[1], [0], [0], [1], [0, 0, 1, 1], [], []>} : vector<64x576xbf16>, vector<576x16xbf16>, vector<64x16xf32> -> vector<64x16xf32>
    %c0_4 = arith.constant 0 : index
    %c0_5 = arith.constant 0 : index
    %4 = vector.load %arg4[%c0_4, %c0_5] : memref<64x1xf32, #tpu.memory_space<vmem>>, vector<64x1xf32>
    %5 = vector.broadcast %4 : vector<64x1xf32> to vector<64x16xf32>
    %6 = arith.mulf %3, %5 : vector<64x16xf32>
    %c0_6 = arith.constant 0 : index
    %c0_7 = arith.constant 0 : index
    %7 = vector.load %arg5[%c0_6, %c0_7] : memref<64x1xf32, #tpu.memory_space<vmem>>, vector<64x1xf32>
    %8 = vector.broadcast %7 : vector<64x1xf32> to vector<64x16xf32>
    %9 = arith.addf %6, %8 : vector<64x16xf32>
    %cst_8 = arith.constant 0.000000e+00 : f32
    %10 = vector.broadcast %cst_8 : f32 to vector<64x16xf32>
    %11 = arith.maximumf %9, %10 : vector<64x16xf32>
    %c0_9 = arith.constant 0 : index
    %c0_10 = arith.constant 0 : index
    %c0_11 = arith.constant 0 : index
    %12 = vector.load %arg6[%c0_9, %c0_10, %c0_11] : memref<1x64x16xf32, #tpu.memory_space<vmem>>, vector<1x64x16xf32>
    %13 = vector.shape_cast %12 : vector<1x64x16xf32> to vector<64x16xf32>
    %14 = vector.shape_cast %11 : vector<64x16xf32> to vector<1x64x16xf32>
    tpu.vector_store %arg6[%c0_9, %c0_10, %c0_11], %14 {strides = array<i32>} : memref<1x64x16xf32, #tpu.memory_space<vmem>>, vector<1x64x16xf32>,
    return
  }
  func.func @transform_0(%arg0: i32, %arg1: i32) -> (i32, i32, i32) {
    %c0_i32 = arith.constant 0 : i32
    %c0_i32_0 = arith.constant 0 : i32
    return %arg0, %c0_i32, %arg1 : i32, i32, i32
  }
  func.func @transform_1(%arg0: i32, %arg1: i32) -> (i32, i32) {
    %c0_i32 = arith.constant 0 : i32
    %c0_i32_0 = arith.constant 0 : i32
    %c0_i32_1 = arith.constant 0 : i32
    return %c0_i32, %c0_i32_0 : i32, i32
  }
  func.func @transform_2(%arg0: i32, %arg1: i32) -> (i32, i32) {
    %c0_i32 = arith.constant 0 : i32
    %c0_i32_0 = arith.constant 0 : i32
    %c0_i32_1 = arith.constant 0 : i32
    return %c0_i32, %c0_i32_0 : i32, i32
  }
  func.func @transform_3(%arg0: i32, %arg1: i32) -> (i32, i32) {
    %c0_i32 = arith.constant 0 : i32
    %c0_i32_0 = arith.constant 0 : i32
    %c0_i32_1 = arith.constant 0 : i32
    return %c0_i32, %c0_i32_0 : i32, i32
  }
  func.func @transform_4(%arg0: i32, %arg1: i32) -> (i32, i32, i32) {
    %c0_i32 = arith.constant 0 : i32
    %c0_i32_0 = arith.constant 0 : i32
    return %arg0, %c0_i32, %arg1 : i32, i32, i32
  }
}

module attributes {stable_mosaic.version = 11 : i64} {
  func.func @_conv_bn_relu_kernel(%arg0: i32, %arg1: i32, %arg2: memref<1x576x4xbf16, #tpu.memory_space<vmem>>, %arg3: memref<64x576xbf16, #tpu.memory_space<vmem>>, %arg4: memref<64x1xf32, #tpu.memory_space<vmem>>, %arg5: memref<64x1xf32, #tpu.memory_space<vmem>>, %arg6: memref<1x64x4xf32, #tpu.memory_space<vmem>>) attributes {dimension_semantics = [#tpu.dimension_semantics<parallel>, #tpu.dimension_semantics<parallel>], iteration_bounds = array<i64: 2, 1>, scalar_prefetch = 0 : i64, scratch_operands = 0 : i64, tpu.core_type = #tpu.core_type<tc>, window_params = [{transform_indices = @transform_0, window_bounds = array<i64: 1, 576, 4>}, {pipeline_mode = #tpu.pipeline_mode<synchronous>, transform_indices = @transform_1, window_bounds = array<i64: 64, 576>}, {pipeline_mode = #tpu.pipeline_mode<synchronous>, transform_indices = @transform_2, window_bounds = array<i64: 64, 1>}, {pipeline_mode = #tpu.pipeline_mode<synchronous>, transform_indices = @transform_3, window_bounds = array<i64: 64, 1>}, {transform_indices = @transform_4, window_bounds = array<i64: 1, 64, 4>}]} {
    %c0 = arith.constant 0 : index
    %c0_0 = arith.constant 0 : index
    %0 = vector.load %arg3[%c0, %c0_0] : memref<64x576xbf16, #tpu.memory_space<vmem>>, vector<64x576xbf16>
    %c0_1 = arith.constant 0 : index
    %c0_2 = arith.constant 0 : index
    %c0_3 = arith.constant 0 : index
    %1 = vector.load %arg2[%c0_1, %c0_2, %c0_3] : memref<1x576x4xbf16, #tpu.memory_space<vmem>>, vector<1x576x4xbf16>
    %2 = vector.shape_cast %1 : vector<1x576x4xbf16> to vector<576x4xbf16>
    %cst = arith.constant dense<0.000000e+00> : vector<64x4xf32>
    %3 = tpu.matmul %0, %2, %cst {dimension_numbers = #tpu.dot_dimension_numbers<[1], [0], [0], [1], [0, 0, 1, 1], [], []>} : vector<64x576xbf16>, vector<576x4xbf16>, vector<64x4xf32> -> vector<64x4xf32>
    %c0_4 = arith.constant 0 : index
    %c0_5 = arith.constant 0 : index
    %4 = vector.load %arg4[%c0_4, %c0_5] : memref<64x1xf32, #tpu.memory_space<vmem>>, vector<64x1xf32>
    %5 = vector.broadcast %4 : vector<64x1xf32> to vector<64x4xf32>
    %6 = arith.mulf %3, %5 : vector<64x4xf32>
    %c0_6 = arith.constant 0 : index
    %c0_7 = arith.constant 0 : index
    %7 = vector.load %arg5[%c0_6, %c0_7] : memref<64x1xf32, #tpu.memory_space<vmem>>, vector<64x1xf32>
    %8 = vector.broadcast %7 : vector<64x1xf32> to vector<64x4xf32>
    %9 = arith.addf %6, %8 : vector<64x4xf32>
    %cst_8 = arith.constant 0.000000e+00 : f32
    %10 = vector.broadcast %cst_8 : f32 to vector<64x4xf32>
    %11 = arith.maximumf %9, %10 : vector<64x4xf32>
    %c0_9 = arith.constant 0 : index
    %c0_10 = arith.constant 0 : index
    %c0_11 = arith.constant 0 : index
    %12 = vector.load %arg6[%c0_9, %c0_10, %c0_11] : memref<1x64x4xf32, #tpu.memory_space<vmem>>, vector<1x64x4xf32>
    %13 = vector.shape_cast %12 : vector<1x64x4xf32> to vector<64x4xf32>
    %14 = vector.shape_cast %11 : vector<64x4xf32> to vector<1x64x4xf32>
    tpu.vector_store %arg6[%c0_9, %c0_10, %c0_11], %14 {strides = array<i32>} : memref<1x64x4xf32, #tpu.memory_space<vmem>>, vector<1x64x4xf32>,
    return
  }
  func.func @transform_0(%arg0: i32, %arg1: i32) -> (i32, i32, i32) {
    %c0_i32 = arith.constant 0 : i32
    %c0_i32_0 = arith.constant 0 : i32
    return %arg0, %c0_i32, %arg1 : i32, i32, i32
  }
  func.func @transform_1(%arg0: i32, %arg1: i32) -> (i32, i32) {
    %c0_i32 = arith.constant 0 : i32
    %c0_i32_0 = arith.constant 0 : i32
    %c0_i32_1 = arith.constant 0 : i32
    return %c0_i32, %c0_i32_0 : i32, i32
  }
  func.func @transform_2(%arg0: i32, %arg1: i32) -> (i32, i32) {
    %c0_i32 = arith.constant 0 : i32
    %c0_i32_0 = arith.constant 0 : i32
    %c0_i32_1 = arith.constant 0 : i32
    return %c0_i32, %c0_i32_0 : i32, i32
  }
  func.func @transform_3(%arg0: i32, %arg1: i32) -> (i32, i32) {
    %c0_i32 = arith.constant 0 : i32
    %c0_i32_0 = arith.constant 0 : i32
    %c0_i32_1 = arith.constant 0 : i32
    return %c0_i32, %c0_i32_0 : i32, i32
  }
  func.func @transform_4(%arg0: i32, %arg1: i32) -> (i32, i32, i32) {
    %c0_i32 = arith.constant 0 : i32
    %c0_i32_0 = arith.constant 0 : i32
    return %arg0, %c0_i32, %arg1 : i32, i32, i32
  }
}

module attributes {stable_mosaic.version = 11 : i64} {
  func.func @_conv_bn_relu_kernel(%arg0: i32, %arg1: i32, %arg2: memref<1x576x16xbf16, #tpu.memory_space<vmem>>, %arg3: memref<32x576xbf16, #tpu.memory_space<vmem>>, %arg4: memref<32x1xf32, #tpu.memory_space<vmem>>, %arg5: memref<32x1xf32, #tpu.memory_space<vmem>>, %arg6: memref<1x32x16xf32, #tpu.memory_space<vmem>>) attributes {dimension_semantics = [#tpu.dimension_semantics<parallel>, #tpu.dimension_semantics<parallel>], iteration_bounds = array<i64: 2, 1>, scalar_prefetch = 0 : i64, scratch_operands = 0 : i64, tpu.core_type = #tpu.core_type<tc>, window_params = [{transform_indices = @transform_0, window_bounds = array<i64: 1, 576, 16>}, {pipeline_mode = #tpu.pipeline_mode<synchronous>, transform_indices = @transform_1, window_bounds = array<i64: 32, 576>}, {pipeline_mode = #tpu.pipeline_mode<synchronous>, transform_indices = @transform_2, window_bounds = array<i64: 32, 1>}, {pipeline_mode = #tpu.pipeline_mode<synchronous>, transform_indices = @transform_3, window_bounds = array<i64: 32, 1>}, {transform_indices = @transform_4, window_bounds = array<i64: 1, 32, 16>}]} {
    %c0 = arith.constant 0 : index
    %c0_0 = arith.constant 0 : index
    %0 = vector.load %arg3[%c0, %c0_0] : memref<32x576xbf16, #tpu.memory_space<vmem>>, vector<32x576xbf16>
    %c0_1 = arith.constant 0 : index
    %c0_2 = arith.constant 0 : index
    %c0_3 = arith.constant 0 : index
    %1 = vector.load %arg2[%c0_1, %c0_2, %c0_3] : memref<1x576x16xbf16, #tpu.memory_space<vmem>>, vector<1x576x16xbf16>
    %2 = vector.shape_cast %1 : vector<1x576x16xbf16> to vector<576x16xbf16>
    %cst = arith.constant dense<0.000000e+00> : vector<32x16xf32>
    %3 = tpu.matmul %0, %2, %cst {dimension_numbers = #tpu.dot_dimension_numbers<[1], [0], [0], [1], [0, 0, 1, 1], [], []>} : vector<32x576xbf16>, vector<576x16xbf16>, vector<32x16xf32> -> vector<32x16xf32>
    %c0_4 = arith.constant 0 : index
    %c0_5 = arith.constant 0 : index
    %4 = vector.load %arg4[%c0_4, %c0_5] : memref<32x1xf32, #tpu.memory_space<vmem>>, vector<32x1xf32>
    %5 = vector.broadcast %4 : vector<32x1xf32> to vector<32x16xf32>
    %6 = arith.mulf %3, %5 : vector<32x16xf32>
    %c0_6 = arith.constant 0 : index
    %c0_7 = arith.constant 0 : index
    %7 = vector.load %arg5[%c0_6, %c0_7] : memref<32x1xf32, #tpu.memory_space<vmem>>, vector<32x1xf32>
    %8 = vector.broadcast %7 : vector<32x1xf32> to vector<32x16xf32>
    %9 = arith.addf %6, %8 : vector<32x16xf32>
    %cst_8 = arith.constant 0.000000e+00 : f32
    %10 = vector.broadcast %cst_8 : f32 to vector<32x16xf32>
    %11 = arith.maximumf %9, %10 : vector<32x16xf32>
    %c0_9 = arith.constant 0 : index
    %c0_10 = arith.constant 0 : index
    %c0_11 = arith.constant 0 : index
    %12 = vector.load %arg6[%c0_9, %c0_10, %c0_11] : memref<1x32x16xf32, #tpu.memory_space<vmem>>, vector<1x32x16xf32>
    %13 = vector.shape_cast %12 : vector<1x32x16xf32> to vector<32x16xf32>
    %14 = vector.shape_cast %11 : vector<32x16xf32> to vector<1x32x16xf32>
    tpu.vector_store %arg6[%c0_9, %c0_10, %c0_11], %14 {strides = array<i32>} : memref<1x32x16xf32, #tpu.memory_space<vmem>>, vector<1x32x16xf32>,
    return
  }
  func.func @transform_0(%arg0: i32, %arg1: i32) -> (i32, i32, i32) {
    %c0_i32 = arith.constant 0 : i32
    %c0_i32_0 = arith.constant 0 : i32
    return %arg0, %c0_i32, %arg1 : i32, i32, i32
  }
  func.func @transform_1(%arg0: i32, %arg1: i32) -> (i32, i32) {
    %c0_i32 = arith.constant 0 : i32
    %c0_i32_0 = arith.constant 0 : i32
    %c0_i32_1 = arith.constant 0 : i32
    return %c0_i32, %c0_i32_0 : i32, i32
  }
  func.func @transform_2(%arg0: i32, %arg1: i32) -> (i32, i32) {
    %c0_i32 = arith.constant 0 : i32
    %c0_i32_0 = arith.constant 0 : i32
    %c0_i32_1 = arith.constant 0 : i32
    return %c0_i32, %c0_i32_0 : i32, i32
  }
  func.func @transform_3(%arg0: i32, %arg1: i32) -> (i32, i32) {
    %c0_i32 = arith.constant 0 : i32
    %c0_i32_0 = arith.constant 0 : i32
    %c0_i32_1 = arith.constant 0 : i32
    return %c0_i32, %c0_i32_0 : i32, i32
  }
  func.func @transform_4(%arg0: i32, %arg1: i32) -> (i32, i32, i32) {
    %c0_i32 = arith.constant 0 : i32
    %c0_i32_0 = arith.constant 0 : i32
    return %arg0, %c0_i32, %arg1 : i32, i32, i32
  }
}

module attributes {stable_mosaic.version = 11 : i64} {
  func.func @_conv_bn_relu_kernel(%arg0: i32, %arg1: i32, %arg2: memref<1x1152x16xbf16, #tpu.memory_space<vmem>>, %arg3: memref<64x1152xbf16, #tpu.memory_space<vmem>>, %arg4: memref<64x1xf32, #tpu.memory_space<vmem>>, %arg5: memref<64x1xf32, #tpu.memory_space<vmem>>, %arg6: memref<1x64x16xf32, #tpu.memory_space<vmem>>) attributes {dimension_semantics = [#tpu.dimension_semantics<parallel>, #tpu.dimension_semantics<parallel>], iteration_bounds = array<i64: 2, 1>, scalar_prefetch = 0 : i64, scratch_operands = 0 : i64, tpu.core_type = #tpu.core_type<tc>, window_params = [{transform_indices = @transform_0, window_bounds = array<i64: 1, 1152, 16>}, {pipeline_mode = #tpu.pipeline_mode<synchronous>, transform_indices = @transform_1, window_bounds = array<i64: 64, 1152>}, {pipeline_mode = #tpu.pipeline_mode<synchronous>, transform_indices = @transform_2, window_bounds = array<i64: 64, 1>}, {pipeline_mode = #tpu.pipeline_mode<synchronous>, transform_indices = @transform_3, window_bounds = array<i64: 64, 1>}, {transform_indices = @transform_4, window_bounds = array<i64: 1, 64, 16>}]} {
    %c0 = arith.constant 0 : index
    %c0_0 = arith.constant 0 : index
    %0 = vector.load %arg3[%c0, %c0_0] : memref<64x1152xbf16, #tpu.memory_space<vmem>>, vector<64x1152xbf16>
    %c0_1 = arith.constant 0 : index
    %c0_2 = arith.constant 0 : index
    %c0_3 = arith.constant 0 : index
    %1 = vector.load %arg2[%c0_1, %c0_2, %c0_3] : memref<1x1152x16xbf16, #tpu.memory_space<vmem>>, vector<1x1152x16xbf16>
    %2 = vector.shape_cast %1 : vector<1x1152x16xbf16> to vector<1152x16xbf16>
    %cst = arith.constant dense<0.000000e+00> : vector<64x16xf32>
    %3 = tpu.matmul %0, %2, %cst {dimension_numbers = #tpu.dot_dimension_numbers<[1], [0], [0], [1], [0, 0, 1, 1], [], []>} : vector<64x1152xbf16>, vector<1152x16xbf16>, vector<64x16xf32> -> vector<64x16xf32>
    %c0_4 = arith.constant 0 : index
    %c0_5 = arith.constant 0 : index
    %4 = vector.load %arg4[%c0_4, %c0_5] : memref<64x1xf32, #tpu.memory_space<vmem>>, vector<64x1xf32>
    %5 = vector.broadcast %4 : vector<64x1xf32> to vector<64x16xf32>
    %6 = arith.mulf %3, %5 : vector<64x16xf32>
    %c0_6 = arith.constant 0 : index
    %c0_7 = arith.constant 0 : index
    %7 = vector.load %arg5[%c0_6, %c0_7] : memref<64x1xf32, #tpu.memory_space<vmem>>, vector<64x1xf32>
    %8 = vector.broadcast %7 : vector<64x1xf32> to vector<64x16xf32>
    %9 = arith.addf %6, %8 : vector<64x16xf32>
    %cst_8 = arith.constant 0.000000e+00 : f32
    %10 = vector.broadcast %cst_8 : f32 to vector<64x16xf32>
    %11 = arith.maximumf %9, %10 : vector<64x16xf32>
    %c0_9 = arith.constant 0 : index
    %c0_10 = arith.constant 0 : index
    %c0_11 = arith.constant 0 : index
    %12 = vector.load %arg6[%c0_9, %c0_10, %c0_11] : memref<1x64x16xf32, #tpu.memory_space<vmem>>, vector<1x64x16xf32>
    %13 = vector.shape_cast %12 : vector<1x64x16xf32> to vector<64x16xf32>
    %14 = vector.shape_cast %11 : vector<64x16xf32> to vector<1x64x16xf32>
    tpu.vector_store %arg6[%c0_9, %c0_10, %c0_11], %14 {strides = array<i32>} : memref<1x64x16xf32, #tpu.memory_space<vmem>>, vector<1x64x16xf32>,
    return
  }
  func.func @transform_0(%arg0: i32, %arg1: i32) -> (i32, i32, i32) {
    %c0_i32 = arith.constant 0 : i32
    %c0_i32_0 = arith.constant 0 : i32
    return %arg0, %c0_i32, %arg1 : i32, i32, i32
  }
  func.func @transform_1(%arg0: i32, %arg1: i32) -> (i32, i32) {
    %c0_i32 = arith.constant 0 : i32
    %c0_i32_0 = arith.constant 0 : i32
    %c0_i32_1 = arith.constant 0 : i32
    return %c0_i32, %c0_i32_0 : i32, i32
  }
  func.func @transform_2(%arg0: i32, %arg1: i32) -> (i32, i32) {
    %c0_i32 = arith.constant 0 : i32
    %c0_i32_0 = arith.constant 0 : i32
    %c0_i32_1 = arith.constant 0 : i32
    return %c0_i32, %c0_i32_0 : i32, i32
  }
  func.func @transform_3(%arg0: i32, %arg1: i32) -> (i32, i32) {
    %c0_i32 = arith.constant 0 : i32
    %c0_i32_0 = arith.constant 0 : i32
    %c0_i32_1 = arith.constant 0 : i32
    return %c0_i32, %c0_i32_0 : i32, i32
  }
  func.func @transform_4(%arg0: i32, %arg1: i32) -> (i32, i32, i32) {
    %c0_i32 = arith.constant 0 : i32
    %c0_i32_0 = arith.constant 0 : i32
    return %arg0, %c0_i32, %arg1 : i32, i32, i32
  }
}

module attributes {stable_mosaic.version = 11 : i64} {
  func.func @_conv_bn_relu_kernel(%arg0: i32, %arg1: i32, %arg2: memref<1x288x64xbf16, #tpu.memory_space<vmem>>, %arg3: memref<16x288xbf16, #tpu.memory_space<vmem>>, %arg4: memref<16x1xf32, #tpu.memory_space<vmem>>, %arg5: memref<16x1xf32, #tpu.memory_space<vmem>>, %arg6: memref<1x16x64xf32, #tpu.memory_space<vmem>>) attributes {dimension_semantics = [#tpu.dimension_semantics<parallel>, #tpu.dimension_semantics<parallel>], iteration_bounds = array<i64: 2, 1>, scalar_prefetch = 0 : i64, scratch_operands = 0 : i64, tpu.core_type = #tpu.core_type<tc>, window_params = [{transform_indices = @transform_0, window_bounds = array<i64: 1, 288, 64>}, {pipeline_mode = #tpu.pipeline_mode<synchronous>, transform_indices = @transform_1, window_bounds = array<i64: 16, 288>}, {pipeline_mode = #tpu.pipeline_mode<synchronous>, transform_indices = @transform_2, window_bounds = array<i64: 16, 1>}, {pipeline_mode = #tpu.pipeline_mode<synchronous>, transform_indices = @transform_3, window_bounds = array<i64: 16, 1>}, {transform_indices = @transform_4, window_bounds = array<i64: 1, 16, 64>}]} {
    %c0 = arith.constant 0 : index
    %c0_0 = arith.constant 0 : index
    %0 = vector.load %arg3[%c0, %c0_0] : memref<16x288xbf16, #tpu.memory_space<vmem>>, vector<16x288xbf16>
    %c0_1 = arith.constant 0 : index
    %c0_2 = arith.constant 0 : index
    %c0_3 = arith.constant 0 : index
    %1 = vector.load %arg2[%c0_1, %c0_2, %c0_3] : memref<1x288x64xbf16, #tpu.memory_space<vmem>>, vector<1x288x64xbf16>
    %2 = vector.shape_cast %1 : vector<1x288x64xbf16> to vector<288x64xbf16>
    %cst = arith.constant dense<0.000000e+00> : vector<16x64xf32>
    %3 = tpu.matmul %0, %2, %cst {dimension_numbers = #tpu.dot_dimension_numbers<[1], [0], [0], [1], [0, 0, 1, 1], [], []>} : vector<16x288xbf16>, vector<288x64xbf16>, vector<16x64xf32> -> vector<16x64xf32>
    %c0_4 = arith.constant 0 : index
    %c0_5 = arith.constant 0 : index
    %4 = vector.load %arg4[%c0_4, %c0_5] : memref<16x1xf32, #tpu.memory_space<vmem>>, vector<16x1xf32>
    %5 = vector.broadcast %4 : vector<16x1xf32> to vector<16x64xf32>
    %6 = arith.mulf %3, %5 : vector<16x64xf32>
    %c0_6 = arith.constant 0 : index
    %c0_7 = arith.constant 0 : index
    %7 = vector.load %arg5[%c0_6, %c0_7] : memref<16x1xf32, #tpu.memory_space<vmem>>, vector<16x1xf32>
    %8 = vector.broadcast %7 : vector<16x1xf32> to vector<16x64xf32>
    %9 = arith.addf %6, %8 : vector<16x64xf32>
    %cst_8 = arith.constant 0.000000e+00 : f32
    %10 = vector.broadcast %cst_8 : f32 to vector<16x64xf32>
    %11 = arith.maximumf %9, %10 : vector<16x64xf32>
    %c0_9 = arith.constant 0 : index
    %c0_10 = arith.constant 0 : index
    %c0_11 = arith.constant 0 : index
    %12 = vector.load %arg6[%c0_9, %c0_10, %c0_11] : memref<1x16x64xf32, #tpu.memory_space<vmem>>, vector<1x16x64xf32>
    %13 = vector.shape_cast %12 : vector<1x16x64xf32> to vector<16x64xf32>
    %14 = vector.shape_cast %11 : vector<16x64xf32> to vector<1x16x64xf32>
    tpu.vector_store %arg6[%c0_9, %c0_10, %c0_11], %14 {strides = array<i32>} : memref<1x16x64xf32, #tpu.memory_space<vmem>>, vector<1x16x64xf32>,
    return
  }
  func.func @transform_0(%arg0: i32, %arg1: i32) -> (i32, i32, i32) {
    %c0_i32 = arith.constant 0 : i32
    %c0_i32_0 = arith.constant 0 : i32
    return %arg0, %c0_i32, %arg1 : i32, i32, i32
  }
  func.func @transform_1(%arg0: i32, %arg1: i32) -> (i32, i32) {
    %c0_i32 = arith.constant 0 : i32
    %c0_i32_0 = arith.constant 0 : i32
    %c0_i32_1 = arith.constant 0 : i32
    return %c0_i32, %c0_i32_0 : i32, i32
  }
  func.func @transform_2(%arg0: i32, %arg1: i32) -> (i32, i32) {
    %c0_i32 = arith.constant 0 : i32
    %c0_i32_0 = arith.constant 0 : i32
    %c0_i32_1 = arith.constant 0 : i32
    return %c0_i32, %c0_i32_0 : i32, i32
  }
  func.func @transform_3(%arg0: i32, %arg1: i32) -> (i32, i32) {
    %c0_i32 = arith.constant 0 : i32
    %c0_i32_0 = arith.constant 0 : i32
    %c0_i32_1 = arith.constant 0 : i32
    return %c0_i32, %c0_i32_0 : i32, i32
  }
  func.func @transform_4(%arg0: i32, %arg1: i32) -> (i32, i32, i32) {
    %c0_i32 = arith.constant 0 : i32
    %c0_i32_0 = arith.constant 0 : i32
    return %arg0, %c0_i32, %arg1 : i32, i32, i32
  }
}

module attributes {stable_mosaic.version = 11 : i64} {
  func.func @_conv_bn_relu_kernel(%arg0: i32, %arg1: i32, %arg2: memref<1x576x64xbf16, #tpu.memory_space<vmem>>, %arg3: memref<32x576xbf16, #tpu.memory_space<vmem>>, %arg4: memref<32x1xf32, #tpu.memory_space<vmem>>, %arg5: memref<32x1xf32, #tpu.memory_space<vmem>>, %arg6: memref<1x32x64xf32, #tpu.memory_space<vmem>>) attributes {dimension_semantics = [#tpu.dimension_semantics<parallel>, #tpu.dimension_semantics<parallel>], iteration_bounds = array<i64: 2, 1>, scalar_prefetch = 0 : i64, scratch_operands = 0 : i64, tpu.core_type = #tpu.core_type<tc>, window_params = [{transform_indices = @transform_0, window_bounds = array<i64: 1, 576, 64>}, {pipeline_mode = #tpu.pipeline_mode<synchronous>, transform_indices = @transform_1, window_bounds = array<i64: 32, 576>}, {pipeline_mode = #tpu.pipeline_mode<synchronous>, transform_indices = @transform_2, window_bounds = array<i64: 32, 1>}, {pipeline_mode = #tpu.pipeline_mode<synchronous>, transform_indices = @transform_3, window_bounds = array<i64: 32, 1>}, {transform_indices = @transform_4, window_bounds = array<i64: 1, 32, 64>}]} {
    %c0 = arith.constant 0 : index
    %c0_0 = arith.constant 0 : index
    %0 = vector.load %arg3[%c0, %c0_0] : memref<32x576xbf16, #tpu.memory_space<vmem>>, vector<32x576xbf16>
    %c0_1 = arith.constant 0 : index
    %c0_2 = arith.constant 0 : index
    %c0_3 = arith.constant 0 : index
    %1 = vector.load %arg2[%c0_1, %c0_2, %c0_3] : memref<1x576x64xbf16, #tpu.memory_space<vmem>>, vector<1x576x64xbf16>
    %2 = vector.shape_cast %1 : vector<1x576x64xbf16> to vector<576x64xbf16>
    %cst = arith.constant dense<0.000000e+00> : vector<32x64xf32>
    %3 = tpu.matmul %0, %2, %cst {dimension_numbers = #tpu.dot_dimension_numbers<[1], [0], [0], [1], [0, 0, 1, 1], [], []>} : vector<32x576xbf16>, vector<576x64xbf16>, vector<32x64xf32> -> vector<32x64xf32>
    %c0_4 = arith.constant 0 : index
    %c0_5 = arith.constant 0 : index
    %4 = vector.load %arg4[%c0_4, %c0_5] : memref<32x1xf32, #tpu.memory_space<vmem>>, vector<32x1xf32>
    %5 = vector.broadcast %4 : vector<32x1xf32> to vector<32x64xf32>
    %6 = arith.mulf %3, %5 : vector<32x64xf32>
    %c0_6 = arith.constant 0 : index
    %c0_7 = arith.constant 0 : index
    %7 = vector.load %arg5[%c0_6, %c0_7] : memref<32x1xf32, #tpu.memory_space<vmem>>, vector<32x1xf32>
    %8 = vector.broadcast %7 : vector<32x1xf32> to vector<32x64xf32>
    %9 = arith.addf %6, %8 : vector<32x64xf32>
    %cst_8 = arith.constant 0.000000e+00 : f32
    %10 = vector.broadcast %cst_8 : f32 to vector<32x64xf32>
    %11 = arith.maximumf %9, %10 : vector<32x64xf32>
    %c0_9 = arith.constant 0 : index
    %c0_10 = arith.constant 0 : index
    %c0_11 = arith.constant 0 : index
    %12 = vector.load %arg6[%c0_9, %c0_10, %c0_11] : memref<1x32x64xf32, #tpu.memory_space<vmem>>, vector<1x32x64xf32>
    %13 = vector.shape_cast %12 : vector<1x32x64xf32> to vector<32x64xf32>
    %14 = vector.shape_cast %11 : vector<32x64xf32> to vector<1x32x64xf32>
    tpu.vector_store %arg6[%c0_9, %c0_10, %c0_11], %14 {strides = array<i32>} : memref<1x32x64xf32, #tpu.memory_space<vmem>>, vector<1x32x64xf32>,
    return
  }
  func.func @transform_0(%arg0: i32, %arg1: i32) -> (i32, i32, i32) {
    %c0_i32 = arith.constant 0 : i32
    %c0_i32_0 = arith.constant 0 : i32
    return %arg0, %c0_i32, %arg1 : i32, i32, i32
  }
  func.func @transform_1(%arg0: i32, %arg1: i32) -> (i32, i32) {
    %c0_i32 = arith.constant 0 : i32
    %c0_i32_0 = arith.constant 0 : i32
    %c0_i32_1 = arith.constant 0 : i32
    return %c0_i32, %c0_i32_0 : i32, i32
  }
  func.func @transform_2(%arg0: i32, %arg1: i32) -> (i32, i32) {
    %c0_i32 = arith.constant 0 : i32
    %c0_i32_0 = arith.constant 0 : i32
    %c0_i32_1 = arith.constant 0 : i32
    return %c0_i32, %c0_i32_0 : i32, i32
  }
  func.func @transform_3(%arg0: i32, %arg1: i32) -> (i32, i32) {
    %c0_i32 = arith.constant 0 : i32
    %c0_i32_0 = arith.constant 0 : i32
    %c0_i32_1 = arith.constant 0 : i32
    return %c0_i32, %c0_i32_0 : i32, i32
  }
  func.func @transform_4(%arg0: i32, %arg1: i32) -> (i32, i32, i32) {
    %c0_i32 = arith.constant 0 : i32
    %c0_i32_0 = arith.constant 0 : i32
    return %arg0, %c0_i32, %arg1 : i32, i32, i32
  }
}

module attributes {stable_mosaic.version = 11 : i64} {
  func.func @_conv_bn_relu_kernel(%arg0: i32, %arg1: i32, %arg2: memref<1x288x256xbf16, #tpu.memory_space<vmem>>, %arg3: memref<16x288xbf16, #tpu.memory_space<vmem>>, %arg4: memref<16x1xf32, #tpu.memory_space<vmem>>, %arg5: memref<16x1xf32, #tpu.memory_space<vmem>>, %arg6: memref<1x16x256xf32, #tpu.memory_space<vmem>>) attributes {dimension_semantics = [#tpu.dimension_semantics<parallel>, #tpu.dimension_semantics<parallel>], iteration_bounds = array<i64: 2, 1>, scalar_prefetch = 0 : i64, scratch_operands = 0 : i64, tpu.core_type = #tpu.core_type<tc>, window_params = [{transform_indices = @transform_0, window_bounds = array<i64: 1, 288, 256>}, {pipeline_mode = #tpu.pipeline_mode<synchronous>, transform_indices = @transform_1, window_bounds = array<i64: 16, 288>}, {pipeline_mode = #tpu.pipeline_mode<synchronous>, transform_indices = @transform_2, window_bounds = array<i64: 16, 1>}, {pipeline_mode = #tpu.pipeline_mode<synchronous>, transform_indices = @transform_3, window_bounds = array<i64: 16, 1>}, {transform_indices = @transform_4, window_bounds = array<i64: 1, 16, 256>}]} {
    %c0 = arith.constant 0 : index
    %c0_0 = arith.constant 0 : index
    %0 = vector.load %arg3[%c0, %c0_0] : memref<16x288xbf16, #tpu.memory_space<vmem>>, vector<16x288xbf16>
    %c0_1 = arith.constant 0 : index
    %c0_2 = arith.constant 0 : index
    %c0_3 = arith.constant 0 : index
    %1 = vector.load %arg2[%c0_1, %c0_2, %c0_3] : memref<1x288x256xbf16, #tpu.memory_space<vmem>>, vector<1x288x256xbf16>
    %2 = vector.shape_cast %1 : vector<1x288x256xbf16> to vector<288x256xbf16>
    %cst = arith.constant dense<0.000000e+00> : vector<16x256xf32>
    %3 = tpu.matmul %0, %2, %cst {dimension_numbers = #tpu.dot_dimension_numbers<[1], [0], [0], [1], [0, 0, 1, 1], [], []>} : vector<16x288xbf16>, vector<288x256xbf16>, vector<16x256xf32> -> vector<16x256xf32>
    %c0_4 = arith.constant 0 : index
    %c0_5 = arith.constant 0 : index
    %4 = vector.load %arg4[%c0_4, %c0_5] : memref<16x1xf32, #tpu.memory_space<vmem>>, vector<16x1xf32>
    %5 = vector.broadcast %4 : vector<16x1xf32> to vector<16x256xf32>
    %6 = arith.mulf %3, %5 : vector<16x256xf32>
    %c0_6 = arith.constant 0 : index
    %c0_7 = arith.constant 0 : index
    %7 = vector.load %arg5[%c0_6, %c0_7] : memref<16x1xf32, #tpu.memory_space<vmem>>, vector<16x1xf32>
    %8 = vector.broadcast %7 : vector<16x1xf32> to vector<16x256xf32>
    %9 = arith.addf %6, %8 : vector<16x256xf32>
    %cst_8 = arith.constant 0.000000e+00 : f32
    %10 = vector.broadcast %cst_8 : f32 to vector<16x256xf32>
    %11 = arith.maximumf %9, %10 : vector<16x256xf32>
    %c0_9 = arith.constant 0 : index
    %c0_10 = arith.constant 0 : index
    %c0_11 = arith.constant 0 : index
    %12 = vector.load %arg6[%c0_9, %c0_10, %c0_11] : memref<1x16x256xf32, #tpu.memory_space<vmem>>, vector<1x16x256xf32>
    %13 = vector.shape_cast %12 : vector<1x16x256xf32> to vector<16x256xf32>
    %14 = vector.shape_cast %11 : vector<16x256xf32> to vector<1x16x256xf32>
    tpu.vector_store %arg6[%c0_9, %c0_10, %c0_11], %14 {strides = array<i32>} : memref<1x16x256xf32, #tpu.memory_space<vmem>>, vector<1x16x256xf32>,
    return
  }
  func.func @transform_0(%arg0: i32, %arg1: i32) -> (i32, i32, i32) {
    %c0_i32 = arith.constant 0 : i32
    %c0_i32_0 = arith.constant 0 : i32
    return %arg0, %c0_i32, %arg1 : i32, i32, i32
  }
  func.func @transform_1(%arg0: i32, %arg1: i32) -> (i32, i32) {
    %c0_i32 = arith.constant 0 : i32
    %c0_i32_0 = arith.constant 0 : i32
    %c0_i32_1 = arith.constant 0 : i32
    return %c0_i32, %c0_i32_0 : i32, i32
  }
  func.func @transform_2(%arg0: i32, %arg1: i32) -> (i32, i32) {
    %c0_i32 = arith.constant 0 : i32
    %c0_i32_0 = arith.constant 0 : i32
    %c0_i32_1 = arith.constant 0 : i32
    return %c0_i32, %c0_i32_0 : i32, i32
  }
  func.func @transform_3(%arg0: i32, %arg1: i32) -> (i32, i32) {
    %c0_i32 = arith.constant 0 : i32
    %c0_i32_0 = arith.constant 0 : i32
    %c0_i32_1 = arith.constant 0 : i32
    return %c0_i32, %c0_i32_0 : i32, i32
  }
  func.func @transform_4(%arg0: i32, %arg1: i32) -> (i32, i32, i32) {
    %c0_i32 = arith.constant 0 : i32
    %c0_i32_0 = arith.constant 0 : i32
    return %arg0, %c0_i32, %arg1 : i32, i32, i32
  }
}

module attributes {stable_mosaic.version = 11 : i64} {
  func.func @_conv_bn_relu_kernel(%arg0: i32, %arg1: i32, %arg2: memref<1x144x256xbf16, #tpu.memory_space<vmem>>, %arg3: memref<8x144xbf16, #tpu.memory_space<vmem>>, %arg4: memref<8x1xf32, #tpu.memory_space<vmem>>, %arg5: memref<8x1xf32, #tpu.memory_space<vmem>>, %arg6: memref<1x8x256xf32, #tpu.memory_space<vmem>>) attributes {dimension_semantics = [#tpu.dimension_semantics<parallel>, #tpu.dimension_semantics<parallel>], iteration_bounds = array<i64: 2, 1>, scalar_prefetch = 0 : i64, scratch_operands = 0 : i64, tpu.core_type = #tpu.core_type<tc>, window_params = [{transform_indices = @transform_0, window_bounds = array<i64: 1, 144, 256>}, {pipeline_mode = #tpu.pipeline_mode<synchronous>, transform_indices = @transform_1, window_bounds = array<i64: 8, 144>}, {pipeline_mode = #tpu.pipeline_mode<synchronous>, transform_indices = @transform_2, window_bounds = array<i64: 8, 1>}, {pipeline_mode = #tpu.pipeline_mode<synchronous>, transform_indices = @transform_3, window_bounds = array<i64: 8, 1>}, {transform_indices = @transform_4, window_bounds = array<i64: 1, 8, 256>}]} {
    %c0 = arith.constant 0 : index
    %c0_0 = arith.constant 0 : index
    %0 = vector.load %arg3[%c0, %c0_0] : memref<8x144xbf16, #tpu.memory_space<vmem>>, vector<8x144xbf16>
    %c0_1 = arith.constant 0 : index
    %c0_2 = arith.constant 0 : index
    %c0_3 = arith.constant 0 : index
    %1 = vector.load %arg2[%c0_1, %c0_2, %c0_3] : memref<1x144x256xbf16, #tpu.memory_space<vmem>>, vector<1x144x256xbf16>
    %2 = vector.shape_cast %1 : vector<1x144x256xbf16> to vector<144x256xbf16>
    %cst = arith.constant dense<0.000000e+00> : vector<8x256xf32>
    %3 = tpu.matmul %0, %2, %cst {dimension_numbers = #tpu.dot_dimension_numbers<[1], [0], [0], [1], [0, 0, 1, 1], [], []>} : vector<8x144xbf16>, vector<144x256xbf16>, vector<8x256xf32> -> vector<8x256xf32>
    %c0_4 = arith.constant 0 : index
    %c0_5 = arith.constant 0 : index
    %4 = vector.load %arg4[%c0_4, %c0_5] : memref<8x1xf32, #tpu.memory_space<vmem>>, vector<8x1xf32>
    %5 = vector.broadcast %4 : vector<8x1xf32> to vector<8x256xf32>
    %6 = arith.mulf %3, %5 : vector<8x256xf32>
    %c0_6 = arith.constant 0 : index
    %c0_7 = arith.constant 0 : index
    %7 = vector.load %arg5[%c0_6, %c0_7] : memref<8x1xf32, #tpu.memory_space<vmem>>, vector<8x1xf32>
    %8 = vector.broadcast %7 : vector<8x1xf32> to vector<8x256xf32>
    %9 = arith.addf %6, %8 : vector<8x256xf32>
    %cst_8 = arith.constant 0.000000e+00 : f32
    %10 = vector.broadcast %cst_8 : f32 to vector<8x256xf32>
    %11 = arith.maximumf %9, %10 : vector<8x256xf32>
    %c0_9 = arith.constant 0 : index
    %c0_10 = arith.constant 0 : index
    %c0_11 = arith.constant 0 : index
    %12 = vector.load %arg6[%c0_9, %c0_10, %c0_11] : memref<1x8x256xf32, #tpu.memory_space<vmem>>, vector<1x8x256xf32>
    %13 = vector.shape_cast %12 : vector<1x8x256xf32> to vector<8x256xf32>
    %14 = vector.shape_cast %11 : vector<8x256xf32> to vector<1x8x256xf32>
    tpu.vector_store %arg6[%c0_9, %c0_10, %c0_11], %14 {strides = array<i32>} : memref<1x8x256xf32, #tpu.memory_space<vmem>>, vector<1x8x256xf32>,
    return
  }
  func.func @transform_0(%arg0: i32, %arg1: i32) -> (i32, i32, i32) {
    %c0_i32 = arith.constant 0 : i32
    %c0_i32_0 = arith.constant 0 : i32
    return %arg0, %c0_i32, %arg1 : i32, i32, i32
  }
  func.func @transform_1(%arg0: i32, %arg1: i32) -> (i32, i32) {
    %c0_i32 = arith.constant 0 : i32
    %c0_i32_0 = arith.constant 0 : i32
    %c0_i32_1 = arith.constant 0 : i32
    return %c0_i32, %c0_i32_0 : i32, i32
  }
  func.func @transform_2(%arg0: i32, %arg1: i32) -> (i32, i32) {
    %c0_i32 = arith.constant 0 : i32
    %c0_i32_0 = arith.constant 0 : i32
    %c0_i32_1 = arith.constant 0 : i32
    return %c0_i32, %c0_i32_0 : i32, i32
  }
  func.func @transform_3(%arg0: i32, %arg1: i32) -> (i32, i32) {
    %c0_i32 = arith.constant 0 : i32
    %c0_i32_0 = arith.constant 0 : i32
    %c0_i32_1 = arith.constant 0 : i32
    return %c0_i32, %c0_i32_0 : i32, i32
  }
  func.func @transform_4(%arg0: i32, %arg1: i32) -> (i32, i32, i32) {
    %c0_i32 = arith.constant 0 : i32
    %c0_i32_0 = arith.constant 0 : i32
    return %arg0, %c0_i32, %arg1 : i32, i32, i32
  }
}

module attributes {stable_mosaic.version = 11 : i64} {
  func.func @_conv_bn_relu_kernel(%arg0: i32, %arg1: i32, %arg2: memref<1x144x512xbf16, #tpu.memory_space<vmem>>, %arg3: memref<8x144xbf16, #tpu.memory_space<vmem>>, %arg4: memref<8x1xf32, #tpu.memory_space<vmem>>, %arg5: memref<8x1xf32, #tpu.memory_space<vmem>>, %arg6: memref<1x8x512xf32, #tpu.memory_space<vmem>>) attributes {dimension_semantics = [#tpu.dimension_semantics<parallel>, #tpu.dimension_semantics<parallel>], iteration_bounds = array<i64: 2, 2>, scalar_prefetch = 0 : i64, scratch_operands = 0 : i64, tpu.core_type = #tpu.core_type<tc>, window_params = [{transform_indices = @transform_0, window_bounds = array<i64: 1, 144, 512>}, {pipeline_mode = #tpu.pipeline_mode<synchronous>, transform_indices = @transform_1, window_bounds = array<i64: 8, 144>}, {pipeline_mode = #tpu.pipeline_mode<synchronous>, transform_indices = @transform_2, window_bounds = array<i64: 8, 1>}, {pipeline_mode = #tpu.pipeline_mode<synchronous>, transform_indices = @transform_3, window_bounds = array<i64: 8, 1>}, {transform_indices = @transform_4, window_bounds = array<i64: 1, 8, 512>}]} {
    %c0 = arith.constant 0 : index
    %c0_0 = arith.constant 0 : index
    %0 = vector.load %arg3[%c0, %c0_0] : memref<8x144xbf16, #tpu.memory_space<vmem>>, vector<8x144xbf16>
    %c0_1 = arith.constant 0 : index
    %c0_2 = arith.constant 0 : index
    %c0_3 = arith.constant 0 : index
    %1 = vector.load %arg2[%c0_1, %c0_2, %c0_3] : memref<1x144x512xbf16, #tpu.memory_space<vmem>>, vector<1x144x512xbf16>
    %2 = vector.shape_cast %1 : vector<1x144x512xbf16> to vector<144x512xbf16>
    %cst = arith.constant dense<0.000000e+00> : vector<8x512xf32>
    %3 = tpu.matmul %0, %2, %cst {dimension_numbers = #tpu.dot_dimension_numbers<[1], [0], [0], [1], [0, 0, 1, 1], [], []>} : vector<8x144xbf16>, vector<144x512xbf16>, vector<8x512xf32> -> vector<8x512xf32>
    %c0_4 = arith.constant 0 : index
    %c0_5 = arith.constant 0 : index
    %4 = vector.load %arg4[%c0_4, %c0_5] : memref<8x1xf32, #tpu.memory_space<vmem>>, vector<8x1xf32>
    %5 = vector.broadcast %4 : vector<8x1xf32> to vector<8x512xf32>
    %6 = arith.mulf %3, %5 : vector<8x512xf32>
    %c0_6 = arith.constant 0 : index
    %c0_7 = arith.constant 0 : index
    %7 = vector.load %arg5[%c0_6, %c0_7] : memref<8x1xf32, #tpu.memory_space<vmem>>, vector<8x1xf32>
    %8 = vector.broadcast %7 : vector<8x1xf32> to vector<8x512xf32>
    %9 = arith.addf %6, %8 : vector<8x512xf32>
    %cst_8 = arith.constant 0.000000e+00 : f32
    %10 = vector.broadcast %cst_8 : f32 to vector<8x512xf32>
    %11 = arith.maximumf %9, %10 : vector<8x512xf32>
    %c0_9 = arith.constant 0 : index
    %c0_10 = arith.constant 0 : index
    %c0_11 = arith.constant 0 : index
    %12 = vector.load %arg6[%c0_9, %c0_10, %c0_11] : memref<1x8x512xf32, #tpu.memory_space<vmem>>, vector<1x8x512xf32>
    %13 = vector.shape_cast %12 : vector<1x8x512xf32> to vector<8x512xf32>
    %14 = vector.shape_cast %11 : vector<8x512xf32> to vector<1x8x512xf32>
    tpu.vector_store %arg6[%c0_9, %c0_10, %c0_11], %14 {strides = array<i32>} : memref<1x8x512xf32, #tpu.memory_space<vmem>>, vector<1x8x512xf32>,
    return
  }
  func.func @transform_0(%arg0: i32, %arg1: i32) -> (i32, i32, i32) {
    %c0_i32 = arith.constant 0 : i32
    %c0_i32_0 = arith.constant 0 : i32
    return %arg0, %c0_i32, %arg1 : i32, i32, i32
  }
  func.func @transform_1(%arg0: i32, %arg1: i32) -> (i32, i32) {
    %c0_i32 = arith.constant 0 : i32
    %c0_i32_0 = arith.constant 0 : i32
    %c0_i32_1 = arith.constant 0 : i32
    return %c0_i32, %c0_i32_0 : i32, i32
  }
  func.func @transform_2(%arg0: i32, %arg1: i32) -> (i32, i32) {
    %c0_i32 = arith.constant 0 : i32
    %c0_i32_0 = arith.constant 0 : i32
    %c0_i32_1 = arith.constant 0 : i32
    return %c0_i32, %c0_i32_0 : i32, i32
  }
  func.func @transform_3(%arg0: i32, %arg1: i32) -> (i32, i32) {
    %c0_i32 = arith.constant 0 : i32
    %c0_i32_0 = arith.constant 0 : i32
    %c0_i32_1 = arith.constant 0 : i32
    return %c0_i32, %c0_i32_0 : i32, i32
  }
  func.func @transform_4(%arg0: i32, %arg1: i32) -> (i32, i32, i32) {
    %c0_i32 = arith.constant 0 : i32
    %c0_i32_0 = arith.constant 0 : i32
    return %arg0, %c0_i32, %arg1 : i32, i32, i32
  }
}

module attributes {stable_mosaic.version = 11 : i64} {
  func.func @_conv1x1_kernel(%arg0: i32, %arg1: i32, %arg2: memref<1x8x512xbf16, #tpu.memory_space<vmem>>, %arg3: memref<2x8xbf16, #tpu.memory_space<vmem>>, %arg4: memref<2x1xf32, #tpu.memory_space<vmem>>, %arg5: memref<1x2x512xf32, #tpu.memory_space<vmem>>) attributes {dimension_semantics = [#tpu.dimension_semantics<parallel>, #tpu.dimension_semantics<parallel>], iteration_bounds = array<i64: 2, 2>, scalar_prefetch = 0 : i64, scratch_operands = 0 : i64, tpu.core_type = #tpu.core_type<tc>, window_params = [{transform_indices = @transform_0, window_bounds = array<i64: 1, 8, 512>}, {pipeline_mode = #tpu.pipeline_mode<synchronous>, transform_indices = @transform_1, window_bounds = array<i64: 2, 8>}, {pipeline_mode = #tpu.pipeline_mode<synchronous>, transform_indices = @transform_2, window_bounds = array<i64: 2, 1>}, {transform_indices = @transform_3, window_bounds = array<i64: 1, 2, 512>}]} {
    %c0 = arith.constant 0 : index
    %c0_0 = arith.constant 0 : index
    %0 = vector.load %arg3[%c0, %c0_0] : memref<2x8xbf16, #tpu.memory_space<vmem>>, vector<2x8xbf16>
    %c0_1 = arith.constant 0 : index
    %c0_2 = arith.constant 0 : index
    %c0_3 = arith.constant 0 : index
    %1 = vector.load %arg2[%c0_1, %c0_2, %c0_3] : memref<1x8x512xbf16, #tpu.memory_space<vmem>>, vector<1x8x512xbf16>
    %2 = vector.shape_cast %1 : vector<1x8x512xbf16> to vector<8x512xbf16>
    %cst = arith.constant dense<0.000000e+00> : vector<2x512xf32>
    %3 = tpu.matmul %0, %2, %cst {dimension_numbers = #tpu.dot_dimension_numbers<[1], [0], [0], [1], [0, 0, 1, 1], [], []>} : vector<2x8xbf16>, vector<8x512xbf16>, vector<2x512xf32> -> vector<2x512xf32>
    %c0_4 = arith.constant 0 : index
    %c0_5 = arith.constant 0 : index
    %4 = vector.load %arg4[%c0_4, %c0_5] : memref<2x1xf32, #tpu.memory_space<vmem>>, vector<2x1xf32>
    %5 = vector.broadcast %4 : vector<2x1xf32> to vector<2x512xf32>
    %6 = arith.addf %3, %5 : vector<2x512xf32>
    %c0_6 = arith.constant 0 : index
    %c0_7 = arith.constant 0 : index
    %c0_8 = arith.constant 0 : index
    %7 = vector.load %arg5[%c0_6, %c0_7, %c0_8] : memref<1x2x512xf32, #tpu.memory_space<vmem>>, vector<1x2x512xf32>
    %8 = vector.shape_cast %7 : vector<1x2x512xf32> to vector<2x512xf32>
    %9 = vector.shape_cast %6 : vector<2x512xf32> to vector<1x2x512xf32>
    tpu.vector_store %arg5[%c0_6, %c0_7, %c0_8], %9 {strides = array<i32>} : memref<1x2x512xf32, #tpu.memory_space<vmem>>, vector<1x2x512xf32>,
    return
  }
  func.func @transform_0(%arg0: i32, %arg1: i32) -> (i32, i32, i32) {
    %c0_i32 = arith.constant 0 : i32
    %c0_i32_0 = arith.constant 0 : i32
    return %arg0, %c0_i32, %arg1 : i32, i32, i32
  }
  func.func @transform_1(%arg0: i32, %arg1: i32) -> (i32, i32) {
    %c0_i32 = arith.constant 0 : i32
    %c0_i32_0 = arith.constant 0 : i32
    %c0_i32_1 = arith.constant 0 : i32
    return %c0_i32, %c0_i32_0 : i32, i32
  }
  func.func @transform_2(%arg0: i32, %arg1: i32) -> (i32, i32) {
    %c0_i32 = arith.constant 0 : i32
    %c0_i32_0 = arith.constant 0 : i32
    %c0_i32_1 = arith.constant 0 : i32
    return %c0_i32, %c0_i32_0 : i32, i32
  }
  func.func @transform_3(%arg0: i32, %arg1: i32) -> (i32, i32, i32) {
    %c0_i32 = arith.constant 0 : i32
    %c0_i32_0 = arith.constant 0 : i32
    return %arg0, %c0_i32, %arg1 : i32, i32, i32
  }
}

</mosaic_0001>

<bundles_post_ra>
// kernel: unet_forward.19
= control target key start
LH: loop header
LB: loop body
LE: loop exit
PB: predicated region body
PF: predicated region fallthrough
CT: control target
= control target key end

     0   :  { %s708_s15 = smov 0   ;;  %s710_s16 = smov 0   ;;  %s807_s0 = inlined_call_operand.vmem [shape: bf16[2,27,1024], index: 0, kind: input, shape index: {}]   ;;  %s808_s1 = inlined_call_operand.vmem [shape: bf16[8,27], index: 1, kind: input, shape index: {}]   ;;  %s809_s2 = inlined_call_operand.vmem [shape: f32[8,1], index: 2, kind: input, shape index: {}]   ;;  %s810_s3 = inlined_call_operand.vmem [shape: f32[8,1], index: 3, kind: input, shape index: {}]   ;;  %s811_s4 = inlined_call_operand.vmem [shape: f32[2,8,1024], index: 4, kind: output, shape index: {}]  }
   0x1   :  { %s712_s17 = smov 0   ;;  %s714_s18 = smov 0  }
   0x2   :  { %s716_s19 = smov 0   ;;  %s718_s20 = smov 0  }
   0x3   :  { %s720_s21 = smov 0  }
   0x4 LB: > { %s23_s22 = sadd.s32 1, %s671_s19  ;;  %s26_s23 = sadd.s32 1, %s675_s20  ;;  %s679_s21 = sphi %s720_s21, %s14_s21   ;;  %s675_s20 = sphi %s718_s20, %s817_s20   ;;  %s671_s19 = sphi %s716_s19, %s816_s19   ;;  %s667_s18 = sphi %s714_s18, %s815_s18   ;;  %s663_s17 = sphi %s712_s17, %s814_s17   ;;  %s659_s16 = sphi %s710_s16, %s813_s16   ;;  %s655_s15 = sphi %s708_s15, %s812_s15  }
   0x5   : > { %p24_p0 = scmp.ge.s32.totalorder %s23_s22, 2  ;;  %p42_p1 = scmp.ne.s32.totalorder %s659_s16, %s655_s15 }
   0x6   : > { %p43_p2 = scmp.eq.s32.totalorder %s679_s21, 0  ;;  %s35_s27 = sadd.s32 1, %s659_s16 }
   0x7   : > { %s819_s22 = smov (%p24_p0, %s23_s22), 0  ;;  %s821_s23 = smov (!%p24_p0, %s26_s23), %s675_s20 }
   0x8   : > { %p44_p3 = por %p43_p2, %p42_p1  ;;  %p28_p4 = scmp.ge.s32.totalorder %s821_s23, 2 }
   0x9   : > { %s31_s24 = ssub.s32 %s671_s19, %s819_s22  ;;  %p532_p6 = scmp.ge.s32.totalorder %s679_s21, 4 }
   0xa   : > { %s823_s23 = smov (%p28_p4, %s821_s23), 0 }
   0xb   : > { %s30_s25 = ssub.s32 %s675_s20, %s823_s23  ;;  %168 = sbr.rel (%p532_p6) target bundleno = 29 (0x1d), region = 28 }
   0xc   : > { %s32_s26 = sor.u32 %s31_s24, %s30_s25 }
   0xd   : > { %p33_p5 = scmp.eq.s32.totalorder %s32_s26, 0 }
   0xf   : > { %s759_s28 = scalar_select %p33_p5, %s659_s16, %s35_s27  }
  0x12   : > { %171 = sbr.rel (!%p44_p3) target bundleno = 29 (0x1d), region = 32  ;;  %s173_s29 = sand.u32 (%p44_p3), 1, %s659_s16  }
  0x13   : > { %s534_s30 = sshll.u32 (%p44_p3), %s671_s19, 2  ;;  %s533_s5 = sshll.u32 (%p44_p3), %s173_s29, 6 }
  0x14   : > { %s535_s6 = sshll.u32 (%p44_p3), %s675_s20, 5  ;;  %s175_s12 = scalar_lea.vmem (%p44_p3), [#allocation2], %s533_s5 }
  0x15   : > { %s178_s7 = sadd.s32 (%p44_p3), %s535_s6, %s534_s30 }
  0x16   : > { %s536_s8 = sshll.u32 (%p44_p3), %s178_s7, 2 }
  0x17   : > { %s180_s11 = scalar_lea.vmem (%p44_p3), %s807_s0, %s536_s8 }
  0x18   : > { %v193_v0 = vld [vmem:[%s180_s11] sm:$0xff] (%p44_p3)  ;;  %v195_v1 = vld [vmem:[%s180_s11 + $0x8] sm:$0xff] (%p44_p3) }
  0x19   : > { %v197_v2 = vld [vmem:[%s180_s11 + $0x20] sm:$0xff]  ;;  %194 = vst [vmem:[%s175_s12] sm:$0xff] %v193_v0  ;;  %196 = vst [vmem:[%s175_s12 + $0x8] sm:$0xff] %v195_v1  ;;  %v199_v3 = vld [vmem:[%s180_s11 + $0x28] sm:$0xff] }
  0x1a   : > { %198 = vst [vmem:[%s175_s12 + $0x10] sm:$0xff] %v197_v2  ;;  %v201_v4 = vld [vmem:[%s180_s11 + $0x40] sm:$0xff]  ;;  %v203_v5 = vld [vmem:[%s180_s11 + $0x48] sm:$0xff]  ;;  %200 = vst [vmem:[%s175_s12 + $0x18] sm:$0xff] %v199_v3 }
  0x1b   : > { %202 = vst [vmem:[%s175_s12 + $0x20] sm:$0xff] %v201_v4  ;;  %204 = vst [vmem:[%s175_s12 + $0x28] sm:$0xff] %v203_v5  ;;  %v205_v6 = vld [vmem:[%s180_s11 + $0x60] sm:$0xff]  ;;  %v207_v7 = vld [vmem:[%s180_s11 + $0x68] sm:$0xff] }
  0x1c   : > { %206 = vst [vmem:[%s175_s12 + $0x30] sm:$0xff] %v205_v6  ;;  %208 = vst [vmem:[%s175_s12 + $0x38] sm:$0xff] %v207_v7 }
  0x1d PF: > { %p537_p7 = scmp.ge.s32.totalorder %s679_s21, 1  ;;  %p213_p8 = scmp.lt.s32.totalorder %s679_s21, 5 }
  0x1f   : > { %p214_p9 = pnand %p537_p7, %p213_p8 }
  0x20   : > { %s220_s13 = sand.u32 (!%p214_p9), 1, %s655_s15   ;;  %vm310_vm0 = vcmask (!%p214_p9), 1044480   ;;  %v408_v8 = vld [vmem:[%s809_s2] sm:$0xff] (!%p214_p9)  ;;  %v681_v9 = vmov (!%p214_p9), 0   ;;  %vm311_vm1 = vcmask (!%p214_p9), 1045504   ;;  %v682_v10 = vmov (!%p214_p9), 65535  }
  0x21   : > { %217 = sbr.rel (%p214_p9) target bundleno = 264 (0x108), region = 55  ;;  %s538_s25 = sshll.u32 (!%p214_p9), %s220_s13, 6  ;;  %358 = vmatprep.mubr.bf16.mxu0 (!%p214_p9), %v681_v9  ;;  %399 = vmatprep.mubr.bf16.mxu1 (!%p214_p9), %v681_v9  ;;  %v312_v11 = vsel (!%p214_p9), %vm310_vm0, 4294967295, %v682_v10  ;;  %v418_v13 = vld [vmem:[%s810_s3] sm:$0xff] (!%p214_p9)  ;;  %vm306_vm2 = vcmask (!%p214_p9), 220160  }
  0x22   : > { %612 = vset.pattern.permute.xlu0 (!%p214_p9), %v681_v9  ;;  %s222_s26 = scalar_lea.vmem (!%p214_p9), [#allocation2], %s538_s25  ;;  %v313_v17 = vsel (!%p214_p9), %vm311_vm1, %v312_v11, 0  ;;  %v261_v26 = vld [vmem:[%s808_s1] sm:$0xf] (!%p214_p9)  ;;  %s539_s5 = sshll.u32 (!%p214_p9), %s663_s17, 2 }
  0x23   : > { %v613_v12 = vld [vmem:[%s222_s26 + $0x4] ss:$16 sps:$4 sm:$0xff] (!%p214_p9)   ;;  %411 = vperm.xlu0 (!%p214_p9), %612, %v408_v8   ;;  %v615_v14 = vld [vmem:[%s222_s26 + $0xc] ss:$16 sps:$4 sm:$0xff] (!%p214_p9)   ;;  %v617_v15 = vld [vmem:[%s222_s26] ss:$16 sps:$4 sm:$0xff] (!%p214_p9)  }
  0x24   : > { %326 = vmatprep.subr.bf16.mxu0 (!%p214_p9), %v613_v12  ;;  %v618_v16 = vld [vmem:[%s222_s26 + $0x8] ss:$16 sps:$4 sm:$0xff] (!%p214_p9)   ;;  %367 = vmatprep.subr.bf16.mxu1 (!%p214_p9), %v615_v14  ;;  %v619_v18 = vld [vmem:[%s222_s26 + $0x24] ss:$16 sps:$4 sm:$0x3f] (!%p214_p9)   ;;  %p251_p10 = scmp.lt.s32.totalorder (!%p214_p9), %s667_s18, 1 }
  0x25   : > { %327 = vmatpush1.bf16.msra.mxu0 (!%p214_p9), %v617_v15  ;;  %368 = vmatpush1.bf16.msra.mxu1 (!%p214_p9), %v618_v16  ;;  %v621_v19 = vld [vmem:[%s222_s26 + $0x2c] ss:$16 sps:$4 sm:$0x3f] (!%p214_p9)   ;;  %v318_v20 = vand.u32 (!%p214_p9), %v619_v18, %v313_v17  ;;  %v623_v21 = vld [vmem:[%s222_s26 + $0x20] ss:$16 sps:$4 sm:$0x3f] (!%p214_p9)  }
  0x26   : > { %v624_v22 = vld [vmem:[%s222_s26 + $0x28] ss:$16 sps:$4 sm:$0x3f] (!%p214_p9)   ;;  %v324_v23 = vand.u32 (!%p214_p9), %v621_v19, %v313_v17  ;;  %v315_v24 = vand.u32 (!%p214_p9), %v623_v21, %v313_v17  ;;  %p253_p11 = scmp.lt.s32.totalorder (!%p214_p9), %s539_s5, 7 }
  0x27   : > { %421 = vperm.xlu0 (!%p214_p9), %612, %v418_v13   ;;  %328 = vmatprep.subr.bf16.mxu0 (!%p214_p9), %v318_v20  ;;  %v321_v25 = vand.u32 (!%p214_p9), %v624_v22, %v313_v17 }
  0x28   : > { %369 = vmatprep.subr.bf16.mxu1 %v324_v23  ;;  %s825_s18 = smov (!%p251_p10, %s667_s18), 1  ;;  %s827_s5 = smov (!%p253_p11, %s539_s5), 7 }
  0x29   : > { %329 = vmatpush1.bf16.msra.mxu0 %v315_v24  ;;  %370 = vmatpush1.bf16.msra.mxu1 %v321_v25  ;;  %s540_s6 = sshll.u32 %s825_s18, 3 }
  0x2a   : > { %s256_s7 = sadd.s32 %s540_s6, %s827_s5 }
  0x2b   : > { %s541_s8 = sshll.u32 %s256_s7, 3 }
  0x2c   : > { %550 = vmatmul.mubr.msk.bf16.vlgmr.msra.gmra.mrb[0].mxu0 %vm306_vm2, %v261_v26  ;;  %551 = vmatmul.mubr.msk.bf16.vlgmr.msra.gmra.mrb[0].mxu1 %vm306_vm2, %v261_v26  ;;  %s258_s18 = scalar_lea.vmem %s811_s4, %s541_s8 }
  0xa2   : > { %v412_v27 = vpop.permute.xlu0 %411 }
  0xa6   : > { %v422_v28 = vpop.permute.xlu0 %421 }
  0xff   : > { %v360_v29 = vpop.f32.mrb[0].mxu0  ;;  %v401_v30 = vpop.f32.mrb[0].mxu1 }
 0x100   : > { %v414_v31 = vmul.f32 %v412_v27, %v360_v29  ;;  %v416_v32 = vmul.f32 %v412_v27, %v401_v30  ;;  %v362_v33 = vpop.f32.mrb[1].mxu0  ;;  %v403_v34 = vpop.f32.mrb[1].mxu1 }
 0x101   : > { %v415_v35 = vmul.f32 %v412_v27, %v362_v33  ;;  %v417_v36 = vmul.f32 %v412_v27, %v403_v34  ;;  %v364_v37 = vpop.f32.mrb[2].mxu0  ;;  %v405_v38 = vpop.f32.mrb[2].mxu1 }
 0x102   : > { %v424_v39 = vadd.f32 %v422_v28, %v414_v31  ;;  %v426_v40 = vadd.f32 %v422_v28, %v416_v32  ;;  %v365_v41 = vpop.f32.mrb[3].mxu0  ;;  %v406_v42 = vpop.f32.mrb[3].mxu1 }
 0x103   : > { %v425_v43 = vadd.f32 %v422_v28, %v415_v35  ;;  %v427_v44 = vadd.f32 %v422_v28, %v417_v36 }
 0x104   : > { %v428_v45 = vmax.f32 %v424_v39, 0.0  ;;  %v430_v46 = vmax.f32 %v426_v40, 0.0 }
 0x105   : > { %v429_v47 = vmax.f32 %v425_v43, 0.0  ;;  %v431_v48 = vmax.f32 %v427_v44, 0.0 }
 0x106   : > { %432 = vst [vmem:[%s258_s18] sm:$0xff] %v428_v45  ;;  %434 = vst [vmem:[%s258_s18 + $0x10] sm:$0xff] %v430_v46 }
 0x107   : > { %433 = vst [vmem:[%s258_s18 + $0x8] sm:$0xff] %v429_v47  ;;  %435 = vst [vmem:[%s258_s18 + $0x18] sm:$0xff] %v431_v48 }
 0x108 PF: > { %s14_s21 = sadd.s32 1, %s679_s21   ;;  %s812_s15 = smov %s659_s16 }
 0x109   : > { %p11_p12 = scmp.ge.s32.totalorder %s14_s21, 6   ;;  %s813_s16 = smov %s759_s28 }
 0x10a   : > { %s814_s17 = smov %s671_s19  ;;  %s815_s18 = smov %s675_s20 }
 0x10b   : > { %s816_s19 = smov %s819_s22  ;;  %s817_s20 = smov %s823_s23 }
 0x10c   :  { %13 = sbr.rel (!%p11_p12) target bundleno = 4 (0x4), region = 94 }

// kernel: unet_forward.20
= control target key start
LH: loop header
LB: loop body
LE: loop exit
PB: predicated region body
PF: predicated region fallthrough
CT: control target
= control target key end

     0   :  { %s817_s15 = smov 0   ;;  %s819_s16 = smov 0   ;;  %s976_s0 = inlined_call_operand.vmem [shape: bf16[2,72,1024], index: 0, kind: input, shape index: {}]   ;;  %s977_s1 = inlined_call_operand.vmem [shape: bf16[8,72], index: 1, kind: input, shape index: {}]   ;;  %s978_s2 = inlined_call_operand.vmem [shape: f32[8,1], index: 2, kind: input, shape index: {}]   ;;  %s979_s3 = inlined_call_operand.vmem [shape: f32[8,1], index: 3, kind: input, shape index: {}]   ;;  %s980_s4 = inlined_call_operand.vmem [shape: f32[2,8,1024], index: 4, kind: output, shape index: {}]  }
   0x1   :  { %s821_s17 = smov 0   ;;  %s823_s18 = smov 0  }
   0x2   :  { %s825_s19 = smov 0   ;;  %s827_s20 = smov 0  }
   0x3   :  { %s829_s21 = smov 0  }
   0x4 LB: > { %s23_s22 = sadd.s32 1, %s781_s19  ;;  %s26_s23 = sadd.s32 1, %s785_s20  ;;  %s789_s21 = sphi %s829_s21, %s14_s21   ;;  %s785_s20 = sphi %s827_s20, %s986_s20   ;;  %s781_s19 = sphi %s825_s19, %s985_s19   ;;  %s777_s18 = sphi %s823_s18, %s984_s18   ;;  %s773_s17 = sphi %s821_s17, %s983_s17   ;;  %s769_s16 = sphi %s819_s16, %s982_s16   ;;  %s765_s15 = sphi %s817_s15, %s981_s15  }
   0x5   : > { %p24_p0 = scmp.ge.s32.totalorder %s23_s22, 2  ;;  %p42_p1 = scmp.ne.s32.totalorder %s769_s16, %s765_s15 }
   0x6   : > { %p43_p2 = scmp.eq.s32.totalorder %s789_s21, 0  ;;  %s35_s27 = sadd.s32 1, %s769_s16 }
   0x7   : > { %s988_s22 = smov (%p24_p0, %s23_s22), 0  ;;  %s990_s23 = smov (!%p24_p0, %s26_s23), %s785_s20 }
   0x8   : > { %p44_p3 = por %p43_p2, %p42_p1  ;;  %p28_p4 = scmp.ge.s32.totalorder %s990_s23, 2 }
   0x9   : > { %s31_s24 = ssub.s32 %s781_s19, %s988_s22  ;;  %p613_p6 = scmp.ge.s32.totalorder %s789_s21, 4 }
   0xa   : > { %s992_s23 = smov (%p28_p4, %s990_s23), 0 }
   0xb   : > { %s30_s25 = ssub.s32 %s785_s20, %s992_s23  ;;  %168 = sbr.rel (%p613_p6) target bundleno = 35 (0x23), region = 28 }
   0xc   : > { %s32_s26 = sor.u32 %s31_s24, %s30_s25 }
   0xd   : > { %p33_p5 = scmp.eq.s32.totalorder %s32_s26, 0 }
   0xf   : > { %s868_s28 = scalar_select %p33_p5, %s769_s16, %s35_s27  }
  0x12   : > { %171 = sbr.rel (!%p44_p3) target bundleno = 35 (0x23), region = 32  ;;  %s173_s29 = sand.u32 (%p44_p3), 1, %s769_s16  }
  0x13   : > { %s646_s30 = smul.u32 (%p44_p3), 144, %s173_s29  ;;  %s614_s5 = sshll.u32 (%p44_p3), %s781_s19, 2 }
  0x14   : > { %s647_s6 = smul.u32 (%p44_p3), 72, %s785_s20 }
  0x15   : > { %s882_s12 = scalar_lea.vmem (%p44_p3), [#allocation2], %s646_s30 }
  0x16   : > { %s178_s7 = sadd.s32 (%p44_p3), %s647_s6, %s614_s5 }
  0x17   : > { %s615_s8 = sshll.u32 (%p44_p3), %s178_s7, 2 }
  0x18   : > { %s877_s11 = scalar_lea.vmem (%p44_p3), %s976_s0, %s615_s8 }
  0x19   : > { %v193_v0 = vld [vmem:[%s877_s11] sm:$0xff]  ;;  %v195_v1 = vld [vmem:[%s877_s11 + $0x8] sm:$0xff] }
  0x1a   : > { %v197_v2 = vld [vmem:[%s877_s11 + $0x20] sm:$0xff]  ;;  %194 = vst [vmem:[%s882_s12] sm:$0xff] %v193_v0  ;;  %196 = vst [vmem:[%s882_s12 + $0x8] sm:$0xff] %v195_v1  ;;  %v199_v3 = vld [vmem:[%s877_s11 + $0x28] sm:$0xff] }
  0x1b   : > { %198 = vst [vmem:[%s882_s12 + $0x10] sm:$0xff] %v197_v2  ;;  %v201_v4 = vld [vmem:[%s877_s11 + $0x40] sm:$0xff]  ;;  %v203_v5 = vld [vmem:[%s877_s11 + $0x48] sm:$0xff]  ;;  %200 = vst [vmem:[%s882_s12 + $0x18] sm:$0xff] %v199_v3 }
  0x1c   : > { %202 = vst [vmem:[%s882_s12 + $0x20] sm:$0xff] %v201_v4  ;;  %204 = vst [vmem:[%s882_s12 + $0x28] sm:$0xff] %v203_v5  ;;  %v205_v6 = vld [vmem:[%s877_s11 + $0x60] sm:$0xff]  ;;  %v207_v7 = vld [vmem:[%s877_s11 + $0x68] sm:$0xff] }
  0x1d   : > { %v209_v8 = vld [vmem:[%s877_s11 + $0x80] sm:$0xff]  ;;  %206 = vst [vmem:[%s882_s12 + $0x30] sm:$0xff] %v205_v6  ;;  %208 = vst [vmem:[%s882_s12 + $0x38] sm:$0xff] %v207_v7  ;;  %v211_v9 = vld [vmem:[%s877_s11 + $0x88] sm:$0xff] }
  0x1e   : > { %210 = vst [vmem:[%s882_s12 + $0x40] sm:$0xff] %v209_v8  ;;  %v213_v10 = vld [vmem:[%s877_s11 + $0xa0] sm:$0xff]  ;;  %v215_v11 = vld [vmem:[%s877_s11 + $0xa8] sm:$0xff]  ;;  %212 = vst [vmem:[%s882_s12 + $0x48] sm:$0xff] %v211_v9 }
  0x1f   : > { %214 = vst [vmem:[%s882_s12 + $0x50] sm:$0xff] %v213_v10  ;;  %216 = vst [vmem:[%s882_s12 + $0x58] sm:$0xff] %v215_v11  ;;  %v217_v12 = vld [vmem:[%s877_s11 + $0xc0] sm:$0xff]  ;;  %v219_v13 = vld [vmem:[%s877_s11 + $0xc8] sm:$0xff] }
  0x20   : > { %v221_v14 = vld [vmem:[%s877_s11 + $0xe0] sm:$0xff]  ;;  %218 = vst [vmem:[%s882_s12 + $0x60] sm:$0xff] %v217_v12  ;;  %220 = vst [vmem:[%s882_s12 + $0x68] sm:$0xff] %v219_v13  ;;  %v223_v15 = vld [vmem:[%s877_s11 + $0xe8] sm:$0xff] }
  0x21   : > { %222 = vst [vmem:[%s882_s12 + $0x70] sm:$0xff] %v221_v14  ;;  %v225_v16 = vld [vmem:[%s877_s11 + $0x100] sm:$0xff]  ;;  %v227_v17 = vld [vmem:[%s877_s11 + $0x108] sm:$0xff]  ;;  %224 = vst [vmem:[%s882_s12 + $0x78] sm:$0xff] %v223_v15 }
  0x22   : > { %226 = vst [vmem:[%s882_s12 + $0x80] sm:$0xff] %v225_v16  ;;  %228 = vst [vmem:[%s882_s12 + $0x88] sm:$0xff] %v227_v17 }
  0x23 PF: > { %p616_p7 = scmp.ge.s32.totalorder %s789_s21, 1  ;;  %p233_p8 = scmp.lt.s32.totalorder %s789_s21, 5 }
  0x25   : > { %p234_p9 = pnand %p616_p7, %p233_p8 }
  0x26   : > { %s240_s13 = sand.u32 (!%p234_p9), 1, %s765_s15   ;;  %v791_v18 = vmov (!%p234_p9), 0   ;;  %v489_v19 = vld [vmem:[%s978_s2] sm:$0xff] (!%p234_p9)  ;;  %vm394_vm0 = vcmask (!%p234_p9), 1043456   ;;  %vm390_vm1 = vcmask (!%p234_p9), 588800   ;;  %s617_s5 = sshll.u32 (!%p234_p9), %s773_s17, 2 }
  0x27   : > { %237 = sbr.rel (%p234_p9) target bundleno = 285 (0x11d), region = 55  ;;  %439 = vmatprep.mubr.bf16.mxu0 (!%p234_p9), %v791_v18  ;;  %480 = vmatprep.mubr.bf16.mxu1 (!%p234_p9), %v791_v18  ;;  %v499_v20 = vld [vmem:[%s979_s3] sm:$0xff] (!%p234_p9)  ;;  %p271_p10 = scmp.lt.s32.totalorder (!%p234_p9), %s777_s18, 1 }
  0x28   : > { %s648_s14 = smul.u32 (!%p234_p9), 144, %s240_s13  ;;  %706 = vset.pattern.permute.xlu0 (!%p234_p9), %v791_v18  ;;  %v281_v45 = vld [vmem:[%s977_s1] sm:$0xf] (!%p234_p9)  ;;  %p273_p11 = scmp.lt.s32.totalorder (!%p234_p9), %s617_s5, 7 }
  0x29   : > { %492 = vperm.xlu0 (!%p234_p9), %706, %v489_v19  }
  0x2a   : > { %s926_s29 = scalar_lea.vmem (!%p234_p9), [#allocation2], %s648_s14 }
  0x2b   : > { %v707_v21 = vld [vmem:[%s926_s29 + $0x4] ss:$16 sps:$4 sm:$0xff] (!%p234_p9)   ;;  %v709_v22 = vld [vmem:[%s926_s29 + $0xc] ss:$16 sps:$4 sm:$0xff] (!%p234_p9)   ;;  %v711_v23 = vld [vmem:[%s926_s29] ss:$16 sps:$4 sm:$0xff] (!%p234_p9)  }
  0x2c   : > { %407 = vmatprep.subr.bf16.mxu0 (!%p234_p9), %v707_v21  ;;  %v712_v24 = vld [vmem:[%s926_s29 + $0x8] ss:$16 sps:$4 sm:$0xff] (!%p234_p9)   ;;  %448 = vmatprep.subr.bf16.mxu1 (!%p234_p9), %v709_v22  ;;  %v713_v25 = vld [vmem:[%s926_s29 + $0x24] ss:$16 sps:$4 sm:$0xff] (!%p234_p9)   ;;  %v715_v26 = vld [vmem:[%s926_s29 + $0x2c] ss:$16 sps:$4 sm:$0xff] (!%p234_p9)  }
  0x2d   : > { %502 = vperm.xlu0 (!%p234_p9), %706, %v499_v20   ;;  %408 = vmatpush1.bf16.msra.mxu0 (!%p234_p9), %v711_v23  ;;  %v717_v27 = vld [vmem:[%s926_s29 + $0x20] ss:$16 sps:$4 sm:$0xff] (!%p234_p9)   ;;  %v718_v28 = vld [vmem:[%s926_s29 + $0x28] ss:$16 sps:$4 sm:$0xff] (!%p234_p9)   ;;  %v719_v29 = vld [vmem:[%s926_s29 + $0x44] ss:$16 sps:$4 sm:$0xff] (!%p234_p9)  }
  0x2e   : > { %449 = vmatpush1.bf16.msra.mxu1 %v712_v24  ;;  %409 = vmatprep.subr.bf16.mxu0 %v713_v25  ;;  %v721_v30 = vld [vmem:[%s926_s29 + $0x4c] ss:$16 sps:$4 sm:$0xff]   ;;  %v723_v31 = vld [vmem:[%s926_s29 + $0x40] ss:$16 sps:$4 sm:$0xff]   ;;  %v724_v32 = vld [vmem:[%s926_s29 + $0x48] ss:$16 sps:$4 sm:$0xff]  }
  0x2f   : > { %450 = vmatprep.subr.bf16.mxu1 %v715_v26  ;;  %v725_v33 = vld [vmem:[%s926_s29 + $0x64] ss:$16 sps:$4 sm:$0xff]   ;;  %v727_v34 = vld [vmem:[%s926_s29 + $0x6c] ss:$16 sps:$4 sm:$0xff]   ;;  %v729_v37 = vld [vmem:[%s926_s29 + $0x60] ss:$16 sps:$4 sm:$0xff]  }
  0x30   : > { %v298_v35 = vld [vmem:[%s926_s29 + $0x80] sm:$0xff]  ;;  %v299_v36 = vld [vmem:[%s926_s29 + $0x88] sm:$0xff]  ;;  %s994_s18 = smov (!%p271_p10, %s777_s18), 1  ;;  %s996_s5 = smov (!%p273_p11, %s617_s5), 7 }
  0x31   : > { %410 = vmatpush1.bf16.msra.mxu0 %v717_v27  ;;  %v730_v38 = vld [vmem:[%s926_s29 + $0x68] ss:$16 sps:$4 sm:$0xff]   ;;  %v637_v39 = vcombine.high %v298_v35, %v298_v35  ;;  %v639_v40 = vcombine.high %v299_v36, %v299_v36  ;;  %v636_v41 = vcombine.low %v298_v35, %v298_v35  ;;  %v638_v42 = vcombine.low %v299_v36, %v299_v36  ;;  %s618_s6 = sshll.u32 %s994_s18, 3 }
  0x32   : > { %451 = vmatpush1.bf16.msra.mxu1 %v718_v28  ;;  %411 = vmatprep.subr.bf16.mxu0 %v719_v29  ;;  %s276_s7 = sadd.s32 %s618_s6, %s996_s5 }
  0x33   : > { %452 = vmatprep.subr.bf16.mxu1 %v721_v30  ;;  %v396_v43 = vsel %vm394_vm0, %v636_v41, 0  ;;  %v402_v44 = vsel %vm394_vm0, %v638_v42, 0  ;;  %s619_s8 = sshll.u32 %s276_s7, 3 }
  0x34   : > { %s278_s18 = scalar_lea.vmem %s980_s4, %s619_s8 }
  0x35   : > { %412 = vmatpush1.bf16.msra.mxu0 %v723_v31 }
  0x36   : > { %453 = vmatpush1.bf16.msra.mxu1 %v724_v32  ;;  %413 = vmatprep.subr.bf16.mxu0 %v725_v33 }
  0x37   : > { %454 = vmatprep.subr.bf16.mxu1 %v727_v34 }
  0x39   : > { %414 = vmatpush1.bf16.msra.mxu0 %v729_v37 }
  0x3a   : > { %455 = vmatpush1.bf16.msra.mxu1 %v730_v38  ;;  %640 = vmatprep.subr.msk.bf16.mxu0 %vm394_vm0, %v637_v39 }
  0x3b   : > { %642 = vmatprep.subr.msk.bf16.mxu1 %vm394_vm0, %v639_v40 }
  0x3d   : > { %416 = vmatpush1.bf16.msra.mxu0 %v396_v43 }
  0x3e   : > { %457 = vmatpush1.bf16.msra.mxu1 %v402_v44 }
  0x40   : > { %641 = vmatmul.mubr.msk.bf16.vlgmr.msra.gmra.mrb[0].mxu0 %vm390_vm1, %v281_v45 }
  0x41   : > { %643 = vmatmul.mubr.msk.bf16.vlgmr.msra.gmra.mrb[0].mxu1 %vm390_vm1, %v281_v45 }
  0xa8   : > { %v493_v46 = vpop.permute.xlu0 %492 }
  0xac   : > { %v503_v47 = vpop.permute.xlu0 %502 }
 0x113   : > { %v441_v48 = vpop.f32.mrb[0].mxu0 }
 0x114   : > { %v482_v49 = vpop.f32.mrb[0].mxu1  ;;  %v495_v50 = vmul.f32 %v493_v46, %v441_v48  ;;  %v443_v52 = vpop.f32.mrb[1].mxu0 }
 0x115   : > { %v497_v51 = vmul.f32 %v493_v46, %v482_v49  ;;  %v484_v53 = vpop.f32.mrb[1].mxu1  ;;  %v496_v54 = vmul.f32 %v493_v46, %v443_v52  ;;  %v445_v56 = vpop.f32.mrb[2].mxu0 }
 0x116   : > { %v498_v55 = vmul.f32 %v493_v46, %v484_v53  ;;  %v486_v57 = vpop.f32.mrb[2].mxu1  ;;  %v505_v58 = vadd.f32 %v503_v47, %v495_v50  ;;  %v446_v60 = vpop.f32.mrb[3].mxu0 }
 0x117   : > { %v507_v59 = vadd.f32 %v503_v47, %v497_v51  ;;  %v487_v61 = vpop.f32.mrb[3].mxu1  ;;  %v506_v62 = vadd.f32 %v503_v47, %v496_v54 }
 0x118   : > { %v508_v63 = vadd.f32 %v503_v47, %v498_v55  ;;  %v509_v0 = vmax.f32 %v505_v58, 0.0 }
 0x119   : > { %v511_v1 = vmax.f32 %v507_v59, 0.0  ;;  %v510_v2 = vmax.f32 %v506_v62, 0.0 }
 0x11a   : > { %v512_v3 = vmax.f32 %v508_v63, 0.0  ;;  %513 = vst [vmem:[%s278_s18] sm:$0xff] %v509_v0 }
 0x11b   : > { %515 = vst [vmem:[%s278_s18 + $0x10] sm:$0xff] %v511_v1  ;;  %514 = vst [vmem:[%s278_s18 + $0x8] sm:$0xff] %v510_v2 }
 0x11c   : > { %516 = vst [vmem:[%s278_s18 + $0x18] sm:$0xff] %v512_v3 }
 0x11d PF: > { %s14_s21 = sadd.s32 1, %s789_s21   ;;  %s981_s15 = smov %s769_s16 }
 0x11e   : > { %p11_p12 = scmp.ge.s32.totalorder %s14_s21, 6   ;;  %s982_s16 = smov %s868_s28 }
 0x11f   : > { %s983_s17 = smov %s781_s19  ;;  %s984_s18 = smov %s785_s20 }
 0x120   : > { %s985_s19 = smov %s988_s22  ;;  %s986_s20 = smov %s992_s23 }
 0x121   :  { %13 = sbr.rel (!%p11_p12) target bundleno = 4 (0x4), region = 94 }

// kernel: unet_forward.21
= control target key start
LH: loop header
LB: loop body
LE: loop exit
PB: predicated region body
PF: predicated region fallthrough
CT: control target
= control target key end

     0   :  { %s597_s15 = smov 0   ;;  %s599_s16 = smov 0   ;;  %s649_s0 = inlined_call_operand.vmem [shape: bf16[2,72,256], index: 0, kind: input, shape index: {}]   ;;  %s650_s1 = inlined_call_operand.vmem [shape: bf16[16,72], index: 1, kind: input, shape index: {}]   ;;  %s651_s2 = inlined_call_operand.vmem [shape: f32[16,1], index: 2, kind: input, shape index: {}]   ;;  %s652_s3 = inlined_call_operand.vmem [shape: f32[16,1], index: 3, kind: input, shape index: {}]   ;;  %s653_s4 = inlined_call_operand.vmem [shape: f32[2,16,256], index: 4, kind: output, shape index: {}]  }
   0x1   :  { %s601_s17 = smov 0  }
   0x2 LB: > { %s26_s18 = sadd.s32 1, %s565_s16  ;;  %p484_p0 = scmp.ge.s32.totalorder %s569_s17, 1  ;;  %s569_s17 = sphi %s601_s17, %s14_s17   ;;  %s565_s16 = sphi %s599_s16, %s655_s16   ;;  %s561_s15 = sphi %s597_s15, %s654_s15  }
   0x3   : > { %p28_p1 = scmp.ge.s32.totalorder %s26_s18, 2  ;;  %p183_p2 = scmp.lt.s32.totalorder %s569_s17, 3 }
   0x5   : > { %s657_s18 = smov (%p28_p1, %s26_s18), 0  ;;  %p184_p3 = pnand %p484_p0, %p183_p2 }
   0x6   : > { %p218_p4 = scmp.lt.s32.totalorder (!%p184_p3), %s561_s15, 1  ;;  %v571_v0 = vmov (!%p184_p3), 0   ;;  %v353_v1 = vld [vmem:[%s651_s2] sm:$0xff] (!%p184_p3)  ;;  %v354_v3 = vld [vmem:[%s651_s2 + $0x8] sm:$0xff] (!%p184_p3)  ;;  %vm303_vm0 = vcmask (!%p184_p3), 1043456   ;;  %vm299_vm1 = vcmask (!%p184_p3), 588800  }
   0x7   : > { %187 = sbr.rel (%p184_p3) target bundleno = 261 (0x105), region = 36  ;;  %342 = vmatprep.mubr.bf16.mxu0 (!%p184_p3), %v571_v0  ;;  %530 = vset.pattern.permute.xlu0 (!%p184_p3), %v571_v0  ;;  %v369_v2 = vld [vmem:[%s652_s3] sm:$0xff] (!%p184_p3)  ;;  %v370_v4 = vld [vmem:[%s652_s3 + $0x8] sm:$0xff] (!%p184_p3) }
   0x8   : > { %357 = vperm.xlu0 (!%p184_p3), %530, %v353_v1   ;;  %531 = vset.pattern.permute.xlu1 (!%p184_p3), %v571_v0  ;;  %v546_v17 = vld [vmem:[%s650_s1] sm:$0xff] (!%p184_p3)  }
   0x9   : > { %373 = vperm.xlu1 (!%p184_p3), %531, %v369_v2  }
   0xc   : > { %362 = vperm.xlu0 (!%p184_p3), %530, %v354_v3  }
   0xd   : > { %378 = vperm.xlu1 (!%p184_p3), %531, %v370_v4  }
   0xe   : > { %s659_s15 = smov (!%p218_p4, %s561_s15), 1 }
   0xf   : > { %s504_s25 = smul.u32 72, %s659_s15  ;;  %s503_s7 = sshll.u32 %s659_s15, 5 }
  0x10   : > { %s235_s10 = scalar_lea.vmem %s653_s4, %s503_s7 }
  0x11   : > { %s225_s30 = scalar_lea.vmem %s649_s0, %s504_s25 }
  0x12   : > { %v532_v5 = vld [vmem:[%s225_s30 + $0x4] ss:$8 sps:$4 sm:$0xff]   ;;  %v534_v6 = vld [vmem:[%s225_s30] ss:$8 sps:$4 sm:$0xff]   ;;  %v535_v7 = vld [vmem:[%s225_s30 + $0x14] ss:$8 sps:$4 sm:$0xff]  }
  0x13   : > { %310 = vmatprep.subr.bf16.mxu0 %v532_v5  ;;  %v537_v8 = vld [vmem:[%s225_s30 + $0x10] ss:$8 sps:$4 sm:$0xff]   ;;  %v538_v9 = vld [vmem:[%s225_s30 + $0x24] ss:$8 sps:$4 sm:$0xff]   ;;  %v540_v10 = vld [vmem:[%s225_s30 + $0x20] ss:$8 sps:$4 sm:$0xff]  }
  0x14   : > { %311 = vmatpush1.bf16.msra.mxu0 %v534_v6  ;;  %v541_v11 = vld [vmem:[%s225_s30 + $0x34] ss:$8 sps:$4 sm:$0xff]   ;;  %v248_v12 = vld [vmem:[%s225_s30 + $0x40] sm:$0xff]  ;;  %v543_v13 = vld [vmem:[%s225_s30 + $0x30] ss:$8 sps:$4 sm:$0xff]  }
  0x15   : > { %312 = vmatprep.subr.bf16.mxu0 %v535_v7  ;;  %v498_v14 = vcombine.high %v248_v12, %v248_v12  ;;  %v497_v15 = vcombine.low %v248_v12, %v248_v12 }
  0x17   : > { %v305_v16 = vsel %vm303_vm0, %v497_v15, 0 }
  0x18   : > { %313 = vmatpush1.bf16.msra.mxu0 %v537_v8 }
  0x19   : > { %314 = vmatprep.subr.bf16.mxu0 %v538_v9 }
  0x1c   : > { %315 = vmatpush1.bf16.msra.mxu0 %v540_v10 }
  0x1d   : > { %316 = vmatprep.subr.bf16.mxu0 %v541_v11 }
  0x20   : > { %317 = vmatpush1.bf16.msra.mxu0 %v543_v13 }
  0x21   : > { %499 = vmatprep.subr.msk.bf16.mxu0 %vm303_vm0, %v498_v14 }
  0x24   : > { %319 = vmatpush1.bf16.msra.mxu0 %v305_v16 }
  0x27   : > { %500 = vmatmul.mubr.msk.bf16.vlgmr.msra.gmra.mrb[0].mxu0 %vm299_vm1, %v546_v17 }
  0x87   : > { %v358_v18 = vpop.permute.xlu0 %357 }
  0x88   : > { %v374_v19 = vpop.permute.xlu1 %373 }
  0x8b   : > { %v363_v23 = vpop.permute.xlu0 %362 }
  0x8c   : > { %v379_v29 = vpop.permute.xlu1 %378 }
  0xfa   : > { %v344_v20 = vpop.f32.mrb[0].mxu0 }
  0xfb   : > { %v365_v21 = vmul.f32 %v358_v18, %v344_v20  ;;  %v346_v22 = vpop.f32.mrb[1].mxu0 }
  0xfc   : > { %v366_v24 = vmul.f32 %v358_v18, %v346_v22  ;;  %v348_v25 = vpop.f32.mrb[2].mxu0 }
  0xfd   : > { %v381_v26 = vadd.f32 %v374_v19, %v365_v21  ;;  %v367_v27 = vmul.f32 %v363_v23, %v348_v25  ;;  %v350_v28 = vpop.f32.mrb[3].mxu0 }
  0xfe   : > { %v382_v30 = vadd.f32 %v374_v19, %v366_v24  ;;  %v368_v31 = vmul.f32 %v363_v23, %v350_v28 }
  0xff   : > { %v385_v32 = vmax.f32 %v381_v26, 0.0  ;;  %v383_v33 = vadd.f32 %v379_v29, %v367_v27 }
 0x100   : > { %v386_v34 = vmax.f32 %v382_v30, 0.0  ;;  %v384_v35 = vadd.f32 %v379_v29, %v368_v31 }
 0x101   : > { %389 = vst [vmem:[%s235_s10] sm:$0xff] %v385_v32  ;;  %v387_v36 = vmax.f32 %v383_v33, 0.0 }
 0x102   : > { %390 = vst [vmem:[%s235_s10 + $0x8] sm:$0xff] %v386_v34  ;;  %v388_v37 = vmax.f32 %v384_v35, 0.0 }
 0x103   : > { %391 = vst [vmem:[%s235_s10 + $0x10] sm:$0xff] %v387_v36 }
 0x104   : > { %392 = vst [vmem:[%s235_s10 + $0x18] sm:$0xff] %v388_v37 }
 0x105 PF: > { %s14_s17 = sadd.s32 1, %s569_s17   ;;  %s654_s15 = smov %s565_s16 }
 0x106   : > { %p11_p5 = scmp.ge.s32.totalorder %s14_s17, 4   ;;  %s655_s16 = smov %s657_s18 }
 0x108   :  { %13 = sbr.rel (!%p11_p5) target bundleno = 2 (0x2), region = 66 }

// kernel: unet_forward.22
= control target key start
LH: loop header
LB: loop body
LE: loop exit
PB: predicated region body
PF: predicated region fallthrough
CT: control target
= control target key end

     0   :  { %s671_s15 = smov 0   ;;  %s673_s16 = smov 0   ;;  %s746_s0 = inlined_call_operand.vmem [shape: bf16[2,144,256], index: 0, kind: input, shape index: {}]   ;;  %s747_s1 = inlined_call_operand.vmem [shape: bf16[16,144], index: 1, kind: input, shape index: {}]   ;;  %s748_s2 = inlined_call_operand.vmem [shape: f32[16,1], index: 2, kind: input, shape index: {}]   ;;  %s749_s3 = inlined_call_operand.vmem [shape: f32[16,1], index: 3, kind: input, shape index: {}]   ;;  %s750_s4 = inlined_call_operand.vmem [shape: f32[2,16,256], index: 4, kind: output, shape index: {}]  }
   0x1   :  { %s675_s17 = smov 0  }
   0x2 LB: > { %s26_s18 = sadd.s32 1, %s639_s16  ;;  %p535_p0 = scmp.ge.s32.totalorder %s643_s17, 1  ;;  %s643_s17 = sphi %s675_s17, %s14_s17   ;;  %s639_s16 = sphi %s673_s16, %s752_s16   ;;  %s635_s15 = sphi %s671_s15, %s751_s15  }
   0x3   : > { %p28_p1 = scmp.ge.s32.totalorder %s26_s18, 2  ;;  %p183_p2 = scmp.lt.s32.totalorder %s643_s17, 3 }
   0x5   : > { %s754_s18 = smov (%p28_p1, %s26_s18), 0  ;;  %p184_p3 = pnand %p535_p0, %p183_p2 }
   0x6   : > { %p218_p4 = scmp.lt.s32.totalorder (!%p184_p3), %s635_s15, 1  ;;  %vm357_vm0 = vcmask (!%p184_p3), 130048   ;;  %v620_v0 = vld [vmem:[%s747_s1 + $0x4] ss:$8 sps:$4 sm:$0xff] (!%p184_p3)   ;;  %v645_v3 = vmov (!%p184_p3), 0  }
   0x7   : > { %187 = sbr.rel (%p184_p3) target bundleno = 277 (0x115), region = 36  ;;  %v404_v1 = vld [vmem:[%s748_s2] sm:$0xff] (!%p184_p3)  ;;  %589 = vset.pattern.permute.xlu0 (!%p184_p3), %v645_v3  ;;  %590 = vset.pattern.permute.xlu1 (!%p184_p3), %v645_v3  ;;  %v405_v4 = vld [vmem:[%s748_s2 + $0x8] sm:$0xff] (!%p184_p3) }
   0x8   : > { %v420_v2 = vld [vmem:[%s749_s3] sm:$0xff] (!%p184_p3)  ;;  %559 = vmatprep.mubr.msk.bf16.mxu0 (!%p184_p3), %vm357_vm0, %v620_v0  ;;  %408 = vperm.xlu0 (!%p184_p3), %589, %v404_v1   ;;  %v421_v5 = vld [vmem:[%s749_s3 + $0x8] sm:$0xff] (!%p184_p3) }
   0x9   : > { %424 = vperm.xlu1 (!%p184_p3), %590, %v420_v2   ;;  %v618_v24 = vld [vmem:[%s747_s1] ss:$8 sps:$4 sm:$0xff] (!%p184_p3)  }
   0xc   : > { %413 = vperm.xlu0 (!%p184_p3), %589, %v405_v4  }
   0xd   : > { %429 = vperm.xlu1 (!%p184_p3), %590, %v421_v5  }
   0xe   : > { %s756_s15 = smov (!%p218_p4, %s635_s15), 1 }
   0xf   : > { %s563_s25 = smul.u32 144, %s756_s15  ;;  %s562_s9 = sshll.u32 %s756_s15, 5 }
  0x10   : > { %s235_s12 = scalar_lea.vmem %s750_s4, %s562_s9 }
  0x11   : > { %s710_s6 = scalar_lea.vmem %s746_s0, %s563_s25 }
  0x12   : > { %v591_v6 = vld [vmem:[%s710_s6 + $0x4] ss:$8 sps:$4 sm:$0xff]   ;;  %v593_v7 = vld [vmem:[%s710_s6] ss:$8 sps:$4 sm:$0xff]   ;;  %v594_v8 = vld [vmem:[%s710_s6 + $0x14] ss:$8 sps:$4 sm:$0xff]  }
  0x13   : > { %361 = vmatprep.subr.bf16.mxu0 %v591_v6  ;;  %v596_v9 = vld [vmem:[%s710_s6 + $0x10] ss:$8 sps:$4 sm:$0xff]   ;;  %v597_v10 = vld [vmem:[%s710_s6 + $0x24] ss:$8 sps:$4 sm:$0xff]   ;;  %v599_v11 = vld [vmem:[%s710_s6 + $0x20] ss:$8 sps:$4 sm:$0xff]  }
  0x14   : > { %362 = vmatpush1.bf16.msra.mxu0 %v593_v7  ;;  %v600_v12 = vld [vmem:[%s710_s6 + $0x34] ss:$8 sps:$4 sm:$0xff]   ;;  %v602_v13 = vld [vmem:[%s710_s6 + $0x30] ss:$8 sps:$4 sm:$0xff]   ;;  %v603_v14 = vld [vmem:[%s710_s6 + $0x44] ss:$8 sps:$4 sm:$0xff]  }
  0x15   : > { %363 = vmatprep.subr.bf16.mxu0 %v594_v8  ;;  %v605_v15 = vld [vmem:[%s710_s6 + $0x40] ss:$8 sps:$4 sm:$0xff]   ;;  %v606_v16 = vld [vmem:[%s710_s6 + $0x54] ss:$8 sps:$4 sm:$0xff]   ;;  %v608_v17 = vld [vmem:[%s710_s6 + $0x50] ss:$8 sps:$4 sm:$0xff]  }
  0x16   : > { %v609_v18 = vld [vmem:[%s710_s6 + $0x64] ss:$8 sps:$4 sm:$0xff]   ;;  %v611_v19 = vld [vmem:[%s710_s6 + $0x60] ss:$8 sps:$4 sm:$0xff]   ;;  %v612_v20 = vld [vmem:[%s710_s6 + $0x74] ss:$8 sps:$4 sm:$0xff]  }
  0x17   : > { %v614_v21 = vld [vmem:[%s710_s6 + $0x70] ss:$8 sps:$4 sm:$0xff]   ;;  %v615_v22 = vld [vmem:[%s710_s6 + $0x84] ss:$8 sps:$4 sm:$0xff]   ;;  %v617_v23 = vld [vmem:[%s710_s6 + $0x80] ss:$8 sps:$4 sm:$0xff]  }
  0x18   : > { %364 = vmatpush1.bf16.msra.mxu0 %v596_v9 }
  0x19   : > { %365 = vmatprep.subr.bf16.mxu0 %v597_v10 }
  0x1c   : > { %366 = vmatpush1.bf16.msra.mxu0 %v599_v11 }
  0x1d   : > { %367 = vmatprep.subr.bf16.mxu0 %v600_v12 }
  0x20   : > { %368 = vmatpush1.bf16.msra.mxu0 %v602_v13 }
  0x21   : > { %369 = vmatprep.subr.bf16.mxu0 %v603_v14 }
  0x24   : > { %370 = vmatpush1.bf16.msra.mxu0 %v605_v15 }
  0x25   : > { %371 = vmatprep.subr.bf16.mxu0 %v606_v16 }
  0x28   : > { %372 = vmatpush1.bf16.msra.mxu0 %v608_v17 }
  0x29   : > { %373 = vmatprep.subr.bf16.mxu0 %v609_v18 }
  0x2c   : > { %374 = vmatpush1.bf16.msra.mxu0 %v611_v19 }
  0x2d   : > { %375 = vmatprep.subr.bf16.mxu0 %v612_v20 }
  0x30   : > { %376 = vmatpush1.bf16.msra.mxu0 %v614_v21 }
  0x31   : > { %377 = vmatprep.subr.bf16.mxu0 %v615_v22 }
  0x34   : > { %378 = vmatpush1.bf16.msra.mxu0 %v617_v23 }
  0x37   : > { %394 = vmatmul.mubr.bf16.vlgmr.msra.gmra.mrb[0].mxu0 %v618_v24 }
  0x87   : > { %v409_v25 = vpop.permute.xlu0 %408 }
  0x88   : > { %v425_v26 = vpop.permute.xlu1 %424 }
  0x8b   : > { %v414_v30 = vpop.permute.xlu0 %413 }
  0x8c   : > { %v430_v36 = vpop.permute.xlu1 %429 }
 0x10a   : > { %v395_v27 = vpop.f32.mrb[0].mxu0 }
 0x10b   : > { %v416_v28 = vmul.f32 %v409_v25, %v395_v27  ;;  %v397_v29 = vpop.f32.mrb[1].mxu0 }
 0x10c   : > { %v417_v31 = vmul.f32 %v409_v25, %v397_v29  ;;  %v399_v32 = vpop.f32.mrb[2].mxu0 }
 0x10d   : > { %v432_v33 = vadd.f32 %v425_v26, %v416_v28  ;;  %v418_v34 = vmul.f32 %v414_v30, %v399_v32  ;;  %v401_v35 = vpop.f32.mrb[3].mxu0 }
 0x10e   : > { %v433_v37 = vadd.f32 %v425_v26, %v417_v31  ;;  %v419_v38 = vmul.f32 %v414_v30, %v401_v35 }
 0x10f   : > { %v436_v39 = vmax.f32 %v432_v33, 0.0  ;;  %v434_v40 = vadd.f32 %v430_v36, %v418_v34 }
 0x110   : > { %v437_v41 = vmax.f32 %v433_v37, 0.0  ;;  %v435_v42 = vadd.f32 %v430_v36, %v419_v38 }
 0x111   : > { %440 = vst [vmem:[%s235_s12] sm:$0xff] %v436_v39  ;;  %v438_v43 = vmax.f32 %v434_v40, 0.0 }
 0x112   : > { %441 = vst [vmem:[%s235_s12 + $0x8] sm:$0xff] %v437_v41  ;;  %v439_v44 = vmax.f32 %v435_v42, 0.0 }
 0x113   : > { %442 = vst [vmem:[%s235_s12 + $0x10] sm:$0xff] %v438_v43 }
 0x114   : > { %443 = vst [vmem:[%s235_s12 + $0x18] sm:$0xff] %v439_v44 }
 0x115 PF: > { %s14_s17 = sadd.s32 1, %s643_s17   ;;  %s751_s15 = smov %s639_s16 }
 0x116   : > { %p11_p5 = scmp.ge.s32.totalorder %s14_s17, 4   ;;  %s752_s16 = smov %s754_s18 }
 0x118   :  { %13 = sbr.rel (!%p11_p5) target bundleno = 2 (0x2), region = 66 }

// kernel: unet_forward.23
= control target key start
LH: loop header
LB: loop body
LE: loop exit
PB: predicated region body
PF: predicated region fallthrough
CT: control target
= control target key end

     0   :  { %s665_s15 = smov 0   ;;  %s667_s16 = smov 0   ;;  %s769_s0 = inlined_call_operand.vmem [shape: bf16[2,144,64], index: 0, kind: input, shape index: {}]   ;;  %s770_s1 = inlined_call_operand.vmem [shape: bf16[32,144], index: 1, kind: input, shape index: {}]   ;;  %s771_s2 = inlined_call_operand.vmem [shape: f32[32,1], index: 2, kind: input, shape index: {}]   ;;  %s772_s3 = inlined_call_operand.vmem [shape: f32[32,1], index: 3, kind: input, shape index: {}]   ;;  %s773_s4 = inlined_call_operand.vmem [shape: f32[2,32,64], index: 4, kind: output, shape index: {}]  }
   0x1   :  { %s669_s17 = smov 0  }
   0x2 LB: > { %s26_s18 = sadd.s32 1, %s633_s16  ;;  %p532_p0 = scmp.ge.s32.totalorder %s637_s17, 1  ;;  %s637_s17 = sphi %s669_s17, %s14_s17   ;;  %s633_s16 = sphi %s667_s16, %s775_s16   ;;  %s629_s15 = sphi %s665_s15, %s774_s15  }
   0x3   : > { %p28_p1 = scmp.ge.s32.totalorder %s26_s18, 2  ;;  %p181_p2 = scmp.lt.s32.totalorder %s637_s17, 3 }
   0x5   : > { %s777_s18 = smov (%p28_p1, %s26_s18), 0  ;;  %p182_p3 = pnand %p532_p0, %p181_p2 }
   0x6   : > { %p213_p4 = scmp.lt.s32.totalorder (!%p182_p3), %s629_s15, 1  ;;  %v639_v0 = vmov (!%p182_p3), 0   ;;  %v611_v1 = vld [vmem:[%s770_s1 + $0x4] ss:$8 sps:$4 sm:$0xff] (!%p182_p3)   ;;  %vm324_vm0 = vcmask (!%p182_p3), 130048   ;;  %v382_v3 = vld [vmem:[%s771_s2 + $0x10] sm:$0xff] (!%p182_p3) }
   0x7   : > { %185 = sbr.rel (%p182_p3) target bundleno = 275 (0x113), region = 36  ;;  %331 = vmatprep.subr.bf16.mxu0 (!%p182_p3), %v639_v0  ;;  %554 = vmatprep.subr.bf16.mxu1 (!%p182_p3), %v639_v0  ;;  %v614_v2 = vld [vmem:[%s770_s1 + $0x14] ss:$8 sps:$4 sm:$0xff] (!%p182_p3)   ;;  %v380_v4 = vld [vmem:[%s771_s2] sm:$0xff] (!%p182_p3)  ;;  %v381_v6 = vld [vmem:[%s771_s2 + $0x8] sm:$0xff] (!%p182_p3)  ;;  %vm440_vm1 = vcmask (!%p182_p3), 523264  }
   0x8   : > { %599 = vset.pattern.permute.xlu1 (!%p182_p3), %v639_v0  ;;  %598 = vset.pattern.permute.xlu0 (!%p182_p3), %v639_v0  ;;  %v383_v5 = vld [vmem:[%s771_s2 + $0x18] sm:$0xff] (!%p182_p3)  ;;  %v409_v7 = vld [vmem:[%s772_s3 + $0x8] sm:$0xff] (!%p182_p3)  ;;  %v408_v9 = vld [vmem:[%s772_s3] sm:$0xff] (!%p182_p3) }
   0x9   : > { %549 = vmatprep.mubr.msk.bf16.mxu0 (!%p182_p3), %vm324_vm0, %v611_v1  ;;  %396 = vperm.xlu1 (!%p182_p3), %599, %v382_v3   ;;  %v411_v11 = vld [vmem:[%s772_s3 + $0x18] sm:$0xff] (!%p182_p3)  ;;  %v410_v12 = vld [vmem:[%s772_s3 + $0x10] sm:$0xff] (!%p182_p3)  ;;  %v609_v20 = vld [vmem:[%s770_s1] ss:$8 sps:$4 sm:$0xff] (!%p182_p3)  }
   0xa   : > { %550 = vmatprep.mubr.msk.bf16.mxu1 (!%p182_p3), %vm324_vm0, %v614_v2  ;;  %386 = vperm.xlu0 (!%p182_p3), %598, %v380_v4   ;;  %v612_v21 = vld [vmem:[%s770_s1 + $0x10] ss:$8 sps:$4 sm:$0xff] (!%p182_p3)  }
   0xd   : > { %401 = vperm.xlu1 (!%p182_p3), %599, %v383_v5  }
   0xe   : > { %s779_s15 = smov (!%p213_p4, %s629_s15), 1  ;;  %391 = vperm.xlu0 %598, %v381_v6  }
   0xf   : > { %s572_s27 = smul.u32 72, %s779_s15  ;;  %s553_s25 = sshll.u32 %s779_s15, 5 }
  0x10   : > { %s228_s28 = scalar_lea.vmem %s773_s4, %s553_s25 }
  0x11   : > { %s711_s8 = scalar_lea.vmem %s769_s0, %s572_s27  ;;  %419 = vperm.xlu1 %599, %v409_v7  }
  0x12   : > { %v600_v8 = vld [vmem:[%s711_s8] sm:$0xff]   ;;  %v601_v10 = vld [vmem:[%s711_s8 + $0x8] sm:$0xff]   ;;  %414 = vperm.xlu0 %598, %v408_v9   ;;  %v602_v13 = vld [vmem:[%s711_s8 + $0x10] sm:$0xff]  }
  0x13   : > { %332 = vmatpush1.bf16.msra.mxu0 %v600_v8  ;;  %563 = vmatpush1.bf16.msra.mxu1 %v600_v8  ;;  %v603_v14 = vld [vmem:[%s711_s8 + $0x18] sm:$0xff]   ;;  %v604_v15 = vld [vmem:[%s711_s8 + $0x20] sm:$0xff]   ;;  %v605_v16 = vld [vmem:[%s711_s8 + $0x28] sm:$0xff]  }
  0x14   : > { %333 = vmatprep.subr.bf16.mxu0 %v639_v0  ;;  %555 = vmatprep.subr.bf16.mxu1 %v639_v0  ;;  %v606_v17 = vld [vmem:[%s711_s8 + $0x30] sm:$0xff]   ;;  %v607_v18 = vld [vmem:[%s711_s8 + $0x38] sm:$0xff]   ;;  %v608_v19 = vld [vmem:[%s711_s8 + $0x40] sm:$0xff]  }
  0x15   : > { %429 = vperm.xlu1 %599, %v411_v11  }
  0x16   : > { %424 = vperm.xlu0 %598, %v410_v12  }
  0x17   : > { %334 = vmatpush1.bf16.msra.mxu0 %v601_v10  ;;  %564 = vmatpush1.bf16.msra.mxu1 %v601_v10 }
  0x18   : > { %335 = vmatprep.subr.bf16.mxu0 %v639_v0  ;;  %556 = vmatprep.subr.bf16.mxu1 %v639_v0 }
  0x1b   : > { %336 = vmatpush1.bf16.msra.mxu0 %v602_v13  ;;  %565 = vmatpush1.bf16.msra.mxu1 %v602_v13 }
  0x1c   : > { %337 = vmatprep.subr.bf16.mxu0 %v639_v0  ;;  %557 = vmatprep.subr.bf16.mxu1 %v639_v0 }
  0x1f   : > { %338 = vmatpush1.bf16.msra.mxu0 %v603_v14  ;;  %566 = vmatpush1.bf16.msra.mxu1 %v603_v14 }
  0x20   : > { %339 = vmatprep.subr.bf16.mxu0 %v639_v0  ;;  %558 = vmatprep.subr.bf16.mxu1 %v639_v0 }
  0x23   : > { %340 = vmatpush1.bf16.msra.mxu0 %v604_v15  ;;  %567 = vmatpush1.bf16.msra.mxu1 %v604_v15 }
  0x24   : > { %341 = vmatprep.subr.bf16.mxu0 %v639_v0  ;;  %559 = vmatprep.subr.bf16.mxu1 %v639_v0 }
  0x27   : > { %342 = vmatpush1.bf16.msra.mxu0 %v605_v16  ;;  %568 = vmatpush1.bf16.msra.mxu1 %v605_v16 }
  0x28   : > { %343 = vmatprep.subr.bf16.mxu0 %v639_v0  ;;  %560 = vmatprep.subr.bf16.mxu1 %v639_v0 }
  0x2b   : > { %344 = vmatpush1.bf16.msra.mxu0 %v606_v17  ;;  %569 = vmatpush1.bf16.msra.mxu1 %v606_v17 }
  0x2c   : > { %345 = vmatprep.subr.bf16.mxu0 %v639_v0  ;;  %561 = vmatprep.subr.bf16.mxu1 %v639_v0 }
  0x2f   : > { %346 = vmatpush1.bf16.msra.mxu0 %v607_v18  ;;  %570 = vmatpush1.bf16.msra.mxu1 %v607_v18 }
  0x30   : > { %347 = vmatprep.subr.bf16.mxu0 %v639_v0  ;;  %562 = vmatprep.subr.bf16.mxu1 %v639_v0 }
  0x33   : > { %348 = vmatpush1.bf16.msra.mxu0 %v608_v19  ;;  %571 = vmatpush1.bf16.msra.mxu1 %v608_v19 }
  0x36   : > { %364 = vmatmul.mubr.bf16.vlgmr.msra.gmra.mrb[0].mxu0 %v609_v20  ;;  %372 = vmatmul.mubr.bf16.vlgmr.msra.gmra.mrb[0].mxu1 %v612_v21 }
  0x88   : > { %v397_v23 = vpop.permute.xlu1 %396 }
  0x89   : > { %v387_v22 = vpop.permute.xlu0 %386 }
  0x8c   : > { %v402_v25 = vpop.permute.xlu1 %401 }
  0x8d   : > { %v392_v24 = vpop.permute.xlu0 %391 }
  0x90   : > { %v420_v27 = vpop.permute.xlu1 %419 }
  0x91   : > { %v415_v26 = vpop.permute.xlu0 %414 }
  0x94   : > { %v430_v43 = vpop.permute.xlu1 %429 }
  0x95   : > { %v425_v28 = vpop.permute.xlu0 %424 }
 0x109   : > { %v365_v29 = vpop.f32.mrb[0].mxu0  ;;  %v373_v30 = vpop.f32.mrb[0].mxu1 }
 0x10a   : > { %v404_v31 = vmul.f32 %v387_v22, %v365_v29  ;;  %v406_v32 = vmul.f32 %v397_v23, %v373_v30  ;;  %v367_v33 = vpop.f32.mrb[1].mxu0  ;;  %v375_v34 = vpop.f32.mrb[1].mxu1 }
 0x10b   : > { %v368_v35 = vpop.f32.mrb[2].mxu0  ;;  %v376_v36 = vpop.f32.mrb[2].mxu1 }
 0x10c   : > { %v432_v37 = vadd.f32 %v415_v26, %v404_v31  ;;  %v434_v38 = vadd.f32 %v425_v28, %v406_v32  ;;  %v405_v39 = vmul.f32 %v392_v24, %v368_v35  ;;  %v407_v40 = vmul.f32 %v402_v25, %v376_v36  ;;  %v370_v41 = vpop.f32.mrb[3].mxu0  ;;  %v378_v42 = vpop.f32.mrb[3].mxu1 }
 0x10e   : > { %v436_v44 = vmax.f32 %v432_v37, 0.0  ;;  %v438_v45 = vmax.f32 %v434_v38, 0.0  ;;  %v433_v46 = vadd.f32 %v420_v27, %v405_v39  ;;  %v435_v47 = vadd.f32 %v430_v43, %v407_v40 }
 0x110   : > { %441 = vst.msk [vmem:[%s228_s28] sm:$0xff] %vm440_vm1, %v436_v44  ;;  %443 = vst.msk [vmem:[%s228_s28 + $0x10] sm:$0xff] %vm440_vm1, %v438_v45  ;;  %v437_v48 = vmax.f32 %v433_v46, 0.0  ;;  %v439_v49 = vmax.f32 %v435_v47, 0.0 }
 0x112   : > { %442 = vst.msk [vmem:[%s228_s28 + $0x8] sm:$0xff] %vm440_vm1, %v437_v48  ;;  %444 = vst.msk [vmem:[%s228_s28 + $0x18] sm:$0xff] %vm440_vm1, %v439_v49 }
 0x113 PF: > { %s14_s17 = sadd.s32 1, %s637_s17   ;;  %s774_s15 = smov %s633_s16 }
 0x114   : > { %p11_p5 = scmp.ge.s32.totalorder %s14_s17, 4   ;;  %s775_s16 = smov %s777_s18 }
 0x116   :  { %13 = sbr.rel (!%p11_p5) target bundleno = 2 (0x2), region = 66 }

// kernel: unet_forward.24
= control target key start
LH: loop header
LB: loop body
LE: loop exit
PB: predicated region body
PF: predicated region fallthrough
CT: control target
= control target key end

     0   :  { %s846_s15 = smov 0   ;;  %s848_s16 = smov 0   ;;  %s951_s0 = inlined_call_operand.vmem [shape: bf16[2,288,64], index: 0, kind: input, shape index: {}]   ;;  %s952_s1 = inlined_call_operand.vmem [shape: bf16[32,288], index: 1, kind: input, shape index: {}]   ;;  %s953_s2 = inlined_call_operand.vmem [shape: f32[32,1], index: 2, kind: input, shape index: {}]   ;;  %s954_s3 = inlined_call_operand.vmem [shape: f32[32,1], index: 3, kind: input, shape index: {}]   ;;  %s955_s4 = inlined_call_operand.vmem [shape: f32[2,32,64], index: 4, kind: output, shape index: {}]  }
   0x1   :  { %s850_s17 = smov 0  }
   0x2 LB: > { %s26_s18 = sadd.s32 1, %s814_s16  ;;  %p669_p0 = scmp.ge.s32.totalorder %s818_s17, 1  ;;  %s818_s17 = sphi %s850_s17, %s14_s17   ;;  %s814_s16 = sphi %s848_s16, %s957_s16   ;;  %s810_s15 = sphi %s846_s15, %s956_s15  }
   0x3   : > { %p28_p1 = scmp.ge.s32.totalorder %s26_s18, 2  ;;  %p181_p2 = scmp.lt.s32.totalorder %s818_s17, 3 }
   0x5   : > { %s959_s18 = smov (%p28_p1, %s26_s18), 0  ;;  %p182_p3 = pnand %p669_p0, %p181_p2 }
   0x6   : > { %p213_p4 = scmp.lt.s32.totalorder (!%p182_p3), %s810_s15, 1  ;;  %vm412_vm0 = vcmask (!%p182_p3), 261120   ;;  %v790_v0 = vld [vmem:[%s952_s1 + $0x4] ss:$12 sps:$4 sm:$0xff] (!%p182_p3)   ;;  %v791_v1 = vld [vmem:[%s952_s1 + $0x8] ss:$12 sps:$4 sm:$0xff] (!%p182_p3)  }
   0x7   : > { %185 = sbr.rel (%p182_p3) target bundleno = 285 (0x11d), region = 36  ;;  %451 = vmatprep.mubr.bf16.mxu0 (!%p182_p3), %v790_v0  ;;  %738 = vmatprep.mubr.msk.bf16.mxu1 (!%p182_p3), %vm412_vm0, %v791_v1  ;;  %v820_v2 = vmov (!%p182_p3), 0   ;;  %v519_v3 = vld [vmem:[%s953_s2 + $0x10] sm:$0xff] (!%p182_p3)  ;;  %v517_v4 = vld [vmem:[%s953_s2] sm:$0xff] (!%p182_p3)  ;;  %v520_v5 = vld [vmem:[%s953_s2 + $0x18] sm:$0xff] (!%p182_p3)  ;;  %vm577_vm1 = vcmask (!%p182_p3), 523264  }
   0x8   : > { %769 = vset.pattern.permute.xlu1 (!%p182_p3), %v820_v2  ;;  %768 = vset.pattern.permute.xlu0 (!%p182_p3), %v820_v2  ;;  %v518_v6 = vld [vmem:[%s953_s2 + $0x8] sm:$0xff] (!%p182_p3)  ;;  %v545_v11 = vld [vmem:[%s954_s3] sm:$0xff] (!%p182_p3)  ;;  %v548_v14 = vld [vmem:[%s954_s3 + $0x18] sm:$0xff] (!%p182_p3) }
   0x9   : > { %533 = vperm.xlu1 (!%p182_p3), %769, %v519_v3   ;;  %523 = vperm.xlu0 (!%p182_p3), %768, %v517_v4   ;;  %v546_v9 = vld [vmem:[%s954_s3 + $0x8] sm:$0xff] (!%p182_p3)  ;;  %v547_v23 = vld [vmem:[%s954_s3 + $0x10] sm:$0xff] (!%p182_p3)  ;;  %v795_v32 = vld [vmem:[%s952_s1 + $0x18] ss:$12 sps:$4 sm:$0xff] (!%p182_p3)  }
   0xa   : > { %v792_v26 = vld [vmem:[%s952_s1 + $0x20] ss:$12 sps:$4 sm:$0xff] (!%p182_p3)   ;;  %v793_v31 = vld [vmem:[%s952_s1 + $0x1c] ss:$12 sps:$4 sm:$0xff] (!%p182_p3)  }
   0xb   : > { %v788_v30 = vld [vmem:[%s952_s1] ss:$12 sps:$4 sm:$0xff] (!%p182_p3)  }
   0xd   : > { %538 = vperm.xlu1 (!%p182_p3), %769, %v520_v5   ;;  %528 = vperm.xlu0 (!%p182_p3), %768, %v518_v6  }
   0xe   : > { %s961_s15 = smov (!%p213_p4, %s810_s15), 1 }
   0xf   : > { %s742_s23 = smul.u32 144, %s961_s15  ;;  %s701_s29 = sshll.u32 %s961_s15, 5 }
  0x10   : > { %s228_s6 = scalar_lea.vmem %s955_s4, %s701_s29 }
  0x11   : > { %s883_s30 = scalar_lea.vmem %s951_s0, %s742_s23  ;;  %556 = vperm.xlu1 %769, %v546_v9   ;;  %551 = vperm.xlu0 %768, %v545_v11  }
  0x12   : > { %v770_v7 = vld [vmem:[%s883_s30 + $0x40] sm:$0xff]   ;;  %v772_v10 = vld [vmem:[%s883_s30 + $0x48] sm:$0xff]   ;;  %v774_v13 = vld [vmem:[%s883_s30 + $0x50] sm:$0xff]  }
  0x13   : > { %v771_v8 = vld [vmem:[%s883_s30] sm:$0xff]   ;;  %702 = vmatprep.subr.bf16.mxu0 %v770_v7  ;;  %v773_v12 = vld [vmem:[%s883_s30 + $0x8] sm:$0xff]   ;;  %v775_v15 = vld [vmem:[%s883_s30 + $0x10] sm:$0xff]  }
  0x14   : > { %703 = vmatpush3.bf16.msra.mxu0 %v771_v8  ;;  %v776_v16 = vld [vmem:[%s883_s30 + $0x58] sm:$0xff]   ;;  %v778_v18 = vld [vmem:[%s883_s30 + $0x60] sm:$0xff]   ;;  %v780_v21 = vld [vmem:[%s883_s30 + $0x68] sm:$0xff]  }
  0x15   : > { %704 = vmatprep.subr.bf16.mxu0 %v772_v10  ;;  %566 = vperm.xlu1 %769, %v548_v14   ;;  %v777_v17 = vld [vmem:[%s883_s30 + $0x18] sm:$0xff]   ;;  %v784_v19 = vld [vmem:[%s883_s30 + $0x80] sm:$0xff]   ;;  %v787_v22 = vld [vmem:[%s883_s30 + $0x88] sm:$0xff]  }
  0x16   : > { %v779_v20 = vld [vmem:[%s883_s30 + $0x20] sm:$0xff]   ;;  %734 = vmatprep.subr.bf16.mxu1 %v784_v19  ;;  %v781_v24 = vld [vmem:[%s883_s30 + $0x28] sm:$0xff]   ;;  %v782_v25 = vld [vmem:[%s883_s30 + $0x70] sm:$0xff]   ;;  %561 = vperm.xlu0 %768, %v547_v23  }
  0x17   : > { %735 = vmatpush3.bf16.msra.mxu1 %v784_v19  ;;  %v783_v27 = vld [vmem:[%s883_s30 + $0x30] sm:$0xff]   ;;  %v785_v28 = vld [vmem:[%s883_s30 + $0x78] sm:$0xff]  }
  0x18   : > { %705 = vmatpush3.bf16.msra.mxu0 %v773_v12  ;;  %736 = vmatprep.subr.bf16.mxu1 %v787_v22  ;;  %v786_v29 = vld [vmem:[%s883_s30 + $0x38] sm:$0xff]  }
  0x19   : > { %706 = vmatprep.subr.bf16.mxu0 %v774_v13 }
  0x1b   : > { %737 = vmatpush3.bf16.msra.mxu1 %v787_v22 }
  0x1c   : > { %707 = vmatpush3.bf16.msra.mxu0 %v775_v15 }
  0x1d   : > { %708 = vmatprep.subr.bf16.mxu0 %v776_v16 }
  0x1e   : > { %739 = vmatmul.mubr.msk.bf16.vlgmr.msra.gmra.mrb[0].mxu1 %vm412_vm0, %v792_v26 }
  0x20   : > { %709 = vmatpush3.bf16.msra.mxu0 %v777_v17 }
  0x21   : > { %710 = vmatprep.subr.bf16.mxu0 %v778_v18 }
  0x24   : > { %711 = vmatpush3.bf16.msra.mxu0 %v779_v20 }
  0x25   : > { %712 = vmatprep.subr.bf16.mxu0 %v780_v21 }
  0x28   : > { %713 = vmatpush3.bf16.msra.mxu0 %v781_v24 }
  0x29   : > { %714 = vmatprep.subr.bf16.mxu0 %v782_v25 }
  0x2c   : > { %715 = vmatpush3.bf16.msra.mxu0 %v783_v27 }
  0x2d   : > { %716 = vmatprep.subr.bf16.mxu0 %v785_v28 }
  0x30   : > { %717 = vmatpush3.bf16.msra.mxu0 %v786_v29 }
  0x33   : > { %452 = vmatmul.mubr.bf16.vlgmr.msra.gmra.mrb[0].mxu0 %v788_v30 }
  0x34   : > { %459 = vmatprep.mubr.bf16.mxu0 %v793_v31 }
  0x3b   : > { %460 = vmatmul.mubr.bf16.gmra.mrb[4].mxu0 %v795_v32 }
  0x88   : > { %v524_v37 = vpop.permute.xlu0 %523  ;;  %v534_v38 = vpop.permute.xlu1 %533 }
  0x8c   : > { %v529_v40 = vpop.permute.xlu0 %528  ;;  %v539_v44 = vpop.permute.xlu1 %538 }
  0x90   : > { %v552_v50 = vpop.permute.xlu0 %551  ;;  %v557_v54 = vpop.permute.xlu1 %556 }
  0x94   : > { %v567_v5 = vpop.permute.xlu1 %566 }
  0x95   : > { %v562_v2 = vpop.permute.xlu0 %561 }
  0xf1   : > { %v740_v33 = vpop.f32.mrb[0].mxu1 }
  0xf2   : > { %v502_v34 = vpop.f32.mrb[1].mxu1 }
  0xf3   : > { %v741_v35 = vpop.f32.mrb[2].mxu1 }
  0xf4   : > { %v505_v36 = vpop.f32.mrb[3].mxu1 }
 0x106   : > { %v718_v39 = vpop.f32.mrb[0].mxu0 }
 0x107   : > { %v719_v41 = vpop.f32.mrb[1].mxu0 }
 0x108   : > { %v720_v42 = vadd.f32 %v719_v41, %v718_v39  ;;  %v721_v43 = vpop.f32.mrb[2].mxu0 }
 0x109   : > { %v722_v45 = vpop.f32.mrb[3].mxu0 }
 0x10a   : > { %v723_v46 = vadd.f32 %v722_v45, %v721_v43  ;;  %v503_v47 = vadd.f32 %v720_v42, %v502_v34 }
 0x10c   : > { %v541_v48 = vmul.f32 %v524_v37, %v503_v47  ;;  %v506_v49 = vadd.f32 %v723_v46, %v505_v36 }
 0x10e   : > { %v569_v51 = vadd.f32 %v552_v50, %v541_v48  ;;  %v542_v52 = vmul.f32 %v529_v40, %v506_v49  ;;  %v724_v53 = vpop.f32.mrb[4].mxu0 }
 0x10f   : > { %v725_v55 = vpop.f32.mrb[5].mxu0 }
 0x110   : > { %v573_v56 = vmax.f32 %v569_v51, 0.0  ;;  %v570_v57 = vadd.f32 %v557_v54, %v542_v52  ;;  %v726_v58 = vadd.f32 %v725_v55, %v724_v53  ;;  %v727_v59 = vpop.f32.mrb[6].mxu0 }
 0x111   : > { %v728_v60 = vpop.f32.mrb[7].mxu0 }
 0x112   : > { %578 = vst.msk [vmem:[%s228_s6] sm:$0xff] %vm577_vm1, %v573_v56  ;;  %v574_v61 = vmax.f32 %v570_v57, 0.0  ;;  %v511_v62 = vadd.f32 %v740_v33, %v726_v58  ;;  %v729_v63 = vadd.f32 %v728_v60, %v727_v59 }
 0x114   : > { %579 = vst.msk [vmem:[%s228_s6 + $0x8] sm:$0xff] %vm577_vm1, %v574_v61  ;;  %v543_v0 = vmul.f32 %v534_v38, %v511_v62  ;;  %v514_v1 = vadd.f32 %v741_v35, %v729_v63 }
 0x116   : > { %v571_v3 = vadd.f32 %v562_v2, %v543_v0  ;;  %v544_v4 = vmul.f32 %v539_v44, %v514_v1 }
 0x118   : > { %v575_v6 = vmax.f32 %v571_v3, 0.0  ;;  %v572_v7 = vadd.f32 %v567_v5, %v544_v4 }
 0x11a   : > { %580 = vst.msk [vmem:[%s228_s6 + $0x10] sm:$0xff] %vm577_vm1, %v575_v6  ;;  %v576_v8 = vmax.f32 %v572_v7, 0.0 }
 0x11c   : > { %581 = vst.msk [vmem:[%s228_s6 + $0x18] sm:$0xff] %vm577_vm1, %v576_v8 }
 0x11d PF: > { %s14_s17 = sadd.s32 1, %s818_s17   ;;  %s956_s15 = smov %s814_s16 }
 0x11e   : > { %p11_p5 = scmp.ge.s32.totalorder %s14_s17, 4   ;;  %s957_s16 = smov %s959_s18 }
 0x120   :  { %13 = sbr.rel (!%p11_p5) target bundleno = 2 (0x2), region = 66 }

// kernel: unet_forward.25
= control target key start
LH: loop header
LB: loop body
LE: loop exit
PB: predicated region body
PF: predicated region fallthrough
CT: control target
= control target key end

     0   :  { %s1036_s15 = smov 0   ;;  %s1038_s16 = smov 0   ;;  %s1208_s0 = inlined_call_operand.vmem [shape: bf16[2,288,16], index: 0, kind: input, shape index: {}]   ;;  %s1209_s1 = inlined_call_operand.vmem [shape: bf16[64,288], index: 1, kind: input, shape index: {}]   ;;  %s1210_s2 = inlined_call_operand.vmem [shape: f32[64,1], index: 2, kind: input, shape index: {}]   ;;  %s1211_s3 = inlined_call_operand.vmem [shape: f32[64,1], index: 3, kind: input, shape index: {}]   ;;  %s1212_s4 = inlined_call_operand.vmem [shape: f32[2,64,16], index: 4, kind: output, shape index: {}]  }
   0x1   :  { %s1040_s17 = smov 0  }
   0x2 LB: > { %s26_s18 = sadd.s32 1, %s1004_s16  ;;  %p809_p0 = scmp.ge.s32.totalorder %s1008_s17, 1  ;;  %s1008_s17 = sphi %s1040_s17, %s14_s17   ;;  %s1004_s16 = sphi %s1038_s16, %s1214_s16   ;;  %s1000_s15 = sphi %s1036_s15, %s1213_s15  }
   0x3   : > { %p28_p1 = scmp.ge.s32.totalorder %s26_s18, 2  ;;  %p181_p2 = scmp.lt.s32.totalorder %s1008_s17, 3 }
   0x5   : > { %s1216_s18 = smov (%p28_p1, %s26_s18), 0  ;;  %p182_p3 = pnand %p809_p0, %p181_p2 }
   0x6   : > { %p213_p4 = scmp.lt.s32.totalorder (!%p182_p3), %s1000_s15, 1  ;;  %v970_v0 = vld [vmem:[%s1209_s1 + $0x4] ss:$12 sps:$4 sm:$0xff] (!%p182_p3)   ;;  %v973_v1 = vld [vmem:[%s1209_s1 + $0x4c] ss:$12 sps:$4 sm:$0xff] (!%p182_p3)   ;;  %v1010_v2 = vmov (!%p182_p3), 0  }
   0x7   : > { %185 = sbr.rel (%p182_p3) target bundleno = 293 (0x125), region = 36  ;;  %951 = vset.pattern.permute.xlu1 (!%p182_p3), %v1010_v2  ;;  %950 = vset.pattern.permute.xlu0 (!%p182_p3), %v1010_v2  ;;  %v595_v16 = vld [vmem:[%s1210_s2 + $0x10] sm:$0xff] (!%p182_p3)  ;;  %v593_v17 = vld [vmem:[%s1210_s2] sm:$0xff] (!%p182_p3)  ;;  %v596_v18 = vld [vmem:[%s1210_s2 + $0x18] sm:$0xff] (!%p182_p3)  ;;  %vm450_vm0 = vcmask (!%p182_p3), 261120   ;;  %vm713_vm1 = vcmask (!%p182_p3), 130048  }
   0x8   : > { %495 = vmatprep.mubr.bf16.mxu0 (!%p182_p3), %v970_v0  ;;  %519 = vmatprep.mubr.bf16.mxu1 (!%p182_p3), %v973_v1  ;;  %v594_v19 = vld [vmem:[%s1210_s2 + $0x8] sm:$0xff] (!%p182_p3)  ;;  %v597_v23 = vld [vmem:[%s1210_s2 + $0x20] sm:$0xff] (!%p182_p3)  ;;  %v600_v28 = vld [vmem:[%s1210_s2 + $0x38] sm:$0xff] (!%p182_p3) }
   0x9   : > { %613 = vperm.xlu1 (!%p182_p3), %951, %v595_v16   ;;  %603 = vperm.xlu0 (!%p182_p3), %950, %v593_v17   ;;  %v598_v22 = vld [vmem:[%s1210_s2 + $0x28] sm:$0xff] (!%p182_p3)  ;;  %v599_v29 = vld [vmem:[%s1210_s2 + $0x30] sm:$0xff] (!%p182_p3)  ;;  %v649_v34 = vld [vmem:[%s1211_s3] sm:$0xff] (!%p182_p3) }
   0xa   : > { %v968_v26 = vld [vmem:[%s1209_s1] ss:$12 sps:$4 sm:$0xff] (!%p182_p3)   ;;  %v971_v27 = vld [vmem:[%s1209_s1 + $0x48] ss:$12 sps:$4 sm:$0xff] (!%p182_p3)   ;;  %v979_v35 = vld [vmem:[%s1209_s1 + $0x18] ss:$12 sps:$4 sm:$0xff] (!%p182_p3)  }
   0xb   : > { %v976_v30 = vld [vmem:[%s1209_s1 + $0x1c] ss:$12 sps:$4 sm:$0xff] (!%p182_p3)   ;;  %v980_v36 = vld [vmem:[%s1209_s1 + $0x20] ss:$12 sps:$4 sm:$0xff] (!%p182_p3)   ;;  %v651_v38 = vld [vmem:[%s1211_s3 + $0x10] sm:$0xff] (!%p182_p3) }
   0xc   : > { %v978_v32 = vld [vmem:[%s1209_s1 + $0x8] ss:$12 sps:$4 sm:$0xff] (!%p182_p3)   ;;  %v652_v37 = vld [vmem:[%s1211_s3 + $0x18] sm:$0xff] (!%p182_p3)  ;;  %v653_v42 = vld [vmem:[%s1211_s3 + $0x20] sm:$0xff] (!%p182_p3) }
   0xd   : > { %618 = vperm.xlu1 (!%p182_p3), %951, %v596_v18   ;;  %608 = vperm.xlu0 (!%p182_p3), %950, %v594_v19   ;;  %v650_v33 = vld [vmem:[%s1211_s3 + $0x8] sm:$0xff] (!%p182_p3)  ;;  %v981_v39 = vld [vmem:[%s1209_s1 + $0x34] ss:$12 sps:$4 sm:$0xff] (!%p182_p3)   ;;  %v983_v40 = vld [vmem:[%s1209_s1 + $0x38] ss:$12 sps:$4 sm:$0xff] (!%p182_p3)  }
   0xe   : > { %s1218_s15 = smov (!%p213_p4, %s1000_s15), 1  ;;  %v654_v41 = vld [vmem:[%s1211_s3 + $0x28] sm:$0xff]  ;;  %v984_v43 = vld [vmem:[%s1209_s1 + $0x30] ss:$12 sps:$4 sm:$0xff]  }
   0xf   : > { %s924_s23 = smul.u32 144, %s1218_s15  ;;  %v985_v44 = vld [vmem:[%s1209_s1 + $0x50] ss:$12 sps:$4 sm:$0xff]   ;;  %s849_s9 = sshll.u32 %s1218_s15, 6 }
  0x10   : > { %v656_v45 = vld [vmem:[%s1211_s3 + $0x38] sm:$0xff]  ;;  %v655_v46 = vld [vmem:[%s1211_s3 + $0x30] sm:$0xff]  ;;  %s1178_s12 = scalar_lea.vmem %s1212_s4, %s849_s9 }
  0x11   : > { %s1066_s26 = scalar_lea.vmem %s1208_s0, %s924_s23  ;;  %628 = vperm.xlu1 %951, %v598_v22   ;;  %623 = vperm.xlu0 %950, %v597_v23  }
  0x12   : > { %v952_v3 = vld [vmem:[%s1066_s26 + $0x40] sm:$0xff]   ;;  %v954_v5 = vld [vmem:[%s1066_s26 + $0x48] sm:$0xff]   ;;  %v956_v7 = vld [vmem:[%s1066_s26 + $0x50] sm:$0xff]  }
  0x13   : > { %v953_v4 = vld [vmem:[%s1066_s26] sm:$0xff]   ;;  %850 = vmatprep.subr.bf16.mxu0 %v952_v3  ;;  %908 = vmatprep.subr.bf16.mxu1 %v952_v3  ;;  %v955_v6 = vld [vmem:[%s1066_s26 + $0x8] sm:$0xff]   ;;  %v957_v8 = vld [vmem:[%s1066_s26 + $0x10] sm:$0xff]  }
  0x14   : > { %851 = vmatpush3.bf16.msra.mxu0 %v953_v4  ;;  %916 = vmatpush3.bf16.msra.mxu1 %v953_v4  ;;  %v958_v9 = vld [vmem:[%s1066_s26 + $0x58] sm:$0xff]   ;;  %v960_v11 = vld [vmem:[%s1066_s26 + $0x60] sm:$0xff]   ;;  %v962_v13 = vld [vmem:[%s1066_s26 + $0x68] sm:$0xff]  }
  0x15   : > { %852 = vmatprep.subr.bf16.mxu0 %v954_v5  ;;  %909 = vmatprep.subr.bf16.mxu1 %v954_v5  ;;  %v959_v10 = vld [vmem:[%s1066_s26 + $0x18] sm:$0xff]   ;;  %v961_v12 = vld [vmem:[%s1066_s26 + $0x20] sm:$0xff]   ;;  %v963_v14 = vld [vmem:[%s1066_s26 + $0x28] sm:$0xff]  }
  0x16   : > { %v964_v15 = vld [vmem:[%s1066_s26 + $0x70] sm:$0xff]   ;;  %v966_v21 = vld [vmem:[%s1066_s26 + $0x78] sm:$0xff]   ;;  %v974_v25 = vld [vmem:[%s1066_s26 + $0x80] sm:$0xff]   ;;  %638 = vperm.xlu1 %951, %v600_v28   ;;  %633 = vperm.xlu0 %950, %v599_v29  }
  0x17   : > { %v965_v20 = vld [vmem:[%s1066_s26 + $0x30] sm:$0xff]   ;;  %v967_v24 = vld [vmem:[%s1066_s26 + $0x38] sm:$0xff]   ;;  %v975_v31 = vld [vmem:[%s1066_s26 + $0x88] sm:$0xff]  }
  0x18   : > { %853 = vmatpush3.bf16.msra.mxu0 %v955_v6  ;;  %917 = vmatpush3.bf16.msra.mxu1 %v955_v6 }
  0x19   : > { %854 = vmatprep.subr.bf16.mxu0 %v956_v7  ;;  %910 = vmatprep.subr.bf16.mxu1 %v956_v7 }
  0x1a   : > { %664 = vperm.xlu1 %951, %v650_v33   ;;  %659 = vperm.xlu0 %950, %v649_v34  }
  0x1c   : > { %855 = vmatpush3.bf16.msra.mxu0 %v957_v8  ;;  %918 = vmatpush3.bf16.msra.mxu1 %v957_v8 }
  0x1d   : > { %856 = vmatprep.subr.bf16.mxu0 %v958_v9  ;;  %911 = vmatprep.subr.bf16.mxu1 %v958_v9 }
  0x1e   : > { %674 = vperm.xlu1 %951, %v652_v37   ;;  %669 = vperm.xlu0 %950, %v651_v38  }
  0x20   : > { %857 = vmatpush3.bf16.msra.mxu0 %v959_v10  ;;  %919 = vmatpush3.bf16.msra.mxu1 %v959_v10 }
  0x21   : > { %858 = vmatprep.subr.bf16.mxu0 %v960_v11  ;;  %912 = vmatprep.subr.bf16.mxu1 %v960_v11 }
  0x22   : > { %684 = vperm.xlu1 %951, %v654_v41   ;;  %679 = vperm.xlu0 %950, %v653_v42  }
  0x24   : > { %859 = vmatpush3.bf16.msra.mxu0 %v961_v12  ;;  %920 = vmatpush3.bf16.msra.mxu1 %v961_v12 }
  0x25   : > { %860 = vmatprep.subr.bf16.mxu0 %v962_v13  ;;  %913 = vmatprep.subr.bf16.mxu1 %v962_v13 }
  0x26   : > { %694 = vperm.xlu1 %951, %v656_v45   ;;  %689 = vperm.xlu0 %950, %v655_v46  }
  0x28   : > { %861 = vmatpush3.bf16.msra.mxu0 %v963_v14  ;;  %921 = vmatpush3.bf16.msra.mxu1 %v963_v14 }
  0x29   : > { %862 = vmatprep.subr.bf16.mxu0 %v964_v15  ;;  %914 = vmatprep.subr.bf16.mxu1 %v964_v15 }
  0x2c   : > { %863 = vmatpush3.bf16.msra.mxu0 %v965_v20  ;;  %922 = vmatpush3.bf16.msra.mxu1 %v965_v20 }
  0x2d   : > { %864 = vmatprep.subr.bf16.mxu0 %v966_v21  ;;  %915 = vmatprep.subr.bf16.mxu1 %v966_v21 }
  0x30   : > { %865 = vmatpush3.bf16.msra.mxu0 %v967_v24  ;;  %923 = vmatpush3.bf16.msra.mxu1 %v967_v24 }
  0x31   : > { %896 = vmatprep.subr.bf16.mxu1 %v974_v25 }
  0x33   : > { %496 = vmatmul.mubr.bf16.vlgmr.msra.gmra.mrb[0].mxu0 %v968_v26  ;;  %520 = vmatmul.mubr.bf16.vlgmr.msra.gmra.mrb[0].mxu1 %v971_v27 }
  0x34   : > { %897 = vmatpush3.bf16.msra.mxu1 %v974_v25  ;;  %503 = vmatprep.mubr.bf16.mxu0 %v976_v30 }
  0x35   : > { %898 = vmatprep.subr.bf16.mxu1 %v975_v31  ;;  %900 = vmatprep.mubr.msk.bf16.mxu1 %vm450_vm0, %v978_v32 }
  0x38   : > { %899 = vmatpush3.bf16.msra.mxu1 %v975_v31 }
  0x3b   : > { %504 = vmatmul.mubr.bf16.gmra.mrb[4].mxu0 %v979_v35  ;;  %901 = vmatmul.mubr.msk.bf16.vlgmr.msra.gmra.mrb[4].mxu1 %vm450_vm0, %v980_v36 }
  0x3c   : > { %511 = vmatprep.mubr.bf16.mxu0 %v981_v39  ;;  %904 = vmatprep.mubr.msk.bf16.mxu1 %vm450_vm0, %v983_v40 }
  0x43   : > { %512 = vmatmul.mubr.bf16.gmra.mrb[8].mxu0 %v984_v43  ;;  %905 = vmatmul.mubr.msk.bf16.gmra.mrb[8].mxu1 %vm450_vm0, %v985_v44 }
  0x88   : > { %v614_v47 = vpop.permute.xlu1 %613  ;;  %v604_v48 = vpop.permute.xlu0 %603 }
  0x8c   : > { %v619_v49 = vpop.permute.xlu1 %618  ;;  %v609_v50 = vpop.permute.xlu0 %608 }
  0x90   : > { %v1168_v51 = vpop.permute.xlu1 %628  ;;  %v1170_v52 = vpop.permute.xlu0 %623 }
  0x95   : > { %v1172_v53 = vpop.permute.xlu1 %638  ;;  %v634_v54 = vpop.permute.xlu0 %633 }
  0x99   : > { %v665_v55 = vpop.permute.xlu1 %664  ;;  %v660_v56 = vpop.permute.xlu0 %659 }
  0x9d   : > { %v675_v5 = vpop.permute.xlu1 %674  ;;  %v670_v6 = vpop.permute.xlu0 %669 }
  0xa1   : > { %v680_v21 = vpop.permute.xlu0 %679  ;;  %v685_v26 = vpop.permute.xlu1 %684 }
  0xa5   : > { %v690_v46 = vpop.permute.xlu0 %689 }
 0x106   : > { %v866_v57 = vpop.f32.mrb[0].mxu0  ;;  %v884_v58 = vpop.f32.mrb[0].mxu1 }
 0x107   : > { %v867_v59 = vpop.f32.mrb[1].mxu0  ;;  %v885_v60 = vpop.f32.mrb[1].mxu1 }
 0x108   : > { %v868_v61 = vadd.f32 %v867_v59, %v866_v57  ;;  %v886_v62 = vadd.f32 %v885_v60, %v884_v58  ;;  %v869_v63 = vpop.f32.mrb[2].mxu0  ;;  %v887_v0 = vpop.f32.mrb[2].mxu1 }
 0x109   : > { %v870_v1 = vpop.f32.mrb[3].mxu0  ;;  %v888_v2 = vpop.f32.mrb[3].mxu1 }
 0x10a   : > { %v871_v3 = vadd.f32 %v870_v1, %v869_v63  ;;  %v889_v4 = vadd.f32 %v888_v2, %v887_v0 }
 0x10e   : > { %v872_v7 = vpop.f32.mrb[4].mxu0  ;;  %v902_v8 = vpop.f32.mrb[4].mxu1 }
 0x10f   : > { %v873_v9 = vpop.f32.mrb[5].mxu0  ;;  %v562_v10 = vpop.f32.mrb[5].mxu1 }
 0x110   : > { %v874_v11 = vadd.f32 %v873_v9, %v872_v7  ;;  %v563_v12 = vadd.f32 %v868_v61, %v562_v10  ;;  %v875_v13 = vpop.f32.mrb[6].mxu0  ;;  %v903_v14 = vpop.f32.mrb[6].mxu1 }
 0x111   : > { %v876_v15 = vpop.f32.mrb[7].mxu0  ;;  %v565_v16 = vpop.f32.mrb[7].mxu1 }
 0x112   : > { %v571_v17 = vadd.f32 %v902_v8, %v874_v11  ;;  %v641_v18 = vmul.f32 %v604_v48, %v563_v12  ;;  %v877_v19 = vadd.f32 %v876_v15, %v875_v13  ;;  %v566_v20 = vadd.f32 %v871_v3, %v565_v16 }
 0x114   : > { %v643_v22 = vmul.f32 %v614_v47, %v571_v17  ;;  %v697_v23 = vadd.f32 %v660_v56, %v641_v18  ;;  %v574_v24 = vadd.f32 %v903_v14, %v877_v19  ;;  %v642_v25 = vmul.f32 %v609_v50, %v566_v20  ;;  %v695_v56 = vpop.permute.xlu1 %694 }
 0x116   : > { %v699_v27 = vadd.f32 %v670_v6, %v643_v22  ;;  %v705_v28 = vmax.f32 %v697_v23, 0.0  ;;  %v644_v29 = vmul.f32 %v619_v49, %v574_v24  ;;  %v698_v30 = vadd.f32 %v665_v55, %v642_v25  ;;  %v878_v31 = vpop.f32.mrb[8].mxu0  ;;  %v906_v32 = vpop.f32.mrb[8].mxu1 }
 0x117   : > { %v587_v33 = vadd.f32 %v906_v32, %v886_v62  ;;  %v879_v34 = vpop.f32.mrb[9].mxu0  ;;  %v578_v35 = vpop.f32.mrb[9].mxu1 }
 0x118   : > { %v707_v36 = vmax.f32 %v699_v27, 0.0  ;;  %714 = vst.msk [vmem:[%s1178_s12] sm:$0xff] %vm713_vm1, %v705_v28  ;;  %v700_v37 = vadd.f32 %v675_v5, %v644_v29  ;;  %v706_v38 = vmax.f32 %v698_v30, 0.0  ;;  %v880_v39 = vadd.f32 %v879_v34, %v878_v31  ;;  %v881_v40 = vpop.f32.mrb[10].mxu0  ;;  %v907_v41 = vpop.f32.mrb[10].mxu1 }
 0x119   : > { %v647_v42 = vmul.f32 %v634_v54, %v587_v33  ;;  %v590_v43 = vadd.f32 %v907_v41, %v889_v4  ;;  %v882_v44 = vpop.f32.mrb[11].mxu0  ;;  %v581_v45 = vpop.f32.mrb[11].mxu1 }
 0x11a   : > { %716 = vst.msk [vmem:[%s1178_s12 + $0x10] sm:$0xff] %vm713_vm1, %v707_v36  ;;  %v708_v47 = vmax.f32 %v700_v37, 0.0  ;;  %715 = vst.msk [vmem:[%s1178_s12 + $0x8] sm:$0xff] %vm713_vm1, %v706_v38  ;;  %v579_v48 = vadd.f32 %v880_v39, %v578_v35  ;;  %v883_v49 = vadd.f32 %v882_v44, %v881_v40 }
 0x11b   : > { %v703_v50 = vadd.f32 %v690_v46, %v647_v42  ;;  %v648_v55 = vmul.f32 %v1172_v53, %v590_v43 }
 0x11c   : > { %717 = vst.msk [vmem:[%s1178_s12 + $0x18] sm:$0xff] %vm713_vm1, %v708_v47  ;;  %v645_v54 = vmul.f32 %v1170_v52, %v579_v48  ;;  %v582_v57 = vadd.f32 %v883_v49, %v581_v45 }
 0x11d   : > { %v711_v58 = vmax.f32 %v703_v50, 0.0  ;;  %v704_v59 = vadd.f32 %v695_v56, %v648_v55 }
 0x11e   : > { %v701_v60 = vadd.f32 %v680_v21, %v645_v54  ;;  %v646_v61 = vmul.f32 %v1168_v51, %v582_v57 }
 0x11f   : > { %720 = vst.msk [vmem:[%s1178_s12 + $0x30] sm:$0xff] %vm713_vm1, %v711_v58  ;;  %v712_v62 = vmax.f32 %v704_v59, 0.0 }
 0x120   : > { %v709_v63 = vmax.f32 %v701_v60, 0.0  ;;  %v702_v0 = vadd.f32 %v685_v26, %v646_v61 }
 0x121   : > { %721 = vst.msk [vmem:[%s1178_s12 + $0x38] sm:$0xff] %vm713_vm1, %v712_v62 }
 0x122   : > { %718 = vst.msk [vmem:[%s1178_s12 + $0x20] sm:$0xff] %vm713_vm1, %v709_v63  ;;  %v710_v53 = vmax.f32 %v702_v0, 0.0 }
 0x124   : > { %719 = vst.msk [vmem:[%s1178_s12 + $0x28] sm:$0xff] %vm713_vm1, %v710_v53 }
 0x125 PF: > { %s14_s17 = sadd.s32 1, %s1008_s17   ;;  %s1213_s15 = smov %s1004_s16 }
 0x126   : > { %p11_p5 = scmp.ge.s32.totalorder %s14_s17, 4   ;;  %s1214_s16 = smov %s1216_s18 }
 0x128   :  { %13 = sbr.rel (!%p11_p5) target bundleno = 2 (0x2), region = 66 }

// kernel: unet_forward.26
= control target key start
LH: loop header
LB: loop body
LE: loop exit
PB: predicated region body
PF: predicated region fallthrough
CT: control target
= control target key end

     0   :  { %s1387_s15 = smov 0   ;;  %s1389_s16 = smov 0   ;;  %s1612_s0 = inlined_call_operand.vmem [shape: bf16[2,576,16], index: 0, kind: input, shape index: {}]   ;;  %s1613_s1 = inlined_call_operand.vmem [shape: bf16[64,576], index: 1, kind: input, shape index: {}]   ;;  %s1614_s2 = inlined_call_operand.vmem [shape: f32[64,1], index: 2, kind: input, shape index: {}]   ;;  %s1615_s3 = inlined_call_operand.vmem [shape: f32[64,1], index: 3, kind: input, shape index: {}]   ;;  %s1616_s4 = inlined_call_operand.vmem [shape: f32[2,64,16], index: 4, kind: output, shape index: {}]  }
   0x1   :  { %s1391_s17 = smov 0  }
   0x2 LB: > { %s26_s18 = sadd.s32 1, %s1355_s16  ;;  %p1066_p0 = scmp.ge.s32.totalorder %s1359_s17, 1  ;;  %s1359_s17 = sphi %s1391_s17, %s14_s17   ;;  %s1355_s16 = sphi %s1389_s16, %s1618_s16   ;;  %s1351_s15 = sphi %s1387_s15, %s1617_s15  }
   0x3   : > { %p28_p1 = scmp.ge.s32.totalorder %s26_s18, 2  ;;  %p181_p2 = scmp.lt.s32.totalorder %s1359_s17, 3 }
   0x5   : > { %s1620_s18 = smov (%p28_p1, %s26_s18), 0  ;;  %p182_p3 = pnand %p1066_p0, %p181_p2 }
   0x6   : > { %p213_p4 = scmp.lt.s32.totalorder (!%p182_p3), %s1351_s15, 1  ;;  %v1307_v0 = vld [vmem:[%s1613_s1 + $0x4] ss:$20 sps:$4 sm:$0xff] (!%p182_p3)   ;;  %v1310_v1 = vld [vmem:[%s1613_s1 + $0xc] ss:$20 sps:$4 sm:$0xff] (!%p182_p3)   ;;  %v1361_v2 = vmov (!%p182_p3), 0  }
   0x7   : > { %185 = sbr.rel (%p182_p3) target bundleno = 309 (0x135), region = 36  ;;  %1272 = vset.pattern.permute.xlu1 (!%p182_p3), %v1361_v2  ;;  %1271 = vset.pattern.permute.xlu0 (!%p182_p3), %v1361_v2  ;;  %v1305_v33 = vld [vmem:[%s1613_s1] ss:$20 sps:$4 sm:$0xff] (!%p182_p3)   ;;  %v1308_v35 = vld [vmem:[%s1613_s1 + $0x8] ss:$20 sps:$4 sm:$0xff] (!%p182_p3)   ;;  %vm642_vm0 = vcmask (!%p182_p3), 523264  }
   0x8   : > { %687 = vmatprep.mubr.bf16.mxu0 (!%p182_p3), %v1307_v0  ;;  %752 = vmatprep.mubr.bf16.mxu1 (!%p182_p3), %v1310_v1  ;;  %v1312_v38 = vld [vmem:[%s1613_s1 + $0x2c] ss:$20 sps:$4 sm:$0xff] (!%p182_p3)   ;;  %v1314_v39 = vld [vmem:[%s1613_s1 + $0x34] ss:$20 sps:$4 sm:$0xff] (!%p182_p3)   ;;  %v1317_v43 = vld [vmem:[%s1613_s1 + $0x30] ss:$20 sps:$4 sm:$0xff] (!%p182_p3)  }
   0x9   : > { %v1316_v42 = vld [vmem:[%s1613_s1 + $0x28] ss:$20 sps:$4 sm:$0xff] (!%p182_p3)   ;;  %v852_v47 = vld [vmem:[%s1614_s2 + $0x10] sm:$0xff] (!%p182_p3)  ;;  %v850_v48 = vld [vmem:[%s1614_s2] sm:$0xff] (!%p182_p3)  ;;  %vm970_vm1 = vcmask (!%p182_p3), 130048  }
   0xa   : > { %v1319_v44 = vld [vmem:[%s1613_s1 + $0x54] ss:$20 sps:$4 sm:$0xff] (!%p182_p3)   ;;  %v1321_v45 = vld [vmem:[%s1613_s1 + $0x5c] ss:$20 sps:$4 sm:$0xff] (!%p182_p3)   ;;  %870 = vperm.xlu1 (!%p182_p3), %1272, %v852_v47   ;;  %v1324_v50 = vld [vmem:[%s1613_s1 + $0x58] ss:$20 sps:$4 sm:$0xff] (!%p182_p3)   ;;  %860 = vperm.xlu0 (!%p182_p3), %1271, %v850_v48  }
   0xb   : > { %v1323_v49 = vld [vmem:[%s1613_s1 + $0x50] ss:$20 sps:$4 sm:$0xff] (!%p182_p3)   ;;  %v853_v52 = vld [vmem:[%s1614_s2 + $0x18] sm:$0xff] (!%p182_p3)  ;;  %v851_v54 = vld [vmem:[%s1614_s2 + $0x8] sm:$0xff] (!%p182_p3) }
   0xc   : > { %v1326_v51 = vld [vmem:[%s1613_s1 + $0x7c] ss:$20 sps:$4 sm:$0xff] (!%p182_p3)   ;;  %v1328_v53 = vld [vmem:[%s1613_s1 + $0x84] ss:$20 sps:$4 sm:$0xff] (!%p182_p3)   ;;  %v855_v55 = vld [vmem:[%s1614_s2 + $0x28] sm:$0xff] (!%p182_p3) }
   0xd   : > { %v854_v56 = vld [vmem:[%s1614_s2 + $0x20] sm:$0xff] (!%p182_p3)  ;;  %v1330_v57 = vld [vmem:[%s1613_s1 + $0x78] ss:$20 sps:$4 sm:$0xff] (!%p182_p3)   ;;  %v856_v62 = vld [vmem:[%s1614_s2 + $0x30] sm:$0xff] (!%p182_p3) }
   0xe   : > { %s1622_s15 = smov (!%p213_p4, %s1351_s15), 1  ;;  %875 = vperm.xlu1 %1272, %v853_v52   ;;  %865 = vperm.xlu0 %1271, %v851_v54   ;;  %v1331_v58 = vld [vmem:[%s1613_s1 + $0x80] ss:$20 sps:$4 sm:$0xff]   ;;  %v1333_v59 = vld [vmem:[%s1613_s1 + $0x10] ss:$20 sps:$4 sm:$0xff]   ;;  %v857_v60 = vld [vmem:[%s1614_s2 + $0x38] sm:$0xff] }
   0xf   : > { %s1245_s23 = smul.u32 288, %s1622_s15  ;;  %v1334_v61 = vld [vmem:[%s1613_s1 + $0x60] ss:$20 sps:$4 sm:$0xff]   ;;  %v907_v63 = vld [vmem:[%s1615_s3 + $0x8] sm:$0xff]  ;;  %s1132_s29 = sshll.u32 %s1622_s15, 6 }
  0x10   : > { %v906_v0 = vld [vmem:[%s1615_s3] sm:$0xff]  ;;  %v1335_v1 = vld [vmem:[%s1613_s1 + $0x38] ss:$20 sps:$4 sm:$0xff]   ;;  %v1336_v2 = vld [vmem:[%s1613_s1 + $0x88] ss:$20 sps:$4 sm:$0xff]   ;;  %s228_s5 = scalar_lea.vmem %s1616_s4, %s1132_s29 }
  0x11   : > { %s1417_s26 = scalar_lea.vmem %s1612_s0, %s1245_s23 }
  0x12   : > { %v1273_v3 = vld [vmem:[%s1417_s26 + $0x40] sm:$0xff]   ;;  %v1277_v7 = vld [vmem:[%s1417_s26 + $0x48] sm:$0xff]   ;;  %v1281_v11 = vld [vmem:[%s1417_s26 + $0x50] sm:$0xff]   ;;  %885 = vperm.xlu1 %1272, %v855_v55   ;;  %880 = vperm.xlu0 %1271, %v854_v56  }
  0x13   : > { %v1274_v4 = vld [vmem:[%s1417_s26 + $0xc0] sm:$0xff]   ;;  %1133 = vmatprep.subr.bf16.mxu0 %v1273_v3  ;;  %v1278_v8 = vld [vmem:[%s1417_s26 + $0xc8] sm:$0xff]   ;;  %v1282_v12 = vld [vmem:[%s1417_s26 + $0xd0] sm:$0xff]  }
  0x14   : > { %v1275_v5 = vld [vmem:[%s1417_s26] sm:$0xff]   ;;  %1173 = vmatprep.subr.bf16.mxu1 %v1274_v4  ;;  %v1279_v9 = vld [vmem:[%s1417_s26 + $0x8] sm:$0xff]   ;;  %v1283_v13 = vld [vmem:[%s1417_s26 + $0x10] sm:$0xff]  }
  0x15   : > { %v1276_v6 = vld [vmem:[%s1417_s26 + $0x80] sm:$0xff]   ;;  %1134 = vmatpush3.bf16.msra.mxu0 %v1275_v5  ;;  %v1280_v10 = vld [vmem:[%s1417_s26 + $0x88] sm:$0xff]   ;;  %v1284_v14 = vld [vmem:[%s1417_s26 + $0x90] sm:$0xff]  }
  0x16   : > { %1174 = vmatpush3.bf16.msra.mxu1 %v1276_v6  ;;  %1135 = vmatprep.subr.bf16.mxu0 %v1277_v7  ;;  %v1285_v15 = vld [vmem:[%s1417_s26 + $0x58] sm:$0xff]   ;;  %v1289_v19 = vld [vmem:[%s1417_s26 + $0x60] sm:$0xff]   ;;  %v1293_v23 = vld [vmem:[%s1417_s26 + $0x68] sm:$0xff]  }
  0x17   : > { %1175 = vmatprep.subr.bf16.mxu1 %v1278_v8  ;;  %v1286_v16 = vld [vmem:[%s1417_s26 + $0xd8] sm:$0xff]   ;;  %v1290_v20 = vld [vmem:[%s1417_s26 + $0xe0] sm:$0xff]   ;;  %v1294_v24 = vld [vmem:[%s1417_s26 + $0xe8] sm:$0xff]   ;;  %895 = vperm.xlu1 %1272, %v857_v60  }
  0x18   : > { %v1287_v17 = vld [vmem:[%s1417_s26 + $0x18] sm:$0xff]   ;;  %v1291_v21 = vld [vmem:[%s1417_s26 + $0x20] sm:$0xff]   ;;  %v1295_v25 = vld [vmem:[%s1417_s26 + $0x28] sm:$0xff]   ;;  %890 = vperm.xlu0 %1271, %v856_v62  }
  0x19   : > { %1136 = vmatpush3.bf16.msra.mxu0 %v1279_v9  ;;  %v1288_v18 = vld [vmem:[%s1417_s26 + $0x98] sm:$0xff]   ;;  %v1292_v22 = vld [vmem:[%s1417_s26 + $0xa0] sm:$0xff]   ;;  %v1296_v26 = vld [vmem:[%s1417_s26 + $0xa8] sm:$0xff]  }
  0x1a   : > { %1176 = vmatpush3.bf16.msra.mxu1 %v1280_v10  ;;  %1137 = vmatprep.subr.bf16.mxu0 %v1281_v11  ;;  %v1297_v27 = vld [vmem:[%s1417_s26 + $0x70] sm:$0xff]   ;;  %v1301_v31 = vld [vmem:[%s1417_s26 + $0x78] sm:$0xff]   ;;  %v1311_v37 = vld [vmem:[%s1417_s26 + $0x100] sm:$0xff]  }
  0x1b   : > { %1177 = vmatprep.subr.bf16.mxu1 %v1282_v12  ;;  %v1298_v28 = vld [vmem:[%s1417_s26 + $0xf0] sm:$0xff]   ;;  %v1302_v32 = vld [vmem:[%s1417_s26 + $0xf8] sm:$0xff]   ;;  %v1318_v40 = vld [vmem:[%s1417_s26 + $0x108] sm:$0xff]   ;;  %921 = vperm.xlu1 %1272, %v907_v63  }
  0x1c   : > { %v1299_v29 = vld [vmem:[%s1417_s26 + $0x30] sm:$0xff]   ;;  %v1303_v34 = vld [vmem:[%s1417_s26 + $0x38] sm:$0xff]   ;;  %916 = vperm.xlu0 %1271, %v906_v0   ;;  %v911_v5 = vld [vmem:[%s1615_s3 + $0x28] sm:$0xff] }
  0x1d   : > { %1138 = vmatpush3.bf16.msra.mxu0 %v1283_v13  ;;  %v1300_v30 = vld [vmem:[%s1417_s26 + $0xb0] sm:$0xff]   ;;  %v1304_v36 = vld [vmem:[%s1417_s26 + $0xb8] sm:$0xff]   ;;  %v910_v6 = vld [vmem:[%s1615_s3 + $0x20] sm:$0xff] }
  0x1e   : > { %1178 = vmatpush3.bf16.msra.mxu1 %v1284_v14  ;;  %1139 = vmatprep.subr.bf16.mxu0 %v1285_v15  ;;  %v1325_v41 = vld [vmem:[%s1417_s26 + $0x110] sm:$0xff]   ;;  %v1332_v46 = vld [vmem:[%s1417_s26 + $0x118] sm:$0xff]  }
  0x1f   : > { %1179 = vmatprep.subr.bf16.mxu1 %v1286_v16  ;;  %v909_v3 = vld [vmem:[%s1615_s3 + $0x18] sm:$0xff]  ;;  %v908_v4 = vld [vmem:[%s1615_s3 + $0x10] sm:$0xff] }
  0x20   : > { %931 = vperm.xlu1 %1272, %v909_v3   ;;  %926 = vperm.xlu0 %1271, %v908_v4   ;;  %v913_v7 = vld [vmem:[%s1615_s3 + $0x38] sm:$0xff]  ;;  %v912_v8 = vld [vmem:[%s1615_s3 + $0x30] sm:$0xff] }
  0x21   : > { %1140 = vmatpush3.bf16.msra.mxu0 %v1287_v17 }
  0x22   : > { %1180 = vmatpush3.bf16.msra.mxu1 %v1288_v18  ;;  %1141 = vmatprep.subr.bf16.mxu0 %v1289_v19 }
  0x23   : > { %1181 = vmatprep.subr.bf16.mxu1 %v1290_v20 }
  0x24   : > { %941 = vperm.xlu1 %1272, %v911_v5   ;;  %936 = vperm.xlu0 %1271, %v910_v6  }
  0x25   : > { %1142 = vmatpush3.bf16.msra.mxu0 %v1291_v21 }
  0x26   : > { %1182 = vmatpush3.bf16.msra.mxu1 %v1292_v22  ;;  %1143 = vmatprep.subr.bf16.mxu0 %v1293_v23 }
  0x27   : > { %1183 = vmatprep.subr.bf16.mxu1 %v1294_v24 }
  0x28   : > { %951 = vperm.xlu1 %1272, %v913_v7   ;;  %946 = vperm.xlu0 %1271, %v912_v8  }
  0x29   : > { %1144 = vmatpush3.bf16.msra.mxu0 %v1295_v25 }
  0x2a   : > { %1184 = vmatpush3.bf16.msra.mxu1 %v1296_v26  ;;  %1145 = vmatprep.subr.bf16.mxu0 %v1297_v27 }
  0x2b   : > { %1185 = vmatprep.subr.bf16.mxu1 %v1298_v28 }
  0x2d   : > { %1146 = vmatpush3.bf16.msra.mxu0 %v1299_v29 }
  0x2e   : > { %1186 = vmatpush3.bf16.msra.mxu1 %v1300_v30  ;;  %1147 = vmatprep.subr.bf16.mxu0 %v1301_v31 }
  0x2f   : > { %1187 = vmatprep.subr.bf16.mxu1 %v1302_v32 }
  0x31   : > { %1148 = vmatpush3.bf16.msra.mxu0 %v1303_v34 }
  0x32   : > { %1188 = vmatpush3.bf16.msra.mxu1 %v1304_v36  ;;  %1221 = vmatprep.subr.bf16.mxu0 %v1311_v37 }
  0x33   : > { %1237 = vmatprep.subr.bf16.mxu1 %v1311_v37 }
  0x34   : > { %688 = vmatmul.mubr.bf16.vlgmr.msra.gmra.mrb[0].mxu0 %v1305_v33 }
  0x35   : > { %753 = vmatmul.mubr.bf16.vlgmr.msra.gmra.mrb[0].mxu1 %v1308_v35  ;;  %1222 = vmatpush3.bf16.msra.mxu0 %v1311_v37 }
  0x36   : > { %1241 = vmatpush3.bf16.msra.mxu1 %v1311_v37  ;;  %695 = vmatprep.mubr.bf16.mxu0 %v1312_v38 }
  0x37   : > { %760 = vmatprep.mubr.bf16.mxu1 %v1314_v39  ;;  %1223 = vmatprep.subr.bf16.mxu0 %v1318_v40 }
  0x38   : > { %1238 = vmatprep.subr.bf16.mxu1 %v1318_v40 }
  0x39   : > { %1224 = vmatpush3.bf16.msra.mxu0 %v1318_v40 }
  0x3a   : > { %1242 = vmatpush3.bf16.msra.mxu1 %v1318_v40  ;;  %1225 = vmatprep.subr.bf16.mxu0 %v1325_v41 }
  0x3b   : > { %1239 = vmatprep.subr.bf16.mxu1 %v1325_v41 }
  0x3c   : > { %696 = vmatmul.mubr.bf16.gmra.mrb[4].mxu0 %v1316_v42 }
  0x3d   : > { %761 = vmatmul.mubr.bf16.gmra.mrb[4].mxu1 %v1317_v43  ;;  %703 = vmatprep.mubr.bf16.mxu0 %v1319_v44 }
  0x3e   : > { %768 = vmatprep.mubr.bf16.mxu1 %v1321_v45  ;;  %1226 = vmatpush3.bf16.msra.mxu0 %v1325_v41 }
  0x3f   : > { %1243 = vmatpush3.bf16.msra.mxu1 %v1325_v41  ;;  %1227 = vmatprep.subr.bf16.mxu0 %v1332_v46 }
  0x40   : > { %1240 = vmatprep.subr.bf16.mxu1 %v1332_v46 }
  0x42   : > { %1228 = vmatpush3.bf16.msra.mxu0 %v1332_v46 }
  0x43   : > { %1244 = vmatpush3.bf16.msra.mxu1 %v1332_v46 }
  0x44   : > { %704 = vmatmul.mubr.bf16.gmra.mrb[8].mxu0 %v1323_v49 }
  0x45   : > { %769 = vmatmul.mubr.bf16.gmra.mrb[8].mxu1 %v1324_v50  ;;  %711 = vmatprep.mubr.bf16.mxu0 %v1326_v51 }
  0x46   : > { %776 = vmatprep.mubr.bf16.mxu1 %v1328_v53 }
  0x4c   : > { %712 = vmatmul.mubr.bf16.gmra.mrb[12].mxu0 %v1330_v57 }
  0x4d   : > { %777 = vmatmul.mubr.bf16.gmra.mrb[12].mxu1 %v1331_v58  ;;  %1229 = vmatprep.mubr.msk.bf16.mxu0 %vm642_vm0, %v1333_v59 }
  0x4e   : > { %1233 = vmatprep.mubr.msk.bf16.mxu1 %vm642_vm0, %v1334_v61 }
  0x54   : > { %1230 = vmatmul.mubr.msk.bf16.vlgmr.msra.gmra.mrb[16].mxu0 %vm642_vm0, %v1335_v1 }
  0x55   : > { %1234 = vmatmul.mubr.msk.bf16.vlgmr.msra.gmra.mrb[16].mxu1 %vm642_vm0, %v1336_v2 }
  0x89   : > { %v1561_v9 = vpop.permute.xlu1 %870  ;;  %v1563_v10 = vpop.permute.xlu0 %860 }
  0x8d   : > { %v1565_v11 = vpop.permute.xlu1 %875  ;;  %v1567_v12 = vpop.permute.xlu0 %865 }
  0x91   : > { %v1569_v13 = vpop.permute.xlu1 %885  ;;  %v1571_v14 = vpop.permute.xlu0 %880 }
  0x96   : > { %v1573_v28 = vpop.permute.xlu1 %895 }
  0x97   : > { %v1577_v30 = vpop.permute.xlu0 %890 }
  0x9a   : > { %v1579_v44 = vpop.permute.xlu1 %921 }
  0x9b   : > { %v917_v46 = vpop.permute.xlu0 %916 }
  0x9f   : > { %v932_v60 = vpop.permute.xlu1 %931  ;;  %v927_v62 = vpop.permute.xlu0 %926 }
 0x107   : > { %v1149_v15 = vpop.f32.mrb[0].mxu0 }
 0x108   : > { %v1189_v16 = vpop.f32.mrb[0].mxu1  ;;  %v1150_v17 = vpop.f32.mrb[1].mxu0 }
 0x109   : > { %v1151_v18 = vadd.f32 %v1150_v17, %v1149_v15  ;;  %v1190_v19 = vpop.f32.mrb[1].mxu1  ;;  %v1152_v20 = vpop.f32.mrb[2].mxu0 }
 0x10a   : > { %v1191_v21 = vadd.f32 %v1190_v19, %v1189_v16  ;;  %v1192_v22 = vpop.f32.mrb[2].mxu1  ;;  %v1153_v23 = vpop.f32.mrb[3].mxu0 }
 0x10b   : > { %v1154_v24 = vadd.f32 %v1153_v23, %v1152_v20  ;;  %v1193_v25 = vpop.f32.mrb[3].mxu1  ;;  %v942_v20 = vpop.permute.xlu1 %941 }
 0x10c   : > { %v1194_v26 = vadd.f32 %v1193_v25, %v1192_v22  ;;  %v755_v27 = vadd.f32 %v1191_v21, %v1151_v18  ;;  %v937_v18 = vpop.permute.xlu0 %936 }
 0x10e   : > { %v1575_v29 = vadd.f32 %v1194_v26, %v1154_v24 }
 0x10f   : > { %v1155_v31 = vpop.f32.mrb[4].mxu0 }
 0x110   : > { %v1195_v32 = vpop.f32.mrb[4].mxu1  ;;  %v1156_v33 = vpop.f32.mrb[5].mxu0 }
 0x111   : > { %v1157_v34 = vadd.f32 %v1156_v33, %v1155_v31  ;;  %v1196_v35 = vpop.f32.mrb[5].mxu1  ;;  %v1158_v36 = vpop.f32.mrb[6].mxu0 }
 0x112   : > { %v1197_v37 = vadd.f32 %v1196_v35, %v1195_v32  ;;  %v1198_v38 = vpop.f32.mrb[6].mxu1  ;;  %v1159_v39 = vpop.f32.mrb[7].mxu0 }
 0x113   : > { %v1160_v40 = vadd.f32 %v1159_v39, %v1158_v36  ;;  %v1199_v41 = vpop.f32.mrb[7].mxu1 }
 0x114   : > { %v1200_v42 = vadd.f32 %v1199_v41, %v1198_v38  ;;  %v763_v43 = vadd.f32 %v1197_v37, %v1157_v34 }
 0x116   : > { %v766_v45 = vadd.f32 %v1200_v42, %v1160_v40 }
 0x117   : > { %v1161_v47 = vpop.f32.mrb[8].mxu0 }
 0x118   : > { %v1201_v48 = vpop.f32.mrb[8].mxu1  ;;  %v1162_v49 = vpop.f32.mrb[9].mxu0 }
 0x119   : > { %v1163_v50 = vadd.f32 %v1162_v49, %v1161_v47  ;;  %v1202_v51 = vpop.f32.mrb[9].mxu1  ;;  %v1164_v52 = vpop.f32.mrb[10].mxu0 }
 0x11a   : > { %v1203_v53 = vadd.f32 %v1202_v51, %v1201_v48  ;;  %v1204_v54 = vpop.f32.mrb[10].mxu1  ;;  %v1165_v55 = vpop.f32.mrb[11].mxu0 }
 0x11b   : > { %v1166_v56 = vadd.f32 %v1165_v55, %v1164_v52  ;;  %v1205_v57 = vpop.f32.mrb[11].mxu1 }
 0x11c   : > { %v1206_v58 = vadd.f32 %v1205_v57, %v1204_v54  ;;  %v771_v59 = vadd.f32 %v1203_v53, %v1163_v50  ;;  %v952_v50 = vpop.permute.xlu1 %951 }
 0x11e   : > { %v774_v61 = vadd.f32 %v1206_v58, %v1166_v56 }
 0x11f   : > { %v1167_v63 = vpop.f32.mrb[12].mxu0 }
 0x120   : > { %v1207_v0 = vpop.f32.mrb[12].mxu1  ;;  %v1168_v1 = vpop.f32.mrb[13].mxu0 }
 0x121   : > { %v1169_v2 = vadd.f32 %v1168_v1, %v1167_v63  ;;  %v1208_v3 = vpop.f32.mrb[13].mxu1  ;;  %v1170_v4 = vpop.f32.mrb[14].mxu0 }
 0x122   : > { %v1209_v5 = vadd.f32 %v1208_v3, %v1207_v0  ;;  %v1210_v6 = vpop.f32.mrb[14].mxu1  ;;  %v1171_v7 = vpop.f32.mrb[15].mxu0 }
 0x123   : > { %v1172_v8 = vadd.f32 %v1171_v7, %v1170_v4  ;;  %v1211_v15 = vpop.f32.mrb[15].mxu1 }
 0x124   : > { %v1212_v16 = vadd.f32 %v1211_v15, %v1210_v6  ;;  %v779_v17 = vadd.f32 %v1209_v5, %v1169_v2 }
 0x126   : > { %v782_v19 = vadd.f32 %v1212_v16, %v1172_v8 }
 0x127   : > { %v1231_v21 = vpop.f32.mrb[16].mxu0 }
 0x128   : > { %v828_v22 = vadd.f32 %v1231_v21, %v763_v43  ;;  %v1235_v23 = vpop.f32.mrb[16].mxu1  ;;  %v819_v24 = vpop.f32.mrb[17].mxu0 }
 0x129   : > { %v844_v25 = vadd.f32 %v1235_v23, %v779_v17  ;;  %v820_v26 = vadd.f32 %v819_v24, %v755_v27  ;;  %v835_v31 = vpop.f32.mrb[17].mxu1  ;;  %v1232_v32 = vpop.f32.mrb[18].mxu0 }
 0x12a   : > { %v900_v33 = vmul.f32 %v1561_v9, %v828_v22  ;;  %v836_v34 = vadd.f32 %v835_v31, %v771_v59  ;;  %v831_v35 = vadd.f32 %v1232_v32, %v766_v45  ;;  %v1236_v36 = vpop.f32.mrb[18].mxu1  ;;  %v822_v37 = vpop.f32.mrb[19].mxu0 }
 0x12b   : > { %v904_v38 = vmul.f32 %v1577_v30, %v844_v25  ;;  %v898_v39 = vmul.f32 %v1563_v10, %v820_v26  ;;  %v847_v40 = vadd.f32 %v1236_v36, %v782_v19  ;;  %v823_v41 = vadd.f32 %v822_v37, %v1575_v29  ;;  %v838_v42 = vpop.f32.mrb[19].mxu1  ;;  %v947_v43 = vpop.permute.xlu0 %946 }
 0x12c   : > { %v956_v27 = vadd.f32 %v927_v62, %v900_v33  ;;  %v902_v47 = vmul.f32 %v1571_v14, %v836_v34  ;;  %v901_v48 = vmul.f32 %v1565_v11, %v831_v35  ;;  %v839_v9 = vadd.f32 %v838_v42, %v774_v61 }
 0x12d   : > { %v960_v45 = vadd.f32 %v947_v43, %v904_v38  ;;  %v954_v49 = vadd.f32 %v917_v46, %v898_v39  ;;  %v905_v30 = vmul.f32 %v1573_v28, %v847_v40  ;;  %v899_v10 = vmul.f32 %v1567_v12, %v823_v41 }
 0x12e   : > { %v964_v29 = vmax.f32 %v956_v27, 0.0  ;;  %v958_v51 = vadd.f32 %v937_v18, %v902_v47  ;;  %v957_v52 = vadd.f32 %v932_v60, %v901_v48  ;;  %v903_v53 = vmul.f32 %v1569_v13, %v839_v9 }
 0x12f   : > { %v968_v14 = vmax.f32 %v960_v45, 0.0  ;;  %v962_v54 = vmax.f32 %v954_v49, 0.0  ;;  %v961_v11 = vadd.f32 %v952_v50, %v905_v30  ;;  %v955_v55 = vadd.f32 %v1579_v44, %v899_v10 }
 0x130   : > { %973 = vst.msk [vmem:[%s228_s5 + $0x10] sm:$0xff] %vm970_vm1, %v964_v29  ;;  %v966_v56 = vmax.f32 %v958_v51, 0.0  ;;  %v965_v57 = vmax.f32 %v957_v52, 0.0  ;;  %v959_v46 = vadd.f32 %v942_v20, %v903_v53 }
 0x131   : > { %977 = vst.msk [vmem:[%s228_s5 + $0x30] sm:$0xff] %vm970_vm1, %v968_v14  ;;  %971 = vst.msk [vmem:[%s228_s5] sm:$0xff] %vm970_vm1, %v962_v54  ;;  %v969_v12 = vmax.f32 %v961_v11, 0.0  ;;  %v963_v28 = vmax.f32 %v955_v55, 0.0 }
 0x132   : > { %975 = vst.msk [vmem:[%s228_s5 + $0x20] sm:$0xff] %vm970_vm1, %v966_v56  ;;  %974 = vst.msk [vmem:[%s228_s5 + $0x18] sm:$0xff] %vm970_vm1, %v965_v57  ;;  %v967_v13 = vmax.f32 %v959_v46, 0.0 }
 0x133   : > { %978 = vst.msk [vmem:[%s228_s5 + $0x38] sm:$0xff] %vm970_vm1, %v969_v12  ;;  %972 = vst.msk [vmem:[%s228_s5 + $0x8] sm:$0xff] %vm970_vm1, %v963_v28 }
 0x134   : > { %976 = vst.msk [vmem:[%s228_s5 + $0x28] sm:$0xff] %vm970_vm1, %v967_v13 }
 0x135 PF: > { %s14_s17 = sadd.s32 1, %s1359_s17   ;;  %s1617_s15 = smov %s1355_s16 }
 0x136   : > { %p11_p5 = scmp.ge.s32.totalorder %s14_s17, 4   ;;  %s1618_s16 = smov %s1620_s18 }
 0x138   :  { %13 = sbr.rel (!%p11_p5) target bundleno = 2 (0x2), region = 66 }

// kernel: unet_forward.27
= control target key start
LH: loop header
LB: loop body
LE: loop exit
PB: predicated region body
PF: predicated region fallthrough
CT: control target
= control target key end

     0   :  { %s1387_s15 = smov 0   ;;  %s1389_s16 = smov 0   ;;  %s1612_s0 = inlined_call_operand.vmem [shape: bf16[2,576,4], index: 0, kind: input, shape index: {}]   ;;  %s1613_s1 = inlined_call_operand.vmem [shape: bf16[64,576], index: 1, kind: input, shape index: {}]   ;;  %s1614_s2 = inlined_call_operand.vmem [shape: f32[64,1], index: 2, kind: input, shape index: {}]   ;;  %s1615_s3 = inlined_call_operand.vmem [shape: f32[64,1], index: 3, kind: input, shape index: {}]   ;;  %s1616_s4 = inlined_call_operand.vmem [shape: f32[2,64,4], index: 4, kind: output, shape index: {}]  }
   0x1   :  { %s1391_s17 = smov 0  }
   0x2 LB: > { %s26_s18 = sadd.s32 1, %s1355_s16  ;;  %p1066_p0 = scmp.ge.s32.totalorder %s1359_s17, 1  ;;  %s1359_s17 = sphi %s1391_s17, %s14_s17   ;;  %s1355_s16 = sphi %s1389_s16, %s1618_s16   ;;  %s1351_s15 = sphi %s1387_s15, %s1617_s15  }
   0x3   : > { %p28_p1 = scmp.ge.s32.totalorder %s26_s18, 2  ;;  %p181_p2 = scmp.lt.s32.totalorder %s1359_s17, 3 }
   0x5   : > { %s1620_s18 = smov (%p28_p1, %s26_s18), 0  ;;  %p182_p3 = pnand %p1066_p0, %p181_p2 }
   0x6   : > { %p213_p4 = scmp.lt.s32.totalorder (!%p182_p3), %s1351_s15, 1  ;;  %v1307_v0 = vld [vmem:[%s1613_s1 + $0x4] ss:$20 sps:$4 sm:$0xff] (!%p182_p3)   ;;  %v1310_v1 = vld [vmem:[%s1613_s1 + $0xc] ss:$20 sps:$4 sm:$0xff] (!%p182_p3)   ;;  %v1361_v2 = vmov (!%p182_p3), 0  }
   0x7   : > { %185 = sbr.rel (%p182_p3) target bundleno = 309 (0x135), region = 36  ;;  %1272 = vset.pattern.permute.xlu1 (!%p182_p3), %v1361_v2  ;;  %1271 = vset.pattern.permute.xlu0 (!%p182_p3), %v1361_v2  ;;  %v1305_v33 = vld [vmem:[%s1613_s1] ss:$20 sps:$4 sm:$0xff] (!%p182_p3)   ;;  %v1308_v35 = vld [vmem:[%s1613_s1 + $0x8] ss:$20 sps:$4 sm:$0xff] (!%p182_p3)   ;;  %vm642_vm0 = vcmask (!%p182_p3), 523264  }
   0x8   : > { %687 = vmatprep.mubr.bf16.mxu0 (!%p182_p3), %v1307_v0  ;;  %752 = vmatprep.mubr.bf16.mxu1 (!%p182_p3), %v1310_v1  ;;  %v1312_v38 = vld [vmem:[%s1613_s1 + $0x2c] ss:$20 sps:$4 sm:$0xff] (!%p182_p3)   ;;  %v1314_v39 = vld [vmem:[%s1613_s1 + $0x34] ss:$20 sps:$4 sm:$0xff] (!%p182_p3)   ;;  %v1317_v43 = vld [vmem:[%s1613_s1 + $0x30] ss:$20 sps:$4 sm:$0xff] (!%p182_p3)  }
   0x9   : > { %v1316_v42 = vld [vmem:[%s1613_s1 + $0x28] ss:$20 sps:$4 sm:$0xff] (!%p182_p3)   ;;  %v852_v47 = vld [vmem:[%s1614_s2 + $0x10] sm:$0xff] (!%p182_p3)  ;;  %v850_v48 = vld [vmem:[%s1614_s2] sm:$0xff] (!%p182_p3)  ;;  %vm970_vm1 = vcmask (!%p182_p3), 31744  }
   0xa   : > { %v1319_v44 = vld [vmem:[%s1613_s1 + $0x54] ss:$20 sps:$4 sm:$0xff] (!%p182_p3)   ;;  %v1321_v45 = vld [vmem:[%s1613_s1 + $0x5c] ss:$20 sps:$4 sm:$0xff] (!%p182_p3)   ;;  %870 = vperm.xlu1 (!%p182_p3), %1272, %v852_v47   ;;  %v1324_v50 = vld [vmem:[%s1613_s1 + $0x58] ss:$20 sps:$4 sm:$0xff] (!%p182_p3)   ;;  %860 = vperm.xlu0 (!%p182_p3), %1271, %v850_v48  }
   0xb   : > { %v1323_v49 = vld [vmem:[%s1613_s1 + $0x50] ss:$20 sps:$4 sm:$0xff] (!%p182_p3)   ;;  %v853_v52 = vld [vmem:[%s1614_s2 + $0x18] sm:$0xff] (!%p182_p3)  ;;  %v851_v54 = vld [vmem:[%s1614_s2 + $0x8] sm:$0xff] (!%p182_p3) }
   0xc   : > { %v1326_v51 = vld [vmem:[%s1613_s1 + $0x7c] ss:$20 sps:$4 sm:$0xff] (!%p182_p3)   ;;  %v1328_v53 = vld [vmem:[%s1613_s1 + $0x84] ss:$20 sps:$4 sm:$0xff] (!%p182_p3)   ;;  %v855_v55 = vld [vmem:[%s1614_s2 + $0x28] sm:$0xff] (!%p182_p3) }
   0xd   : > { %v854_v56 = vld [vmem:[%s1614_s2 + $0x20] sm:$0xff] (!%p182_p3)  ;;  %v1330_v57 = vld [vmem:[%s1613_s1 + $0x78] ss:$20 sps:$4 sm:$0xff] (!%p182_p3)   ;;  %v856_v62 = vld [vmem:[%s1614_s2 + $0x30] sm:$0xff] (!%p182_p3) }
   0xe   : > { %s1622_s15 = smov (!%p213_p4, %s1351_s15), 1  ;;  %875 = vperm.xlu1 %1272, %v853_v52   ;;  %865 = vperm.xlu0 %1271, %v851_v54   ;;  %v1331_v58 = vld [vmem:[%s1613_s1 + $0x80] ss:$20 sps:$4 sm:$0xff]   ;;  %v1333_v59 = vld [vmem:[%s1613_s1 + $0x10] ss:$20 sps:$4 sm:$0xff]   ;;  %v857_v60 = vld [vmem:[%s1614_s2 + $0x38] sm:$0xff] }
   0xf   : > { %s1245_s23 = smul.u32 288, %s1622_s15  ;;  %v1334_v61 = vld [vmem:[%s1613_s1 + $0x60] ss:$20 sps:$4 sm:$0xff]   ;;  %v907_v63 = vld [vmem:[%s1615_s3 + $0x8] sm:$0xff]  ;;  %s1132_s29 = sshll.u32 %s1622_s15, 6 }
  0x10   : > { %v906_v0 = vld [vmem:[%s1615_s3] sm:$0xff]  ;;  %v1335_v1 = vld [vmem:[%s1613_s1 + $0x38] ss:$20 sps:$4 sm:$0xff]   ;;  %v1336_v2 = vld [vmem:[%s1613_s1 + $0x88] ss:$20 sps:$4 sm:$0xff]   ;;  %s228_s5 = scalar_lea.vmem %s1616_s4, %s1132_s29 }
  0x11   : > { %s1417_s26 = scalar_lea.vmem %s1612_s0, %s1245_s23 }
  0x12   : > { %v1273_v3 = vld [vmem:[%s1417_s26 + $0x40] sm:$0xff]   ;;  %v1277_v7 = vld [vmem:[%s1417_s26 + $0x48] sm:$0xff]   ;;  %v1281_v11 = vld [vmem:[%s1417_s26 + $0x50] sm:$0xff]   ;;  %885 = vperm.xlu1 %1272, %v855_v55   ;;  %880 = vperm.xlu0 %1271, %v854_v56  }
  0x13   : > { %v1274_v4 = vld [vmem:[%s1417_s26 + $0xc0] sm:$0xff]   ;;  %1133 = vmatprep.subr.bf16.mxu0 %v1273_v3  ;;  %v1278_v8 = vld [vmem:[%s1417_s26 + $0xc8] sm:$0xff]   ;;  %v1282_v12 = vld [vmem:[%s1417_s26 + $0xd0] sm:$0xff]  }
  0x14   : > { %v1275_v5 = vld [vmem:[%s1417_s26] sm:$0xff]   ;;  %1173 = vmatprep.subr.bf16.mxu1 %v1274_v4  ;;  %v1279_v9 = vld [vmem:[%s1417_s26 + $0x8] sm:$0xff]   ;;  %v1283_v13 = vld [vmem:[%s1417_s26 + $0x10] sm:$0xff]  }
  0x15   : > { %v1276_v6 = vld [vmem:[%s1417_s26 + $0x80] sm:$0xff]   ;;  %1134 = vmatpush3.bf16.msra.mxu0 %v1275_v5  ;;  %v1280_v10 = vld [vmem:[%s1417_s26 + $0x88] sm:$0xff]   ;;  %v1284_v14 = vld [vmem:[%s1417_s26 + $0x90] sm:$0xff]  }
  0x16   : > { %1174 = vmatpush3.bf16.msra.mxu1 %v1276_v6  ;;  %1135 = vmatprep.subr.bf16.mxu0 %v1277_v7  ;;  %v1285_v15 = vld [vmem:[%s1417_s26 + $0x58] sm:$0xff]   ;;  %v1289_v19 = vld [vmem:[%s1417_s26 + $0x60] sm:$0xff]   ;;  %v1293_v23 = vld [vmem:[%s1417_s26 + $0x68] sm:$0xff]  }
  0x17   : > { %1175 = vmatprep.subr.bf16.mxu1 %v1278_v8  ;;  %v1286_v16 = vld [vmem:[%s1417_s26 + $0xd8] sm:$0xff]   ;;  %v1290_v20 = vld [vmem:[%s1417_s26 + $0xe0] sm:$0xff]   ;;  %v1294_v24 = vld [vmem:[%s1417_s26 + $0xe8] sm:$0xff]   ;;  %895 = vperm.xlu1 %1272, %v857_v60  }
  0x18   : > { %v1287_v17 = vld [vmem:[%s1417_s26 + $0x18] sm:$0xff]   ;;  %v1291_v21 = vld [vmem:[%s1417_s26 + $0x20] sm:$0xff]   ;;  %v1295_v25 = vld [vmem:[%s1417_s26 + $0x28] sm:$0xff]   ;;  %890 = vperm.xlu0 %1271, %v856_v62  }
  0x19   : > { %1136 = vmatpush3.bf16.msra.mxu0 %v1279_v9  ;;  %v1288_v18 = vld [vmem:[%s1417_s26 + $0x98] sm:$0xff]   ;;  %v1292_v22 = vld [vmem:[%s1417_s26 + $0xa0] sm:$0xff]   ;;  %v1296_v26 = vld [vmem:[%s1417_s26 + $0xa8] sm:$0xff]  }
  0x1a   : > { %1176 = vmatpush3.bf16.msra.mxu1 %v1280_v10  ;;  %1137 = vmatprep.subr.bf16.mxu0 %v1281_v11  ;;  %v1297_v27 = vld [vmem:[%s1417_s26 + $0x70] sm:$0xff]   ;;  %v1301_v31 = vld [vmem:[%s1417_s26 + $0x78] sm:$0xff]   ;;  %v1311_v37 = vld [vmem:[%s1417_s26 + $0x100] sm:$0xff]  }
  0x1b   : > { %1177 = vmatprep.subr.bf16.mxu1 %v1282_v12  ;;  %v1298_v28 = vld [vmem:[%s1417_s26 + $0xf0] sm:$0xff]   ;;  %v1302_v32 = vld [vmem:[%s1417_s26 + $0xf8] sm:$0xff]   ;;  %v1318_v40 = vld [vmem:[%s1417_s26 + $0x108] sm:$0xff]   ;;  %921 = vperm.xlu1 %1272, %v907_v63  }
  0x1c   : > { %v1299_v29 = vld [vmem:[%s1417_s26 + $0x30] sm:$0xff]   ;;  %v1303_v34 = vld [vmem:[%s1417_s26 + $0x38] sm:$0xff]   ;;  %916 = vperm.xlu0 %1271, %v906_v0   ;;  %v911_v5 = vld [vmem:[%s1615_s3 + $0x28] sm:$0xff] }
  0x1d   : > { %1138 = vmatpush3.bf16.msra.mxu0 %v1283_v13  ;;  %v1300_v30 = vld [vmem:[%s1417_s26 + $0xb0] sm:$0xff]   ;;  %v1304_v36 = vld [vmem:[%s1417_s26 + $0xb8] sm:$0xff]   ;;  %v910_v6 = vld [vmem:[%s1615_s3 + $0x20] sm:$0xff] }
  0x1e   : > { %1178 = vmatpush3.bf16.msra.mxu1 %v1284_v14  ;;  %1139 = vmatprep.subr.bf16.mxu0 %v1285_v15  ;;  %v1325_v41 = vld [vmem:[%s1417_s26 + $0x110] sm:$0xff]   ;;  %v1332_v46 = vld [vmem:[%s1417_s26 + $0x118] sm:$0xff]  }
  0x1f   : > { %1179 = vmatprep.subr.bf16.mxu1 %v1286_v16  ;;  %v909_v3 = vld [vmem:[%s1615_s3 + $0x18] sm:$0xff]  ;;  %v908_v4 = vld [vmem:[%s1615_s3 + $0x10] sm:$0xff] }
  0x20   : > { %931 = vperm.xlu1 %1272, %v909_v3   ;;  %926 = vperm.xlu0 %1271, %v908_v4   ;;  %v913_v7 = vld [vmem:[%s1615_s3 + $0x38] sm:$0xff]  ;;  %v912_v8 = vld [vmem:[%s1615_s3 + $0x30] sm:$0xff] }
  0x21   : > { %1140 = vmatpush3.bf16.msra.mxu0 %v1287_v17 }
  0x22   : > { %1180 = vmatpush3.bf16.msra.mxu1 %v1288_v18  ;;  %1141 = vmatprep.subr.bf16.mxu0 %v1289_v19 }
  0x23   : > { %1181 = vmatprep.subr.bf16.mxu1 %v1290_v20 }
  0x24   : > { %941 = vperm.xlu1 %1272, %v911_v5   ;;  %936 = vperm.xlu0 %1271, %v910_v6  }
  0x25   : > { %1142 = vmatpush3.bf16.msra.mxu0 %v1291_v21 }
  0x26   : > { %1182 = vmatpush3.bf16.msra.mxu1 %v1292_v22  ;;  %1143 = vmatprep.subr.bf16.mxu0 %v1293_v23 }
  0x27   : > { %1183 = vmatprep.subr.bf16.mxu1 %v1294_v24 }
  0x28   : > { %951 = vperm.xlu1 %1272, %v913_v7   ;;  %946 = vperm.xlu0 %1271, %v912_v8  }
  0x29   : > { %1144 = vmatpush3.bf16.msra.mxu0 %v1295_v25 }
  0x2a   : > { %1184 = vmatpush3.bf16.msra.mxu1 %v1296_v26  ;;  %1145 = vmatprep.subr.bf16.mxu0 %v1297_v27 }
  0x2b   : > { %1185 = vmatprep.subr.bf16.mxu1 %v1298_v28 }
  0x2d   : > { %1146 = vmatpush3.bf16.msra.mxu0 %v1299_v29 }
  0x2e   : > { %1186 = vmatpush3.bf16.msra.mxu1 %v1300_v30  ;;  %1147 = vmatprep.subr.bf16.mxu0 %v1301_v31 }
  0x2f   : > { %1187 = vmatprep.subr.bf16.mxu1 %v1302_v32 }
  0x31   : > { %1148 = vmatpush3.bf16.msra.mxu0 %v1303_v34 }
  0x32   : > { %1188 = vmatpush3.bf16.msra.mxu1 %v1304_v36  ;;  %1221 = vmatprep.subr.bf16.mxu0 %v1311_v37 }
  0x33   : > { %1237 = vmatprep.subr.bf16.mxu1 %v1311_v37 }
  0x34   : > { %688 = vmatmul.mubr.bf16.vlgmr.msra.gmra.mrb[0].mxu0 %v1305_v33 }
  0x35   : > { %753 = vmatmul.mubr.bf16.vlgmr.msra.gmra.mrb[0].mxu1 %v1308_v35  ;;  %1222 = vmatpush3.bf16.msra.mxu0 %v1311_v37 }
  0x36   : > { %1241 = vmatpush3.bf16.msra.mxu1 %v1311_v37  ;;  %695 = vmatprep.mubr.bf16.mxu0 %v1312_v38 }
  0x37   : > { %760 = vmatprep.mubr.bf16.mxu1 %v1314_v39  ;;  %1223 = vmatprep.subr.bf16.mxu0 %v1318_v40 }
  0x38   : > { %1238 = vmatprep.subr.bf16.mxu1 %v1318_v40 }
  0x39   : > { %1224 = vmatpush3.bf16.msra.mxu0 %v1318_v40 }
  0x3a   : > { %1242 = vmatpush3.bf16.msra.mxu1 %v1318_v40  ;;  %1225 = vmatprep.subr.bf16.mxu0 %v1325_v41 }
  0x3b   : > { %1239 = vmatprep.subr.bf16.mxu1 %v1325_v41 }
  0x3c   : > { %696 = vmatmul.mubr.bf16.gmra.mrb[4].mxu0 %v1316_v42 }
  0x3d   : > { %761 = vmatmul.mubr.bf16.gmra.mrb[4].mxu1 %v1317_v43  ;;  %703 = vmatprep.mubr.bf16.mxu0 %v1319_v44 }
  0x3e   : > { %768 = vmatprep.mubr.bf16.mxu1 %v1321_v45  ;;  %1226 = vmatpush3.bf16.msra.mxu0 %v1325_v41 }
  0x3f   : > { %1243 = vmatpush3.bf16.msra.mxu1 %v1325_v41  ;;  %1227 = vmatprep.subr.bf16.mxu0 %v1332_v46 }
  0x40   : > { %1240 = vmatprep.subr.bf16.mxu1 %v1332_v46 }
  0x42   : > { %1228 = vmatpush3.bf16.msra.mxu0 %v1332_v46 }
  0x43   : > { %1244 = vmatpush3.bf16.msra.mxu1 %v1332_v46 }
  0x44   : > { %704 = vmatmul.mubr.bf16.gmra.mrb[8].mxu0 %v1323_v49 }
  0x45   : > { %769 = vmatmul.mubr.bf16.gmra.mrb[8].mxu1 %v1324_v50  ;;  %711 = vmatprep.mubr.bf16.mxu0 %v1326_v51 }
  0x46   : > { %776 = vmatprep.mubr.bf16.mxu1 %v1328_v53 }
  0x4c   : > { %712 = vmatmul.mubr.bf16.gmra.mrb[12].mxu0 %v1330_v57 }
  0x4d   : > { %777 = vmatmul.mubr.bf16.gmra.mrb[12].mxu1 %v1331_v58  ;;  %1229 = vmatprep.mubr.msk.bf16.mxu0 %vm642_vm0, %v1333_v59 }
  0x4e   : > { %1233 = vmatprep.mubr.msk.bf16.mxu1 %vm642_vm0, %v1334_v61 }
  0x54   : > { %1230 = vmatmul.mubr.msk.bf16.vlgmr.msra.gmra.mrb[16].mxu0 %vm642_vm0, %v1335_v1 }
  0x55   : > { %1234 = vmatmul.mubr.msk.bf16.vlgmr.msra.gmra.mrb[16].mxu1 %vm642_vm0, %v1336_v2 }
  0x89   : > { %v1561_v9 = vpop.permute.xlu1 %870  ;;  %v1563_v10 = vpop.permute.xlu0 %860 }
  0x8d   : > { %v1565_v11 = vpop.permute.xlu1 %875  ;;  %v1567_v12 = vpop.permute.xlu0 %865 }
  0x91   : > { %v1569_v13 = vpop.permute.xlu1 %885  ;;  %v1571_v14 = vpop.permute.xlu0 %880 }
  0x96   : > { %v1573_v28 = vpop.permute.xlu1 %895 }
  0x97   : > { %v1577_v30 = vpop.permute.xlu0 %890 }
  0x9a   : > { %v1579_v44 = vpop.permute.xlu1 %921 }
  0x9b   : > { %v917_v46 = vpop.permute.xlu0 %916 }
  0x9f   : > { %v932_v60 = vpop.permute.xlu1 %931  ;;  %v927_v62 = vpop.permute.xlu0 %926 }
 0x107   : > { %v1149_v15 = vpop.f32.mrb[0].mxu0 }
 0x108   : > { %v1189_v16 = vpop.f32.mrb[0].mxu1  ;;  %v1150_v17 = vpop.f32.mrb[1].mxu0 }
 0x109   : > { %v1151_v18 = vadd.f32 %v1150_v17, %v1149_v15  ;;  %v1190_v19 = vpop.f32.mrb[1].mxu1  ;;  %v1152_v20 = vpop.f32.mrb[2].mxu0 }
 0x10a   : > { %v1191_v21 = vadd.f32 %v1190_v19, %v1189_v16  ;;  %v1192_v22 = vpop.f32.mrb[2].mxu1  ;;  %v1153_v23 = vpop.f32.mrb[3].mxu0 }
 0x10b   : > { %v1154_v24 = vadd.f32 %v1153_v23, %v1152_v20  ;;  %v1193_v25 = vpop.f32.mrb[3].mxu1  ;;  %v942_v20 = vpop.permute.xlu1 %941 }
 0x10c   : > { %v1194_v26 = vadd.f32 %v1193_v25, %v1192_v22  ;;  %v755_v27 = vadd.f32 %v1191_v21, %v1151_v18  ;;  %v937_v18 = vpop.permute.xlu0 %936 }
 0x10e   : > { %v1575_v29 = vadd.f32 %v1194_v26, %v1154_v24 }
 0x10f   : > { %v1155_v31 = vpop.f32.mrb[4].mxu0 }
 0x110   : > { %v1195_v32 = vpop.f32.mrb[4].mxu1  ;;  %v1156_v33 = vpop.f32.mrb[5].mxu0 }
 0x111   : > { %v1157_v34 = vadd.f32 %v1156_v33, %v1155_v31  ;;  %v1196_v35 = vpop.f32.mrb[5].mxu1  ;;  %v1158_v36 = vpop.f32.mrb[6].mxu0 }
 0x112   : > { %v1197_v37 = vadd.f32 %v1196_v35, %v1195_v32  ;;  %v1198_v38 = vpop.f32.mrb[6].mxu1  ;;  %v1159_v39 = vpop.f32.mrb[7].mxu0 }
 0x113   : > { %v1160_v40 = vadd.f32 %v1159_v39, %v1158_v36  ;;  %v1199_v41 = vpop.f32.mrb[7].mxu1 }
 0x114   : > { %v1200_v42 = vadd.f32 %v1199_v41, %v1198_v38  ;;  %v763_v43 = vadd.f32 %v1197_v37, %v1157_v34 }
 0x116   : > { %v766_v45 = vadd.f32 %v1200_v42, %v1160_v40 }
 0x117   : > { %v1161_v47 = vpop.f32.mrb[8].mxu0 }
 0x118   : > { %v1201_v48 = vpop.f32.mrb[8].mxu1  ;;  %v1162_v49 = vpop.f32.mrb[9].mxu0 }
 0x119   : > { %v1163_v50 = vadd.f32 %v1162_v49, %v1161_v47  ;;  %v1202_v51 = vpop.f32.mrb[9].mxu1  ;;  %v1164_v52 = vpop.f32.mrb[10].mxu0 }
 0x11a   : > { %v1203_v53 = vadd.f32 %v1202_v51, %v1201_v48  ;;  %v1204_v54 = vpop.f32.mrb[10].mxu1  ;;  %v1165_v55 = vpop.f32.mrb[11].mxu0 }
 0x11b   : > { %v1166_v56 = vadd.f32 %v1165_v55, %v1164_v52  ;;  %v1205_v57 = vpop.f32.mrb[11].mxu1 }
 0x11c   : > { %v1206_v58 = vadd.f32 %v1205_v57, %v1204_v54  ;;  %v771_v59 = vadd.f32 %v1203_v53, %v1163_v50  ;;  %v952_v50 = vpop.permute.xlu1 %951 }
 0x11e   : > { %v774_v61 = vadd.f32 %v1206_v58, %v1166_v56 }
 0x11f   : > { %v1167_v63 = vpop.f32.mrb[12].mxu0 }
 0x120   : > { %v1207_v0 = vpop.f32.mrb[12].mxu1  ;;  %v1168_v1 = vpop.f32.mrb[13].mxu0 }
 0x121   : > { %v1169_v2 = vadd.f32 %v1168_v1, %v1167_v63  ;;  %v1208_v3 = vpop.f32.mrb[13].mxu1  ;;  %v1170_v4 = vpop.f32.mrb[14].mxu0 }
 0x122   : > { %v1209_v5 = vadd.f32 %v1208_v3, %v1207_v0  ;;  %v1210_v6 = vpop.f32.mrb[14].mxu1  ;;  %v1171_v7 = vpop.f32.mrb[15].mxu0 }
 0x123   : > { %v1172_v8 = vadd.f32 %v1171_v7, %v1170_v4  ;;  %v1211_v15 = vpop.f32.mrb[15].mxu1 }
 0x124   : > { %v1212_v16 = vadd.f32 %v1211_v15, %v1210_v6  ;;  %v779_v17 = vadd.f32 %v1209_v5, %v1169_v2 }
 0x126   : > { %v782_v19 = vadd.f32 %v1212_v16, %v1172_v8 }
 0x127   : > { %v1231_v21 = vpop.f32.mrb[16].mxu0 }
 0x128   : > { %v828_v22 = vadd.f32 %v1231_v21, %v763_v43  ;;  %v1235_v23 = vpop.f32.mrb[16].mxu1  ;;  %v819_v24 = vpop.f32.mrb[17].mxu0 }
 0x129   : > { %v844_v25 = vadd.f32 %v1235_v23, %v779_v17  ;;  %v820_v26 = vadd.f32 %v819_v24, %v755_v27  ;;  %v835_v31 = vpop.f32.mrb[17].mxu1  ;;  %v1232_v32 = vpop.f32.mrb[18].mxu0 }
 0x12a   : > { %v900_v33 = vmul.f32 %v1561_v9, %v828_v22  ;;  %v836_v34 = vadd.f32 %v835_v31, %v771_v59  ;;  %v831_v35 = vadd.f32 %v1232_v32, %v766_v45  ;;  %v1236_v36 = vpop.f32.mrb[18].mxu1  ;;  %v822_v37 = vpop.f32.mrb[19].mxu0 }
 0x12b   : > { %v904_v38 = vmul.f32 %v1577_v30, %v844_v25  ;;  %v898_v39 = vmul.f32 %v1563_v10, %v820_v26  ;;  %v847_v40 = vadd.f32 %v1236_v36, %v782_v19  ;;  %v823_v41 = vadd.f32 %v822_v37, %v1575_v29  ;;  %v838_v42 = vpop.f32.mrb[19].mxu1  ;;  %v947_v43 = vpop.permute.xlu0 %946 }
 0x12c   : > { %v956_v27 = vadd.f32 %v927_v62, %v900_v33  ;;  %v902_v47 = vmul.f32 %v1571_v14, %v836_v34  ;;  %v901_v48 = vmul.f32 %v1565_v11, %v831_v35  ;;  %v839_v9 = vadd.f32 %v838_v42, %v774_v61 }
 0x12d   : > { %v960_v45 = vadd.f32 %v947_v43, %v904_v38  ;;  %v954_v49 = vadd.f32 %v917_v46, %v898_v39  ;;  %v905_v30 = vmul.f32 %v1573_v28, %v847_v40  ;;  %v899_v10 = vmul.f32 %v1567_v12, %v823_v41 }
 0x12e   : > { %v964_v29 = vmax.f32 %v956_v27, 0.0  ;;  %v958_v51 = vadd.f32 %v937_v18, %v902_v47  ;;  %v957_v52 = vadd.f32 %v932_v60, %v901_v48  ;;  %v903_v53 = vmul.f32 %v1569_v13, %v839_v9 }
 0x12f   : > { %v968_v14 = vmax.f32 %v960_v45, 0.0  ;;  %v962_v54 = vmax.f32 %v954_v49, 0.0  ;;  %v961_v11 = vadd.f32 %v952_v50, %v905_v30  ;;  %v955_v55 = vadd.f32 %v1579_v44, %v899_v10 }
 0x130   : > { %973 = vst.msk [vmem:[%s228_s5 + $0x10] sm:$0xff] %vm970_vm1, %v964_v29  ;;  %v966_v56 = vmax.f32 %v958_v51, 0.0  ;;  %v965_v57 = vmax.f32 %v957_v52, 0.0  ;;  %v959_v46 = vadd.f32 %v942_v20, %v903_v53 }
 0x131   : > { %977 = vst.msk [vmem:[%s228_s5 + $0x30] sm:$0xff] %vm970_vm1, %v968_v14  ;;  %971 = vst.msk [vmem:[%s228_s5] sm:$0xff] %vm970_vm1, %v962_v54  ;;  %v969_v12 = vmax.f32 %v961_v11, 0.0  ;;  %v963_v28 = vmax.f32 %v955_v55, 0.0 }
 0x132   : > { %975 = vst.msk [vmem:[%s228_s5 + $0x20] sm:$0xff] %vm970_vm1, %v966_v56  ;;  %974 = vst.msk [vmem:[%s228_s5 + $0x18] sm:$0xff] %vm970_vm1, %v965_v57  ;;  %v967_v13 = vmax.f32 %v959_v46, 0.0 }
 0x133   : > { %978 = vst.msk [vmem:[%s228_s5 + $0x38] sm:$0xff] %vm970_vm1, %v969_v12  ;;  %972 = vst.msk [vmem:[%s228_s5 + $0x8] sm:$0xff] %vm970_vm1, %v963_v28 }
 0x134   : > { %976 = vst.msk [vmem:[%s228_s5 + $0x28] sm:$0xff] %vm970_vm1, %v967_v13 }
 0x135 PF: > { %s14_s17 = sadd.s32 1, %s1359_s17   ;;  %s1617_s15 = smov %s1355_s16 }
 0x136   : > { %p11_p5 = scmp.ge.s32.totalorder %s14_s17, 4   ;;  %s1618_s16 = smov %s1620_s18 }
 0x138   :  { %13 = sbr.rel (!%p11_p5) target bundleno = 2 (0x2), region = 66 }

// kernel: unet_forward.30
= control target key start
LH: loop header
LB: loop body
LE: loop exit
PB: predicated region body
PF: predicated region fallthrough
CT: control target
= control target key end

     0   :  { %s1143_s15 = smov 0   ;;  %s1145_s16 = smov 0   ;;  %s1274_s0 = inlined_call_operand.vmem [shape: bf16[2,576,16], index: 0, kind: input, shape index: {}]   ;;  %s1275_s1 = inlined_call_operand.vmem [shape: bf16[32,576], index: 1, kind: input, shape index: {}]   ;;  %s1276_s2 = inlined_call_operand.vmem [shape: f32[32,1], index: 2, kind: input, shape index: {}]   ;;  %s1277_s3 = inlined_call_operand.vmem [shape: f32[32,1], index: 3, kind: input, shape index: {}]   ;;  %s1278_s4 = inlined_call_operand.vmem [shape: f32[2,32,16], index: 4, kind: output, shape index: {}]  }
   0x1   :  { %s1147_s17 = smov 0  }
   0x2 LB: > { %s26_s18 = sadd.s32 1, %s1111_s16  ;;  %p886_p0 = scmp.ge.s32.totalorder %s1115_s17, 1  ;;  %s1115_s17 = sphi %s1147_s17, %s14_s17   ;;  %s1111_s16 = sphi %s1145_s16, %s1280_s16   ;;  %s1107_s15 = sphi %s1143_s15, %s1279_s15  }
   0x3   : > { %p28_p1 = scmp.ge.s32.totalorder %s26_s18, 2  ;;  %p181_p2 = scmp.lt.s32.totalorder %s1115_s17, 3 }
   0x5   : > { %s1282_s18 = smov (%p28_p1, %s26_s18), 0  ;;  %p182_p3 = pnand %p886_p0, %p181_p2 }
   0x6   : > { %p213_p4 = scmp.lt.s32.totalorder (!%p182_p3), %s1107_s15, 1  ;;  %v1077_v0 = vld [vmem:[%s1275_s1 + $0x4] ss:$20 sps:$4 sm:$0xff] (!%p182_p3)   ;;  %v1080_v1 = vld [vmem:[%s1275_s1 + $0xc] ss:$20 sps:$4 sm:$0xff] (!%p182_p3)   ;;  %v1117_v2 = vmov (!%p182_p3), 0  }
   0x7   : > { %185 = sbr.rel (%p182_p3) target bundleno = 292 (0x124), region = 36  ;;  %1042 = vset.pattern.permute.xlu1 (!%p182_p3), %v1117_v2  ;;  %1041 = vset.pattern.permute.xlu0 (!%p182_p3), %v1117_v2  ;;  %v1075_v33 = vld [vmem:[%s1275_s1] ss:$20 sps:$4 sm:$0xff] (!%p182_p3)   ;;  %v1078_v35 = vld [vmem:[%s1275_s1 + $0x8] ss:$20 sps:$4 sm:$0xff] (!%p182_p3)   ;;  %vm580_vm0 = vcmask (!%p182_p3), 523264  }
   0x8   : > { %619 = vmatprep.mubr.bf16.mxu0 (!%p182_p3), %v1077_v0  ;;  %668 = vmatprep.mubr.bf16.mxu1 (!%p182_p3), %v1080_v1  ;;  %v1083_v37 = vld [vmem:[%s1275_s1 + $0x2c] ss:$20 sps:$4 sm:$0xff] (!%p182_p3)   ;;  %v1085_v40 = vld [vmem:[%s1275_s1 + $0x34] ss:$20 sps:$4 sm:$0xff] (!%p182_p3)   ;;  %v737_v45 = vld [vmem:[%s1276_s2 + $0x18] sm:$0xff] (!%p182_p3)  ;;  %vm794_vm1 = vcmask (!%p182_p3), 130048  }
   0x9   : > { %v736_v41 = vld [vmem:[%s1276_s2 + $0x10] sm:$0xff] (!%p182_p3)  ;;  %v734_v42 = vld [vmem:[%s1276_s2] sm:$0xff] (!%p182_p3)  ;;  %v1087_v44 = vld [vmem:[%s1275_s1 + $0x28] ss:$20 sps:$4 sm:$0xff] (!%p182_p3)  }
   0xa   : > { %750 = vperm.xlu1 (!%p182_p3), %1042, %v736_v41   ;;  %740 = vperm.xlu0 (!%p182_p3), %1041, %v734_v42   ;;  %v1088_v46 = vld [vmem:[%s1275_s1 + $0x30] ss:$20 sps:$4 sm:$0xff] (!%p182_p3)   ;;  %v735_v47 = vld [vmem:[%s1276_s2 + $0x8] sm:$0xff] (!%p182_p3)  ;;  %v765_v53 = vld [vmem:[%s1277_s3 + $0x18] sm:$0xff] (!%p182_p3) }
   0xb   : > { %v1091_v49 = vld [vmem:[%s1275_s1 + $0x10] ss:$20 sps:$4 sm:$0xff] (!%p182_p3)   ;;  %v763_v50 = vld [vmem:[%s1277_s3 + $0x8] sm:$0xff] (!%p182_p3) }
   0xc   : > { %v762_v51 = vld [vmem:[%s1277_s3] sm:$0xff] (!%p182_p3)  ;;  %v1092_v52 = vld [vmem:[%s1275_s1 + $0x38] ss:$20 sps:$4 sm:$0xff] (!%p182_p3)   ;;  %v764_v54 = vld [vmem:[%s1277_s3 + $0x10] sm:$0xff] (!%p182_p3) }
   0xe   : > { %s1284_s15 = smov (!%p213_p4, %s1107_s15), 1  ;;  %755 = vperm.xlu1 %1042, %v737_v45   ;;  %745 = vperm.xlu0 %1041, %v735_v47  }
   0xf   : > { %s1015_s23 = smul.u32 288, %s1284_s15  ;;  %s940_s11 = sshll.u32 %s1284_s15, 5 }
  0x10   : > { %s228_s14 = scalar_lea.vmem %s1278_s4, %s940_s11 }
  0x11   : > { %s1173_s26 = scalar_lea.vmem %s1274_s0, %s1015_s23 }
  0x12   : > { %v1043_v3 = vld [vmem:[%s1173_s26 + $0x40] sm:$0xff]   ;;  %v1047_v7 = vld [vmem:[%s1173_s26 + $0x48] sm:$0xff]   ;;  %v1051_v11 = vld [vmem:[%s1173_s26 + $0x50] sm:$0xff]   ;;  %773 = vperm.xlu1 %1042, %v763_v50   ;;  %768 = vperm.xlu0 %1041, %v762_v51  }
  0x13   : > { %v1044_v4 = vld [vmem:[%s1173_s26 + $0xc0] sm:$0xff]   ;;  %941 = vmatprep.subr.bf16.mxu0 %v1043_v3  ;;  %v1048_v8 = vld [vmem:[%s1173_s26 + $0xc8] sm:$0xff]   ;;  %v1052_v12 = vld [vmem:[%s1173_s26 + $0xd0] sm:$0xff]  }
  0x14   : > { %v1045_v5 = vld [vmem:[%s1173_s26] sm:$0xff]   ;;  %969 = vmatprep.subr.bf16.mxu1 %v1044_v4  ;;  %v1049_v9 = vld [vmem:[%s1173_s26 + $0x8] sm:$0xff]   ;;  %v1053_v13 = vld [vmem:[%s1173_s26 + $0x10] sm:$0xff]  }
  0x15   : > { %v1046_v6 = vld [vmem:[%s1173_s26 + $0x80] sm:$0xff]   ;;  %942 = vmatpush3.bf16.msra.mxu0 %v1045_v5  ;;  %v1050_v10 = vld [vmem:[%s1173_s26 + $0x88] sm:$0xff]   ;;  %v1054_v14 = vld [vmem:[%s1173_s26 + $0x90] sm:$0xff]  }
  0x16   : > { %970 = vmatpush3.bf16.msra.mxu1 %v1046_v6  ;;  %943 = vmatprep.subr.bf16.mxu0 %v1047_v7  ;;  %v1055_v15 = vld [vmem:[%s1173_s26 + $0x58] sm:$0xff]   ;;  %v1059_v19 = vld [vmem:[%s1173_s26 + $0x60] sm:$0xff]   ;;  %v1063_v23 = vld [vmem:[%s1173_s26 + $0x68] sm:$0xff]  }
  0x17   : > { %971 = vmatprep.subr.bf16.mxu1 %v1048_v8  ;;  %v1056_v16 = vld [vmem:[%s1173_s26 + $0xd8] sm:$0xff]   ;;  %v1060_v20 = vld [vmem:[%s1173_s26 + $0xe0] sm:$0xff]   ;;  %v1064_v24 = vld [vmem:[%s1173_s26 + $0xe8] sm:$0xff]   ;;  %783 = vperm.xlu1 %1042, %v765_v53  }
  0x18   : > { %v1057_v17 = vld [vmem:[%s1173_s26 + $0x18] sm:$0xff]   ;;  %v1061_v21 = vld [vmem:[%s1173_s26 + $0x20] sm:$0xff]   ;;  %v1065_v25 = vld [vmem:[%s1173_s26 + $0x28] sm:$0xff]   ;;  %778 = vperm.xlu0 %1041, %v764_v54  }
  0x19   : > { %944 = vmatpush3.bf16.msra.mxu0 %v1049_v9  ;;  %v1058_v18 = vld [vmem:[%s1173_s26 + $0x98] sm:$0xff]   ;;  %v1062_v22 = vld [vmem:[%s1173_s26 + $0xa0] sm:$0xff]   ;;  %v1066_v26 = vld [vmem:[%s1173_s26 + $0xa8] sm:$0xff]  }
  0x1a   : > { %972 = vmatpush3.bf16.msra.mxu1 %v1050_v10  ;;  %945 = vmatprep.subr.bf16.mxu0 %v1051_v11  ;;  %v1067_v27 = vld [vmem:[%s1173_s26 + $0x70] sm:$0xff]   ;;  %v1071_v31 = vld [vmem:[%s1173_s26 + $0x78] sm:$0xff]   ;;  %v1081_v38 = vld [vmem:[%s1173_s26 + $0x100] sm:$0xff]  }
  0x1b   : > { %973 = vmatprep.subr.bf16.mxu1 %v1052_v12  ;;  %v1068_v28 = vld [vmem:[%s1173_s26 + $0xf0] sm:$0xff]   ;;  %v1072_v32 = vld [vmem:[%s1173_s26 + $0xf8] sm:$0xff]   ;;  %v1082_v39 = vld [vmem:[%s1173_s26 + $0x108] sm:$0xff]  }
  0x1c   : > { %v1069_v29 = vld [vmem:[%s1173_s26 + $0x30] sm:$0xff]   ;;  %v1073_v34 = vld [vmem:[%s1173_s26 + $0x38] sm:$0xff]  }
  0x1d   : > { %946 = vmatpush3.bf16.msra.mxu0 %v1053_v13  ;;  %v1070_v30 = vld [vmem:[%s1173_s26 + $0xb0] sm:$0xff]   ;;  %v1074_v36 = vld [vmem:[%s1173_s26 + $0xb8] sm:$0xff]  }
  0x1e   : > { %974 = vmatpush3.bf16.msra.mxu1 %v1054_v14  ;;  %947 = vmatprep.subr.bf16.mxu0 %v1055_v15  ;;  %v1089_v43 = vld [vmem:[%s1173_s26 + $0x110] sm:$0xff]   ;;  %v1090_v48 = vld [vmem:[%s1173_s26 + $0x118] sm:$0xff]  }
  0x1f   : > { %975 = vmatprep.subr.bf16.mxu1 %v1056_v16 }
  0x21   : > { %948 = vmatpush3.bf16.msra.mxu0 %v1057_v17 }
  0x22   : > { %976 = vmatpush3.bf16.msra.mxu1 %v1058_v18  ;;  %949 = vmatprep.subr.bf16.mxu0 %v1059_v19 }
  0x23   : > { %977 = vmatprep.subr.bf16.mxu1 %v1060_v20 }
  0x25   : > { %950 = vmatpush3.bf16.msra.mxu0 %v1061_v21 }
  0x26   : > { %978 = vmatpush3.bf16.msra.mxu1 %v1062_v22  ;;  %951 = vmatprep.subr.bf16.mxu0 %v1063_v23 }
  0x27   : > { %979 = vmatprep.subr.bf16.mxu1 %v1064_v24 }
  0x29   : > { %952 = vmatpush3.bf16.msra.mxu0 %v1065_v25 }
  0x2a   : > { %980 = vmatpush3.bf16.msra.mxu1 %v1066_v26  ;;  %953 = vmatprep.subr.bf16.mxu0 %v1067_v27 }
  0x2b   : > { %981 = vmatprep.subr.bf16.mxu1 %v1068_v28 }
  0x2d   : > { %954 = vmatpush3.bf16.msra.mxu0 %v1069_v29 }
  0x2e   : > { %982 = vmatpush3.bf16.msra.mxu1 %v1070_v30  ;;  %955 = vmatprep.subr.bf16.mxu0 %v1071_v31 }
  0x2f   : > { %983 = vmatprep.subr.bf16.mxu1 %v1072_v32 }
  0x31   : > { %956 = vmatpush3.bf16.msra.mxu0 %v1073_v34 }
  0x32   : > { %984 = vmatpush3.bf16.msra.mxu1 %v1074_v36  ;;  %1003 = vmatprep.subr.bf16.mxu0 %v1081_v38 }
  0x34   : > { %620 = vmatmul.mubr.bf16.vlgmr.msra.gmra.mrb[0].mxu0 %v1075_v33 }
  0x35   : > { %669 = vmatmul.mubr.bf16.vlgmr.msra.gmra.mrb[0].mxu1 %v1078_v35  ;;  %1004 = vmatpush3.bf16.msra.mxu0 %v1081_v38 }
  0x36   : > { %1005 = vmatprep.subr.bf16.mxu0 %v1082_v39  ;;  %627 = vmatprep.mubr.bf16.mxu0 %v1083_v37 }
  0x37   : > { %676 = vmatprep.mubr.bf16.mxu1 %v1085_v40 }
  0x39   : > { %1006 = vmatpush3.bf16.msra.mxu0 %v1082_v39 }
  0x3a   : > { %1007 = vmatprep.subr.bf16.mxu0 %v1089_v43 }
  0x3c   : > { %628 = vmatmul.mubr.bf16.gmra.mrb[4].mxu0 %v1087_v44 }
  0x3d   : > { %677 = vmatmul.mubr.bf16.gmra.mrb[4].mxu1 %v1088_v46  ;;  %1008 = vmatpush3.bf16.msra.mxu0 %v1089_v43 }
  0x3e   : > { %1009 = vmatprep.subr.bf16.mxu0 %v1090_v48  ;;  %1011 = vmatprep.mubr.msk.bf16.mxu0 %vm580_vm0, %v1091_v49 }
  0x41   : > { %1010 = vmatpush3.bf16.msra.mxu0 %v1090_v48 }
  0x44   : > { %1012 = vmatmul.mubr.msk.bf16.vlgmr.msra.gmra.mrb[8].mxu0 %vm580_vm0, %v1092_v52 }
  0x89   : > { %v751_v55 = vpop.permute.xlu1 %750  ;;  %v741_v56 = vpop.permute.xlu0 %740 }
  0x8d   : > { %v756_v6 = vpop.permute.xlu1 %755  ;;  %v746_v8 = vpop.permute.xlu0 %745 }
  0x91   : > { %v769_v22 = vpop.permute.xlu0 %768  ;;  %v774_v24 = vpop.permute.xlu1 %773 }
  0x96   : > { %v784_v38 = vpop.permute.xlu1 %783 }
  0x97   : > { %v779_v33 = vpop.permute.xlu0 %778 }
 0x107   : > { %v957_v57 = vpop.f32.mrb[0].mxu0 }
 0x108   : > { %v985_v58 = vpop.f32.mrb[0].mxu1  ;;  %v958_v59 = vpop.f32.mrb[1].mxu0 }
 0x109   : > { %v959_v60 = vadd.f32 %v958_v59, %v957_v57  ;;  %v986_v61 = vpop.f32.mrb[1].mxu1  ;;  %v960_v62 = vpop.f32.mrb[2].mxu0 }
 0x10a   : > { %v987_v63 = vadd.f32 %v986_v61, %v985_v58  ;;  %v988_v0 = vpop.f32.mrb[2].mxu1  ;;  %v961_v1 = vpop.f32.mrb[3].mxu0 }
 0x10b   : > { %v962_v2 = vadd.f32 %v961_v1, %v960_v62  ;;  %v989_v3 = vpop.f32.mrb[3].mxu1 }
 0x10c   : > { %v990_v4 = vadd.f32 %v989_v3, %v988_v0  ;;  %v671_v5 = vadd.f32 %v987_v63, %v959_v60 }
 0x10e   : > { %v674_v7 = vadd.f32 %v990_v4, %v962_v2 }
 0x10f   : > { %v963_v9 = vpop.f32.mrb[4].mxu0 }
 0x110   : > { %v991_v10 = vpop.f32.mrb[4].mxu1  ;;  %v964_v11 = vpop.f32.mrb[5].mxu0 }
 0x111   : > { %v965_v12 = vadd.f32 %v964_v11, %v963_v9  ;;  %v992_v13 = vpop.f32.mrb[5].mxu1  ;;  %v966_v14 = vpop.f32.mrb[6].mxu0 }
 0x112   : > { %v993_v15 = vadd.f32 %v992_v13, %v991_v10  ;;  %v994_v16 = vpop.f32.mrb[6].mxu1  ;;  %v967_v17 = vpop.f32.mrb[7].mxu0 }
 0x113   : > { %v968_v18 = vadd.f32 %v967_v17, %v966_v14  ;;  %v995_v19 = vpop.f32.mrb[7].mxu1 }
 0x114   : > { %v996_v20 = vadd.f32 %v995_v19, %v994_v16  ;;  %v679_v21 = vadd.f32 %v993_v15, %v965_v12 }
 0x116   : > { %v682_v23 = vadd.f32 %v996_v20, %v968_v18 }
 0x117   : > { %v1013_v25 = vpop.f32.mrb[8].mxu0 }
 0x118   : > { %v728_v26 = vadd.f32 %v1013_v25, %v679_v21  ;;  %v719_v27 = vpop.f32.mrb[9].mxu0 }
 0x119   : > { %v720_v28 = vadd.f32 %v719_v27, %v671_v5  ;;  %v1014_v29 = vpop.f32.mrb[10].mxu0 }
 0x11a   : > { %v760_v30 = vmul.f32 %v751_v55, %v728_v26  ;;  %v731_v31 = vadd.f32 %v1014_v29, %v682_v23  ;;  %v722_v32 = vpop.f32.mrb[11].mxu0 }
 0x11b   : > { %v758_v34 = vmul.f32 %v741_v56, %v720_v28  ;;  %v723_v35 = vadd.f32 %v722_v32, %v674_v7 }
 0x11c   : > { %v788_v36 = vadd.f32 %v779_v33, %v760_v30  ;;  %v761_v37 = vmul.f32 %v756_v6, %v731_v31 }
 0x11d   : > { %v786_v39 = vadd.f32 %v769_v22, %v758_v34  ;;  %v759_v40 = vmul.f32 %v746_v8, %v723_v35 }
 0x11e   : > { %v792_v41 = vmax.f32 %v788_v36, 0.0  ;;  %v789_v42 = vadd.f32 %v784_v38, %v761_v37 }
 0x11f   : > { %v790_v43 = vmax.f32 %v786_v39, 0.0  ;;  %v787_v44 = vadd.f32 %v774_v24, %v759_v40 }
 0x120   : > { %797 = vst.msk [vmem:[%s228_s14 + $0x10] sm:$0xff] %vm794_vm1, %v792_v41  ;;  %v793_v45 = vmax.f32 %v789_v42, 0.0 }
 0x121   : > { %795 = vst.msk [vmem:[%s228_s14] sm:$0xff] %vm794_vm1, %v790_v43  ;;  %v791_v46 = vmax.f32 %v787_v44, 0.0 }
 0x122   : > { %798 = vst.msk [vmem:[%s228_s14 + $0x18] sm:$0xff] %vm794_vm1, %v793_v45 }
 0x123   : > { %796 = vst.msk [vmem:[%s228_s14 + $0x8] sm:$0xff] %vm794_vm1, %v791_v46 }
 0x124 PF: > { %s14_s17 = sadd.s32 1, %s1115_s17   ;;  %s1279_s15 = smov %s1111_s16 }
 0x125   : > { %p11_p5 = scmp.ge.s32.totalorder %s14_s17, 4   ;;  %s1280_s16 = smov %s1282_s18 }
 0x127   :  { %13 = sbr.rel (!%p11_p5) target bundleno = 2 (0x2), region = 66 }

// kernel: unet_forward.29
= control target key start
LH: loop header
LB: loop body
LE: loop exit
PB: predicated region body
PF: predicated region fallthrough
CT: control target
= control target key end

     0   :  { %s2100_s15 = smov 0   ;;  %s2102_s16 = smov 0   ;;  %s2426_s0 = inlined_call_operand.vmem [shape: bf16[2,1152,16], index: 0, kind: input, shape index: {}]   ;;  %s2427_s1 = inlined_call_operand.vmem [shape: bf16[64,1152], index: 1, kind: input, shape index: {}]   ;;  %s2428_s2 = inlined_call_operand.vmem [shape: f32[64,1], index: 2, kind: input, shape index: {}]   ;;  %s2429_s3 = inlined_call_operand.vmem [shape: f32[64,1], index: 3, kind: input, shape index: {}]   ;;  %s2430_s4 = inlined_call_operand.vmem [shape: f32[2,64,16], index: 4, kind: output, shape index: {}]  }
   0x1   :  { %s2104_s17 = smov 0  }
   0x2 LB: > { %s26_s18 = sadd.s32 1, %s2068_s16  ;;  %p1571_p0 = scmp.ge.s32.totalorder %s2072_s17, 1  ;;  %s2072_s17 = sphi %s2104_s17, %s14_s17   ;;  %s2068_s16 = sphi %s2102_s16, %s2432_s16   ;;  %s2064_s15 = sphi %s2100_s15, %s2431_s15  }
   0x3   : > { %p28_p1 = scmp.ge.s32.totalorder %s26_s18, 2  ;;  %p181_p2 = scmp.lt.s32.totalorder %s2072_s17, 3 }
   0x5   : > { %s2434_s18 = smov (%p28_p1, %s26_s18), 0  ;;  %p182_p3 = pnand %p1571_p0, %p181_p2 }
   0x6   : > { %p213_p4 = scmp.lt.s32.totalorder (!%p182_p3), %s2064_s15, 1  ;;  %v1960_v0 = vld [vmem:[%s2427_s1 + $0x4] ss:$36 sps:$4 sm:$0xff] (!%p182_p3)   ;;  %v2074_v1 = vmov (!%p182_p3), 0   ;;  %v1963_v2 = vld [vmem:[%s2427_s1 + $0xc] ss:$36 sps:$4 sm:$0xff] (!%p182_p3)  }
   0x7   : > { %185 = sbr.rel (%p182_p3) target bundleno = 342 (0x156), region = 36  ;;  %1925 = vset.pattern.permute.xlu1 (!%p182_p3), %v2074_v1  ;;  %1924 = vset.pattern.permute.xlu0 (!%p182_p3), %v2074_v1  ;;  %v1958_v33 = vld [vmem:[%s2427_s1] ss:$36 sps:$4 sm:$0xff] (!%p182_p3)   ;;  %v1961_v35 = vld [vmem:[%s2427_s1 + $0x8] ss:$36 sps:$4 sm:$0xff] (!%p182_p3)   ;;  %vm1475_vm0 = vcmask (!%p182_p3), 130048  }
   0x8   : > { %1062 = vmatprep.mubr.bf16.mxu0 (!%p182_p3), %v1960_v0  ;;  %1127 = vmatprep.mubr.bf16.mxu1 (!%p182_p3), %v1963_v2  ;;  %v1972_v37 = vld [vmem:[%s2427_s1 + $0x4c] ss:$36 sps:$4 sm:$0xff] (!%p182_p3)   ;;  %v1974_v39 = vld [vmem:[%s2427_s1 + $0x54] ss:$36 sps:$4 sm:$0xff] (!%p182_p3)   ;;  %v1988_v58 = vld [vmem:[%s2427_s1 + $0x9c] ss:$36 sps:$4 sm:$0xff] (!%p182_p3)  }
   0x9   : > { %v1976_v45 = vld [vmem:[%s2427_s1 + $0x48] ss:$36 sps:$4 sm:$0xff] (!%p182_p3)   ;;  %v1977_v47 = vld [vmem:[%s2427_s1 + $0x50] ss:$36 sps:$4 sm:$0xff] (!%p182_p3)   ;;  %v1991_v60 = vld [vmem:[%s2427_s1 + $0x98] ss:$36 sps:$4 sm:$0xff] (!%p182_p3)  }
   0xa   : > { %v1986_v49 = vld [vmem:[%s2427_s1 + $0x94] ss:$36 sps:$4 sm:$0xff] (!%p182_p3)  }
   0xb   : > { %v1990_v59 = vld [vmem:[%s2427_s1 + $0x90] ss:$36 sps:$4 sm:$0xff] (!%p182_p3)  }
   0xe   : > { %s2436_s15 = smov (!%p213_p4, %s2064_s15), 1 }
   0xf   : > { %s1898_s23 = smul.u32 576, %s2436_s15  ;;  %s1685_s19 = sshll.u32 %s2436_s15, 6 }
  0x10   : > { %s228_s21 = scalar_lea.vmem %s2430_s4, %s1685_s19 }
  0x11   : > { %s2130_s26 = scalar_lea.vmem %s2426_s0, %s1898_s23 }
  0x12   : > { %v1926_v3 = vld [vmem:[%s2130_s26 + $0x40] sm:$0xff]   ;;  %v1930_v7 = vld [vmem:[%s2130_s26 + $0x48] sm:$0xff]   ;;  %v1934_v11 = vld [vmem:[%s2130_s26 + $0x50] sm:$0xff]  }
  0x13   : > { %v1927_v4 = vld [vmem:[%s2130_s26 + $0xc0] sm:$0xff]   ;;  %1686 = vmatprep.subr.bf16.mxu0 %v1926_v3  ;;  %v1931_v8 = vld [vmem:[%s2130_s26 + $0xc8] sm:$0xff]   ;;  %v1935_v12 = vld [vmem:[%s2130_s26 + $0xd0] sm:$0xff]  }
  0x14   : > { %v1928_v5 = vld [vmem:[%s2130_s26] sm:$0xff]   ;;  %1726 = vmatprep.subr.bf16.mxu1 %v1927_v4  ;;  %v1932_v9 = vld [vmem:[%s2130_s26 + $0x8] sm:$0xff]   ;;  %v1936_v13 = vld [vmem:[%s2130_s26 + $0x10] sm:$0xff]  }
  0x15   : > { %v1929_v6 = vld [vmem:[%s2130_s26 + $0x80] sm:$0xff]   ;;  %1687 = vmatpush3.bf16.msra.mxu0 %v1928_v5  ;;  %v1933_v10 = vld [vmem:[%s2130_s26 + $0x88] sm:$0xff]   ;;  %v1937_v14 = vld [vmem:[%s2130_s26 + $0x90] sm:$0xff]  }
  0x16   : > { %1727 = vmatpush3.bf16.msra.mxu1 %v1929_v6  ;;  %1688 = vmatprep.subr.bf16.mxu0 %v1930_v7  ;;  %v1938_v15 = vld [vmem:[%s2130_s26 + $0x58] sm:$0xff]   ;;  %v1942_v19 = vld [vmem:[%s2130_s26 + $0x60] sm:$0xff]   ;;  %v1946_v23 = vld [vmem:[%s2130_s26 + $0x68] sm:$0xff]  }
  0x17   : > { %1728 = vmatprep.subr.bf16.mxu1 %v1931_v8  ;;  %v1939_v16 = vld [vmem:[%s2130_s26 + $0xd8] sm:$0xff]   ;;  %v1943_v20 = vld [vmem:[%s2130_s26 + $0xe0] sm:$0xff]   ;;  %v1947_v24 = vld [vmem:[%s2130_s26 + $0xe8] sm:$0xff]  }
  0x18   : > { %v1940_v17 = vld [vmem:[%s2130_s26 + $0x18] sm:$0xff]   ;;  %v1944_v21 = vld [vmem:[%s2130_s26 + $0x20] sm:$0xff]   ;;  %v1948_v25 = vld [vmem:[%s2130_s26 + $0x28] sm:$0xff]  }
  0x19   : > { %1689 = vmatpush3.bf16.msra.mxu0 %v1932_v9  ;;  %v1941_v18 = vld [vmem:[%s2130_s26 + $0x98] sm:$0xff]   ;;  %v1945_v22 = vld [vmem:[%s2130_s26 + $0xa0] sm:$0xff]   ;;  %v1949_v26 = vld [vmem:[%s2130_s26 + $0xa8] sm:$0xff]  }
  0x1a   : > { %1729 = vmatpush3.bf16.msra.mxu1 %v1933_v10  ;;  %1690 = vmatprep.subr.bf16.mxu0 %v1934_v11  ;;  %v1950_v27 = vld [vmem:[%s2130_s26 + $0x70] sm:$0xff]   ;;  %v1954_v31 = vld [vmem:[%s2130_s26 + $0x78] sm:$0xff]   ;;  %v1964_v38 = vld [vmem:[%s2130_s26 + $0x140] sm:$0xff]  }
  0x1b   : > { %1730 = vmatprep.subr.bf16.mxu1 %v1935_v12  ;;  %v1951_v28 = vld [vmem:[%s2130_s26 + $0xf0] sm:$0xff]   ;;  %v1955_v32 = vld [vmem:[%s2130_s26 + $0xf8] sm:$0xff]   ;;  %v1965_v40 = vld [vmem:[%s2130_s26 + $0x1c0] sm:$0xff]  }
  0x1c   : > { %v1952_v29 = vld [vmem:[%s2130_s26 + $0x30] sm:$0xff]   ;;  %v1956_v34 = vld [vmem:[%s2130_s26 + $0x38] sm:$0xff]   ;;  %v1966_v41 = vld [vmem:[%s2130_s26 + $0x100] sm:$0xff]  }
  0x1d   : > { %1691 = vmatpush3.bf16.msra.mxu0 %v1936_v13  ;;  %v1953_v30 = vld [vmem:[%s2130_s26 + $0xb0] sm:$0xff]   ;;  %v1957_v36 = vld [vmem:[%s2130_s26 + $0xb8] sm:$0xff]   ;;  %v1967_v42 = vld [vmem:[%s2130_s26 + $0x180] sm:$0xff]  }
  0x1e   : > { %1731 = vmatpush3.bf16.msra.mxu1 %v1937_v14  ;;  %1692 = vmatprep.subr.bf16.mxu0 %v1938_v15  ;;  %v1968_v43 = vld [vmem:[%s2130_s26 + $0x148] sm:$0xff]   ;;  %v1978_v50 = vld [vmem:[%s2130_s26 + $0x150] sm:$0xff]   ;;  %v1982_v54 = vld [vmem:[%s2130_s26 + $0x158] sm:$0xff]  }
  0x1f   : > { %1732 = vmatprep.subr.bf16.mxu1 %v1939_v16  ;;  %v1969_v44 = vld [vmem:[%s2130_s26 + $0x1c8] sm:$0xff]   ;;  %v1979_v51 = vld [vmem:[%s2130_s26 + $0x1d0] sm:$0xff]   ;;  %v1983_v55 = vld [vmem:[%s2130_s26 + $0x1d8] sm:$0xff]  }
  0x20   : > { %v1970_v46 = vld [vmem:[%s2130_s26 + $0x108] sm:$0xff]   ;;  %v1980_v52 = vld [vmem:[%s2130_s26 + $0x110] sm:$0xff]   ;;  %v1984_v56 = vld [vmem:[%s2130_s26 + $0x118] sm:$0xff]  }
  0x21   : > { %1693 = vmatpush3.bf16.msra.mxu0 %v1940_v17  ;;  %v1971_v48 = vld [vmem:[%s2130_s26 + $0x188] sm:$0xff]   ;;  %v1981_v53 = vld [vmem:[%s2130_s26 + $0x190] sm:$0xff]   ;;  %v1985_v57 = vld [vmem:[%s2130_s26 + $0x198] sm:$0xff]  }
  0x22   : > { %1733 = vmatpush3.bf16.msra.mxu1 %v1941_v18  ;;  %1694 = vmatprep.subr.bf16.mxu0 %v1942_v19  ;;  %v1992_v61 = vld [vmem:[%s2130_s26 + $0x160] sm:$0xff]   ;;  %v1996_v1 = vld [vmem:[%s2130_s26 + $0x168] sm:$0xff]   ;;  %v2004_v7 = vld [vmem:[%s2427_s1 + $0xd8] ss:$36 sps:$4 sm:$0xff]  }
  0x23   : > { %1734 = vmatprep.subr.bf16.mxu1 %v1943_v20  ;;  %v1993_v62 = vld [vmem:[%s2130_s26 + $0x1e0] sm:$0xff]   ;;  %v1997_v2 = vld [vmem:[%s2130_s26 + $0x1e8] sm:$0xff]   ;;  %v2006_v9 = vld [vmem:[%s2130_s26 + $0x170] sm:$0xff]  }
  0x24   : > { %v1994_v63 = vld [vmem:[%s2130_s26 + $0x120] sm:$0xff]   ;;  %v1998_v3 = vld [vmem:[%s2130_s26 + $0x128] sm:$0xff]   ;;  %v2007_v10 = vld [vmem:[%s2130_s26 + $0x1f0] sm:$0xff]  }
  0x25   : > { %1695 = vmatpush3.bf16.msra.mxu0 %v1944_v21  ;;  %v1995_v0 = vld [vmem:[%s2130_s26 + $0x1a0] sm:$0xff]   ;;  %v1999_v4 = vld [vmem:[%s2130_s26 + $0x1a8] sm:$0xff]   ;;  %v2008_v11 = vld [vmem:[%s2130_s26 + $0x130] sm:$0xff]  }
  0x26   : > { %1735 = vmatpush3.bf16.msra.mxu1 %v1945_v22  ;;  %1696 = vmatprep.subr.bf16.mxu0 %v1946_v23  ;;  %v2000_v5 = vld [vmem:[%s2427_s1 + $0xdc] ss:$36 sps:$4 sm:$0xff]   ;;  %v2002_v6 = vld [vmem:[%s2427_s1 + $0xe4] ss:$36 sps:$4 sm:$0xff]   ;;  %v2009_v12 = vld [vmem:[%s2130_s26 + $0x1b0] sm:$0xff]  }
  0x27   : > { %1736 = vmatprep.subr.bf16.mxu1 %v1947_v24  ;;  %v2005_v8 = vld [vmem:[%s2427_s1 + $0xe0] ss:$36 sps:$4 sm:$0xff]   ;;  %v2010_v13 = vld [vmem:[%s2130_s26 + $0x178] sm:$0xff]   ;;  %v2014_v17 = vld [vmem:[%s2427_s1 + $0x10] ss:$36 sps:$4 sm:$0xff]  }
  0x28   : > { %v2011_v14 = vld [vmem:[%s2130_s26 + $0x1f8] sm:$0xff]   ;;  %v2020_v21 = vld [vmem:[%s2130_s26 + $0x200] sm:$0xff]   ;;  %v2021_v22 = vld [vmem:[%s2130_s26 + $0x208] sm:$0xff]  }
  0x29   : > { %1697 = vmatpush3.bf16.msra.mxu0 %v1948_v25  ;;  %v2012_v15 = vld [vmem:[%s2130_s26 + $0x138] sm:$0xff]   ;;  %v2024_v24 = vld [vmem:[%s2427_s1 + $0x64] ss:$36 sps:$4 sm:$0xff]  }
  0x2a   : > { %1737 = vmatpush3.bf16.msra.mxu1 %v1949_v26  ;;  %1698 = vmatprep.subr.bf16.mxu0 %v1950_v27  ;;  %v2013_v16 = vld [vmem:[%s2130_s26 + $0x1b8] sm:$0xff]   ;;  %v2027_v26 = vld [vmem:[%s2427_s1 + $0x60] ss:$36 sps:$4 sm:$0xff]   ;;  %v2028_v27 = vld [vmem:[%s2130_s26 + $0x210] sm:$0xff]  }
  0x2b   : > { %1738 = vmatprep.subr.bf16.mxu1 %v1951_v28  ;;  %v2016_v18 = vld [vmem:[%s2427_s1 + $0x14] ss:$36 sps:$4 sm:$0xff]   ;;  %v2019_v20 = vld [vmem:[%s2427_s1 + $0x1c] ss:$36 sps:$4 sm:$0xff]   ;;  %v2030_v28 = vld [vmem:[%s2427_s1 + $0xa4] ss:$36 sps:$4 sm:$0xff]  }
  0x2c   : > { %v2017_v19 = vld [vmem:[%s2427_s1 + $0x18] ss:$36 sps:$4 sm:$0xff]  }
  0x2d   : > { %1699 = vmatpush3.bf16.msra.mxu0 %v1952_v29  ;;  %v2022_v23 = vld [vmem:[%s2427_s1 + $0x5c] ss:$36 sps:$4 sm:$0xff]   ;;  %v2032_v29 = vld [vmem:[%s2427_s1 + $0xac] ss:$36 sps:$4 sm:$0xff]  }
  0x2e   : > { %1739 = vmatpush3.bf16.msra.mxu1 %v1953_v30  ;;  %1700 = vmatprep.subr.bf16.mxu0 %v1954_v31  ;;  %v2026_v25 = vld [vmem:[%s2427_s1 + $0x58] ss:$36 sps:$4 sm:$0xff]   ;;  %v2034_v31 = vld [vmem:[%s2427_s1 + $0xa0] ss:$36 sps:$4 sm:$0xff]  }
  0x2f   : > { %1740 = vmatprep.subr.bf16.mxu1 %v1955_v32  ;;  %v2029_v30 = vld [vmem:[%s2130_s26 + $0x218] sm:$0xff]   ;;  %v2035_v32 = vld [vmem:[%s2427_s1 + $0xa8] ss:$36 sps:$4 sm:$0xff]  }
  0x31   : > { %1701 = vmatpush3.bf16.msra.mxu0 %v1956_v34  ;;  %v2038_v34 = vld [vmem:[%s2427_s1 + $0xec] ss:$36 sps:$4 sm:$0xff]  }
  0x32   : > { %1741 = vmatpush3.bf16.msra.mxu1 %v1957_v36  ;;  %1766 = vmatprep.subr.bf16.mxu0 %v1964_v38  ;;  %v2037_v36 = vld [vmem:[%s2130_s26 + $0x228] sm:$0xff]   ;;  %v1355_v38 = vld [vmem:[%s2428_s2] sm:$0xff] }
  0x33   : > { %1806 = vmatprep.subr.bf16.mxu1 %v1965_v40  ;;  %v2044_v40 = vld [vmem:[%s2130_s26 + $0x230] sm:$0xff]   ;;  %1365 = vperm.xlu0 %1924, %v1355_v38  }
  0x34   : > { %1063 = vmatmul.mubr.bf16.vlgmr.msra.gmra.mrb[0].mxu0 %v1958_v33  ;;  %v2036_v33 = vld [vmem:[%s2130_s26 + $0x220] sm:$0xff]  }
  0x35   : > { %1128 = vmatmul.mubr.bf16.vlgmr.msra.gmra.mrb[0].mxu1 %v1961_v35  ;;  %1767 = vmatpush3.bf16.msra.mxu0 %v1966_v41  ;;  %v2040_v35 = vld [vmem:[%s2427_s1 + $0xf4] ss:$36 sps:$4 sm:$0xff]  }
  0x36   : > { %1807 = vmatpush3.bf16.msra.mxu1 %v1967_v42  ;;  %1070 = vmatprep.mubr.bf16.mxu0 %v1972_v37  ;;  %v1357_v37 = vld [vmem:[%s2428_s2 + $0x10] sm:$0xff]  ;;  %v2046_v42 = vld [vmem:[%s2427_s1 + $0x20] ss:$36 sps:$4 sm:$0xff]  }
  0x37   : > { %1768 = vmatprep.subr.bf16.mxu0 %v1968_v43  ;;  %1135 = vmatprep.mubr.bf16.mxu1 %v1974_v39  ;;  %v2042_v39 = vld [vmem:[%s2427_s1 + $0xe8] ss:$36 sps:$4 sm:$0xff]   ;;  %v2043_v41 = vld [vmem:[%s2427_s1 + $0xf0] ss:$36 sps:$4 sm:$0xff]  }
  0x38   : > { %1808 = vmatprep.subr.bf16.mxu1 %v1969_v44  ;;  %1375 = vperm.xlu1 %1925, %v1357_v37   ;;  %v2047_v43 = vld [vmem:[%s2427_s1 + $0xb0] ss:$36 sps:$4 sm:$0xff]   ;;  %v2045_v44 = vld [vmem:[%s2130_s26 + $0x238] sm:$0xff]  }
  0x39   : > { %1769 = vmatpush3.bf16.msra.mxu0 %v1970_v46  ;;  %v1356_v46 = vld [vmem:[%s2428_s2 + $0x8] sm:$0xff] }
  0x3a   : > { %1809 = vmatpush3.bf16.msra.mxu1 %v1971_v48  ;;  %1770 = vmatprep.subr.bf16.mxu0 %v1978_v50  ;;  %v1360_v48 = vld [vmem:[%s2428_s2 + $0x28] sm:$0xff]  ;;  %v1359_v50 = vld [vmem:[%s2428_s2 + $0x20] sm:$0xff] }
  0x3b   : > { %1810 = vmatprep.subr.bf16.mxu1 %v1979_v51  ;;  %1370 = vperm.xlu0 %1924, %v1356_v46   ;;  %v1362_v51 = vld [vmem:[%s2428_s2 + $0x38] sm:$0xff] }
  0x3c   : > { %1071 = vmatmul.mubr.bf16.gmra.mrb[4].mxu0 %v1976_v45  ;;  %v1358_v45 = vld [vmem:[%s2428_s2 + $0x18] sm:$0xff] }
  0x3d   : > { %1136 = vmatmul.mubr.bf16.gmra.mrb[4].mxu1 %v1977_v47  ;;  %1771 = vmatpush3.bf16.msra.mxu0 %v1980_v52  ;;  %v2048_v47 = vld [vmem:[%s2427_s1 + $0x68] ss:$36 sps:$4 sm:$0xff]   ;;  %v1361_v52 = vld [vmem:[%s2428_s2 + $0x30] sm:$0xff] }
  0x3e   : > { %1811 = vmatpush3.bf16.msra.mxu1 %v1981_v53  ;;  %1078 = vmatprep.mubr.bf16.mxu0 %v1986_v49  ;;  %v2049_v49 = vld [vmem:[%s2427_s1 + $0xf8] ss:$36 sps:$4 sm:$0xff]   ;;  %v1412_v53 = vld [vmem:[%s2429_s3 + $0x8] sm:$0xff] }
  0x3f   : > { %1772 = vmatprep.subr.bf16.mxu0 %v1982_v54  ;;  %1812 = vmatprep.subr.bf16.mxu1 %v1983_v55  ;;  %v1411_v54 = vld [vmem:[%s2429_s3] sm:$0xff]  ;;  %v1414_v55 = vld [vmem:[%s2429_s3 + $0x18] sm:$0xff] }
  0x40   : > { %1143 = vmatprep.mubr.bf16.mxu1 %v1988_v58  ;;  %1380 = vperm.xlu1 %1925, %v1358_v45   ;;  %v1415_v58 = vld [vmem:[%s2429_s3 + $0x20] sm:$0xff] }
  0x41   : > { %1773 = vmatpush3.bf16.msra.mxu0 %v1984_v56  ;;  %1385 = vperm.xlu0 %1924, %v1359_v50   ;;  %v1413_v56 = vld [vmem:[%s2429_s3 + $0x10] sm:$0xff] }
  0x42   : > { %1813 = vmatpush3.bf16.msra.mxu1 %v1985_v57  ;;  %1774 = vmatprep.subr.bf16.mxu0 %v1992_v61  ;;  %v1416_v57 = vld [vmem:[%s2429_s3 + $0x28] sm:$0xff] }
  0x43   : > { %1814 = vmatprep.subr.bf16.mxu1 %v1993_v62 }
  0x44   : > { %1079 = vmatmul.mubr.bf16.gmra.mrb[8].mxu0 %v1990_v59  ;;  %1390 = vperm.xlu1 %1925, %v1360_v48   ;;  %v1418_v59 = vld [vmem:[%s2429_s3 + $0x38] sm:$0xff] }
  0x45   : > { %1144 = vmatmul.mubr.bf16.gmra.mrb[8].mxu1 %v1991_v60  ;;  %1775 = vmatpush3.bf16.msra.mxu0 %v1994_v63  ;;  %v1417_v60 = vld [vmem:[%s2429_s3 + $0x30] sm:$0xff] }
  0x46   : > { %1815 = vmatpush3.bf16.msra.mxu1 %v1995_v0  ;;  %1776 = vmatprep.subr.bf16.mxu0 %v1996_v1 }
  0x47   : > { %1816 = vmatprep.subr.bf16.mxu1 %v1997_v2  ;;  %1086 = vmatprep.mubr.bf16.mxu0 %v2000_v5 }
  0x48   : > { %1151 = vmatprep.mubr.bf16.mxu1 %v2002_v6  ;;  %1400 = vperm.xlu1 %1925, %v1362_v51  }
  0x49   : > { %1777 = vmatpush3.bf16.msra.mxu0 %v1998_v3  ;;  %1395 = vperm.xlu0 %1924, %v1361_v52  }
  0x4a   : > { %1817 = vmatpush3.bf16.msra.mxu1 %v1999_v4  ;;  %1778 = vmatprep.subr.bf16.mxu0 %v2006_v9 }
  0x4b   : > { %1818 = vmatprep.subr.bf16.mxu1 %v2007_v10 }
  0x4c   : > { %1087 = vmatmul.mubr.bf16.gmra.mrb[12].mxu0 %v2004_v7  ;;  %1426 = vperm.xlu1 %1925, %v1412_v53  }
  0x4d   : > { %1152 = vmatmul.mubr.bf16.gmra.mrb[12].mxu1 %v2005_v8  ;;  %1779 = vmatpush3.bf16.msra.mxu0 %v2008_v11 }
  0x4e   : > { %1819 = vmatpush3.bf16.msra.mxu1 %v2009_v12  ;;  %1780 = vmatprep.subr.bf16.mxu0 %v2010_v13 }
  0x4f   : > { %1820 = vmatprep.subr.bf16.mxu1 %v2011_v14  ;;  %1192 = vmatprep.mubr.bf16.mxu0 %v2016_v18 }
  0x50   : > { %1257 = vmatprep.mubr.bf16.mxu1 %v2019_v20  ;;  %1421 = vperm.xlu0 %1924, %v1411_v54  }
  0x51   : > { %1781 = vmatpush3.bf16.msra.mxu0 %v2012_v15  ;;  %1436 = vperm.xlu1 %1925, %v1414_v55  }
  0x52   : > { %1821 = vmatpush3.bf16.msra.mxu1 %v2013_v16  ;;  %1858 = vmatprep.subr.bf16.mxu0 %v2020_v21 }
  0x53   : > { %1882 = vmatprep.subr.bf16.mxu1 %v2020_v21 }
  0x54   : > { %1193 = vmatmul.mubr.bf16.vlgmr.msra.gmra.mrb[16].mxu0 %v2014_v17  ;;  %1431 = vperm.xlu0 %1924, %v1413_v56  }
  0x55   : > { %1258 = vmatmul.mubr.bf16.vlgmr.msra.gmra.mrb[16].mxu1 %v2017_v19  ;;  %1859 = vmatpush3.bf16.msra.mxu0 %v2020_v21 }
  0x56   : > { %1890 = vmatpush3.bf16.msra.mxu1 %v2020_v21  ;;  %1860 = vmatprep.subr.bf16.mxu0 %v2021_v22 }
  0x57   : > { %1883 = vmatprep.subr.bf16.mxu1 %v2021_v22  ;;  %1200 = vmatprep.mubr.bf16.mxu0 %v2022_v23 }
  0x58   : > { %1265 = vmatprep.mubr.bf16.mxu1 %v2024_v24  ;;  %1446 = vperm.xlu1 %1925, %v1416_v57  }
  0x59   : > { %1861 = vmatpush3.bf16.msra.mxu0 %v2021_v22  ;;  %1441 = vperm.xlu0 %1924, %v1415_v58  }
  0x5a   : > { %1891 = vmatpush3.bf16.msra.mxu1 %v2021_v22  ;;  %1862 = vmatprep.subr.bf16.mxu0 %v2028_v27 }
  0x5b   : > { %1884 = vmatprep.subr.bf16.mxu1 %v2028_v27 }
  0x5c   : > { %1201 = vmatmul.mubr.bf16.gmra.mrb[20].mxu0 %v2026_v25  ;;  %1456 = vperm.xlu1 %1925, %v1418_v59  }
  0x5d   : > { %1266 = vmatmul.mubr.bf16.gmra.mrb[20].mxu1 %v2027_v26  ;;  %1208 = vmatprep.mubr.bf16.mxu0 %v2030_v28 }
  0x5e   : > { %1863 = vmatpush3.bf16.msra.mxu0 %v2028_v27  ;;  %1273 = vmatprep.mubr.bf16.mxu1 %v2032_v29 }
  0x5f   : > { %1892 = vmatpush3.bf16.msra.mxu1 %v2028_v27  ;;  %1864 = vmatprep.subr.bf16.mxu0 %v2029_v30 }
  0x60   : > { %1885 = vmatprep.subr.bf16.mxu1 %v2029_v30  ;;  %1451 = vperm.xlu0 %1924, %v1417_v60  }
  0x62   : > { %1865 = vmatpush3.bf16.msra.mxu0 %v2029_v30 }
  0x63   : > { %1893 = vmatpush3.bf16.msra.mxu1 %v2029_v30  ;;  %1866 = vmatprep.subr.bf16.mxu0 %v2036_v33 }
  0x64   : > { %1209 = vmatmul.mubr.bf16.gmra.mrb[24].mxu0 %v2034_v31  ;;  %1886 = vmatprep.subr.bf16.mxu1 %v2036_v33 }
  0x65   : > { %1274 = vmatmul.mubr.bf16.gmra.mrb[24].mxu1 %v2035_v32  ;;  %1216 = vmatprep.mubr.bf16.mxu0 %v2038_v34 }
  0x66   : > { %1867 = vmatpush3.bf16.msra.mxu0 %v2036_v33  ;;  %1281 = vmatprep.mubr.bf16.mxu1 %v2040_v35 }
  0x67   : > { %1894 = vmatpush3.bf16.msra.mxu1 %v2036_v33  ;;  %1868 = vmatprep.subr.bf16.mxu0 %v2037_v36 }
  0x68   : > { %1887 = vmatprep.subr.bf16.mxu1 %v2037_v36 }
  0x6a   : > { %1869 = vmatpush3.bf16.msra.mxu0 %v2037_v36 }
  0x6b   : > { %1895 = vmatpush3.bf16.msra.mxu1 %v2037_v36  ;;  %1870 = vmatprep.subr.bf16.mxu0 %v2044_v40 }
  0x6c   : > { %1217 = vmatmul.mubr.bf16.gmra.mrb[28].mxu0 %v2042_v39  ;;  %1888 = vmatprep.subr.bf16.mxu1 %v2044_v40 }
  0x6d   : > { %1282 = vmatmul.mubr.bf16.gmra.mrb[28].mxu1 %v2043_v41  ;;  %1874 = vmatprep.mubr.bf16.mxu0 %v2046_v42 }
  0x6e   : > { %1871 = vmatpush3.bf16.msra.mxu0 %v2044_v40  ;;  %1878 = vmatprep.mubr.bf16.mxu1 %v2047_v43 }
  0x6f   : > { %1896 = vmatpush3.bf16.msra.mxu1 %v2044_v40  ;;  %1872 = vmatprep.subr.bf16.mxu0 %v2045_v44 }
  0x70   : > { %1889 = vmatprep.subr.bf16.mxu1 %v2045_v44 }
  0x72   : > { %1873 = vmatpush3.bf16.msra.mxu0 %v2045_v44 }
  0x73   : > { %1897 = vmatpush3.bf16.msra.mxu1 %v2045_v44 }
  0x75   : > { %1875 = vmatmul.mubr.bf16.vlgmr.msra.gmra.mrb[32].mxu0 %v2048_v47 }
  0x76   : > { %1879 = vmatmul.mubr.bf16.vlgmr.msra.gmra.mrb[32].mxu1 %v2049_v49 }
  0xb2   : > { %v2360_v39 = vpop.permute.xlu0 %1365 }
  0xb7   : > { %v2362_v50 = vpop.permute.xlu1 %1375 }
  0xba   : > { %v2366_v54 = vpop.permute.xlu0 %1370 }
  0xbf   : > { %v2370_v56 = vpop.permute.xlu1 %1380 }
  0xc0   : > { %v2372_v58 = vpop.permute.xlu0 %1385 }
 0x107   : > { %v1702_v61 = vpop.f32.mrb[0].mxu0 }
 0x108   : > { %v1742_v62 = vpop.f32.mrb[0].mxu1  ;;  %v1703_v63 = vpop.f32.mrb[1].mxu0 }
 0x109   : > { %v1704_v0 = vadd.f32 %v1703_v63, %v1702_v61  ;;  %v1743_v1 = vpop.f32.mrb[1].mxu1  ;;  %v1705_v2 = vpop.f32.mrb[2].mxu0 }
 0x10a   : > { %v1744_v3 = vadd.f32 %v1743_v1, %v1742_v62  ;;  %v1745_v4 = vpop.f32.mrb[2].mxu1  ;;  %v1706_v5 = vpop.f32.mrb[3].mxu0 }
 0x10b   : > { %v1707_v6 = vadd.f32 %v1706_v5, %v1705_v2  ;;  %v1746_v7 = vpop.f32.mrb[3].mxu1 }
 0x10c   : > { %v1130_v8 = vadd.f32 %v1744_v3, %v1704_v0  ;;  %v1747_v9 = vadd.f32 %v1746_v7, %v1745_v4 }
 0x10e   : > { %v1133_v10 = vadd.f32 %v1747_v9, %v1707_v6 }
 0x10f   : > { %v1708_v11 = vpop.f32.mrb[4].mxu0 }
 0x110   : > { %v1748_v12 = vpop.f32.mrb[4].mxu1  ;;  %v1709_v13 = vpop.f32.mrb[5].mxu0 }
 0x111   : > { %v1710_v14 = vadd.f32 %v1709_v13, %v1708_v11  ;;  %v1749_v15 = vpop.f32.mrb[5].mxu1  ;;  %v1711_v16 = vpop.f32.mrb[6].mxu0 }
 0x112   : > { %v1750_v17 = vadd.f32 %v1749_v15, %v1748_v12  ;;  %v1751_v18 = vpop.f32.mrb[6].mxu1  ;;  %v1712_v19 = vpop.f32.mrb[7].mxu0 }
 0x113   : > { %v1713_v20 = vadd.f32 %v1712_v19, %v1711_v16  ;;  %v1752_v21 = vpop.f32.mrb[7].mxu1  ;;  %v2376_v11 = vpop.permute.xlu1 %1390 }
 0x114   : > { %v1138_v22 = vadd.f32 %v1750_v17, %v1710_v14  ;;  %v1753_v23 = vadd.f32 %v1752_v21, %v1751_v18  ;;  %v2380_v14 = vpop.permute.xlu0 %1395 }
 0x116   : > { %v2354_v24 = vadd.f32 %v1753_v23, %v1713_v20 }
 0x117   : > { %v1714_v25 = vpop.f32.mrb[8].mxu0 }
 0x118   : > { %v1754_v26 = vpop.f32.mrb[8].mxu1  ;;  %v1715_v27 = vpop.f32.mrb[9].mxu0 }
 0x119   : > { %v1716_v28 = vadd.f32 %v1715_v27, %v1714_v25  ;;  %v1755_v29 = vpop.f32.mrb[9].mxu1  ;;  %v1717_v30 = vpop.f32.mrb[10].mxu0 }
 0x11a   : > { %v1756_v31 = vadd.f32 %v1755_v29, %v1754_v26  ;;  %v1757_v32 = vpop.f32.mrb[10].mxu1  ;;  %v1718_v33 = vpop.f32.mrb[11].mxu0 }
 0x11b   : > { %v1719_v34 = vadd.f32 %v1718_v33, %v1717_v30  ;;  %v1758_v35 = vpop.f32.mrb[11].mxu1  ;;  %v2383_v29 = vpop.permute.xlu1 %1400 }
 0x11c   : > { %v2356_v36 = vadd.f32 %v1756_v31, %v1716_v28  ;;  %v1759_v37 = vadd.f32 %v1758_v35, %v1757_v32  ;;  %v2385_v32 = vpop.permute.xlu0 %1421 }
 0x11e   : > { %v2358_v38 = vadd.f32 %v1759_v37, %v1719_v34 }
 0x11f   : > { %v1720_v40 = vpop.f32.mrb[12].mxu0 }
 0x120   : > { %v1760_v41 = vpop.f32.mrb[12].mxu1  ;;  %v1721_v42 = vpop.f32.mrb[13].mxu0 }
 0x121   : > { %v1761_v43 = vpop.f32.mrb[13].mxu1  ;;  %v1722_v44 = vadd.f32 %v1721_v42, %v1720_v40  ;;  %v1723_v46 = vpop.f32.mrb[14].mxu0 }
 0x122   : > { %v1762_v45 = vadd.f32 %v1761_v43, %v1760_v41  ;;  %v1763_v47 = vpop.f32.mrb[14].mxu1  ;;  %v1724_v48 = vpop.f32.mrb[15].mxu0 }
 0x123   : > { %v1764_v49 = vpop.f32.mrb[15].mxu1  ;;  %v1725_v52 = vadd.f32 %v1724_v48, %v1723_v46 }
 0x124   : > { %v2364_v51 = vadd.f32 %v1762_v45, %v1722_v44  ;;  %v1765_v53 = vadd.f32 %v1764_v49, %v1763_v47  ;;  %v2388_v45 = vpop.permute.xlu1 %1426 }
 0x126   : > { %v2368_v55 = vadd.f32 %v1765_v53, %v1725_v52  ;;  %v1432_v53 = vpop.permute.xlu0 %1431 }
 0x127   : > { %v1782_v57 = vpop.f32.mrb[16].mxu0 }
 0x128   : > { %v1783_v59 = vpop.f32.mrb[17].mxu0  ;;  %v1822_v60 = vpop.f32.mrb[16].mxu1 }
 0x129   : > { %v1784_v61 = vadd.f32 %v1783_v59, %v1782_v57  ;;  %v1785_v62 = vpop.f32.mrb[18].mxu0  ;;  %v1823_v63 = vpop.f32.mrb[17].mxu1 }
 0x12a   : > { %v1786_v0 = vpop.f32.mrb[19].mxu0  ;;  %v1824_v2 = vadd.f32 %v1823_v63, %v1822_v60  ;;  %v1825_v3 = vpop.f32.mrb[18].mxu1 }
 0x12b   : > { %v1195_v1 = vadd.f32 %v1784_v61, %v1130_v8  ;;  %v1787_v4 = vadd.f32 %v1786_v0, %v1785_v62  ;;  %v1826_v5 = vpop.f32.mrb[19].mxu1 }
 0x12c   : > { %v1827_v7 = vadd.f32 %v1826_v5, %v1825_v3 }
 0x12d   : > { %v1198_v6 = vadd.f32 %v1787_v4, %v1133_v10  ;;  %v2374_v9 = vadd.f32 %v1824_v2, %v1195_v1 }
 0x12f   : > { %v1788_v12 = vpop.f32.mrb[20].mxu0  ;;  %v2378_v13 = vadd.f32 %v1827_v7, %v1198_v6 }
 0x130   : > { %v1789_v15 = vpop.f32.mrb[21].mxu0  ;;  %v1828_v16 = vpop.f32.mrb[20].mxu1 }
 0x131   : > { %v1790_v17 = vadd.f32 %v1789_v15, %v1788_v12  ;;  %v1791_v18 = vpop.f32.mrb[22].mxu0  ;;  %v1829_v8 = vpop.f32.mrb[21].mxu1 }
 0x132   : > { %v1792_v19 = vpop.f32.mrb[23].mxu0  ;;  %v1830_v21 = vadd.f32 %v1829_v8, %v1828_v16  ;;  %v1831_v23 = vpop.f32.mrb[22].mxu1 }
 0x133   : > { %v1203_v20 = vadd.f32 %v1790_v17, %v1138_v22  ;;  %v1793_v10 = vadd.f32 %v1792_v19, %v1791_v18  ;;  %v1832_v25 = vpop.f32.mrb[23].mxu1  ;;  %v1442_v12 = vpop.permute.xlu0 %1441 }
 0x134   : > { %v1833_v27 = vadd.f32 %v1832_v25, %v1831_v23 }
 0x135   : > { %v1206_v26 = vadd.f32 %v1793_v10, %v2354_v24  ;;  %v1268_v28 = vadd.f32 %v1830_v21, %v1203_v20 }
 0x137   : > { %v1794_v30 = vpop.f32.mrb[24].mxu0  ;;  %v1271_v31 = vadd.f32 %v1833_v27, %v1206_v26 }
 0x138   : > { %v1795_v33 = vpop.f32.mrb[25].mxu0  ;;  %v1834_v34 = vpop.f32.mrb[24].mxu1 }
 0x139   : > { %v1796_v35 = vadd.f32 %v1795_v33, %v1794_v30  ;;  %v1797_v37 = vpop.f32.mrb[26].mxu0  ;;  %v1835_v40 = vpop.f32.mrb[25].mxu1 }
 0x13a   : > { %v1798_v22 = vpop.f32.mrb[27].mxu0  ;;  %v1836_v42 = vadd.f32 %v1835_v40, %v1834_v34  ;;  %v1837_v43 = vpop.f32.mrb[26].mxu1 }
 0x13b   : > { %v1211_v41 = vadd.f32 %v1796_v35, %v2356_v36  ;;  %v1799_v44 = vadd.f32 %v1798_v22, %v1797_v37  ;;  %v1838_v24 = vpop.f32.mrb[27].mxu1  ;;  %v1437_v36 = vpop.permute.xlu1 %1436 }
 0x13c   : > { %v1839_v47 = vadd.f32 %v1838_v24, %v1837_v43  ;;  %v1452_v35 = vpop.permute.xlu0 %1451 }
 0x13d   : > { %v1214_v46 = vadd.f32 %v1799_v44, %v2358_v38  ;;  %v1276_v48 = vadd.f32 %v1836_v42, %v1211_v41 }
 0x13f   : > { %v1800_v49 = vpop.f32.mrb[28].mxu0  ;;  %v1279_v52 = vadd.f32 %v1839_v47, %v1214_v46  ;;  %v1447_v15 = vpop.permute.xlu1 %1446 }
 0x140   : > { %v1801_v57 = vpop.f32.mrb[29].mxu0  ;;  %v1840_v59 = vpop.f32.mrb[28].mxu1 }
 0x141   : > { %v1802_v60 = vadd.f32 %v1801_v57, %v1800_v49  ;;  %v1803_v61 = vpop.f32.mrb[30].mxu0  ;;  %v1841_v62 = vpop.f32.mrb[29].mxu1 }
 0x142   : > { %v1804_v63 = vpop.f32.mrb[31].mxu0  ;;  %v1842_v1 = vadd.f32 %v1841_v62, %v1840_v59  ;;  %v1843_v2 = vpop.f32.mrb[30].mxu1 }
 0x143   : > { %v1219_v0 = vadd.f32 %v1802_v60, %v2364_v51  ;;  %v1805_v3 = vadd.f32 %v1804_v63, %v1803_v61  ;;  %v1844_v4 = vpop.f32.mrb[31].mxu1 }
 0x144   : > { %v1845_v5 = vadd.f32 %v1844_v4, %v1843_v2 }
 0x145   : > { %v1222_v38 = vadd.f32 %v1805_v3, %v2368_v55  ;;  %v1284_v6 = vadd.f32 %v1842_v1, %v1219_v0 }
 0x147   : > { %v1287_v7 = vadd.f32 %v1845_v5, %v1222_v38 }
 0x148   : > { %v1876_v16 = vpop.f32.mrb[32].mxu0 }
 0x149   : > { %v1333_v17 = vadd.f32 %v1876_v16, %v1268_v28  ;;  %v1880_v18 = vpop.f32.mrb[32].mxu1  ;;  %v1324_v8 = vpop.f32.mrb[33].mxu0 }
 0x14a   : > { %v1349_v19 = vadd.f32 %v1880_v18, %v1284_v6  ;;  %v1325_v20 = vadd.f32 %v1324_v8, %v2374_v9  ;;  %v1340_v51 = vpop.f32.mrb[33].mxu1  ;;  %v1877_v21 = vpop.f32.mrb[34].mxu0 }
 0x14b   : > { %v1405_v23 = vmul.f32 %v2362_v50, %v1333_v17  ;;  %v1341_v10 = vadd.f32 %v1340_v51, %v1276_v48  ;;  %v1336_v55 = vadd.f32 %v1877_v21, %v1271_v31  ;;  %v1881_v25 = vpop.f32.mrb[34].mxu1  ;;  %v1327_v26 = vpop.f32.mrb[35].mxu0 }
 0x14c   : > { %v1409_v27 = vmul.f32 %v2380_v14, %v1349_v19  ;;  %v1403_v30 = vmul.f32 %v2360_v39, %v1325_v20  ;;  %v1352_v28 = vadd.f32 %v1881_v25, %v1287_v7  ;;  %v1328_v33 = vadd.f32 %v1327_v26, %v2378_v13  ;;  %v1343_v34 = vpop.f32.mrb[35].mxu1  ;;  %v1457_v13 = vpop.permute.xlu1 %1456 }
 0x14d   : > { %v1461_v9 = vadd.f32 %v1432_v53, %v1405_v23  ;;  %v1407_v37 = vmul.f32 %v2372_v58, %v1341_v10  ;;  %v1406_v40 = vmul.f32 %v2370_v56, %v1336_v55  ;;  %v1344_v50 = vadd.f32 %v1343_v34, %v1279_v52 }
 0x14e   : > { %v1465_v31 = vadd.f32 %v1452_v35, %v1409_v27  ;;  %v1459_v14 = vadd.f32 %v2385_v32, %v1403_v30  ;;  %v1410_v39 = vmul.f32 %v2383_v29, %v1352_v28  ;;  %v1404_v22 = vmul.f32 %v2366_v54, %v1328_v33 }
 0x14f   : > { %v1469_v41 = vmax.f32 %v1461_v9, 0.0  ;;  %v1463_v42 = vadd.f32 %v1442_v12, %v1407_v37  ;;  %v1462_v43 = vadd.f32 %v1437_v36, %v1406_v40  ;;  %v1408_v58 = vmul.f32 %v2376_v11, %v1344_v50 }
 0x150   : > { %v1473_v44 = vmax.f32 %v1465_v31, 0.0  ;;  %v1467_v56 = vmax.f32 %v1459_v14, 0.0  ;;  %v1466_v24 = vadd.f32 %v1457_v13, %v1410_v39  ;;  %v1460_v46 = vadd.f32 %v2388_v45, %v1404_v22 }
 0x151   : > { %1478 = vst.msk [vmem:[%s228_s21 + $0x10] sm:$0xff] %vm1475_vm0, %v1469_v41  ;;  %v1471_v47 = vmax.f32 %v1463_v42, 0.0  ;;  %v1470_v48 = vmax.f32 %v1462_v43, 0.0  ;;  %v1464_v32 = vadd.f32 %v1447_v15, %v1408_v58 }
 0x152   : > { %1482 = vst.msk [vmem:[%s228_s21 + $0x30] sm:$0xff] %vm1475_vm0, %v1473_v44  ;;  %1476 = vst.msk [vmem:[%s228_s21] sm:$0xff] %vm1475_vm0, %v1467_v56  ;;  %v1474_v54 = vmax.f32 %v1466_v24, 0.0  ;;  %v1468_v29 = vmax.f32 %v1460_v46, 0.0 }
 0x153   : > { %1480 = vst.msk [vmem:[%s228_s21 + $0x20] sm:$0xff] %vm1475_vm0, %v1471_v47  ;;  %1479 = vst.msk [vmem:[%s228_s21 + $0x18] sm:$0xff] %vm1475_vm0, %v1470_v48  ;;  %v1472_v11 = vmax.f32 %v1464_v32, 0.0 }
 0x154   : > { %1483 = vst.msk [vmem:[%s228_s21 + $0x38] sm:$0xff] %vm1475_vm0, %v1474_v54  ;;  %1477 = vst.msk [vmem:[%s228_s21 + $0x8] sm:$0xff] %vm1475_vm0, %v1468_v29 }
 0x155   : > { %1481 = vst.msk [vmem:[%s228_s21 + $0x28] sm:$0xff] %vm1475_vm0, %v1472_v11 }
 0x156 PF: > { %s14_s17 = sadd.s32 1, %s2072_s17   ;;  %s2431_s15 = smov %s2068_s16 }
 0x157   : > { %p11_p5 = scmp.ge.s32.totalorder %s14_s17, 4   ;;  %s2432_s16 = smov %s2434_s18 }
 0x159   :  { %13 = sbr.rel (!%p11_p5) target bundleno = 2 (0x2), region = 66 }

// kernel: unet_forward.32
= control target key start
LH: loop header
LB: loop body
LE: loop exit
PB: predicated region body
PF: predicated region fallthrough
CT: control target
= control target key end

     0   :  { %s765_s15 = smov 0   ;;  %s767_s16 = smov 0   ;;  %s843_s0 = inlined_call_operand.vmem [shape: bf16[2,288,64], index: 0, kind: input, shape index: {}]   ;;  %s844_s1 = inlined_call_operand.vmem [shape: bf16[16,288], index: 1, kind: input, shape index: {}]   ;;  %s845_s2 = inlined_call_operand.vmem [shape: f32[16,1], index: 2, kind: input, shape index: {}]   ;;  %s846_s3 = inlined_call_operand.vmem [shape: f32[16,1], index: 3, kind: input, shape index: {}]   ;;  %s847_s4 = inlined_call_operand.vmem [shape: f32[2,16,64], index: 4, kind: output, shape index: {}]  }
   0x1   :  { %s769_s17 = smov 0  }
   0x2 LB: > { %s26_s18 = sadd.s32 1, %s731_s16  ;;  %p599_p0 = scmp.ge.s32.totalorder %s735_s17, 1  ;;  %s735_s17 = sphi %s769_s17, %s14_s17   ;;  %s731_s16 = sphi %s767_s16, %s849_s16   ;;  %s727_s15 = sphi %s765_s15, %s848_s15  }
   0x3   : > { %p28_p1 = scmp.ge.s32.totalorder %s26_s18, 2  ;;  %p181_p2 = scmp.lt.s32.totalorder %s735_s17, 3 }
   0x5   : > { %s851_s18 = smov (%p28_p1, %s26_s18), 0  ;;  %p182_p3 = pnand %p599_p0, %p181_p2 }
   0x6   : > { %p213_p4 = scmp.lt.s32.totalorder (!%p182_p3), %s727_s15, 1  ;;  %v737_v0 = vmov (!%p182_p3), 0.0   ;;  %v711_v1 = vld [vmem:[%s844_s1 + $0x4] ss:$12 sps:$4 sm:$0xff] (!%p182_p3)   ;;  %vm738_vm0 = vmmov (!%p182_p3), 0   ;;  %v739_v2 = vmov (!%p182_p3), 0  }
   0x7   : > { %185 = sbr.rel (%p182_p3) target bundleno = 277 (0x115), region = 36  ;;  %653 = vmatprep.subr.bf16.mxu1 (!%p182_p3), %v737_v0  ;;  %657 = vmatprep.mubr.msk.bf16.mxu1 (!%p182_p3), %vm738_vm0, %v737_v0  ;;  %v479_v3 = vld [vmem:[%s845_s2] sm:$0xff] (!%p182_p3)  ;;  %v480_v5 = vld [vmem:[%s845_s2 + $0x8] sm:$0xff] (!%p182_p3)  ;;  %vm393_vm1 = vcmask (!%p182_p3), 261120   ;;  %vm509_vm2 = vcmask (!%p182_p3), 523264  }
   0x8   : > { %429 = vmatprep.mubr.bf16.mxu0 (!%p182_p3), %v711_v1  ;;  %689 = vset.pattern.permute.xlu0 (!%p182_p3), %v739_v2  ;;  %v493_v4 = vld [vmem:[%s846_s3] sm:$0xff] (!%p182_p3)  ;;  %v494_v6 = vld [vmem:[%s846_s3 + $0x8] sm:$0xff] (!%p182_p3) }
   0x9   : > { %483 = vperm.xlu0 (!%p182_p3), %689, %v479_v3   ;;  %690 = vset.pattern.permute.xlu1 (!%p182_p3), %v739_v2  ;;  %v712_v21 = vld [vmem:[%s844_s1 + $0x8] ss:$12 sps:$4 sm:$0xff] (!%p182_p3)   ;;  %v709_v26 = vld [vmem:[%s844_s1] ss:$12 sps:$4 sm:$0xff] (!%p182_p3)  }
   0xa   : > { %497 = vperm.xlu1 (!%p182_p3), %690, %v493_v4  }
   0xd   : > { %488 = vperm.xlu0 (!%p182_p3), %689, %v480_v5  }
   0xe   : > { %s853_s15 = smov (!%p213_p4, %s727_s15), 1  ;;  %502 = vperm.xlu1 %690, %v494_v6  }
   0xf   : > { %s661_s25 = smul.u32 144, %s853_s15  ;;  %s627_s11 = sshll.u32 %s853_s15, 4 }
  0x10   : > { %s228_s14 = scalar_lea.vmem %s847_s4, %s627_s11 }
  0x11   : > { %s801_s30 = scalar_lea.vmem %s843_s0, %s661_s25 }
  0x12   : > { %v691_v7 = vld [vmem:[%s801_s30 + $0x40] sm:$0xff]   ;;  %v693_v9 = vld [vmem:[%s801_s30 + $0x48] sm:$0xff]   ;;  %v695_v11 = vld [vmem:[%s801_s30 + $0x50] sm:$0xff]  }
  0x13   : > { %v692_v8 = vld [vmem:[%s801_s30] sm:$0xff]   ;;  %628 = vmatprep.subr.bf16.mxu0 %v691_v7  ;;  %v694_v10 = vld [vmem:[%s801_s30 + $0x8] sm:$0xff]   ;;  %v696_v12 = vld [vmem:[%s801_s30 + $0x10] sm:$0xff]  }
  0x14   : > { %629 = vmatpush3.bf16.msra.mxu0 %v692_v8  ;;  %v697_v13 = vld [vmem:[%s801_s30 + $0x58] sm:$0xff]   ;;  %v699_v15 = vld [vmem:[%s801_s30 + $0x60] sm:$0xff]   ;;  %v701_v18 = vld [vmem:[%s801_s30 + $0x68] sm:$0xff]  }
  0x15   : > { %630 = vmatprep.subr.bf16.mxu0 %v693_v9  ;;  %v698_v14 = vld [vmem:[%s801_s30 + $0x18] sm:$0xff]   ;;  %v705_v16 = vld [vmem:[%s801_s30 + $0x80] sm:$0xff]   ;;  %v708_v19 = vld [vmem:[%s801_s30 + $0x88] sm:$0xff]  }
  0x16   : > { %v700_v17 = vld [vmem:[%s801_s30 + $0x20] sm:$0xff]   ;;  %654 = vmatpush3.bf16.msra.mxu1 %v705_v16  ;;  %v702_v20 = vld [vmem:[%s801_s30 + $0x28] sm:$0xff]   ;;  %v703_v22 = vld [vmem:[%s801_s30 + $0x70] sm:$0xff]  }
  0x17   : > { %655 = vmatprep.subr.bf16.mxu1 %v737_v0  ;;  %v704_v23 = vld [vmem:[%s801_s30 + $0x30] sm:$0xff]   ;;  %v706_v24 = vld [vmem:[%s801_s30 + $0x78] sm:$0xff]  }
  0x18   : > { %631 = vmatpush3.bf16.msra.mxu0 %v694_v10  ;;  %v707_v25 = vld [vmem:[%s801_s30 + $0x38] sm:$0xff]  }
  0x19   : > { %632 = vmatprep.subr.bf16.mxu0 %v695_v11 }
  0x1a   : > { %656 = vmatpush3.bf16.msra.mxu1 %v708_v19 }
  0x1c   : > { %633 = vmatpush3.bf16.msra.mxu0 %v696_v12 }
  0x1d   : > { %634 = vmatprep.subr.bf16.mxu0 %v697_v13  ;;  %658 = vmatmul.mubr.msk.bf16.vlgmr.msra.gmra.mrb[0].mxu1 %vm393_vm1, %v712_v21 }
  0x20   : > { %635 = vmatpush3.bf16.msra.mxu0 %v698_v14 }
  0x21   : > { %636 = vmatprep.subr.bf16.mxu0 %v699_v15 }
  0x24   : > { %637 = vmatpush3.bf16.msra.mxu0 %v700_v17 }
  0x25   : > { %638 = vmatprep.subr.bf16.mxu0 %v701_v18 }
  0x28   : > { %639 = vmatpush3.bf16.msra.mxu0 %v702_v20 }
  0x29   : > { %640 = vmatprep.subr.bf16.mxu0 %v703_v22 }
  0x2c   : > { %641 = vmatpush3.bf16.msra.mxu0 %v704_v23 }
  0x2d   : > { %642 = vmatprep.subr.bf16.mxu0 %v706_v24 }
  0x30   : > { %643 = vmatpush3.bf16.msra.mxu0 %v707_v25 }
  0x33   : > { %430 = vmatmul.mubr.bf16.vlgmr.msra.gmra.mrb[0].mxu0 %v709_v26 }
  0x88   : > { %v484_v32 = vpop.permute.xlu0 %483 }
  0x89   : > { %v498_v36 = vpop.permute.xlu1 %497 }
  0x8c   : > { %v489_v42 = vpop.permute.xlu0 %488 }
  0x8d   : > { %v503_v45 = vpop.permute.xlu1 %502 }
  0xf0   : > { %v472_v27 = vpop.f32.mrb[0].mxu1 }
  0xf1   : > { %v659_v28 = vpop.f32.mrb[1].mxu1 }
  0xf2   : > { %v475_v29 = vpop.f32.mrb[2].mxu1 }
  0xf3   : > { %v660_v30 = vpop.f32.mrb[3].mxu1 }
 0x106   : > { %v644_v31 = vpop.f32.mrb[0].mxu0 }
 0x107   : > { %v645_v33 = vpop.f32.mrb[1].mxu0 }
 0x108   : > { %v646_v34 = vadd.f32 %v645_v33, %v644_v31  ;;  %v647_v35 = vpop.f32.mrb[2].mxu0 }
 0x109   : > { %v648_v37 = vpop.f32.mrb[3].mxu0 }
 0x10a   : > { %v473_v38 = vadd.f32 %v646_v34, %v472_v27  ;;  %v649_v39 = vadd.f32 %v648_v37, %v647_v35 }
 0x10c   : > { %v491_v40 = vmul.f32 %v484_v32, %v473_v38  ;;  %v476_v41 = vadd.f32 %v649_v39, %v475_v29 }
 0x10e   : > { %v505_v43 = vadd.f32 %v498_v36, %v491_v40  ;;  %v492_v44 = vmul.f32 %v489_v42, %v476_v41 }
 0x110   : > { %v507_v46 = vmax.f32 %v505_v43, 0.0  ;;  %v506_v47 = vadd.f32 %v503_v45, %v492_v44 }
 0x112   : > { %v508_v48 = vmax.f32 %v506_v47, 0.0  ;;  %510 = vst.msk [vmem:[%s228_s14] sm:$0xff] %vm509_vm2, %v507_v46 }
 0x114   : > { %511 = vst.msk [vmem:[%s228_s14 + $0x8] sm:$0xff] %vm509_vm2, %v508_v48 }
 0x115 PF: > { %s14_s17 = sadd.s32 1, %s735_s17   ;;  %s848_s15 = smov %s731_s16 }
 0x116   : > { %p11_p5 = scmp.ge.s32.totalorder %s14_s17, 4   ;;  %s849_s16 = smov %s851_s18 }
 0x118   :  { %13 = sbr.rel (!%p11_p5) target bundleno = 2 (0x2), region = 66 }

// kernel: unet_forward.31
= control target key start
LH: loop header
LB: loop body
LE: loop exit
PB: predicated region body
PF: predicated region fallthrough
CT: control target
= control target key end

     0   :  { %s1142_s15 = smov 0   ;;  %s1144_s16 = smov 0   ;;  %s1277_s0 = inlined_call_operand.vmem [shape: bf16[2,576,64], index: 0, kind: input, shape index: {}]   ;;  %s1278_s1 = inlined_call_operand.vmem [shape: bf16[32,576], index: 1, kind: input, shape index: {}]   ;;  %s1279_s2 = inlined_call_operand.vmem [shape: f32[32,1], index: 2, kind: input, shape index: {}]   ;;  %s1280_s3 = inlined_call_operand.vmem [shape: f32[32,1], index: 3, kind: input, shape index: {}]   ;;  %s1281_s4 = inlined_call_operand.vmem [shape: f32[2,32,64], index: 4, kind: output, shape index: {}]  }
   0x1   :  { %s1146_s17 = smov 0  }
   0x2 LB: > { %s26_s18 = sadd.s32 1, %s1110_s16  ;;  %p885_p0 = scmp.ge.s32.totalorder %s1114_s17, 1  ;;  %s1114_s17 = sphi %s1146_s17, %s14_s17   ;;  %s1110_s16 = sphi %s1144_s16, %s1283_s16   ;;  %s1106_s15 = sphi %s1142_s15, %s1282_s15  }
   0x3   : > { %p28_p1 = scmp.ge.s32.totalorder %s26_s18, 2  ;;  %p181_p2 = scmp.lt.s32.totalorder %s1114_s17, 3 }
   0x5   : > { %s1285_s18 = smov (%p28_p1, %s26_s18), 0  ;;  %p182_p3 = pnand %p885_p0, %p181_p2 }
   0x6   : > { %p213_p4 = scmp.lt.s32.totalorder (!%p182_p3), %s1106_s15, 1  ;;  %v1076_v0 = vld [vmem:[%s1278_s1 + $0x4] ss:$20 sps:$4 sm:$0xff] (!%p182_p3)   ;;  %v1079_v1 = vld [vmem:[%s1278_s1 + $0xc] ss:$20 sps:$4 sm:$0xff] (!%p182_p3)   ;;  %v1116_v2 = vmov (!%p182_p3), 0  }
   0x7   : > { %185 = sbr.rel (%p182_p3) target bundleno = 292 (0x124), region = 36  ;;  %1041 = vset.pattern.permute.xlu1 (!%p182_p3), %v1116_v2  ;;  %1040 = vset.pattern.permute.xlu0 (!%p182_p3), %v1116_v2  ;;  %v1074_v33 = vld [vmem:[%s1278_s1] ss:$20 sps:$4 sm:$0xff] (!%p182_p3)   ;;  %v1077_v35 = vld [vmem:[%s1278_s1 + $0x8] ss:$20 sps:$4 sm:$0xff] (!%p182_p3)   ;;  %vm580_vm0 = vcmask (!%p182_p3), 523264  }
   0x8   : > { %619 = vmatprep.mubr.bf16.mxu0 (!%p182_p3), %v1076_v0  ;;  %668 = vmatprep.mubr.bf16.mxu1 (!%p182_p3), %v1079_v1  ;;  %v1082_v37 = vld [vmem:[%s1278_s1 + $0x2c] ss:$20 sps:$4 sm:$0xff] (!%p182_p3)   ;;  %v1084_v40 = vld [vmem:[%s1278_s1 + $0x34] ss:$20 sps:$4 sm:$0xff] (!%p182_p3)   ;;  %v737_v45 = vld [vmem:[%s1279_s2 + $0x18] sm:$0xff] (!%p182_p3) }
   0x9   : > { %v736_v41 = vld [vmem:[%s1279_s2 + $0x10] sm:$0xff] (!%p182_p3)  ;;  %v734_v42 = vld [vmem:[%s1279_s2] sm:$0xff] (!%p182_p3)  ;;  %v1086_v44 = vld [vmem:[%s1278_s1 + $0x28] ss:$20 sps:$4 sm:$0xff] (!%p182_p3)  }
   0xa   : > { %750 = vperm.xlu1 (!%p182_p3), %1041, %v736_v41   ;;  %740 = vperm.xlu0 (!%p182_p3), %1040, %v734_v42   ;;  %v1087_v46 = vld [vmem:[%s1278_s1 + $0x30] ss:$20 sps:$4 sm:$0xff] (!%p182_p3)   ;;  %v735_v47 = vld [vmem:[%s1279_s2 + $0x8] sm:$0xff] (!%p182_p3)  ;;  %v765_v53 = vld [vmem:[%s1280_s3 + $0x18] sm:$0xff] (!%p182_p3) }
   0xb   : > { %v1090_v49 = vld [vmem:[%s1278_s1 + $0x10] ss:$20 sps:$4 sm:$0xff] (!%p182_p3)   ;;  %v763_v50 = vld [vmem:[%s1280_s3 + $0x8] sm:$0xff] (!%p182_p3) }
   0xc   : > { %v762_v51 = vld [vmem:[%s1280_s3] sm:$0xff] (!%p182_p3)  ;;  %v1091_v52 = vld [vmem:[%s1278_s1 + $0x38] ss:$20 sps:$4 sm:$0xff] (!%p182_p3)   ;;  %v764_v54 = vld [vmem:[%s1280_s3 + $0x10] sm:$0xff] (!%p182_p3) }
   0xe   : > { %s1287_s15 = smov (!%p213_p4, %s1106_s15), 1  ;;  %755 = vperm.xlu1 %1041, %v737_v45   ;;  %745 = vperm.xlu0 %1040, %v735_v47  }
   0xf   : > { %s1014_s23 = smul.u32 288, %s1287_s15  ;;  %s939_s11 = sshll.u32 %s1287_s15, 5 }
  0x10   : > { %s228_s14 = scalar_lea.vmem %s1281_s4, %s939_s11 }
  0x11   : > { %s1172_s26 = scalar_lea.vmem %s1277_s0, %s1014_s23 }
  0x12   : > { %v1042_v3 = vld [vmem:[%s1172_s26 + $0x40] sm:$0xff]   ;;  %v1046_v7 = vld [vmem:[%s1172_s26 + $0x48] sm:$0xff]   ;;  %v1050_v11 = vld [vmem:[%s1172_s26 + $0x50] sm:$0xff]   ;;  %773 = vperm.xlu1 %1041, %v763_v50   ;;  %768 = vperm.xlu0 %1040, %v762_v51  }
  0x13   : > { %v1043_v4 = vld [vmem:[%s1172_s26 + $0xc0] sm:$0xff]   ;;  %940 = vmatprep.subr.bf16.mxu0 %v1042_v3  ;;  %v1047_v8 = vld [vmem:[%s1172_s26 + $0xc8] sm:$0xff]   ;;  %v1051_v12 = vld [vmem:[%s1172_s26 + $0xd0] sm:$0xff]  }
  0x14   : > { %v1044_v5 = vld [vmem:[%s1172_s26] sm:$0xff]   ;;  %968 = vmatprep.subr.bf16.mxu1 %v1043_v4  ;;  %v1048_v9 = vld [vmem:[%s1172_s26 + $0x8] sm:$0xff]   ;;  %v1052_v13 = vld [vmem:[%s1172_s26 + $0x10] sm:$0xff]  }
  0x15   : > { %v1045_v6 = vld [vmem:[%s1172_s26 + $0x80] sm:$0xff]   ;;  %941 = vmatpush3.bf16.msra.mxu0 %v1044_v5  ;;  %v1049_v10 = vld [vmem:[%s1172_s26 + $0x88] sm:$0xff]   ;;  %v1053_v14 = vld [vmem:[%s1172_s26 + $0x90] sm:$0xff]  }
  0x16   : > { %969 = vmatpush3.bf16.msra.mxu1 %v1045_v6  ;;  %942 = vmatprep.subr.bf16.mxu0 %v1046_v7  ;;  %v1054_v15 = vld [vmem:[%s1172_s26 + $0x58] sm:$0xff]   ;;  %v1058_v19 = vld [vmem:[%s1172_s26 + $0x60] sm:$0xff]   ;;  %v1062_v23 = vld [vmem:[%s1172_s26 + $0x68] sm:$0xff]  }
  0x17   : > { %970 = vmatprep.subr.bf16.mxu1 %v1047_v8  ;;  %v1055_v16 = vld [vmem:[%s1172_s26 + $0xd8] sm:$0xff]   ;;  %v1059_v20 = vld [vmem:[%s1172_s26 + $0xe0] sm:$0xff]   ;;  %v1063_v24 = vld [vmem:[%s1172_s26 + $0xe8] sm:$0xff]   ;;  %783 = vperm.xlu1 %1041, %v765_v53  }
  0x18   : > { %v1056_v17 = vld [vmem:[%s1172_s26 + $0x18] sm:$0xff]   ;;  %v1060_v21 = vld [vmem:[%s1172_s26 + $0x20] sm:$0xff]   ;;  %v1064_v25 = vld [vmem:[%s1172_s26 + $0x28] sm:$0xff]   ;;  %778 = vperm.xlu0 %1040, %v764_v54  }
  0x19   : > { %943 = vmatpush3.bf16.msra.mxu0 %v1048_v9  ;;  %v1057_v18 = vld [vmem:[%s1172_s26 + $0x98] sm:$0xff]   ;;  %v1061_v22 = vld [vmem:[%s1172_s26 + $0xa0] sm:$0xff]   ;;  %v1065_v26 = vld [vmem:[%s1172_s26 + $0xa8] sm:$0xff]  }
  0x1a   : > { %971 = vmatpush3.bf16.msra.mxu1 %v1049_v10  ;;  %944 = vmatprep.subr.bf16.mxu0 %v1050_v11  ;;  %v1066_v27 = vld [vmem:[%s1172_s26 + $0x70] sm:$0xff]   ;;  %v1070_v31 = vld [vmem:[%s1172_s26 + $0x78] sm:$0xff]   ;;  %v1080_v38 = vld [vmem:[%s1172_s26 + $0x100] sm:$0xff]  }
  0x1b   : > { %972 = vmatprep.subr.bf16.mxu1 %v1051_v12  ;;  %v1067_v28 = vld [vmem:[%s1172_s26 + $0xf0] sm:$0xff]   ;;  %v1071_v32 = vld [vmem:[%s1172_s26 + $0xf8] sm:$0xff]   ;;  %v1081_v39 = vld [vmem:[%s1172_s26 + $0x108] sm:$0xff]  }
  0x1c   : > { %v1068_v29 = vld [vmem:[%s1172_s26 + $0x30] sm:$0xff]   ;;  %v1072_v34 = vld [vmem:[%s1172_s26 + $0x38] sm:$0xff]  }
  0x1d   : > { %945 = vmatpush3.bf16.msra.mxu0 %v1052_v13  ;;  %v1069_v30 = vld [vmem:[%s1172_s26 + $0xb0] sm:$0xff]   ;;  %v1073_v36 = vld [vmem:[%s1172_s26 + $0xb8] sm:$0xff]  }
  0x1e   : > { %973 = vmatpush3.bf16.msra.mxu1 %v1053_v14  ;;  %946 = vmatprep.subr.bf16.mxu0 %v1054_v15  ;;  %v1088_v43 = vld [vmem:[%s1172_s26 + $0x110] sm:$0xff]   ;;  %v1089_v48 = vld [vmem:[%s1172_s26 + $0x118] sm:$0xff]  }
  0x1f   : > { %974 = vmatprep.subr.bf16.mxu1 %v1055_v16 }
  0x21   : > { %947 = vmatpush3.bf16.msra.mxu0 %v1056_v17 }
  0x22   : > { %975 = vmatpush3.bf16.msra.mxu1 %v1057_v18  ;;  %948 = vmatprep.subr.bf16.mxu0 %v1058_v19 }
  0x23   : > { %976 = vmatprep.subr.bf16.mxu1 %v1059_v20 }
  0x25   : > { %949 = vmatpush3.bf16.msra.mxu0 %v1060_v21 }
  0x26   : > { %977 = vmatpush3.bf16.msra.mxu1 %v1061_v22  ;;  %950 = vmatprep.subr.bf16.mxu0 %v1062_v23 }
  0x27   : > { %978 = vmatprep.subr.bf16.mxu1 %v1063_v24 }
  0x29   : > { %951 = vmatpush3.bf16.msra.mxu0 %v1064_v25 }
  0x2a   : > { %979 = vmatpush3.bf16.msra.mxu1 %v1065_v26  ;;  %952 = vmatprep.subr.bf16.mxu0 %v1066_v27 }
  0x2b   : > { %980 = vmatprep.subr.bf16.mxu1 %v1067_v28 }
  0x2d   : > { %953 = vmatpush3.bf16.msra.mxu0 %v1068_v29 }
  0x2e   : > { %981 = vmatpush3.bf16.msra.mxu1 %v1069_v30  ;;  %954 = vmatprep.subr.bf16.mxu0 %v1070_v31 }
  0x2f   : > { %982 = vmatprep.subr.bf16.mxu1 %v1071_v32 }
  0x31   : > { %955 = vmatpush3.bf16.msra.mxu0 %v1072_v34 }
  0x32   : > { %983 = vmatpush3.bf16.msra.mxu1 %v1073_v36  ;;  %1002 = vmatprep.subr.bf16.mxu0 %v1080_v38 }
  0x34   : > { %620 = vmatmul.mubr.bf16.vlgmr.msra.gmra.mrb[0].mxu0 %v1074_v33 }
  0x35   : > { %669 = vmatmul.mubr.bf16.vlgmr.msra.gmra.mrb[0].mxu1 %v1077_v35  ;;  %1003 = vmatpush3.bf16.msra.mxu0 %v1080_v38 }
  0x36   : > { %1004 = vmatprep.subr.bf16.mxu0 %v1081_v39  ;;  %627 = vmatprep.mubr.bf16.mxu0 %v1082_v37 }
  0x37   : > { %676 = vmatprep.mubr.bf16.mxu1 %v1084_v40 }
  0x39   : > { %1005 = vmatpush3.bf16.msra.mxu0 %v1081_v39 }
  0x3a   : > { %1006 = vmatprep.subr.bf16.mxu0 %v1088_v43 }
  0x3c   : > { %628 = vmatmul.mubr.bf16.gmra.mrb[4].mxu0 %v1086_v44 }
  0x3d   : > { %677 = vmatmul.mubr.bf16.gmra.mrb[4].mxu1 %v1087_v46  ;;  %1007 = vmatpush3.bf16.msra.mxu0 %v1088_v43 }
  0x3e   : > { %1008 = vmatprep.subr.bf16.mxu0 %v1089_v48  ;;  %1010 = vmatprep.mubr.msk.bf16.mxu0 %vm580_vm0, %v1090_v49 }
  0x41   : > { %1009 = vmatpush3.bf16.msra.mxu0 %v1089_v48 }
  0x44   : > { %1011 = vmatmul.mubr.msk.bf16.vlgmr.msra.gmra.mrb[8].mxu0 %vm580_vm0, %v1091_v52 }
  0x89   : > { %v751_v55 = vpop.permute.xlu1 %750  ;;  %v741_v56 = vpop.permute.xlu0 %740 }
  0x8d   : > { %v756_v6 = vpop.permute.xlu1 %755  ;;  %v746_v8 = vpop.permute.xlu0 %745 }
  0x91   : > { %v769_v22 = vpop.permute.xlu0 %768  ;;  %v774_v24 = vpop.permute.xlu1 %773 }
  0x96   : > { %v784_v38 = vpop.permute.xlu1 %783 }
  0x97   : > { %v779_v33 = vpop.permute.xlu0 %778 }
 0x107   : > { %v956_v57 = vpop.f32.mrb[0].mxu0 }
 0x108   : > { %v984_v58 = vpop.f32.mrb[0].mxu1  ;;  %v957_v59 = vpop.f32.mrb[1].mxu0 }
 0x109   : > { %v958_v60 = vadd.f32 %v957_v59, %v956_v57  ;;  %v985_v61 = vpop.f32.mrb[1].mxu1  ;;  %v959_v62 = vpop.f32.mrb[2].mxu0 }
 0x10a   : > { %v986_v63 = vadd.f32 %v985_v61, %v984_v58  ;;  %v987_v0 = vpop.f32.mrb[2].mxu1  ;;  %v960_v1 = vpop.f32.mrb[3].mxu0 }
 0x10b   : > { %v961_v2 = vadd.f32 %v960_v1, %v959_v62  ;;  %v988_v3 = vpop.f32.mrb[3].mxu1 }
 0x10c   : > { %v989_v4 = vadd.f32 %v988_v3, %v987_v0  ;;  %v671_v5 = vadd.f32 %v986_v63, %v958_v60 }
 0x10e   : > { %v674_v7 = vadd.f32 %v989_v4, %v961_v2 }
 0x10f   : > { %v962_v9 = vpop.f32.mrb[4].mxu0 }
 0x110   : > { %v990_v10 = vpop.f32.mrb[4].mxu1  ;;  %v963_v11 = vpop.f32.mrb[5].mxu0 }
 0x111   : > { %v964_v12 = vadd.f32 %v963_v11, %v962_v9  ;;  %v991_v13 = vpop.f32.mrb[5].mxu1  ;;  %v965_v14 = vpop.f32.mrb[6].mxu0 }
 0x112   : > { %v992_v15 = vadd.f32 %v991_v13, %v990_v10  ;;  %v993_v16 = vpop.f32.mrb[6].mxu1  ;;  %v966_v17 = vpop.f32.mrb[7].mxu0 }
 0x113   : > { %v967_v18 = vadd.f32 %v966_v17, %v965_v14  ;;  %v994_v19 = vpop.f32.mrb[7].mxu1 }
 0x114   : > { %v995_v20 = vadd.f32 %v994_v19, %v993_v16  ;;  %v679_v21 = vadd.f32 %v992_v15, %v964_v12 }
 0x116   : > { %v682_v23 = vadd.f32 %v995_v20, %v967_v18 }
 0x117   : > { %v1012_v25 = vpop.f32.mrb[8].mxu0 }
 0x118   : > { %v728_v26 = vadd.f32 %v1012_v25, %v679_v21  ;;  %v719_v27 = vpop.f32.mrb[9].mxu0 }
 0x119   : > { %v720_v28 = vadd.f32 %v719_v27, %v671_v5  ;;  %v1013_v29 = vpop.f32.mrb[10].mxu0 }
 0x11a   : > { %v760_v30 = vmul.f32 %v751_v55, %v728_v26  ;;  %v731_v31 = vadd.f32 %v1013_v29, %v682_v23  ;;  %v722_v32 = vpop.f32.mrb[11].mxu0 }
 0x11b   : > { %v758_v34 = vmul.f32 %v741_v56, %v720_v28  ;;  %v723_v35 = vadd.f32 %v722_v32, %v674_v7 }
 0x11c   : > { %v788_v36 = vadd.f32 %v779_v33, %v760_v30  ;;  %v761_v37 = vmul.f32 %v756_v6, %v731_v31 }
 0x11d   : > { %v786_v39 = vadd.f32 %v769_v22, %v758_v34  ;;  %v759_v40 = vmul.f32 %v746_v8, %v723_v35 }
 0x11e   : > { %v792_v41 = vmax.f32 %v788_v36, 0.0  ;;  %v789_v42 = vadd.f32 %v784_v38, %v761_v37 }
 0x11f   : > { %v790_v43 = vmax.f32 %v786_v39, 0.0  ;;  %v787_v44 = vadd.f32 %v774_v24, %v759_v40 }
 0x120   : > { %796 = vst.msk [vmem:[%s228_s14 + $0x10] sm:$0xff] %vm580_vm0, %v792_v41  ;;  %v793_v45 = vmax.f32 %v789_v42, 0.0 }
 0x121   : > { %794 = vst.msk [vmem:[%s228_s14] sm:$0xff] %vm580_vm0, %v790_v43  ;;  %v791_v46 = vmax.f32 %v787_v44, 0.0 }
 0x122   : > { %797 = vst.msk [vmem:[%s228_s14 + $0x18] sm:$0xff] %vm580_vm0, %v793_v45 }
 0x123   : > { %795 = vst.msk [vmem:[%s228_s14 + $0x8] sm:$0xff] %vm580_vm0, %v791_v46 }
 0x124 PF: > { %s14_s17 = sadd.s32 1, %s1114_s17   ;;  %s1282_s15 = smov %s1110_s16 }
 0x125   : > { %p11_p5 = scmp.ge.s32.totalorder %s14_s17, 4   ;;  %s1283_s16 = smov %s1285_s18 }
 0x127   :  { %13 = sbr.rel (!%p11_p5) target bundleno = 2 (0x2), region = 66 }

// kernel: unet_forward.34
= control target key start
LH: loop header
LB: loop body
LE: loop exit
PB: predicated region body
PF: predicated region fallthrough
CT: control target
= control target key end

     0   :  { %s643_s15 = smov 0   ;;  %s645_s16 = smov 0   ;;  %s709_s0 = inlined_call_operand.vmem [shape: bf16[2,144,256], index: 0, kind: input, shape index: {}]   ;;  %s710_s1 = inlined_call_operand.vmem [shape: bf16[8,144], index: 1, kind: input, shape index: {}]   ;;  %s711_s2 = inlined_call_operand.vmem [shape: f32[8,1], index: 2, kind: input, shape index: {}]   ;;  %s712_s3 = inlined_call_operand.vmem [shape: f32[8,1], index: 3, kind: input, shape index: {}]   ;;  %s713_s4 = inlined_call_operand.vmem [shape: f32[2,8,256], index: 4, kind: output, shape index: {}]  }
   0x1   :  { %s647_s17 = smov 0  }
   0x2 LB: > { %s26_s18 = sadd.s32 1, %s611_s16  ;;  %p509_p0 = scmp.ge.s32.totalorder %s615_s17, 1  ;;  %s615_s17 = sphi %s647_s17, %s14_s17   ;;  %s611_s16 = sphi %s645_s16, %s715_s16   ;;  %s607_s15 = sphi %s643_s15, %s714_s15  }
   0x3   : > { %p28_p1 = scmp.ge.s32.totalorder %s26_s18, 2  ;;  %p183_p2 = scmp.lt.s32.totalorder %s615_s17, 3 }
   0x5   : > { %s717_s18 = smov (%p28_p1, %s26_s18), 0  ;;  %p184_p3 = pnand %p509_p0, %p183_p2 }
   0x6   : > { %p218_p4 = scmp.lt.s32.totalorder (!%p184_p3), %s607_s15, 1  ;;  %v238_v0 = vld [vmem:[%s710_s1] sm:$0xff] (!%p184_p3)  ;;  %vm353_vm0 = vcmask (!%p184_p3), 130048   ;;  %v617_v3 = vmov (!%p184_p3), 0  }
   0x7   : > { %187 = sbr.rel (%p184_p3) target bundleno = 275 (0x113), region = 36  ;;  %v398_v1 = vld [vmem:[%s711_s2] sm:$0xff] (!%p184_p3)  ;;  %v514_v2 = vcombine.high (!%p184_p3), %v238_v0, %v238_v0  ;;  %563 = vset.pattern.permute.xlu0 (!%p184_p3), %v617_v3  ;;  %v513_v23 = vcombine.low (!%p184_p3), %v238_v0, %v238_v0 }
   0x8   : > { %401 = vperm.xlu0 (!%p184_p3), %563, %v398_v1   ;;  %v406_v4 = vld [vmem:[%s712_s3] sm:$0xff] (!%p184_p3) }
   0x9   : > { %533 = vmatprep.mubr.msk.bf16.mxu0 (!%p184_p3), %vm353_vm0, %v514_v2 }
   0xc   : > { %409 = vperm.xlu0 (!%p184_p3), %563, %v406_v4  }
   0xe   : > { %s719_s15 = smov (!%p218_p4, %s607_s15), 1 }
   0xf   : > { %s537_s25 = smul.u32 144, %s719_s15  ;;  %s536_s29 = sshll.u32 %s719_s15, 4 }
  0x10   : > { %s235_s6 = scalar_lea.vmem %s713_s4, %s536_s29 }
  0x11   : > { %s676_s28 = scalar_lea.vmem %s709_s0, %s537_s25 }
  0x12   : > { %v564_v5 = vld [vmem:[%s676_s28 + $0x4] ss:$8 sps:$4 sm:$0xff]   ;;  %v566_v6 = vld [vmem:[%s676_s28] ss:$8 sps:$4 sm:$0xff]   ;;  %v567_v7 = vld [vmem:[%s676_s28 + $0x14] ss:$8 sps:$4 sm:$0xff]  }
  0x13   : > { %357 = vmatprep.subr.bf16.mxu0 %v564_v5  ;;  %v569_v8 = vld [vmem:[%s676_s28 + $0x10] ss:$8 sps:$4 sm:$0xff]   ;;  %v570_v9 = vld [vmem:[%s676_s28 + $0x24] ss:$8 sps:$4 sm:$0xff]   ;;  %v572_v10 = vld [vmem:[%s676_s28 + $0x20] ss:$8 sps:$4 sm:$0xff]  }
  0x14   : > { %358 = vmatpush1.bf16.msra.mxu0 %v566_v6  ;;  %v573_v11 = vld [vmem:[%s676_s28 + $0x34] ss:$8 sps:$4 sm:$0xff]   ;;  %v575_v12 = vld [vmem:[%s676_s28 + $0x30] ss:$8 sps:$4 sm:$0xff]   ;;  %v576_v13 = vld [vmem:[%s676_s28 + $0x44] ss:$8 sps:$4 sm:$0xff]  }
  0x15   : > { %359 = vmatprep.subr.bf16.mxu0 %v567_v7  ;;  %v578_v14 = vld [vmem:[%s676_s28 + $0x40] ss:$8 sps:$4 sm:$0xff]   ;;  %v579_v15 = vld [vmem:[%s676_s28 + $0x54] ss:$8 sps:$4 sm:$0xff]   ;;  %v581_v16 = vld [vmem:[%s676_s28 + $0x50] ss:$8 sps:$4 sm:$0xff]  }
  0x16   : > { %v582_v17 = vld [vmem:[%s676_s28 + $0x64] ss:$8 sps:$4 sm:$0xff]   ;;  %v584_v18 = vld [vmem:[%s676_s28 + $0x60] ss:$8 sps:$4 sm:$0xff]   ;;  %v585_v19 = vld [vmem:[%s676_s28 + $0x74] ss:$8 sps:$4 sm:$0xff]  }
  0x17   : > { %v587_v20 = vld [vmem:[%s676_s28 + $0x70] ss:$8 sps:$4 sm:$0xff]   ;;  %v588_v21 = vld [vmem:[%s676_s28 + $0x84] ss:$8 sps:$4 sm:$0xff]   ;;  %v590_v22 = vld [vmem:[%s676_s28 + $0x80] ss:$8 sps:$4 sm:$0xff]  }
  0x18   : > { %360 = vmatpush1.bf16.msra.mxu0 %v569_v8 }
  0x19   : > { %361 = vmatprep.subr.bf16.mxu0 %v570_v9 }
  0x1c   : > { %362 = vmatpush1.bf16.msra.mxu0 %v572_v10 }
  0x1d   : > { %363 = vmatprep.subr.bf16.mxu0 %v573_v11 }
  0x20   : > { %364 = vmatpush1.bf16.msra.mxu0 %v575_v12 }
  0x21   : > { %365 = vmatprep.subr.bf16.mxu0 %v576_v13 }
  0x24   : > { %366 = vmatpush1.bf16.msra.mxu0 %v578_v14 }
  0x25   : > { %367 = vmatprep.subr.bf16.mxu0 %v579_v15 }
  0x28   : > { %368 = vmatpush1.bf16.msra.mxu0 %v581_v16 }
  0x29   : > { %369 = vmatprep.subr.bf16.mxu0 %v582_v17 }
  0x2c   : > { %370 = vmatpush1.bf16.msra.mxu0 %v584_v18 }
  0x2d   : > { %371 = vmatprep.subr.bf16.mxu0 %v585_v19 }
  0x30   : > { %372 = vmatpush1.bf16.msra.mxu0 %v587_v20 }
  0x31   : > { %373 = vmatprep.subr.bf16.mxu0 %v588_v21 }
  0x34   : > { %374 = vmatpush1.bf16.msra.mxu0 %v590_v22 }
  0x37   : > { %390 = vmatmul.mubr.bf16.vlgmr.msra.gmra.mrb[0].mxu0 %v513_v23 }
  0x87   : > { %v402_v24 = vpop.permute.xlu0 %401 }
  0x8b   : > { %v410_v28 = vpop.permute.xlu0 %409 }
 0x10a   : > { %v391_v25 = vpop.f32.mrb[0].mxu0 }
 0x10b   : > { %v404_v26 = vmul.f32 %v402_v24, %v391_v25  ;;  %v393_v27 = vpop.f32.mrb[1].mxu0 }
 0x10c   : > { %v405_v29 = vmul.f32 %v402_v24, %v393_v27  ;;  %v395_v30 = vpop.f32.mrb[2].mxu0 }
 0x10d   : > { %v412_v31 = vadd.f32 %v410_v28, %v404_v26  ;;  %v396_v32 = vpop.f32.mrb[3].mxu0 }
 0x10e   : > { %v413_v33 = vadd.f32 %v410_v28, %v405_v29 }
 0x10f   : > { %v414_v34 = vmax.f32 %v412_v31, 0.0 }
 0x110   : > { %v415_v35 = vmax.f32 %v413_v33, 0.0 }
 0x111   : > { %416 = vst [vmem:[%s235_s6] sm:$0xff] %v414_v34 }
 0x112   : > { %417 = vst [vmem:[%s235_s6 + $0x8] sm:$0xff] %v415_v35 }
 0x113 PF: > { %s14_s17 = sadd.s32 1, %s615_s17   ;;  %s714_s15 = smov %s611_s16 }
 0x114   : > { %p11_p5 = scmp.ge.s32.totalorder %s14_s17, 4   ;;  %s715_s16 = smov %s717_s18 }
 0x116   :  { %13 = sbr.rel (!%p11_p5) target bundleno = 2 (0x2), region = 66 }

// kernel: unet_forward.33
= control target key start
LH: loop header
LB: loop body
LE: loop exit
PB: predicated region body
PF: predicated region fallthrough
CT: control target
= control target key end

     0   :  { %s881_s15 = smov 0   ;;  %s883_s16 = smov 0   ;;  %s977_s0 = inlined_call_operand.vmem [shape: bf16[2,288,256], index: 0, kind: input, shape index: {}]   ;;  %s978_s1 = inlined_call_operand.vmem [shape: bf16[16,288], index: 1, kind: input, shape index: {}]   ;;  %s979_s2 = inlined_call_operand.vmem [shape: f32[16,1], index: 2, kind: input, shape index: {}]   ;;  %s980_s3 = inlined_call_operand.vmem [shape: f32[16,1], index: 3, kind: input, shape index: {}]   ;;  %s981_s4 = inlined_call_operand.vmem [shape: f32[2,16,256], index: 4, kind: output, shape index: {}]  }
   0x1   :  { %s885_s17 = smov 0  }
   0x2 LB: > { %s26_s18 = sadd.s32 1, %s849_s16  ;;  %p694_p0 = scmp.ge.s32.totalorder %s853_s17, 1  ;;  %s853_s17 = sphi %s885_s17, %s14_s17   ;;  %s849_s16 = sphi %s883_s16, %s983_s16   ;;  %s845_s15 = sphi %s881_s15, %s982_s15  }
   0x3   : > { %p28_p1 = scmp.ge.s32.totalorder %s26_s18, 2  ;;  %p183_p2 = scmp.lt.s32.totalorder %s853_s17, 3 }
   0x5   : > { %s985_s18 = smov (%p28_p1, %s26_s18), 0  ;;  %p184_p3 = pnand %p694_p0, %p183_p2 }
   0x6   : > { %p218_p4 = scmp.lt.s32.totalorder (!%p184_p3), %s845_s15, 1  ;;  %v855_v0 = vmov (!%p184_p3), 0   ;;  %v830_v1 = vld [vmem:[%s978_s1 + $0x4] ss:$12 sps:$4 sm:$0xff] (!%p184_p3)   ;;  %v564_v4 = vld [vmem:[%s979_s2 + $0x8] sm:$0xff] (!%p184_p3)  ;;  %vm473_vm0 = vcmask (!%p184_p3), 261120  }
   0x7   : > { %187 = sbr.rel (%p184_p3) target bundleno = 307 (0x133), region = 36  ;;  %552 = vmatprep.mubr.bf16.mxu0 (!%p184_p3), %v855_v0  ;;  %771 = vset.pattern.permute.xlu0 (!%p184_p3), %v855_v0  ;;  %v563_v2 = vld [vmem:[%s979_s2] sm:$0xff] (!%p184_p3)  ;;  %v580_v5 = vld [vmem:[%s980_s3 + $0x8] sm:$0xff] (!%p184_p3) }
   0x8   : > { %772 = vset.pattern.permute.xlu1 (!%p184_p3), %v855_v0  ;;  %567 = vperm.xlu0 (!%p184_p3), %771, %v563_v2   ;;  %v579_v3 = vld [vmem:[%s980_s3] sm:$0xff] (!%p184_p3)  ;;  %v827_v25 = vld [vmem:[%s978_s1 + $0x8] ss:$12 sps:$4 sm:$0xff] (!%p184_p3)  }
   0x9   : > { %509 = vmatprep.mubr.bf16.mxu1 (!%p184_p3), %v830_v1  ;;  %583 = vperm.xlu1 (!%p184_p3), %772, %v579_v3   ;;  %v828_v43 = vld [vmem:[%s978_s1] ss:$12 sps:$4 sm:$0xff] (!%p184_p3)  }
   0xc   : > { %572 = vperm.xlu0 (!%p184_p3), %771, %v564_v4  }
   0xd   : > { %588 = vperm.xlu1 (!%p184_p3), %772, %v580_v5  }
   0xe   : > { %s987_s15 = smov (!%p218_p4, %s845_s15), 1 }
   0xf   : > { %s745_s25 = smul.u32 288, %s987_s15  ;;  %s740_s11 = sshll.u32 %s987_s15, 5 }
  0x10   : > { %s235_s14 = scalar_lea.vmem %s981_s4, %s740_s11 }
  0x11   : > { %s920_s6 = scalar_lea.vmem %s977_s0, %s745_s25 }
  0x12   : > { %v773_v6 = vld [vmem:[%s920_s6 + $0x4] ss:$8 sps:$4 sm:$0xff]   ;;  %v775_v7 = vld [vmem:[%s920_s6] ss:$8 sps:$4 sm:$0xff]   ;;  %v776_v8 = vld [vmem:[%s920_s6 + $0x14] ss:$8 sps:$4 sm:$0xff]  }
  0x13   : > { %477 = vmatprep.subr.bf16.mxu1 %v773_v6  ;;  %v778_v9 = vld [vmem:[%s920_s6 + $0x10] ss:$8 sps:$4 sm:$0xff]   ;;  %v779_v10 = vld [vmem:[%s920_s6 + $0x24] ss:$8 sps:$4 sm:$0xff]   ;;  %v781_v11 = vld [vmem:[%s920_s6 + $0x20] ss:$8 sps:$4 sm:$0xff]  }
  0x14   : > { %478 = vmatpush1.bf16.msra.mxu1 %v775_v7  ;;  %v782_v12 = vld [vmem:[%s920_s6 + $0x34] ss:$8 sps:$4 sm:$0xff]   ;;  %v784_v13 = vld [vmem:[%s920_s6 + $0x30] ss:$8 sps:$4 sm:$0xff]   ;;  %v785_v14 = vld [vmem:[%s920_s6 + $0x44] ss:$8 sps:$4 sm:$0xff]  }
  0x15   : > { %479 = vmatprep.subr.bf16.mxu1 %v776_v8  ;;  %v787_v15 = vld [vmem:[%s920_s6 + $0x40] ss:$8 sps:$4 sm:$0xff]   ;;  %v788_v16 = vld [vmem:[%s920_s6 + $0x54] ss:$8 sps:$4 sm:$0xff]   ;;  %v790_v17 = vld [vmem:[%s920_s6 + $0x50] ss:$8 sps:$4 sm:$0xff]  }
  0x16   : > { %v815_v18 = vld [vmem:[%s920_s6 + $0x104] ss:$8 sps:$4 sm:$0xff]   ;;  %v817_v19 = vld [vmem:[%s920_s6 + $0x100] ss:$8 sps:$4 sm:$0xff]   ;;  %v821_v21 = vld [vmem:[%s920_s6 + $0x114] ss:$8 sps:$4 sm:$0xff]  }
  0x17   : > { %v791_v20 = vld [vmem:[%s920_s6 + $0x64] ss:$8 sps:$4 sm:$0xff]   ;;  %520 = vmatprep.subr.bf16.mxu0 %v815_v18  ;;  %v823_v22 = vld [vmem:[%s920_s6 + $0x110] ss:$8 sps:$4 sm:$0xff]   ;;  %v793_v23 = vld [vmem:[%s920_s6 + $0x60] ss:$8 sps:$4 sm:$0xff]  }
  0x18   : > { %480 = vmatpush1.bf16.msra.mxu1 %v778_v9  ;;  %521 = vmatpush1.bf16.msra.mxu0 %v817_v19  ;;  %v794_v24 = vld [vmem:[%s920_s6 + $0x74] ss:$8 sps:$4 sm:$0xff]   ;;  %v796_v26 = vld [vmem:[%s920_s6 + $0x70] ss:$8 sps:$4 sm:$0xff]   ;;  %v797_v27 = vld [vmem:[%s920_s6 + $0x84] ss:$8 sps:$4 sm:$0xff]  }
  0x19   : > { %481 = vmatprep.subr.bf16.mxu1 %v779_v10  ;;  %522 = vmatprep.subr.bf16.mxu0 %v821_v21  ;;  %v799_v28 = vld [vmem:[%s920_s6 + $0x80] ss:$8 sps:$4 sm:$0xff]   ;;  %v800_v29 = vld [vmem:[%s920_s6 + $0x94] ss:$8 sps:$4 sm:$0xff]   ;;  %v802_v30 = vld [vmem:[%s920_s6 + $0x90] ss:$8 sps:$4 sm:$0xff]  }
  0x1a   : > { %v803_v31 = vld [vmem:[%s920_s6 + $0xa4] ss:$8 sps:$4 sm:$0xff]   ;;  %v805_v32 = vld [vmem:[%s920_s6 + $0xa0] ss:$8 sps:$4 sm:$0xff]   ;;  %v806_v33 = vld [vmem:[%s920_s6 + $0xb4] ss:$8 sps:$4 sm:$0xff]  }
  0x1b   : > { %v808_v34 = vld [vmem:[%s920_s6 + $0xb0] ss:$8 sps:$4 sm:$0xff]   ;;  %v809_v35 = vld [vmem:[%s920_s6 + $0xc4] ss:$8 sps:$4 sm:$0xff]   ;;  %v811_v36 = vld [vmem:[%s920_s6 + $0xc0] ss:$8 sps:$4 sm:$0xff]  }
  0x1c   : > { %482 = vmatpush1.bf16.msra.mxu1 %v781_v11  ;;  %523 = vmatpush1.bf16.msra.mxu0 %v823_v22  ;;  %v812_v37 = vld [vmem:[%s920_s6 + $0xd4] ss:$8 sps:$4 sm:$0xff]   ;;  %v814_v38 = vld [vmem:[%s920_s6 + $0xd0] ss:$8 sps:$4 sm:$0xff]   ;;  %v818_v39 = vld [vmem:[%s920_s6 + $0xe4] ss:$8 sps:$4 sm:$0xff]  }
  0x1d   : > { %483 = vmatprep.subr.bf16.mxu1 %v782_v12  ;;  %v820_v40 = vld [vmem:[%s920_s6 + $0xe0] ss:$8 sps:$4 sm:$0xff]   ;;  %v824_v41 = vld [vmem:[%s920_s6 + $0xf4] ss:$8 sps:$4 sm:$0xff]   ;;  %v826_v42 = vld [vmem:[%s920_s6 + $0xf0] ss:$8 sps:$4 sm:$0xff]  }
  0x1f   : > { %737 = vmatmul.mubr.msk.bf16.vlgmr.msra.gmra.mrb[0].mxu0 %vm473_vm0, %v827_v25 }
  0x20   : > { %484 = vmatpush1.bf16.msra.mxu1 %v784_v13 }
  0x21   : > { %485 = vmatprep.subr.bf16.mxu1 %v785_v14 }
  0x24   : > { %486 = vmatpush1.bf16.msra.mxu1 %v787_v15 }
  0x25   : > { %487 = vmatprep.subr.bf16.mxu1 %v788_v16 }
  0x28   : > { %488 = vmatpush1.bf16.msra.mxu1 %v790_v17 }
  0x29   : > { %489 = vmatprep.subr.bf16.mxu1 %v791_v20 }
  0x2c   : > { %490 = vmatpush1.bf16.msra.mxu1 %v793_v23 }
  0x2d   : > { %491 = vmatprep.subr.bf16.mxu1 %v794_v24 }
  0x30   : > { %492 = vmatpush1.bf16.msra.mxu1 %v796_v26 }
  0x31   : > { %493 = vmatprep.subr.bf16.mxu1 %v797_v27 }
  0x34   : > { %494 = vmatpush1.bf16.msra.mxu1 %v799_v28 }
  0x35   : > { %495 = vmatprep.subr.bf16.mxu1 %v800_v29 }
  0x38   : > { %496 = vmatpush1.bf16.msra.mxu1 %v802_v30 }
  0x39   : > { %497 = vmatprep.subr.bf16.mxu1 %v803_v31 }
  0x3c   : > { %498 = vmatpush1.bf16.msra.mxu1 %v805_v32 }
  0x3d   : > { %499 = vmatprep.subr.bf16.mxu1 %v806_v33 }
  0x40   : > { %500 = vmatpush1.bf16.msra.mxu1 %v808_v34 }
  0x41   : > { %501 = vmatprep.subr.bf16.mxu1 %v809_v35 }
  0x44   : > { %502 = vmatpush1.bf16.msra.mxu1 %v811_v36 }
  0x45   : > { %503 = vmatprep.subr.bf16.mxu1 %v812_v37 }
  0x48   : > { %504 = vmatpush1.bf16.msra.mxu1 %v814_v38 }
  0x49   : > { %505 = vmatprep.subr.bf16.mxu1 %v818_v39 }
  0x4c   : > { %506 = vmatpush1.bf16.msra.mxu1 %v820_v40 }
  0x4d   : > { %507 = vmatprep.subr.bf16.mxu1 %v824_v41 }
  0x50   : > { %508 = vmatpush1.bf16.msra.mxu1 %v826_v42 }
  0x53   : > { %510 = vmatmul.mubr.bf16.vlgmr.msra.gmra.mrb[0].mxu1 %v828_v43 }
  0x87   : > { %v568_v48 = vpop.permute.xlu0 %567 }
  0x88   : > { %v584_v49 = vpop.permute.xlu1 %583 }
  0x8b   : > { %v573_v58 = vpop.permute.xlu0 %572 }
  0x8c   : > { %v589_v0 = vpop.permute.xlu1 %588 }
  0xf2   : > { %v554_v44 = vpop.f32.mrb[0].mxu0 }
  0xf3   : > { %v556_v45 = vpop.f32.mrb[1].mxu0 }
  0xf4   : > { %v558_v46 = vpop.f32.mrb[2].mxu0 }
  0xf5   : > { %v560_v47 = vpop.f32.mrb[3].mxu0 }
 0x126   : > { %v511_v50 = vpop.f32.mrb[0].mxu1 }
 0x127   : > { %v555_v51 = vadd.f32 %v554_v44, %v511_v50  ;;  %v513_v52 = vpop.f32.mrb[1].mxu1 }
 0x128   : > { %v557_v53 = vadd.f32 %v556_v45, %v513_v52  ;;  %v515_v54 = vpop.f32.mrb[2].mxu1 }
 0x129   : > { %v575_v55 = vmul.f32 %v568_v48, %v555_v51  ;;  %v559_v56 = vadd.f32 %v558_v46, %v515_v54  ;;  %v517_v57 = vpop.f32.mrb[3].mxu1 }
 0x12a   : > { %v576_v59 = vmul.f32 %v568_v48, %v557_v53  ;;  %v561_v60 = vadd.f32 %v560_v47, %v517_v57 }
 0x12b   : > { %v591_v61 = vadd.f32 %v584_v49, %v575_v55  ;;  %v577_v62 = vmul.f32 %v573_v58, %v559_v56 }
 0x12c   : > { %v592_v63 = vadd.f32 %v584_v49, %v576_v59  ;;  %v578_v1 = vmul.f32 %v573_v58, %v561_v60 }
 0x12d   : > { %v595_v2 = vmax.f32 %v591_v61, 0.0  ;;  %v593_v3 = vadd.f32 %v589_v0, %v577_v62 }
 0x12e   : > { %v596_v4 = vmax.f32 %v592_v63, 0.0  ;;  %v594_v5 = vadd.f32 %v589_v0, %v578_v1 }
 0x12f   : > { %599 = vst [vmem:[%s235_s14] sm:$0xff] %v595_v2  ;;  %v597_v6 = vmax.f32 %v593_v3, 0.0 }
 0x130   : > { %600 = vst [vmem:[%s235_s14 + $0x8] sm:$0xff] %v596_v4  ;;  %v598_v7 = vmax.f32 %v594_v5, 0.0 }
 0x131   : > { %601 = vst [vmem:[%s235_s14 + $0x10] sm:$0xff] %v597_v6 }
 0x132   : > { %602 = vst [vmem:[%s235_s14 + $0x18] sm:$0xff] %v598_v7 }
 0x133 PF: > { %s14_s17 = sadd.s32 1, %s853_s17   ;;  %s982_s15 = smov %s849_s16 }
 0x134   : > { %p11_p5 = scmp.ge.s32.totalorder %s14_s17, 4   ;;  %s983_s16 = smov %s985_s18 }
 0x136   :  { %13 = sbr.rel (!%p11_p5) target bundleno = 2 (0x2), region = 66 }

// kernel: unet_forward.35
= control target key start
LH: loop header
LB: loop body
LE: loop exit
PB: predicated region body
PF: predicated region fallthrough
CT: control target
= control target key end

     0   :  { %s998_s15 = smov 0   ;;  %s1000_s16 = smov 0   ;;  %s1217_s0 = inlined_call_operand.vmem [shape: bf16[2,144,1024], index: 0, kind: input, shape index: {}]   ;;  %s1218_s1 = inlined_call_operand.vmem [shape: bf16[8,144], index: 1, kind: input, shape index: {}]   ;;  %s1219_s2 = inlined_call_operand.vmem [shape: f32[8,1], index: 2, kind: input, shape index: {}]   ;;  %s1220_s3 = inlined_call_operand.vmem [shape: f32[8,1], index: 3, kind: input, shape index: {}]   ;;  %s1221_s4 = inlined_call_operand.vmem [shape: f32[2,8,1024], index: 4, kind: output, shape index: {}]  }
   0x1   :  { %s1002_s17 = smov 0   ;;  %s1004_s18 = smov 0  }
   0x2   :  { %s1006_s19 = smov 0   ;;  %s1008_s20 = smov 0  }
   0x3   :  { %s1010_s21 = smov 0  }
   0x4 LB: > { %s23_s22 = sadd.s32 1, %s962_s19  ;;  %s26_s23 = sadd.s32 1, %s966_s20  ;;  %s970_s21 = sphi %s1010_s21, %s14_s21   ;;  %s966_s20 = sphi %s1008_s20, %s1227_s20   ;;  %s962_s19 = sphi %s1006_s19, %s1226_s19   ;;  %s958_s18 = sphi %s1004_s18, %s1225_s18   ;;  %s954_s17 = sphi %s1002_s17, %s1224_s17   ;;  %s950_s16 = sphi %s1000_s16, %s1223_s16   ;;  %s946_s15 = sphi %s998_s15, %s1222_s15  }
   0x5   : > { %p24_p0 = scmp.ge.s32.totalorder %s23_s22, 2  ;;  %p42_p1 = scmp.ne.s32.totalorder %s950_s16, %s946_s15 }
   0x6   : > { %p43_p2 = scmp.eq.s32.totalorder %s970_s21, 0  ;;  %s35_s27 = sadd.s32 1, %s950_s16 }
   0x7   : > { %s1229_s22 = smov (%p24_p0, %s23_s22), 0  ;;  %s1231_s23 = smov (!%p24_p0, %s26_s23), %s966_s20 }
   0x8   : > { %p44_p3 = por %p43_p2, %p42_p1  ;;  %p28_p4 = scmp.ge.s32.totalorder %s1231_s23, 2 }
   0x9   : > { %s31_s24 = ssub.s32 %s962_s19, %s1229_s22  ;;  %p750_p6 = scmp.ge.s32.totalorder %s970_s21, 4 }
   0xa   : > { %s1233_s23 = smov (%p28_p4, %s1231_s23), 0 }
   0xb   : > { %s30_s25 = ssub.s32 %s966_s20, %s1233_s23  ;;  %168 = sbr.rel (%p750_p6) target bundleno = 44 (0x2c), region = 28 }
   0xc   : > { %s32_s26 = sor.u32 %s31_s24, %s30_s25 }
   0xd   : > { %p33_p5 = scmp.eq.s32.totalorder %s32_s26, 0 }
   0xf   : > { %s1049_s28 = scalar_select %p33_p5, %s950_s16, %s35_s27  }
  0x12   : > { %171 = sbr.rel (!%p44_p3) target bundleno = 44 (0x2c), region = 32  ;;  %s173_s29 = sand.u32 (%p44_p3), 1, %s950_s16  }
  0x13   : > { %s799_s30 = smul.u32 (%p44_p3), 288, %s173_s29  ;;  %s751_s5 = sshll.u32 (%p44_p3), %s962_s19, 2 }
  0x14   : > { %s800_s6 = smul.u32 (%p44_p3), 144, %s966_s20 }
  0x15   : > { %s1063_s12 = scalar_lea.vmem (%p44_p3), [#allocation2], %s799_s30 }
  0x16   : > { %s178_s7 = sadd.s32 (%p44_p3), %s800_s6, %s751_s5 }
  0x17   : > { %s752_s8 = sshll.u32 (%p44_p3), %s178_s7, 2 }
  0x18   : > { %s1058_s11 = scalar_lea.vmem (%p44_p3), %s1217_s0, %s752_s8 }
  0x19   : > { %v193_v0 = vld [vmem:[%s1058_s11] sm:$0xff]  ;;  %v195_v1 = vld [vmem:[%s1058_s11 + $0x8] sm:$0xff] }
  0x1a   : > { %v197_v2 = vld [vmem:[%s1058_s11 + $0x20] sm:$0xff]  ;;  %194 = vst [vmem:[%s1063_s12] sm:$0xff] %v193_v0  ;;  %196 = vst [vmem:[%s1063_s12 + $0x8] sm:$0xff] %v195_v1  ;;  %v199_v3 = vld [vmem:[%s1058_s11 + $0x28] sm:$0xff] }
  0x1b   : > { %198 = vst [vmem:[%s1063_s12 + $0x10] sm:$0xff] %v197_v2  ;;  %v201_v4 = vld [vmem:[%s1058_s11 + $0x40] sm:$0xff]  ;;  %v203_v5 = vld [vmem:[%s1058_s11 + $0x48] sm:$0xff]  ;;  %200 = vst [vmem:[%s1063_s12 + $0x18] sm:$0xff] %v199_v3 }
  0x1c   : > { %202 = vst [vmem:[%s1063_s12 + $0x20] sm:$0xff] %v201_v4  ;;  %204 = vst [vmem:[%s1063_s12 + $0x28] sm:$0xff] %v203_v5  ;;  %v205_v6 = vld [vmem:[%s1058_s11 + $0x60] sm:$0xff]  ;;  %v207_v7 = vld [vmem:[%s1058_s11 + $0x68] sm:$0xff] }
  0x1d   : > { %v209_v8 = vld [vmem:[%s1058_s11 + $0x80] sm:$0xff]  ;;  %206 = vst [vmem:[%s1063_s12 + $0x30] sm:$0xff] %v205_v6  ;;  %208 = vst [vmem:[%s1063_s12 + $0x38] sm:$0xff] %v207_v7  ;;  %v211_v9 = vld [vmem:[%s1058_s11 + $0x88] sm:$0xff] }
  0x1e   : > { %210 = vst [vmem:[%s1063_s12 + $0x40] sm:$0xff] %v209_v8  ;;  %v213_v10 = vld [vmem:[%s1058_s11 + $0xa0] sm:$0xff]  ;;  %v215_v11 = vld [vmem:[%s1058_s11 + $0xa8] sm:$0xff]  ;;  %212 = vst [vmem:[%s1063_s12 + $0x48] sm:$0xff] %v211_v9 }
  0x1f   : > { %214 = vst [vmem:[%s1063_s12 + $0x50] sm:$0xff] %v213_v10  ;;  %216 = vst [vmem:[%s1063_s12 + $0x58] sm:$0xff] %v215_v11  ;;  %v217_v12 = vld [vmem:[%s1058_s11 + $0xc0] sm:$0xff]  ;;  %v219_v13 = vld [vmem:[%s1058_s11 + $0xc8] sm:$0xff] }
  0x20   : > { %v221_v14 = vld [vmem:[%s1058_s11 + $0xe0] sm:$0xff]  ;;  %218 = vst [vmem:[%s1063_s12 + $0x60] sm:$0xff] %v217_v12  ;;  %220 = vst [vmem:[%s1063_s12 + $0x68] sm:$0xff] %v219_v13  ;;  %v223_v15 = vld [vmem:[%s1058_s11 + $0xe8] sm:$0xff] }
  0x21   : > { %222 = vst [vmem:[%s1063_s12 + $0x70] sm:$0xff] %v221_v14  ;;  %v225_v16 = vld [vmem:[%s1058_s11 + $0x100] sm:$0xff]  ;;  %v227_v17 = vld [vmem:[%s1058_s11 + $0x108] sm:$0xff]  ;;  %224 = vst [vmem:[%s1063_s12 + $0x78] sm:$0xff] %v223_v15 }
  0x22   : > { %226 = vst [vmem:[%s1063_s12 + $0x80] sm:$0xff] %v225_v16  ;;  %228 = vst [vmem:[%s1063_s12 + $0x88] sm:$0xff] %v227_v17  ;;  %v229_v18 = vld [vmem:[%s1058_s11 + $0x120] sm:$0xff]  ;;  %v231_v19 = vld [vmem:[%s1058_s11 + $0x128] sm:$0xff] }
  0x23   : > { %v233_v20 = vld [vmem:[%s1058_s11 + $0x140] sm:$0xff]  ;;  %230 = vst [vmem:[%s1063_s12 + $0x90] sm:$0xff] %v229_v18  ;;  %232 = vst [vmem:[%s1063_s12 + $0x98] sm:$0xff] %v231_v19  ;;  %v235_v21 = vld [vmem:[%s1058_s11 + $0x148] sm:$0xff] }
  0x24   : > { %234 = vst [vmem:[%s1063_s12 + $0xa0] sm:$0xff] %v233_v20  ;;  %v237_v22 = vld [vmem:[%s1058_s11 + $0x160] sm:$0xff]  ;;  %v239_v23 = vld [vmem:[%s1058_s11 + $0x168] sm:$0xff]  ;;  %236 = vst [vmem:[%s1063_s12 + $0xa8] sm:$0xff] %v235_v21 }
  0x25   : > { %238 = vst [vmem:[%s1063_s12 + $0xb0] sm:$0xff] %v237_v22  ;;  %240 = vst [vmem:[%s1063_s12 + $0xb8] sm:$0xff] %v239_v23  ;;  %v241_v24 = vld [vmem:[%s1058_s11 + $0x180] sm:$0xff]  ;;  %v243_v25 = vld [vmem:[%s1058_s11 + $0x188] sm:$0xff] }
  0x26   : > { %v245_v26 = vld [vmem:[%s1058_s11 + $0x1a0] sm:$0xff]  ;;  %242 = vst [vmem:[%s1063_s12 + $0xc0] sm:$0xff] %v241_v24  ;;  %244 = vst [vmem:[%s1063_s12 + $0xc8] sm:$0xff] %v243_v25  ;;  %v247_v27 = vld [vmem:[%s1058_s11 + $0x1a8] sm:$0xff] }
  0x27   : > { %246 = vst [vmem:[%s1063_s12 + $0xd0] sm:$0xff] %v245_v26  ;;  %v249_v28 = vld [vmem:[%s1058_s11 + $0x1c0] sm:$0xff]  ;;  %v251_v29 = vld [vmem:[%s1058_s11 + $0x1c8] sm:$0xff]  ;;  %248 = vst [vmem:[%s1063_s12 + $0xd8] sm:$0xff] %v247_v27 }
  0x28   : > { %250 = vst [vmem:[%s1063_s12 + $0xe0] sm:$0xff] %v249_v28  ;;  %252 = vst [vmem:[%s1063_s12 + $0xe8] sm:$0xff] %v251_v29  ;;  %v253_v30 = vld [vmem:[%s1058_s11 + $0x1e0] sm:$0xff]  ;;  %v255_v31 = vld [vmem:[%s1058_s11 + $0x1e8] sm:$0xff] }
  0x29   : > { %v257_v32 = vld [vmem:[%s1058_s11 + $0x200] sm:$0xff]  ;;  %254 = vst [vmem:[%s1063_s12 + $0xf0] sm:$0xff] %v253_v30  ;;  %256 = vst [vmem:[%s1063_s12 + $0xf8] sm:$0xff] %v255_v31  ;;  %v259_v33 = vld [vmem:[%s1058_s11 + $0x208] sm:$0xff] }
  0x2a   : > { %258 = vst [vmem:[%s1063_s12 + $0x100] sm:$0xff] %v257_v32  ;;  %v261_v34 = vld [vmem:[%s1058_s11 + $0x220] sm:$0xff]  ;;  %v263_v35 = vld [vmem:[%s1058_s11 + $0x228] sm:$0xff]  ;;  %260 = vst [vmem:[%s1063_s12 + $0x108] sm:$0xff] %v259_v33 }
  0x2b   : > { %262 = vst [vmem:[%s1063_s12 + $0x110] sm:$0xff] %v261_v34  ;;  %264 = vst [vmem:[%s1063_s12 + $0x118] sm:$0xff] %v263_v35 }
  0x2c PF: > { %p753_p7 = scmp.ge.s32.totalorder %s970_s21, 1  ;;  %p269_p8 = scmp.lt.s32.totalorder %s970_s21, 5 }
  0x2e   : > { %p270_p9 = pnand %p753_p7, %p269_p8 }
  0x2f   : > { %s276_s13 = sand.u32 (!%p270_p9), 1, %s946_s15   ;;  %v1140_v36 = vld [vmem:[%s1218_s1] sm:$0xff] (!%p270_p9)  ;;  %vm540_vm0 = vcmask (!%p270_p9), 130048   ;;  %v972_v39 = vmov (!%p270_p9), 0   ;;  %s754_s5 = sshll.u32 (!%p270_p9), %s954_s17, 2 }
  0x30   : > { %273 = sbr.rel (%p270_p9) target bundleno = 310 (0x136), region = 55  ;;  %v626_v37 = vld [vmem:[%s1219_s2] sm:$0xff] (!%p270_p9)  ;;  %v758_v38 = vcombine.high (!%p270_p9), %v1140_v36, %v1140_v36  ;;  %859 = vset.pattern.permute.xlu0 (!%p270_p9), %v972_v39  ;;  %v757_v13 = vcombine.low (!%p270_p9), %v1140_v36, %v1140_v36  ;;  %p307_p10 = scmp.lt.s32.totalorder (!%p270_p9), %s958_s18, 1 }
  0x31   : > { %s801_s27 = smul.u32 (!%p270_p9), 288, %s276_s13  ;;  %629 = vperm.xlu0 (!%p270_p9), %859, %v626_v37   ;;  %v636_v40 = vld [vmem:[%s1220_s3] sm:$0xff] (!%p270_p9)  ;;  %p309_p11 = scmp.lt.s32.totalorder (!%p270_p9), %s754_s5, 7 }
  0x32   : > { %795 = vmatprep.mubr.msk.bf16.mxu0 (!%p270_p9), %vm540_vm0, %v758_v38  ;;  %796 = vmatprep.mubr.msk.bf16.mxu1 (!%p270_p9), %vm540_vm0, %v758_v38 }
  0x33   : > { %s1150_s30 = scalar_lea.vmem (!%p270_p9), [#allocation2], %s801_s27 }
  0x34   : > { %v860_v41 = vld [vmem:[%s1150_s30 + $0x4] ss:$16 sps:$4 sm:$0xff] (!%p270_p9)   ;;  %v862_v42 = vld [vmem:[%s1150_s30 + $0xc] ss:$16 sps:$4 sm:$0xff] (!%p270_p9)   ;;  %v864_v43 = vld [vmem:[%s1150_s30] ss:$16 sps:$4 sm:$0xff] (!%p270_p9)  }
  0x35   : > { %544 = vmatprep.subr.bf16.mxu0 (!%p270_p9), %v860_v41  ;;  %v865_v44 = vld [vmem:[%s1150_s30 + $0x8] ss:$16 sps:$4 sm:$0xff] (!%p270_p9)   ;;  %639 = vperm.xlu0 (!%p270_p9), %859, %v636_v40   ;;  %v866_v45 = vld [vmem:[%s1150_s30 + $0x24] ss:$16 sps:$4 sm:$0xff] (!%p270_p9)   ;;  %v868_v46 = vld [vmem:[%s1150_s30 + $0x2c] ss:$16 sps:$4 sm:$0xff] (!%p270_p9)  }
  0x36   : > { %585 = vmatprep.subr.bf16.mxu1 (!%p270_p9), %v862_v42  ;;  %545 = vmatpush1.bf16.msra.mxu0 (!%p270_p9), %v864_v43  ;;  %v870_v47 = vld [vmem:[%s1150_s30 + $0x20] ss:$16 sps:$4 sm:$0xff] (!%p270_p9)   ;;  %v871_v48 = vld [vmem:[%s1150_s30 + $0x28] ss:$16 sps:$4 sm:$0xff] (!%p270_p9)   ;;  %v872_v49 = vld [vmem:[%s1150_s30 + $0x44] ss:$16 sps:$4 sm:$0xff] (!%p270_p9)  }
  0x37   : > { %586 = vmatpush1.bf16.msra.mxu1 %v865_v44  ;;  %546 = vmatprep.subr.bf16.mxu0 %v866_v45  ;;  %v874_v50 = vld [vmem:[%s1150_s30 + $0x4c] ss:$16 sps:$4 sm:$0xff]   ;;  %v876_v51 = vld [vmem:[%s1150_s30 + $0x40] ss:$16 sps:$4 sm:$0xff]   ;;  %v877_v52 = vld [vmem:[%s1150_s30 + $0x48] ss:$16 sps:$4 sm:$0xff]  }
  0x38   : > { %587 = vmatprep.subr.bf16.mxu1 %v868_v46  ;;  %v878_v53 = vld [vmem:[%s1150_s30 + $0x64] ss:$16 sps:$4 sm:$0xff]   ;;  %v880_v54 = vld [vmem:[%s1150_s30 + $0x6c] ss:$16 sps:$4 sm:$0xff]   ;;  %v882_v55 = vld [vmem:[%s1150_s30 + $0x60] ss:$16 sps:$4 sm:$0xff]  }
  0x39   : > { %v883_v56 = vld [vmem:[%s1150_s30 + $0x68] ss:$16 sps:$4 sm:$0xff]   ;;  %v884_v57 = vld [vmem:[%s1150_s30 + $0x84] ss:$16 sps:$4 sm:$0xff]   ;;  %v886_v58 = vld [vmem:[%s1150_s30 + $0x8c] ss:$16 sps:$4 sm:$0xff]  }
  0x3a   : > { %547 = vmatpush1.bf16.msra.mxu0 %v870_v47  ;;  %v888_v59 = vld [vmem:[%s1150_s30 + $0x80] ss:$16 sps:$4 sm:$0xff]   ;;  %v889_v60 = vld [vmem:[%s1150_s30 + $0x88] ss:$16 sps:$4 sm:$0xff]   ;;  %v890_v61 = vld [vmem:[%s1150_s30 + $0xa4] ss:$16 sps:$4 sm:$0xff]  }
  0x3b   : > { %588 = vmatpush1.bf16.msra.mxu1 %v871_v48  ;;  %548 = vmatprep.subr.bf16.mxu0 %v872_v49  ;;  %v892_v62 = vld [vmem:[%s1150_s30 + $0xac] ss:$16 sps:$4 sm:$0xff]   ;;  %v894_v63 = vld [vmem:[%s1150_s30 + $0xa0] ss:$16 sps:$4 sm:$0xff]   ;;  %v895_v0 = vld [vmem:[%s1150_s30 + $0xa8] ss:$16 sps:$4 sm:$0xff]  }
  0x3c   : > { %589 = vmatprep.subr.bf16.mxu1 %v874_v50  ;;  %v896_v1 = vld [vmem:[%s1150_s30 + $0xc4] ss:$16 sps:$4 sm:$0xff]   ;;  %v898_v2 = vld [vmem:[%s1150_s30 + $0xcc] ss:$16 sps:$4 sm:$0xff]   ;;  %v900_v3 = vld [vmem:[%s1150_s30 + $0xc0] ss:$16 sps:$4 sm:$0xff]  }
  0x3d   : > { %v901_v4 = vld [vmem:[%s1150_s30 + $0xc8] ss:$16 sps:$4 sm:$0xff]   ;;  %v902_v5 = vld [vmem:[%s1150_s30 + $0xe4] ss:$16 sps:$4 sm:$0xff]   ;;  %v904_v6 = vld [vmem:[%s1150_s30 + $0xec] ss:$16 sps:$4 sm:$0xff]  }
  0x3e   : > { %549 = vmatpush1.bf16.msra.mxu0 %v876_v51  ;;  %v906_v7 = vld [vmem:[%s1150_s30 + $0xe0] ss:$16 sps:$4 sm:$0xff]   ;;  %v907_v8 = vld [vmem:[%s1150_s30 + $0xe8] ss:$16 sps:$4 sm:$0xff]   ;;  %v908_v9 = vld [vmem:[%s1150_s30 + $0x104] ss:$16 sps:$4 sm:$0xff]  }
  0x3f   : > { %590 = vmatpush1.bf16.msra.mxu1 %v877_v52  ;;  %550 = vmatprep.subr.bf16.mxu0 %v878_v53  ;;  %v910_v10 = vld [vmem:[%s1150_s30 + $0x10c] ss:$16 sps:$4 sm:$0xff]   ;;  %v912_v11 = vld [vmem:[%s1150_s30 + $0x100] ss:$16 sps:$4 sm:$0xff]   ;;  %v913_v12 = vld [vmem:[%s1150_s30 + $0x108] ss:$16 sps:$4 sm:$0xff]  }
  0x40   : > { %591 = vmatprep.subr.bf16.mxu1 %v880_v54  ;;  %s1235_s18 = smov (!%p307_p10, %s958_s18), 1  ;;  %s1237_s5 = smov (!%p309_p11, %s754_s5), 7 }
  0x41   : > { %s755_s6 = sshll.u32 %s1235_s18, 3 }
  0x42   : > { %551 = vmatpush1.bf16.msra.mxu0 %v882_v55  ;;  %s312_s7 = sadd.s32 %s755_s6, %s1237_s5 }
  0x43   : > { %592 = vmatpush1.bf16.msra.mxu1 %v883_v56  ;;  %552 = vmatprep.subr.bf16.mxu0 %v884_v57  ;;  %s756_s8 = sshll.u32 %s312_s7, 3 }
  0x44   : > { %593 = vmatprep.subr.bf16.mxu1 %v886_v58  ;;  %s314_s18 = scalar_lea.vmem %s1221_s4, %s756_s8 }
  0x46   : > { %553 = vmatpush1.bf16.msra.mxu0 %v888_v59 }
  0x47   : > { %594 = vmatpush1.bf16.msra.mxu1 %v889_v60  ;;  %554 = vmatprep.subr.bf16.mxu0 %v890_v61 }
  0x48   : > { %595 = vmatprep.subr.bf16.mxu1 %v892_v62 }
  0x4a   : > { %555 = vmatpush1.bf16.msra.mxu0 %v894_v63 }
  0x4b   : > { %596 = vmatpush1.bf16.msra.mxu1 %v895_v0  ;;  %556 = vmatprep.subr.bf16.mxu0 %v896_v1 }
  0x4c   : > { %597 = vmatprep.subr.bf16.mxu1 %v898_v2 }
  0x4e   : > { %557 = vmatpush1.bf16.msra.mxu0 %v900_v3 }
  0x4f   : > { %598 = vmatpush1.bf16.msra.mxu1 %v901_v4  ;;  %558 = vmatprep.subr.bf16.mxu0 %v902_v5 }
  0x50   : > { %599 = vmatprep.subr.bf16.mxu1 %v904_v6 }
  0x52   : > { %559 = vmatpush1.bf16.msra.mxu0 %v906_v7 }
  0x53   : > { %600 = vmatpush1.bf16.msra.mxu1 %v907_v8  ;;  %560 = vmatprep.subr.bf16.mxu0 %v908_v9 }
  0x54   : > { %601 = vmatprep.subr.bf16.mxu1 %v910_v10 }
  0x56   : > { %561 = vmatpush1.bf16.msra.mxu0 %v912_v11 }
  0x57   : > { %602 = vmatpush1.bf16.msra.mxu1 %v913_v12 }
  0x59   : > { %577 = vmatmul.mubr.bf16.vlgmr.msra.gmra.mrb[0].mxu0 %v757_v13 }
  0x5a   : > { %618 = vmatmul.mubr.bf16.vlgmr.msra.gmra.mrb[0].mxu1 %v757_v13 }
  0xb0   : > { %v630_v14 = vpop.permute.xlu0 %629 }
  0xb4   : > { %v640_v15 = vpop.permute.xlu0 %639 }
 0x12c   : > { %v578_v16 = vpop.f32.mrb[0].mxu0 }
 0x12d   : > { %v619_v17 = vpop.f32.mrb[0].mxu1  ;;  %v632_v18 = vmul.f32 %v630_v14, %v578_v16  ;;  %v580_v20 = vpop.f32.mrb[1].mxu0 }
 0x12e   : > { %v634_v19 = vmul.f32 %v630_v14, %v619_v17  ;;  %v621_v21 = vpop.f32.mrb[1].mxu1  ;;  %v633_v22 = vmul.f32 %v630_v14, %v580_v20  ;;  %v582_v24 = vpop.f32.mrb[2].mxu0 }
 0x12f   : > { %v635_v23 = vmul.f32 %v630_v14, %v621_v21  ;;  %v623_v25 = vpop.f32.mrb[2].mxu1  ;;  %v642_v26 = vadd.f32 %v640_v15, %v632_v18  ;;  %v583_v28 = vpop.f32.mrb[3].mxu0 }
 0x130   : > { %v644_v27 = vadd.f32 %v640_v15, %v634_v19  ;;  %v624_v29 = vpop.f32.mrb[3].mxu1  ;;  %v643_v30 = vadd.f32 %v640_v15, %v633_v22 }
 0x131   : > { %v645_v31 = vadd.f32 %v640_v15, %v635_v23  ;;  %v646_v32 = vmax.f32 %v642_v26, 0.0 }
 0x132   : > { %v648_v33 = vmax.f32 %v644_v27, 0.0  ;;  %v647_v34 = vmax.f32 %v643_v30, 0.0 }
 0x133   : > { %v649_v35 = vmax.f32 %v645_v31, 0.0  ;;  %650 = vst [vmem:[%s314_s18] sm:$0xff] %v646_v32 }
 0x134   : > { %652 = vst [vmem:[%s314_s18 + $0x10] sm:$0xff] %v648_v33  ;;  %651 = vst [vmem:[%s314_s18 + $0x8] sm:$0xff] %v647_v34 }
 0x135   : > { %653 = vst [vmem:[%s314_s18 + $0x18] sm:$0xff] %v649_v35 }
 0x136 PF: > { %s14_s21 = sadd.s32 1, %s970_s21   ;;  %s1222_s15 = smov %s950_s16 }
 0x137   : > { %p11_p12 = scmp.ge.s32.totalorder %s14_s21, 6   ;;  %s1223_s16 = smov %s1049_s28 }
 0x138   : > { %s1224_s17 = smov %s962_s19  ;;  %s1225_s18 = smov %s966_s20 }
 0x139   : > { %s1226_s19 = smov %s1229_s22  ;;  %s1227_s20 = smov %s1233_s23 }
 0x13a   :  { %13 = sbr.rel (!%p11_p12) target bundleno = 4 (0x4), region = 94 }

// kernel: unet_forward.37
= control target key start
LH: loop header
LB: loop body
LE: loop exit
PB: predicated region body
PF: predicated region fallthrough
CT: control target
= control target key end

     0   :  { %s572_s12 = smov 0   ;;  %s574_s13 = smov 0   ;;  %s633_s0 = inlined_call_operand.vmem [shape: bf16[2,8,1024], index: 0, kind: input, shape index: {}]   ;;  %s634_s1 = inlined_call_operand.vmem [shape: bf16[2,8], index: 1, kind: input, shape index: {}]   ;;  %s635_s2 = inlined_call_operand.vmem [shape: f32[2,1], index: 2, kind: input, shape index: {}]   ;;  %s636_s3 = inlined_call_operand.vmem [shape: f32[2,2,1024], index: 3, kind: output, shape index: {}]  }
   0x1   :  { %s576_s14 = smov 0   ;;  %s578_s15 = smov 0  }
   0x2   :  { %s580_s16 = smov 0  }
   0x3 LB: > { %s22_s17 = sadd.s32 1, %s540_s14  ;;  %s25_s18 = sadd.s32 1, %s544_s15  ;;  %s548_s16 = sphi %s580_s16, %s13_s16   ;;  %s544_s15 = sphi %s578_s15, %s640_s15   ;;  %s540_s14 = sphi %s576_s14, %s639_s14   ;;  %s536_s13 = sphi %s574_s13, %s638_s13   ;;  %s532_s12 = sphi %s572_s12, %s637_s12  }
   0x4   : > { %p23_p0 = scmp.ge.s32.totalorder %s22_s17, 2  ;;  %p446_p1 = scmp.ge.s32.totalorder %s548_s16, 1 }
   0x5   : > { %p158_p2 = scmp.lt.s32.totalorder %s548_s16, 5 }
   0x6   : > { %s642_s17 = smov (%p23_p0, %s22_s17), 0  ;;  %s644_s18 = smov (!%p23_p0, %s25_s18), %s544_s15 }
   0x7   : > { %p159_p3 = pnand %p446_p1, %p158_p2  ;;  %p27_p4 = scmp.ge.s32.totalorder %s644_s18, 2 }
   0x8   : > { %s447_s19 = sshll.u32 (!%p159_p3), %s532_s12, 2  ;;  %p191_p5 = scmp.lt.s32.totalorder (!%p159_p3), %s536_s13, 1  ;;  %v550_v0 = vmov (!%p159_p3), 0   ;;  %v214_v1 = vld [vmem:[%s635_s2] sm:$0x3] (!%p159_p3)  ;;  %vm234_vm0 = vcmask (!%p159_p3), 1043456   ;;  %v338_v13 = vlaneseq (!%p159_p3) }
   0x9   : > { %s646_s18 = smov (%p27_p4, %s644_s18), 0  ;;  %162 = sbr.rel (%p159_p3) target bundleno = 250 (0xfa), region = 32 }
   0xa   : > { %p193_p6 = scmp.lt.s32.totalorder (!%p159_p3), %s447_s19, 7  ;;  %279 = vmatprep.mubr.bf16.mxu0 (!%p159_p3), %v550_v0  ;;  %320 = vmatprep.mubr.bf16.mxu1 (!%p159_p3), %v550_v0  ;;  %v211_v10 = vld [vmem:[%s634_s1] sm:$0x1] (!%p159_p3)  ;;  %vm230_vm1 = vcmask (!%p159_p3), 64512   ;;  %v551_v11 = vmov (!%p159_p3), 1983009808  }
   0xb   : > { %505 = vset.pattern.permute.xlu0 (!%p159_p3), %v550_v0  ;;  %v336_v12 = vunpack.c.l.s4 (!%p159_p3), %v551_v11  ;;  %v339_v16 = vshrl.u32 (!%p159_p3), %v338_v13, 7 }
   0xc   : > { %217 = vperm.xlu0 (!%p159_p3), %505, %v214_v1  }
   0xd   : > { %v337_v15 = vunpack.c.0.s8 (!%p159_p3), %v336_v12 }
   0xf   : > { %v340_v24 = vsub.s32 (!%p159_p3), %v337_v15, %v339_v16 }
  0x10   : > { %s648_s13 = smov (!%p191_p5, %s536_s13), 1  ;;  %s650_s19 = smov (!%p193_p6, %s447_s19), 7 }
  0x11   : > { %s448_s22 = sshll.u32 %s648_s13, 3 }
  0x12   : > { %s605_s23 = sadd.s32 %s448_s22, %s650_s19 }
  0x13   : > { %s449_s24 = sshll.u32 %s605_s23, 2  ;;  %s452_s30 = sshll.u32 %s605_s23, 1 }
  0x14   : > { %s198_s27 = scalar_lea.vmem %s633_s0, %s449_s24  ;;  %s208_s6 = scalar_lea.vmem %s636_s3, %s452_s30 }
  0x15   : > { %v212_v2 = vld [vmem:[%s198_s27] sm:$0xff]  ;;  %v213_v3 = vld [vmem:[%s198_s27 + $0x8] sm:$0xff] }
  0x16   : > { %v454_v4 = vcombine.high %v212_v2, %v212_v2  ;;  %v456_v5 = vcombine.high %v213_v3, %v213_v3  ;;  %v453_v6 = vcombine.low %v212_v2, %v212_v2  ;;  %v455_v7 = vcombine.low %v213_v3, %v213_v3 }
  0x18   : > { %457 = vmatprep.subr.msk.bf16.mxu0 %vm234_vm0, %v454_v4  ;;  %459 = vmatprep.subr.msk.bf16.mxu1 %vm234_vm0, %v456_v5  ;;  %v236_v8 = vsel %vm234_vm0, %v453_v6, 0  ;;  %v242_v9 = vsel %vm234_vm0, %v455_v7, 0 }
  0x19   : > { %248 = vmatpush1.bf16.msra.mxu0 %v236_v8  ;;  %289 = vmatpush1.bf16.msra.mxu1 %v242_v9 }
  0x1c   : > { %458 = vmatmul.mubr.msk.bf16.vlgmr.msra.gmra.mrb[0].mxu0 %vm230_vm1, %v211_v10  ;;  %460 = vmatmul.mubr.msk.bf16.vlgmr.msra.gmra.mrb[0].mxu1 %vm230_vm1, %v211_v10 }
  0x8b   : > { %v218_v14 = vpop.permute.xlu0 %217 }
  0xef   : > { %v281_v17 = vpop.f32.mrb[0].mxu0  ;;  %v322_v18 = vpop.f32.mrb[0].mxu1 }
  0xf0   : > { %v282_v19 = vadd.f32 %v281_v17, %v218_v14  ;;  %v323_v20 = vadd.f32 %v322_v18, %v218_v14  ;;  %v283_v21 = vpop.f32.mrb[1].mxu0  ;;  %v324_v22 = vpop.f32.mrb[1].mxu1 }
  0xf1   : > { %v284_v23 = vadd.f32 %v283_v21, %v218_v14  ;;  %v325_v25 = vadd.f32 %v324_v22, %v218_v14  ;;  %v285_v26 = vpop.f32.mrb[2].mxu0  ;;  %v326_v27 = vpop.f32.mrb[2].mxu1 }
  0xf2   : > { %v286_v28 = vpop.f32.mrb[3].mxu0  ;;  %v327_v29 = vpop.f32.mrb[3].mxu1 }
  0xf3   : > { %v333_v30 = vcombine.low %v282_v19, %v284_v23  ;;  %v334_v31 = vcombine.low %v323_v20, %v325_v25 }
  0xf5   : > { %v341_v32 = vrot.slane %v333_v30, %v340_v24  ;;  %v348_v33 = vrot.slane %v334_v31, %v340_v24 }
  0xf7   : > { %v349_v34 = vcombine.low %v341_v32, %v348_v33 }
  0xf9   : > { %351 = vst [vmem:[%s208_s6] sm:$0xff] %v349_v34 }
  0xfa PF: > { %s13_s16 = sadd.s32 1, %s548_s16   ;;  %s637_s12 = smov %s540_s14 }
  0xfb   : > { %p10_p7 = scmp.ge.s32.totalorder %s13_s16, 6   ;;  %s638_s13 = smov %s544_s15 }
  0xfc   : > { %s639_s14 = smov %s642_s17  ;;  %s640_s15 = smov %s646_s18 }
  0xfd   :  { %12 = sbr.rel (!%p10_p7) target bundleno = 3 (0x3), region = 62 }

</bundles_post_ra>
